<compile_context>
chip_gen: v6e
topology: v6e:2x2x1
jax: 0.10.0
libtpu: 0.0.40
codegen_flags: <defaults>
</compile_context>

<pallas_src>
import jax
import jax.numpy as jnp
from jax.experimental import pallas as pl
from jax.experimental.pallas import tpu as pltpu

EPS = 1e-5  # nn.InstanceNorm2d default (affine=False, track_running_stats=False)


def _rows_per_block(H, W, Cp):
    """Image rows per conv block so the f32 accumulator stays vreg-resident."""
    budget = 128 * 1024  # bytes of f32 accumulator per block
    if H * W * Cp * 4 <= 2 * budget:
        return H
    rpb = 1
    for r in range(1, H + 1):
        if H % r == 0 and r * W * Cp * 4 <= budget:
            rpb = r
    return rpb


def _vmem_limit_bytes():
    """~75% of this generation's physical per-core VMEM (None -> compiler default)."""
    try:
        return int(pltpu.get_tpu_info().vmem_capacity_bytes) * 3 // 4
    except Exception:  # query unavailable: fall back to the default scoped limit
        return None


def resnet_rk_kernel(x_ref, w1_ref, w2_ref, out_ref, pad_ref):
    """One batch element per grid step.

    x_ref   : (H, W, Cp)        f32        input image (channel-padded)
    w*_ref  : (9, Cp, Cp)       mxu dtype  per-tap conv weights (dy*3+dx, cin, cout)
    out_ref : (H, W, Cp)        f32        output (also used to stage raw conv output)
    pad_ref : (H+2, W+2, Cp)    mxu dtype  VMEM scratch, reflect-padded image (reused)
    """
    H, W, Cp = out_ref.shape
    HW = H * W
    mxu_dtype = pad_ref.dtype
    inv_n = 1.0 / float(HW)
    rpb = _rows_per_block(H, W, Cp)
    n_blk = H // rpb

    def build_halos():
        # Reflect halos, copied from the already-written interior of pad_ref.
        pad_ref[0:1, 1:W + 1, :] = pad_ref[2:3, 1:W + 1, :]          # top    = row 1
        pad_ref[H + 1:H + 2, 1:W + 1, :] = pad_ref[H - 1:H, 1:W + 1, :]  # bottom = row H-2
        pad_ref[:, 0:1, :] = pad_ref[:, 2:3, :]                       # left   (incl. corners)
        pad_ref[:, W + 1:W + 2, :] = pad_ref[:, W - 1:W, :]           # right  (incl. corners)

    def conv3x3(w_ref):
        # Direct 9-tap accumulation from shifted windows of pad_ref (no im2col):
        # one MXU matmul per tap, f32 accumulator kept as a value per row-block.
        # Raw conv output is staged in out_ref; returns per-channel (sum, sum_sq).
        s = jnp.zeros((1, Cp), jnp.float32)
        s2 = jnp.zeros((1, Cp), jnp.float32)
        for m in range(n_blk):
            h0 = m * rpb
            acc = jnp.zeros((rpb * W, Cp), jnp.float32)
            for dy in range(3):
                for dx in range(3):
                    v = pad_ref[dy + h0:dy + h0 + rpb, dx:dx + W, :].reshape(rpb * W, Cp)
                    acc = acc + jnp.dot(v, w_ref[dy * 3 + dx],
                                        preferred_element_type=jnp.float32)
            out_ref[h0:h0 + rpb, :, :] = acc.reshape(rpb, W, Cp)
            s = s + jnp.sum(acc, axis=0, keepdims=True)
            s2 = s2 + jnp.sum(acc * acc, axis=0, keepdims=True)
        return s, s2

    def norm_params(s, s2):
        mean = s * inv_n
        # One-pass variance, clamped at 0 so rsqrt never sees a negative value.
        var = jnp.maximum(s2 * inv_n - mean * mean, 0.0)
        return mean.reshape(1, 1, Cp), jax.lax.rsqrt(var + EPS).reshape(1, 1, Cp)

    # ---- conv1 -> instance norm -> relu -----------------------------------
    pad_ref[1:H + 1, 1:W + 1, :] = x_ref[...].astype(mxu_dtype)
    build_halos()
    s, s2 = conv3x3(w1_ref)
    mean1, scale1 = norm_params(s, s2)
    # Normalize + ReLU, re-padding into the (reused) scratch for conv2.
    pad_ref[1:H + 1, 1:W + 1, :] = jnp.maximum(
        (out_ref[...] - mean1) * scale1, 0.0).astype(mxu_dtype)
    build_halos()

    # ---- conv2 -> instance norm -> residual add ----------------------------
    s, s2 = conv3x3(w2_ref)
    mean2, scale2 = norm_params(s, s2)
    out_ref[...] = ((out_ref[...] - mean2) * scale2 + x_ref[...]).astype(out_ref.dtype)


def resnet_rk(x_nhwc, w1, b1, w2, b2, *, mxu_dtype=jnp.bfloat16):
    """x_nhwc: (N, H, W, C); w: (3, 3, C, C) HWIO; b: (C,).  Cin == Cout.

    Note: b1/b2 are accepted for API parity with the PyTorch module but are not
    used — a per-channel bias before affine-free InstanceNorm2d is exactly
    cancelled by the mean subtraction, so dropping it is a mathematical no-op.
    """
    del b1, b2
    N, H, W, C = x_nhwc.shape
    assert w1.shape == (3, 3, C, C) and w2.shape == (3, 3, C, C)
    assert H >= 2 and W >= 2, "reflect pad of size 1 needs H, W >= 2"

    # Pad channels (lane dim) to a multiple of 128: lane-dense matmuls and
    # unmasked output stores.  Padded channels stay exactly zero end-to-end.
    Cp = ((C + 127) // 128) * 128
    pad_c = Cp - C

    x_p = jnp.pad(x_nhwc, ((0, 0), (0, 0), (0, 0), (0, pad_c)))

    def prep_w(w):
        wp = jnp.pad(w, ((0, 0), (0, 0), (0, pad_c), (0, pad_c)))
        # (3, 3, Cp, Cp) -> (9, Cp, Cp): tap index dy*3+dx, then (cin, cout).
        return wp.reshape(9, Cp, Cp).astype(mxu_dtype)

    w1r, w2r = prep_w(w1), prep_w(w2)

    w_bytes = 2 * 9 * Cp * Cp * jnp.dtype(mxu_dtype).itemsize
    cost = pl.CostEstimate(
        flops=2 * 2 * N * H * W * 9 * Cp * Cp,                 # 2 convs
        transcendentals=2 * N * Cp,                            # rsqrt per norm
        bytes_accessed=2 * N * H * W * Cp * 4 + w_bytes)       # x in + out + weights

    out_p = pl.pallas_call(
        resnet_rk_kernel,
        out_shape=jax.ShapeDtypeStruct((N, H, W, Cp), x_nhwc.dtype),
        grid=(N,),
        in_specs=[
            pl.BlockSpec((None, H, W, Cp), lambda b: (b, 0, 0, 0)),   # x
            # Constant index maps -> never re-DMA'd across grid steps.
            pl.BlockSpec((9, Cp, Cp), lambda b: (0, 0, 0)),           # w1 (per-tap)
            pl.BlockSpec((9, Cp, Cp), lambda b: (0, 0, 0)),           # w2 (per-tap)
        ],
        out_specs=pl.BlockSpec((None, H, W, Cp), lambda b: (b, 0, 0, 0)),
        scratch_shapes=[
            pltpu.VMEM((H + 2, W + 2, Cp), mxu_dtype),   # reflect-padded image (reused)
        ],
        compiler_params=pltpu.CompilerParams(
            dimension_semantics=("parallel",),
            vmem_limit_bytes=_vmem_limit_bytes()),
        cost_estimate=cost,
    )(x_p, w1r, w2r)

    return out_p[..., :C]


def ref_forward(x, w1, b1, w2, b2):
    """Pure-JAX f32 reference of the PyTorch forward (NHWC), biases included."""
    def conv(xp, w, b):
        N, Hp, Wp, cin = xp.shape
        H, W = Hp - 2, Wp - 2
        cout = w.shape[-1]
        acc = jnp.zeros((N, H, W, cout), jnp.float32)
        for dy in range(3):
            for dx in range(3):
                acc = acc + jnp.einsum(
                    "nhwc,cd->nhwd", xp[:, dy:dy + H, dx:dx + W, :], w[dy, dx])
        return acc + b.reshape(1, 1, 1, cout)

    def inorm(y):
        m = y.mean(axis=(1, 2), keepdims=True)
        v = ((y - m) ** 2).mean(axis=(1, 2), keepdims=True)
        return (y - m) * jax.lax.rsqrt(v + EPS)

    xp = jnp.pad(x, ((0, 0), (1, 1), (1, 1), (0, 0)), mode="reflect")
    y1 = jnp.maximum(inorm(conv(xp, w1, b1)), 0.0)
    yp = jnp.pad(y1, ((0, 0), (1, 1), (1, 1), (0, 0)), mode="reflect")
    y2 = inorm(conv(yp, w2, b2))
    return y2 + x


if __name__ == "__main__":
    # Resnet_Rk(in_k=4, out_k=4), x: (2, 4, 16, 16) in PyTorch NCHW
    # == (2, 16, 16, 4) in our NHWC layout.
    N, H, W, C = 2, 16, 16, 4
    key = jax.random.PRNGKey(0)
    k1, k2, k3, k4, k5 = jax.random.split(key, 5)

    x = jax.random.normal(k1, (N, H, W, C), jnp.float32)
    w1 = 0.1 * jax.random.normal(k2, (3, 3, C, C), jnp.float32)
    b1 = 0.1 * jax.random.normal(k3, (C,), jnp.float32)
    w2 = 0.1 * jax.random.normal(k4, (3, 3, C, C), jnp.float32)
    b2 = 0.1 * jax.random.normal(k5, (C,), jnp.float32)

    ref = ref_forward(x, w1, b1, w2, b2)

    # Full-precision MXU path: tight check against the f32 reference (also
    # validates that dropping the pre-norm bias is a no-op).
    out_f32 = jax.block_until_ready(
        resnet_rk(x, w1, b1, w2, b2, mxu_dtype=jnp.float32))
    assert out_f32.shape == (N, H, W, C)
    assert jnp.allclose(out_f32, ref, atol=5e-3, rtol=5e-3), "f32 path mismatch"

    # Default (performance) path: bf16 MXU operands, f32 accumulation / VPU math.
    out_bf16 = jax.block_until_ready(resnet_rk(x, w1, b1, w2, b2))
    assert out_bf16.shape == (N, H, W, C)
    assert jnp.allclose(out_bf16, ref, atol=3e-2, rtol=3e-2), "bf16 path mismatch"

    print("KERNEL_OK")
</pallas_src>

<mosaic_0001>
module attributes {stable_mosaic.version = 11 : i64} {
  func.func @resnet_rk_kernel(%arg0: i32, %arg1: memref<1x16x16x128xf32, #tpu.memory_space<vmem>>, %arg2: memref<9x128x128xf32, #tpu.memory_space<vmem>>, %arg3: memref<9x128x128xf32, #tpu.memory_space<vmem>>, %arg4: memref<1x16x16x128xf32, #tpu.memory_space<vmem>>, %arg5: memref<18x18x128xf32, #tpu.memory_space<vmem>>) attributes {dimension_semantics = [#tpu.dimension_semantics<parallel>], iteration_bounds = array<i64: 2>, scalar_prefetch = 0 : i64, scratch_operands = 1 : i64, tpu.core_type = #tpu.core_type<tc>, window_params = [{transform_indices = @transform_0, window_bounds = array<i64: 1, 16, 16, 128>}, {pipeline_mode = #tpu.pipeline_mode<synchronous>, transform_indices = @transform_1, window_bounds = array<i64: 9, 128, 128>}, {pipeline_mode = #tpu.pipeline_mode<synchronous>, transform_indices = @transform_2, window_bounds = array<i64: 9, 128, 128>}, {transform_indices = @transform_3, window_bounds = array<i64: 1, 16, 16, 128>}]} {
    %c0 = arith.constant 0 : index
    %c0_0 = arith.constant 0 : index
    %c0_1 = arith.constant 0 : index
    %c0_2 = arith.constant 0 : index
    %0 = vector.load %arg1[%c0, %c0_0, %c0_1, %c0_2] : memref<1x16x16x128xf32, #tpu.memory_space<vmem>>, vector<1x16x16x128xf32>
    %1 = vector.shape_cast %0 : vector<1x16x16x128xf32> to vector<16x16x128xf32>
    %c1 = arith.constant 1 : index
    %c1_3 = arith.constant 1 : index
    %c0_4 = arith.constant 0 : index
    %2 = vector.load %arg5[%c1, %c1_3, %c0_4] : memref<18x18x128xf32, #tpu.memory_space<vmem>>, vector<16x16x128xf32>
    tpu.vector_store %arg5[%c1, %c1_3, %c0_4], %1 {strides = array<i32>} : memref<18x18x128xf32, #tpu.memory_space<vmem>>, vector<16x16x128xf32>,
    %c2 = arith.constant 2 : index
    %c1_5 = arith.constant 1 : index
    %c0_6 = arith.constant 0 : index
    %3 = vector.load %arg5[%c2, %c1_5, %c0_6] : memref<18x18x128xf32, #tpu.memory_space<vmem>>, vector<1x16x128xf32>
    %c0_7 = arith.constant 0 : index
    %c1_8 = arith.constant 1 : index
    %c0_9 = arith.constant 0 : index
    %4 = vector.load %arg5[%c0_7, %c1_8, %c0_9] : memref<18x18x128xf32, #tpu.memory_space<vmem>>, vector<1x16x128xf32>
    tpu.vector_store %arg5[%c0_7, %c1_8, %c0_9], %3 {strides = array<i32>} : memref<18x18x128xf32, #tpu.memory_space<vmem>>, vector<1x16x128xf32>,
    %c15 = arith.constant 15 : index
    %c1_10 = arith.constant 1 : index
    %c0_11 = arith.constant 0 : index
    %5 = vector.load %arg5[%c15, %c1_10, %c0_11] : memref<18x18x128xf32, #tpu.memory_space<vmem>>, vector<1x16x128xf32>
    %c17 = arith.constant 17 : index
    %c1_12 = arith.constant 1 : index
    %c0_13 = arith.constant 0 : index
    %6 = vector.load %arg5[%c17, %c1_12, %c0_13] : memref<18x18x128xf32, #tpu.memory_space<vmem>>, vector<1x16x128xf32>
    tpu.vector_store %arg5[%c17, %c1_12, %c0_13], %5 {strides = array<i32>} : memref<18x18x128xf32, #tpu.memory_space<vmem>>, vector<1x16x128xf32>,
    %c0_14 = arith.constant 0 : index
    %c2_15 = arith.constant 2 : index
    %c0_16 = arith.constant 0 : index
    %7 = vector.load %arg5[%c0_14, %c2_15, %c0_16] : memref<18x18x128xf32, #tpu.memory_space<vmem>>, vector<18x1x128xf32>
    %c0_17 = arith.constant 0 : index
    %c0_18 = arith.constant 0 : index
    %c0_19 = arith.constant 0 : index
    %8 = vector.load %arg5[%c0_17, %c0_18, %c0_19] : memref<18x18x128xf32, #tpu.memory_space<vmem>>, vector<18x1x128xf32>
    tpu.vector_store %arg5[%c0_17, %c0_18, %c0_19], %7 {strides = array<i32>} : memref<18x18x128xf32, #tpu.memory_space<vmem>>, vector<18x1x128xf32>,
    %c0_20 = arith.constant 0 : index
    %c15_21 = arith.constant 15 : index
    %c0_22 = arith.constant 0 : index
    %9 = vector.load %arg5[%c0_20, %c15_21, %c0_22] : memref<18x18x128xf32, #tpu.memory_space<vmem>>, vector<18x1x128xf32>
    %c0_23 = arith.constant 0 : index
    %c17_24 = arith.constant 17 : index
    %c0_25 = arith.constant 0 : index
    %10 = vector.load %arg5[%c0_23, %c17_24, %c0_25] : memref<18x18x128xf32, #tpu.memory_space<vmem>>, vector<18x1x128xf32>
    tpu.vector_store %arg5[%c0_23, %c17_24, %c0_25], %9 {strides = array<i32>} : memref<18x18x128xf32, #tpu.memory_space<vmem>>, vector<18x1x128xf32>,
    %cst = arith.constant 0.000000e+00 : f32
    %11 = vector.broadcast %cst : f32 to vector<1x128xf32>
    %cst_26 = arith.constant 0.000000e+00 : f32
    %12 = vector.broadcast %cst_26 : f32 to vector<1x128xf32>
    %cst_27 = arith.constant 0.000000e+00 : f32
    %13 = vector.broadcast %cst_27 : f32 to vector<256x128xf32>
    %c0_28 = arith.constant 0 : index
    %c0_29 = arith.constant 0 : index
    %c0_30 = arith.constant 0 : index
    %14 = vector.load %arg5[%c0_28, %c0_29, %c0_30] : memref<18x18x128xf32, #tpu.memory_space<vmem>>, vector<16x16x128xf32>
    %15 = vector.shape_cast %14 : vector<16x16x128xf32> to vector<256x128xf32>
    %c0_31 = arith.constant 0 : index
    %c0_32 = arith.constant 0 : index
    %c0_33 = arith.constant 0 : index
    %16 = vector.load %arg2[%c0_31, %c0_32, %c0_33] : memref<9x128x128xf32, #tpu.memory_space<vmem>>, vector<1x128x128xf32>
    %17 = vector.shape_cast %16 : vector<1x128x128xf32> to vector<128x128xf32>
    %cst_34 = arith.constant dense<0.000000e+00> : vector<256x128xf32>
    %18 = tpu.matmul %15, %17, %cst_34 {dimension_numbers = #tpu.dot_dimension_numbers<[1], [0], [0], [1], [0, 0, 1, 1], [], []>} : vector<256x128xf32>, vector<128x128xf32>, vector<256x128xf32> -> vector<256x128xf32>
    %19 = arith.addf %13, %18 : vector<256x128xf32>
    %c0_35 = arith.constant 0 : index
    %c1_36 = arith.constant 1 : index
    %c0_37 = arith.constant 0 : index
    %20 = vector.load %arg5[%c0_35, %c1_36, %c0_37] : memref<18x18x128xf32, #tpu.memory_space<vmem>>, vector<16x16x128xf32>
    %21 = vector.shape_cast %20 : vector<16x16x128xf32> to vector<256x128xf32>
    %c1_38 = arith.constant 1 : index
    %c0_39 = arith.constant 0 : index
    %c0_40 = arith.constant 0 : index
    %22 = vector.load %arg2[%c1_38, %c0_39, %c0_40] : memref<9x128x128xf32, #tpu.memory_space<vmem>>, vector<1x128x128xf32>
    %23 = vector.shape_cast %22 : vector<1x128x128xf32> to vector<128x128xf32>
    %cst_41 = arith.constant dense<0.000000e+00> : vector<256x128xf32>
    %24 = tpu.matmul %21, %23, %cst_41 {dimension_numbers = #tpu.dot_dimension_numbers<[1], [0], [0], [1], [0, 0, 1, 1], [], []>} : vector<256x128xf32>, vector<128x128xf32>, vector<256x128xf32> -> vector<256x128xf32>
    %25 = arith.addf %19, %24 : vector<256x128xf32>
    %c0_42 = arith.constant 0 : index
    %c2_43 = arith.constant 2 : index
    %c0_44 = arith.constant 0 : index
    %26 = vector.load %arg5[%c0_42, %c2_43, %c0_44] : memref<18x18x128xf32, #tpu.memory_space<vmem>>, vector<16x16x128xf32>
    %27 = vector.shape_cast %26 : vector<16x16x128xf32> to vector<256x128xf32>
    %c2_45 = arith.constant 2 : index
    %c0_46 = arith.constant 0 : index
    %c0_47 = arith.constant 0 : index
    %28 = vector.load %arg2[%c2_45, %c0_46, %c0_47] : memref<9x128x128xf32, #tpu.memory_space<vmem>>, vector<1x128x128xf32>
    %29 = vector.shape_cast %28 : vector<1x128x128xf32> to vector<128x128xf32>
    %cst_48 = arith.constant dense<0.000000e+00> : vector<256x128xf32>
    %30 = tpu.matmul %27, %29, %cst_48 {dimension_numbers = #tpu.dot_dimension_numbers<[1], [0], [0], [1], [0, 0, 1, 1], [], []>} : vector<256x128xf32>, vector<128x128xf32>, vector<256x128xf32> -> vector<256x128xf32>
    %31 = arith.addf %25, %30 : vector<256x128xf32>
    %c1_49 = arith.constant 1 : index
    %c0_50 = arith.constant 0 : index
    %c0_51 = arith.constant 0 : index
    %32 = vector.load %arg5[%c1_49, %c0_50, %c0_51] : memref<18x18x128xf32, #tpu.memory_space<vmem>>, vector<16x16x128xf32>
    %33 = vector.shape_cast %32 : vector<16x16x128xf32> to vector<256x128xf32>
    %c3 = arith.constant 3 : index
    %c0_52 = arith.constant 0 : index
    %c0_53 = arith.constant 0 : index
    %34 = vector.load %arg2[%c3, %c0_52, %c0_53] : memref<9x128x128xf32, #tpu.memory_space<vmem>>, vector<1x128x128xf32>
    %35 = vector.shape_cast %34 : vector<1x128x128xf32> to vector<128x128xf32>
    %cst_54 = arith.constant dense<0.000000e+00> : vector<256x128xf32>
    %36 = tpu.matmul %33, %35, %cst_54 {dimension_numbers = #tpu.dot_dimension_numbers<[1], [0], [0], [1], [0, 0, 1, 1], [], []>} : vector<256x128xf32>, vector<128x128xf32>, vector<256x128xf32> -> vector<256x128xf32>
    %37 = arith.addf %31, %36 : vector<256x128xf32>
    %c1_55 = arith.constant 1 : index
    %c1_56 = arith.constant 1 : index
    %c0_57 = arith.constant 0 : index
    %38 = vector.load %arg5[%c1_55, %c1_56, %c0_57] : memref<18x18x128xf32, #tpu.memory_space<vmem>>, vector<16x16x128xf32>
    %39 = vector.shape_cast %38 : vector<16x16x128xf32> to vector<256x128xf32>
    %c4 = arith.constant 4 : index
    %c0_58 = arith.constant 0 : index
    %c0_59 = arith.constant 0 : index
    %40 = vector.load %arg2[%c4, %c0_58, %c0_59] : memref<9x128x128xf32, #tpu.memory_space<vmem>>, vector<1x128x128xf32>
    %41 = vector.shape_cast %40 : vector<1x128x128xf32> to vector<128x128xf32>
    %cst_60 = arith.constant dense<0.000000e+00> : vector<256x128xf32>
    %42 = tpu.matmul %39, %41, %cst_60 {dimension_numbers = #tpu.dot_dimension_numbers<[1], [0], [0], [1], [0, 0, 1, 1], [], []>} : vector<256x128xf32>, vector<128x128xf32>, vector<256x128xf32> -> vector<256x128xf32>
    %43 = arith.addf %37, %42 : vector<256x128xf32>
    %c1_61 = arith.constant 1 : index
    %c2_62 = arith.constant 2 : index
    %c0_63 = arith.constant 0 : index
    %44 = vector.load %arg5[%c1_61, %c2_62, %c0_63] : memref<18x18x128xf32, #tpu.memory_space<vmem>>, vector<16x16x128xf32>
    %45 = vector.shape_cast %44 : vector<16x16x128xf32> to vector<256x128xf32>
    %c5 = arith.constant 5 : index
    %c0_64 = arith.constant 0 : index
    %c0_65 = arith.constant 0 : index
    %46 = vector.load %arg2[%c5, %c0_64, %c0_65] : memref<9x128x128xf32, #tpu.memory_space<vmem>>, vector<1x128x128xf32>
    %47 = vector.shape_cast %46 : vector<1x128x128xf32> to vector<128x128xf32>
    %cst_66 = arith.constant dense<0.000000e+00> : vector<256x128xf32>
    %48 = tpu.matmul %45, %47, %cst_66 {dimension_numbers = #tpu.dot_dimension_numbers<[1], [0], [0], [1], [0, 0, 1, 1], [], []>} : vector<256x128xf32>, vector<128x128xf32>, vector<256x128xf32> -> vector<256x128xf32>
    %49 = arith.addf %43, %48 : vector<256x128xf32>
    %c2_67 = arith.constant 2 : index
    %c0_68 = arith.constant 0 : index
    %c0_69 = arith.constant 0 : index
    %50 = vector.load %arg5[%c2_67, %c0_68, %c0_69] : memref<18x18x128xf32, #tpu.memory_space<vmem>>, vector<16x16x128xf32>
    %51 = vector.shape_cast %50 : vector<16x16x128xf32> to vector<256x128xf32>
    %c6 = arith.constant 6 : index
    %c0_70 = arith.constant 0 : index
    %c0_71 = arith.constant 0 : index
    %52 = vector.load %arg2[%c6, %c0_70, %c0_71] : memref<9x128x128xf32, #tpu.memory_space<vmem>>, vector<1x128x128xf32>
    %53 = vector.shape_cast %52 : vector<1x128x128xf32> to vector<128x128xf32>
    %cst_72 = arith.constant dense<0.000000e+00> : vector<256x128xf32>
    %54 = tpu.matmul %51, %53, %cst_72 {dimension_numbers = #tpu.dot_dimension_numbers<[1], [0], [0], [1], [0, 0, 1, 1], [], []>} : vector<256x128xf32>, vector<128x128xf32>, vector<256x128xf32> -> vector<256x128xf32>
    %55 = arith.addf %49, %54 : vector<256x128xf32>
    %c2_73 = arith.constant 2 : index
    %c1_74 = arith.constant 1 : index
    %c0_75 = arith.constant 0 : index
    %56 = vector.load %arg5[%c2_73, %c1_74, %c0_75] : memref<18x18x128xf32, #tpu.memory_space<vmem>>, vector<16x16x128xf32>
    %57 = vector.shape_cast %56 : vector<16x16x128xf32> to vector<256x128xf32>
    %c7 = arith.constant 7 : index
    %c0_76 = arith.constant 0 : index
    %c0_77 = arith.constant 0 : index
    %58 = vector.load %arg2[%c7, %c0_76, %c0_77] : memref<9x128x128xf32, #tpu.memory_space<vmem>>, vector<1x128x128xf32>
    %59 = vector.shape_cast %58 : vector<1x128x128xf32> to vector<128x128xf32>
    %cst_78 = arith.constant dense<0.000000e+00> : vector<256x128xf32>
    %60 = tpu.matmul %57, %59, %cst_78 {dimension_numbers = #tpu.dot_dimension_numbers<[1], [0], [0], [1], [0, 0, 1, 1], [], []>} : vector<256x128xf32>, vector<128x128xf32>, vector<256x128xf32> -> vector<256x128xf32>
    %61 = arith.addf %55, %60 : vector<256x128xf32>
    %c2_79 = arith.constant 2 : index
    %c2_80 = arith.constant 2 : index
    %c0_81 = arith.constant 0 : index
    %62 = vector.load %arg5[%c2_79, %c2_80, %c0_81] : memref<18x18x128xf32, #tpu.memory_space<vmem>>, vector<16x16x128xf32>
    %63 = vector.shape_cast %62 : vector<16x16x128xf32> to vector<256x128xf32>
    %c8 = arith.constant 8 : index
    %c0_82 = arith.constant 0 : index
    %c0_83 = arith.constant 0 : index
    %64 = vector.load %arg2[%c8, %c0_82, %c0_83] : memref<9x128x128xf32, #tpu.memory_space<vmem>>, vector<1x128x128xf32>
    %65 = vector.shape_cast %64 : vector<1x128x128xf32> to vector<128x128xf32>
    %cst_84 = arith.constant dense<0.000000e+00> : vector<256x128xf32>
    %66 = tpu.matmul %63, %65, %cst_84 {dimension_numbers = #tpu.dot_dimension_numbers<[1], [0], [0], [1], [0, 0, 1, 1], [], []>} : vector<256x128xf32>, vector<128x128xf32>, vector<256x128xf32> -> vector<256x128xf32>
    %67 = arith.addf %61, %66 : vector<256x128xf32>
    %68 = vector.shape_cast %67 : vector<256x128xf32> to vector<16x16x128xf32>
    %c0_85 = arith.constant 0 : index
    %c0_86 = arith.constant 0 : index
    %c0_87 = arith.constant 0 : index
    %c0_88 = arith.constant 0 : index
    %69 = vector.load %arg4[%c0_85, %c0_86, %c0_87, %c0_88] : memref<1x16x16x128xf32, #tpu.memory_space<vmem>>, vector<1x16x16x128xf32>
    %70 = vector.shape_cast %69 : vector<1x16x16x128xf32> to vector<16x16x128xf32>
    %71 = vector.shape_cast %68 : vector<16x16x128xf32> to vector<1x16x16x128xf32>
    tpu.vector_store %arg4[%c0_85, %c0_86, %c0_87, %c0_88], %71 {strides = array<i32>} : memref<1x16x16x128xf32, #tpu.memory_space<vmem>>, vector<1x16x16x128xf32>,
    %cst_89 = arith.constant dense<0.000000e+00> : vector<128xf32>
    %72 = vector.multi_reduction <add>, %67, %cst_89 [0] : vector<256x128xf32> to vector<128xf32>
    %73 = vector.shape_cast %72 : vector<128xf32> to vector<1x128xf32>
    %74 = arith.addf %11, %73 : vector<1x128xf32>
    %75 = arith.mulf %67, %67 : vector<256x128xf32>
    %cst_90 = arith.constant dense<0.000000e+00> : vector<128xf32>
    %76 = vector.multi_reduction <add>, %75, %cst_90 [0] : vector<256x128xf32> to vector<128xf32>
    %77 = vector.shape_cast %76 : vector<128xf32> to vector<1x128xf32>
    %78 = arith.addf %12, %77 : vector<1x128xf32>
    %cst_91 = arith.constant 3.906250e-03 : f32
    %79 = vector.broadcast %cst_91 : f32 to vector<1x128xf32>
    %80 = arith.mulf %74, %79 : vector<1x128xf32>
    %cst_92 = arith.constant 3.906250e-03 : f32
    %81 = vector.broadcast %cst_92 : f32 to vector<1x128xf32>
    %82 = arith.mulf %78, %81 : vector<1x128xf32>
    %83 = arith.mulf %80, %80 : vector<1x128xf32>
    %84 = arith.subf %82, %83 : vector<1x128xf32>
    %cst_93 = arith.constant 0.000000e+00 : f32
    %85 = vector.broadcast %cst_93 : f32 to vector<1x128xf32>
    %86 = arith.maximumf %84, %85 : vector<1x128xf32>
    %87 = vector.shape_cast %80 : vector<1x128xf32> to vector<1x1x128xf32>
    %cst_94 = arith.constant 9.99999974E-6 : f32
    %88 = vector.broadcast %cst_94 : f32 to vector<1x128xf32>
    %89 = arith.addf %86, %88 : vector<1x128xf32>
    %90 = math.rsqrt %89 : vector<1x128xf32>
    %91 = vector.shape_cast %90 : vector<1x128xf32> to vector<1x1x128xf32>
    %c0_95 = arith.constant 0 : index
    %c0_96 = arith.constant 0 : index
    %c0_97 = arith.constant 0 : index
    %c0_98 = arith.constant 0 : index
    %92 = vector.load %arg4[%c0_95, %c0_96, %c0_97, %c0_98] : memref<1x16x16x128xf32, #tpu.memory_space<vmem>>, vector<1x16x16x128xf32>
    %93 = vector.shape_cast %92 : vector<1x16x16x128xf32> to vector<16x16x128xf32>
    %94 = vector.broadcast %87 : vector<1x1x128xf32> to vector<16x16x128xf32>
    %95 = arith.subf %93, %94 : vector<16x16x128xf32>
    %96 = vector.broadcast %91 : vector<1x1x128xf32> to vector<16x16x128xf32>
    %97 = arith.mulf %95, %96 : vector<16x16x128xf32>
    %cst_99 = arith.constant 0.000000e+00 : f32
    %98 = vector.broadcast %cst_99 : f32 to vector<16x16x128xf32>
    %99 = arith.maximumf %97, %98 : vector<16x16x128xf32>
    %c1_100 = arith.constant 1 : index
    %c1_101 = arith.constant 1 : index
    %c0_102 = arith.constant 0 : index
    %100 = vector.load %arg5[%c1_100, %c1_101, %c0_102] : memref<18x18x128xf32, #tpu.memory_space<vmem>>, vector<16x16x128xf32>
    tpu.vector_store %arg5[%c1_100, %c1_101, %c0_102], %99 {strides = array<i32>} : memref<18x18x128xf32, #tpu.memory_space<vmem>>, vector<16x16x128xf32>,
    %c2_103 = arith.constant 2 : index
    %c1_104 = arith.constant 1 : index
    %c0_105 = arith.constant 0 : index
    %101 = vector.load %arg5[%c2_103, %c1_104, %c0_105] : memref<18x18x128xf32, #tpu.memory_space<vmem>>, vector<1x16x128xf32>
    %c0_106 = arith.constant 0 : index
    %c1_107 = arith.constant 1 : index
    %c0_108 = arith.constant 0 : index
    %102 = vector.load %arg5[%c0_106, %c1_107, %c0_108] : memref<18x18x128xf32, #tpu.memory_space<vmem>>, vector<1x16x128xf32>
    tpu.vector_store %arg5[%c0_106, %c1_107, %c0_108], %101 {strides = array<i32>} : memref<18x18x128xf32, #tpu.memory_space<vmem>>, vector<1x16x128xf32>,
    %c15_109 = arith.constant 15 : index
    %c1_110 = arith.constant 1 : index
    %c0_111 = arith.constant 0 : index
    %103 = vector.load %arg5[%c15_109, %c1_110, %c0_111] : memref<18x18x128xf32, #tpu.memory_space<vmem>>, vector<1x16x128xf32>
    %c17_112 = arith.constant 17 : index
    %c1_113 = arith.constant 1 : index
    %c0_114 = arith.constant 0 : index
    %104 = vector.load %arg5[%c17_112, %c1_113, %c0_114] : memref<18x18x128xf32, #tpu.memory_space<vmem>>, vector<1x16x128xf32>
    tpu.vector_store %arg5[%c17_112, %c1_113, %c0_114], %103 {strides = array<i32>} : memref<18x18x128xf32, #tpu.memory_space<vmem>>, vector<1x16x128xf32>,
    %c0_115 = arith.constant 0 : index
    %c2_116 = arith.constant 2 : index
    %c0_117 = arith.constant 0 : index
    %105 = vector.load %arg5[%c0_115, %c2_116, %c0_117] : memref<18x18x128xf32, #tpu.memory_space<vmem>>, vector<18x1x128xf32>
    %c0_118 = arith.constant 0 : index
    %c0_119 = arith.constant 0 : index
    %c0_120 = arith.constant 0 : index
    %106 = vector.load %arg5[%c0_118, %c0_119, %c0_120] : memref<18x18x128xf32, #tpu.memory_space<vmem>>, vector<18x1x128xf32>
    tpu.vector_store %arg5[%c0_118, %c0_119, %c0_120], %105 {strides = array<i32>} : memref<18x18x128xf32, #tpu.memory_space<vmem>>, vector<18x1x128xf32>,
    %c0_121 = arith.constant 0 : index
    %c15_122 = arith.constant 15 : index
    %c0_123 = arith.constant 0 : index
    %107 = vector.load %arg5[%c0_121, %c15_122, %c0_123] : memref<18x18x128xf32, #tpu.memory_space<vmem>>, vector<18x1x128xf32>
    %c0_124 = arith.constant 0 : index
    %c17_125 = arith.constant 17 : index
    %c0_126 = arith.constant 0 : index
    %108 = vector.load %arg5[%c0_124, %c17_125, %c0_126] : memref<18x18x128xf32, #tpu.memory_space<vmem>>, vector<18x1x128xf32>
    tpu.vector_store %arg5[%c0_124, %c17_125, %c0_126], %107 {strides = array<i32>} : memref<18x18x128xf32, #tpu.memory_space<vmem>>, vector<18x1x128xf32>,
    %cst_127 = arith.constant 0.000000e+00 : f32
    %109 = vector.broadcast %cst_127 : f32 to vector<1x128xf32>
    %cst_128 = arith.constant 0.000000e+00 : f32
    %110 = vector.broadcast %cst_128 : f32 to vector<1x128xf32>
    %cst_129 = arith.constant 0.000000e+00 : f32
    %111 = vector.broadcast %cst_129 : f32 to vector<256x128xf32>
    %c0_130 = arith.constant 0 : index
    %c0_131 = arith.constant 0 : index
    %c0_132 = arith.constant 0 : index
    %112 = vector.load %arg5[%c0_130, %c0_131, %c0_132] : memref<18x18x128xf32, #tpu.memory_space<vmem>>, vector<16x16x128xf32>
    %113 = vector.shape_cast %112 : vector<16x16x128xf32> to vector<256x128xf32>
    %c0_133 = arith.constant 0 : index
    %c0_134 = arith.constant 0 : index
    %c0_135 = arith.constant 0 : index
    %114 = vector.load %arg3[%c0_133, %c0_134, %c0_135] : memref<9x128x128xf32, #tpu.memory_space<vmem>>, vector<1x128x128xf32>
    %115 = vector.shape_cast %114 : vector<1x128x128xf32> to vector<128x128xf32>
    %cst_136 = arith.constant dense<0.000000e+00> : vector<256x128xf32>
    %116 = tpu.matmul %113, %115, %cst_136 {dimension_numbers = #tpu.dot_dimension_numbers<[1], [0], [0], [1], [0, 0, 1, 1], [], []>} : vector<256x128xf32>, vector<128x128xf32>, vector<256x128xf32> -> vector<256x128xf32>
    %117 = arith.addf %111, %116 : vector<256x128xf32>
    %c0_137 = arith.constant 0 : index
    %c1_138 = arith.constant 1 : index
    %c0_139 = arith.constant 0 : index
    %118 = vector.load %arg5[%c0_137, %c1_138, %c0_139] : memref<18x18x128xf32, #tpu.memory_space<vmem>>, vector<16x16x128xf32>
    %119 = vector.shape_cast %118 : vector<16x16x128xf32> to vector<256x128xf32>
    %c1_140 = arith.constant 1 : index
    %c0_141 = arith.constant 0 : index
    %c0_142 = arith.constant 0 : index
    %120 = vector.load %arg3[%c1_140, %c0_141, %c0_142] : memref<9x128x128xf32, #tpu.memory_space<vmem>>, vector<1x128x128xf32>
    %121 = vector.shape_cast %120 : vector<1x128x128xf32> to vector<128x128xf32>
    %cst_143 = arith.constant dense<0.000000e+00> : vector<256x128xf32>
    %122 = tpu.matmul %119, %121, %cst_143 {dimension_numbers = #tpu.dot_dimension_numbers<[1], [0], [0], [1], [0, 0, 1, 1], [], []>} : vector<256x128xf32>, vector<128x128xf32>, vector<256x128xf32> -> vector<256x128xf32>
    %123 = arith.addf %117, %122 : vector<256x128xf32>
    %c0_144 = arith.constant 0 : index
    %c2_145 = arith.constant 2 : index
    %c0_146 = arith.constant 0 : index
    %124 = vector.load %arg5[%c0_144, %c2_145, %c0_146] : memref<18x18x128xf32, #tpu.memory_space<vmem>>, vector<16x16x128xf32>
    %125 = vector.shape_cast %124 : vector<16x16x128xf32> to vector<256x128xf32>
    %c2_147 = arith.constant 2 : index
    %c0_148 = arith.constant 0 : index
    %c0_149 = arith.constant 0 : index
    %126 = vector.load %arg3[%c2_147, %c0_148, %c0_149] : memref<9x128x128xf32, #tpu.memory_space<vmem>>, vector<1x128x128xf32>
    %127 = vector.shape_cast %126 : vector<1x128x128xf32> to vector<128x128xf32>
    %cst_150 = arith.constant dense<0.000000e+00> : vector<256x128xf32>
    %128 = tpu.matmul %125, %127, %cst_150 {dimension_numbers = #tpu.dot_dimension_numbers<[1], [0], [0], [1], [0, 0, 1, 1], [], []>} : vector<256x128xf32>, vector<128x128xf32>, vector<256x128xf32> -> vector<256x128xf32>
    %129 = arith.addf %123, %128 : vector<256x128xf32>
    %c1_151 = arith.constant 1 : index
    %c0_152 = arith.constant 0 : index
    %c0_153 = arith.constant 0 : index
    %130 = vector.load %arg5[%c1_151, %c0_152, %c0_153] : memref<18x18x128xf32, #tpu.memory_space<vmem>>, vector<16x16x128xf32>
    %131 = vector.shape_cast %130 : vector<16x16x128xf32> to vector<256x128xf32>
    %c3_154 = arith.constant 3 : index
    %c0_155 = arith.constant 0 : index
    %c0_156 = arith.constant 0 : index
    %132 = vector.load %arg3[%c3_154, %c0_155, %c0_156] : memref<9x128x128xf32, #tpu.memory_space<vmem>>, vector<1x128x128xf32>
    %133 = vector.shape_cast %132 : vector<1x128x128xf32> to vector<128x128xf32>
    %cst_157 = arith.constant dense<0.000000e+00> : vector<256x128xf32>
    %134 = tpu.matmul %131, %133, %cst_157 {dimension_numbers = #tpu.dot_dimension_numbers<[1], [0], [0], [1], [0, 0, 1, 1], [], []>} : vector<256x128xf32>, vector<128x128xf32>, vector<256x128xf32> -> vector<256x128xf32>
    %135 = arith.addf %129, %134 : vector<256x128xf32>
    %c1_158 = arith.constant 1 : index
    %c1_159 = arith.constant 1 : index
    %c0_160 = arith.constant 0 : index
    %136 = vector.load %arg5[%c1_158, %c1_159, %c0_160] : memref<18x18x128xf32, #tpu.memory_space<vmem>>, vector<16x16x128xf32>
    %137 = vector.shape_cast %136 : vector<16x16x128xf32> to vector<256x128xf32>
    %c4_161 = arith.constant 4 : index
    %c0_162 = arith.constant 0 : index
    %c0_163 = arith.constant 0 : index
    %138 = vector.load %arg3[%c4_161, %c0_162, %c0_163] : memref<9x128x128xf32, #tpu.memory_space<vmem>>, vector<1x128x128xf32>
    %139 = vector.shape_cast %138 : vector<1x128x128xf32> to vector<128x128xf32>
    %cst_164 = arith.constant dense<0.000000e+00> : vector<256x128xf32>
    %140 = tpu.matmul %137, %139, %cst_164 {dimension_numbers = #tpu.dot_dimension_numbers<[1], [0], [0], [1], [0, 0, 1, 1], [], []>} : vector<256x128xf32>, vector<128x128xf32>, vector<256x128xf32> -> vector<256x128xf32>
    %141 = arith.addf %135, %140 : vector<256x128xf32>
    %c1_165 = arith.constant 1 : index
    %c2_166 = arith.constant 2 : index
    %c0_167 = arith.constant 0 : index
    %142 = vector.load %arg5[%c1_165, %c2_166, %c0_167] : memref<18x18x128xf32, #tpu.memory_space<vmem>>, vector<16x16x128xf32>
    %143 = vector.shape_cast %142 : vector<16x16x128xf32> to vector<256x128xf32>
    %c5_168 = arith.constant 5 : index
    %c0_169 = arith.constant 0 : index
    %c0_170 = arith.constant 0 : index
    %144 = vector.load %arg3[%c5_168, %c0_169, %c0_170] : memref<9x128x128xf32, #tpu.memory_space<vmem>>, vector<1x128x128xf32>
    %145 = vector.shape_cast %144 : vector<1x128x128xf32> to vector<128x128xf32>
    %cst_171 = arith.constant dense<0.000000e+00> : vector<256x128xf32>
    %146 = tpu.matmul %143, %145, %cst_171 {dimension_numbers = #tpu.dot_dimension_numbers<[1], [0], [0], [1], [0, 0, 1, 1], [], []>} : vector<256x128xf32>, vector<128x128xf32>, vector<256x128xf32> -> vector<256x128xf32>
    %147 = arith.addf %141, %146 : vector<256x128xf32>
    %c2_172 = arith.constant 2 : index
    %c0_173 = arith.constant 0 : index
    %c0_174 = arith.constant 0 : index
    %148 = vector.load %arg5[%c2_172, %c0_173, %c0_174] : memref<18x18x128xf32, #tpu.memory_space<vmem>>, vector<16x16x128xf32>
    %149 = vector.shape_cast %148 : vector<16x16x128xf32> to vector<256x128xf32>
    %c6_175 = arith.constant 6 : index
    %c0_176 = arith.constant 0 : index
    %c0_177 = arith.constant 0 : index
    %150 = vector.load %arg3[%c6_175, %c0_176, %c0_177] : memref<9x128x128xf32, #tpu.memory_space<vmem>>, vector<1x128x128xf32>
    %151 = vector.shape_cast %150 : vector<1x128x128xf32> to vector<128x128xf32>
    %cst_178 = arith.constant dense<0.000000e+00> : vector<256x128xf32>
    %152 = tpu.matmul %149, %151, %cst_178 {dimension_numbers = #tpu.dot_dimension_numbers<[1], [0], [0], [1], [0, 0, 1, 1], [], []>} : vector<256x128xf32>, vector<128x128xf32>, vector<256x128xf32> -> vector<256x128xf32>
    %153 = arith.addf %147, %152 : vector<256x128xf32>
    %c2_179 = arith.constant 2 : index
    %c1_180 = arith.constant 1 : index
    %c0_181 = arith.constant 0 : index
    %154 = vector.load %arg5[%c2_179, %c1_180, %c0_181] : memref<18x18x128xf32, #tpu.memory_space<vmem>>, vector<16x16x128xf32>
    %155 = vector.shape_cast %154 : vector<16x16x128xf32> to vector<256x128xf32>
    %c7_182 = arith.constant 7 : index
    %c0_183 = arith.constant 0 : index
    %c0_184 = arith.constant 0 : index
    %156 = vector.load %arg3[%c7_182, %c0_183, %c0_184] : memref<9x128x128xf32, #tpu.memory_space<vmem>>, vector<1x128x128xf32>
    %157 = vector.shape_cast %156 : vector<1x128x128xf32> to vector<128x128xf32>
    %cst_185 = arith.constant dense<0.000000e+00> : vector<256x128xf32>
    %158 = tpu.matmul %155, %157, %cst_185 {dimension_numbers = #tpu.dot_dimension_numbers<[1], [0], [0], [1], [0, 0, 1, 1], [], []>} : vector<256x128xf32>, vector<128x128xf32>, vector<256x128xf32> -> vector<256x128xf32>
    %159 = arith.addf %153, %158 : vector<256x128xf32>
    %c2_186 = arith.constant 2 : index
    %c2_187 = arith.constant 2 : index
    %c0_188 = arith.constant 0 : index
    %160 = vector.load %arg5[%c2_186, %c2_187, %c0_188] : memref<18x18x128xf32, #tpu.memory_space<vmem>>, vector<16x16x128xf32>
    %161 = vector.shape_cast %160 : vector<16x16x128xf32> to vector<256x128xf32>
    %c8_189 = arith.constant 8 : index
    %c0_190 = arith.constant 0 : index
    %c0_191 = arith.constant 0 : index
    %162 = vector.load %arg3[%c8_189, %c0_190, %c0_191] : memref<9x128x128xf32, #tpu.memory_space<vmem>>, vector<1x128x128xf32>
    %163 = vector.shape_cast %162 : vector<1x128x128xf32> to vector<128x128xf32>
    %cst_192 = arith.constant dense<0.000000e+00> : vector<256x128xf32>
    %164 = tpu.matmul %161, %163, %cst_192 {dimension_numbers = #tpu.dot_dimension_numbers<[1], [0], [0], [1], [0, 0, 1, 1], [], []>} : vector<256x128xf32>, vector<128x128xf32>, vector<256x128xf32> -> vector<256x128xf32>
    %165 = arith.addf %159, %164 : vector<256x128xf32>
    %166 = vector.shape_cast %165 : vector<256x128xf32> to vector<16x16x128xf32>
    %c0_193 = arith.constant 0 : index
    %c0_194 = arith.constant 0 : index
    %c0_195 = arith.constant 0 : index
    %c0_196 = arith.constant 0 : index
    %167 = vector.load %arg4[%c0_193, %c0_194, %c0_195, %c0_196] : memref<1x16x16x128xf32, #tpu.memory_space<vmem>>, vector<1x16x16x128xf32>
    %168 = vector.shape_cast %167 : vector<1x16x16x128xf32> to vector<16x16x128xf32>
    %169 = vector.shape_cast %166 : vector<16x16x128xf32> to vector<1x16x16x128xf32>
    tpu.vector_store %arg4[%c0_193, %c0_194, %c0_195, %c0_196], %169 {strides = array<i32>} : memref<1x16x16x128xf32, #tpu.memory_space<vmem>>, vector<1x16x16x128xf32>,
    %cst_197 = arith.constant dense<0.000000e+00> : vector<128xf32>
    %170 = vector.multi_reduction <add>, %165, %cst_197 [0] : vector<256x128xf32> to vector<128xf32>
    %171 = vector.shape_cast %170 : vector<128xf32> to vector<1x128xf32>
    %172 = arith.addf %109, %171 : vector<1x128xf32>
    %173 = arith.mulf %165, %165 : vector<256x128xf32>
    %cst_198 = arith.constant dense<0.000000e+00> : vector<128xf32>
    %174 = vector.multi_reduction <add>, %173, %cst_198 [0] : vector<256x128xf32> to vector<128xf32>
    %175 = vector.shape_cast %174 : vector<128xf32> to vector<1x128xf32>
    %176 = arith.addf %110, %175 : vector<1x128xf32>
    %cst_199 = arith.constant 3.906250e-03 : f32
    %177 = vector.broadcast %cst_199 : f32 to vector<1x128xf32>
    %178 = arith.mulf %172, %177 : vector<1x128xf32>
    %cst_200 = arith.constant 3.906250e-03 : f32
    %179 = vector.broadcast %cst_200 : f32 to vector<1x128xf32>
    %180 = arith.mulf %176, %179 : vector<1x128xf32>
    %181 = arith.mulf %178, %178 : vector<1x128xf32>
    %182 = arith.subf %180, %181 : vector<1x128xf32>
    %cst_201 = arith.constant 0.000000e+00 : f32
    %183 = vector.broadcast %cst_201 : f32 to vector<1x128xf32>
    %184 = arith.maximumf %182, %183 : vector<1x128xf32>
    %185 = vector.shape_cast %178 : vector<1x128xf32> to vector<1x1x128xf32>
    %cst_202 = arith.constant 9.99999974E-6 : f32
    %186 = vector.broadcast %cst_202 : f32 to vector<1x128xf32>
    %187 = arith.addf %184, %186 : vector<1x128xf32>
    %188 = math.rsqrt %187 : vector<1x128xf32>
    %189 = vector.shape_cast %188 : vector<1x128xf32> to vector<1x1x128xf32>
    %c0_203 = arith.constant 0 : index
    %c0_204 = arith.constant 0 : index
    %c0_205 = arith.constant 0 : index
    %c0_206 = arith.constant 0 : index
    %190 = vector.load %arg4[%c0_203, %c0_204, %c0_205, %c0_206] : memref<1x16x16x128xf32, #tpu.memory_space<vmem>>, vector<1x16x16x128xf32>
    %191 = vector.shape_cast %190 : vector<1x16x16x128xf32> to vector<16x16x128xf32>
    %192 = vector.broadcast %185 : vector<1x1x128xf32> to vector<16x16x128xf32>
    %193 = arith.subf %191, %192 : vector<16x16x128xf32>
    %194 = vector.broadcast %189 : vector<1x1x128xf32> to vector<16x16x128xf32>
    %195 = arith.mulf %193, %194 : vector<16x16x128xf32>
    %c0_207 = arith.constant 0 : index
    %c0_208 = arith.constant 0 : index
    %c0_209 = arith.constant 0 : index
    %c0_210 = arith.constant 0 : index
    %196 = vector.load %arg1[%c0_207, %c0_208, %c0_209, %c0_210] : memref<1x16x16x128xf32, #tpu.memory_space<vmem>>, vector<1x16x16x128xf32>
    %197 = vector.shape_cast %196 : vector<1x16x16x128xf32> to vector<16x16x128xf32>
    %198 = arith.addf %195, %197 : vector<16x16x128xf32>
    %c0_211 = arith.constant 0 : index
    %c0_212 = arith.constant 0 : index
    %c0_213 = arith.constant 0 : index
    %c0_214 = arith.constant 0 : index
    %199 = vector.load %arg4[%c0_211, %c0_212, %c0_213, %c0_214] : memref<1x16x16x128xf32, #tpu.memory_space<vmem>>, vector<1x16x16x128xf32>
    %200 = vector.shape_cast %199 : vector<1x16x16x128xf32> to vector<16x16x128xf32>
    %201 = vector.shape_cast %198 : vector<16x16x128xf32> to vector<1x16x16x128xf32>
    tpu.vector_store %arg4[%c0_211, %c0_212, %c0_213, %c0_214], %201 {strides = array<i32>} : memref<1x16x16x128xf32, #tpu.memory_space<vmem>>, vector<1x16x16x128xf32>,
    return
  }
  func.func @transform_0(%arg0: i32) -> (i32, i32, i32, i32) {
    %c0_i32 = arith.constant 0 : i32
    %c0_i32_0 = arith.constant 0 : i32
    %c0_i32_1 = arith.constant 0 : i32
    %c0_i32_2 = arith.constant 0 : i32
    return %arg0, %c0_i32, %c0_i32_0, %c0_i32_1 : i32, i32, i32, i32
  }
  func.func @transform_1(%arg0: i32) -> (i32, i32, i32) {
    %c0_i32 = arith.constant 0 : i32
    %c0_i32_0 = arith.constant 0 : i32
    %c0_i32_1 = arith.constant 0 : i32
    %c0_i32_2 = arith.constant 0 : i32
    return %c0_i32, %c0_i32_0, %c0_i32_1 : i32, i32, i32
  }
  func.func @transform_2(%arg0: i32) -> (i32, i32, i32) {
    %c0_i32 = arith.constant 0 : i32
    %c0_i32_0 = arith.constant 0 : i32
    %c0_i32_1 = arith.constant 0 : i32
    %c0_i32_2 = arith.constant 0 : i32
    return %c0_i32, %c0_i32_0, %c0_i32_1 : i32, i32, i32
  }
  func.func @transform_3(%arg0: i32) -> (i32, i32, i32, i32) {
    %c0_i32 = arith.constant 0 : i32
    %c0_i32_0 = arith.constant 0 : i32
    %c0_i32_1 = arith.constant 0 : i32
    %c0_i32_2 = arith.constant 0 : i32
    return %arg0, %c0_i32, %c0_i32_0, %c0_i32_1 : i32, i32, i32, i32
  }
}

</mosaic_0001>

<bundles_post_ra>
// kernel: tpu_custom_call.1
= control target key start
LH: loop header
LB: loop body
LE: loop exit
PB: predicated region body
PF: predicated region fallthrough
CT: control target
= control target key end

     0   :  { %8 = vsyncpa [#allocation4], 0  ;;  %s12136_s0 = inlined_call_operand.hbm [shape: f32[2,16,16,128], index: 0, kind: input, shape index: {}]   ;;  %s12137_s1 = inlined_call_operand.hbm [shape: f32[9,128,128], index: 1, kind: input, shape index: {}]   ;;  %s12138_s2 = inlined_call_operand.hbm [shape: f32[9,128,128], index: 2, kind: input, shape index: {}]   ;;  %s12139_s3 = inlined_call_operand.hbm [shape: f32[2,16,16,128], index: 3, kind: output, shape index: {}]  }
   0x1   :  { %10 = vsyncpa [#allocation4 + $0x1], 0 }
   0x2   :  { %11 = vsyncpa [#allocation7], 0 }
   0x3   :  { %12 = vsyncpa [#allocation5], 0 }
   0x4   :  { %14 = vsyncpa [#allocation5 + $0x1], 0  ;;  %s9170_s12 = smov 0   ;;  %s9172_s13 = smov 0  }
   0x5   :  { %s9174_s14 = smov 0   ;;  %s9176_s15 = smov 0  }
   0x6 LB: > { %s9191_s16 = sadd.s32 4294967295, %s9140_s15   ;;  %s6576_s17 = sadd.s32 4294967294, %s9140_s15   ;;  %s9140_s15 = sphi %s9176_s15, %s12360_s15   ;;  %s9136_s14 = sphi %s9174_s14, %s12359_s14   ;;  %s9132_s13 = sphi %s9172_s13, %s12358_s13   ;;  %s9128_s12 = sphi %s9170_s12, %s12357_s12  }
   0x7   : > { %p40_p0 = scmp.ne.s32.totalorder %s9132_s13, %s9128_s12  ;;  %p12140_p1 = scmp.eq.s32.totalorder %s9191_s16, 0 }
   0x8   : > { %p106_p2 = scmp.eq.s32.totalorder %s9191_s16, 1  ;;  %p112_p3 = scmp.eq.s32.totalorder %s6576_s17, 1 }
   0x9   : > { %p9200_p4 = por %p12140_p1, %p40_p0  ;;  %p6577_p5 = scmp.ge.s32.totalorder %s9140_s15, 1 }
   0xa   : > { %p9205_p6 = por %p112_p3, %p40_p0  ;;  %p119_p7 = scmp.lt.s32.totalorder %s9140_s15, 3 }
   0xb   : > { %s12144_s18 = scalar_select %p9200_p4, 1, 0 }
   0xc   : > { %s12145_s19 = scalar_select %p9205_p6, 1, 0 }
   0xd   : > { %p9210_p8 = pnand %p6577_p5, %p119_p7  ;;  %s9142_s21 = smov [#allocation6]  }
   0xe   : > { %s131_s22 = sshll.u32 %s9142_s21, 4  ;;  %s9143_s24 = smov [#allocation8]   ;;  %s132_s22 = int_to_ptr.vmem [resolvable:$true] %s131_s22 }
   0xf   : > { %s12146_s20 = scalar_select %p9210_p8, 1, 0 }
  0x10   : > { %p8912_p9 = pneg %p9210_p8  ;;  %s144_s25 = sshll.u32 %s9143_s24, 4  ;;  %s145_s25 = int_to_ptr.vmem [resolvable:$true] %s144_s25 }
  0x11   : > { %s9003_s26 = scalar_lea.vmem %s132_s22, 18432  ;;  %p9011_p5 = scmp.lt.s32.totalorder %s132_s22, %s132_s22 }
  0x12   : > { %p9219_p11 = pnand %p8912_p9, %p12140_p1  ;;  %p9004_p13 = scmp.ne.s32.totalorder %s132_s22, %s9003_s26 }
  0x13   : > { %p9012_p7 = scmp.lt.s32.totalorder %s9003_s26, %s9003_s26 }
  0x14   : > { %p8994_p12 = pneg %p9219_p11 }
  0x15   : > { %p9013_p10 = por %p9012_p7, %p9011_p5 }
  0x16   : > { %p9006_p0 = pnand %p9004_p13, %p8994_p12 }
  0x18   : > { %p9007_p3 = pneg %p9006_p0 }
  0x1a   : > { %p9014_p9 = pnand %p9013_p10, %p9007_p3 }
  0x1c   : > { %9017 = shalt.err (!%p9014_p9)
}
  0x1d   : > { %s9144_s27 = smov 128   ;;  %s9145_s28 = smov 8  }
  0x1e   : > { %8915 = dma.hbm_to_vmem [thread:$0]  (!%p9219_p11), %s12137_s1, 18432, %s132_s22, [#allocation7], %s9144_s27, %s9144_s27, %s9145_s28  }
  0x1f   : > { %s9029_s4 = scalar_lea.vmem %s145_s25, 18432  ;;  %p9037_p10 = scmp.lt.s32.totalorder %s145_s25, %s145_s25 }
  0x20   : > { %p9030_p13 = scmp.ne.s32.totalorder %s145_s25, %s9029_s4  ;;  %p9038_p3 = scmp.lt.s32.totalorder %s9029_s4, %s9029_s4 }
  0x22   : > { %p9032_p0 = pnand %p9030_p13, %p8994_p12  ;;  %p9039_p7 = por %p9038_p3, %p9037_p10 }
  0x24   : > { %p9033_p5 = pneg %p9032_p0 }
  0x26   : > { %p9040_p9 = pnand %p9039_p7, %p9033_p5 }
  0x28   : > { %9043 = shalt.err (!%p9040_p9)
}
  0x29   : > { %8918 = dma.hbm_to_vmem [thread:$0]  (!%p9219_p11), %s12138_s2, 18432, %s145_s25, [#allocation7], %s9144_s27, %s9144_s27, %s9145_s28  }
  0x2a   : > { %s9248_s7 = sadd.s32 1, %s9140_s15   ;;  %s27_s8 = sadd.s32 1, %s9136_s14 }
  0x2b   : > { %s24_s9 = ssub.s32 %s9140_s15, %s9248_s7  ;;  %p34_p12 = scmp.ne.s32.totalorder %s9136_s14, %s9132_s13 }
  0x2c   : > { %p25_p13 = scmp.eq.s32.totalorder %s24_s9, 0  ;;  %p35_p0 = scmp.eq.s32.totalorder %s9140_s15, 0 }
  0x2d   : > { %p9258_p5 = por %p106_p2, %p34_p12  ;;  %p8929_p10 = scmp.lt.s32.totalorder %s9140_s15, 2 }
  0x2e   : > { %s9264_s11 = scalar_select %p25_p13, %s9136_s14, %s27_s8  }
  0x2f   : > { %s12148_s10 = scalar_select %p9258_p5, 1, 0 }
  0x30   : > { %p36_p3 = por %p35_p0, %p34_p12  ;;  %s158_s17 = sand.u32 1, %s9136_s14  }
  0x31   : > { %s6581_s21 = sshll.u32 %s158_s17, 8  ;;  %s6594_s22 = sshll.u32 %s9140_s15, 12 }
  0x32   : > { %s9271_s25 = scalar_lea.hbm %s12136_s0, %s6594_s22  ;;  %s162_s26 = scalar_lea.vmem [#allocation3], %s6581_s21 }
  0x33   : > { %s169_s29 = sshll.u32 %s162_s26, 4  ;;  %p9275_p2 = pnand %p8929_p10, %p36_p3  ;;  %s9273_s29 = int_to_ptr.vmem [resolvable:$true] %s169_s29 }
  0x34   : > { %s9279_s4 = scalar_lea.sflag [#allocation4], %s158_s17  ;;  %s9044_s5 = scalar_lea.hbm %s9271_s25, 4096 }
  0x35   : > { %p9045_p11 = scmp.ne.s32.totalorder %s9271_s25, %s9044_s5  ;;  %p9046_p7 = pneg %p9275_p2 }
  0x36   : > { %s9049_s9 = scalar_lea.hbm %s12136_s0, 8192  ;;  %p9050_p13 = scmp.lt.s32.totalorder %s9271_s25, %s12136_s0 }
  0x37   : > { %p9047_p9 = pnand %p9046_p7, %p9045_p11  ;;  %p9051_p0 = scmp.lt.s32.totalorder %s9049_s9, %s9044_s5 }
  0x39   : > { %p9048_p12 = pneg %p9047_p9  ;;  %p9052_p10 = por %p9051_p0, %p9050_p13 }
  0x3b   : > { %p9053_p3 = pnand %p9052_p10, %p9048_p12 }
  0x3d   : > { %9056 = shalt.err (!%p9053_p3)
}
  0x3e   : > { %s9057_s17 = scalar_lea.vmem %s9273_s29, 4096  ;;  %s9146_s23 = smov [#allocation3]  }
  0x3f   : > { %p9058_p1 = scmp.ne.s32.totalorder %s9273_s29, %s9057_s17  ;;  %s9062_s24 = sshll.u32 %s9146_s23, 4  ;;  %s9063_s24 = int_to_ptr.vmem [resolvable:$false] %s9062_s24 }
  0x40   : > { %s9064_s26 = scalar_lea.vmem %s9063_s24, 8192  ;;  %p9065_p9 = scmp.lt.s32.totalorder %s9273_s29, %s9063_s24 }
  0x41   : > { %p9060_p6 = pnand %p9058_p1, %p9046_p7  ;;  %p9066_p5 = scmp.lt.s32.totalorder %s9064_s26, %s9057_s17 }
  0x43   : > { %p9061_p11 = pneg %p9060_p6  ;;  %p9067_p4 = por %p9066_p5, %p9065_p9 }
  0x45   : > { %p9068_p8 = pnand %p9067_p4, %p9061_p11 }
  0x47   : > { %9071 = shalt.err (!%p9068_p8)
}
  0x48   : > { %8922 = dma.hbm_to_vmem [thread:$0]  (!%p9275_p2), %s9271_s25, 4096, %s9273_s29, %s9279_s4, %s9144_s27, %s9144_s27, %s9145_s28  }
  0x49   : > { %p12150_p1 = scmp.ne.s32.totalorder %s12146_s20, 0 }
  0x4b   : > { %181 = sbr.rel (%p12150_p1) target bundleno = 1289 (0x509), region = 32 }
  0x50   : > { %s9306_s5 = sand.u32 1, %s9132_s13   ;;  %p12151_p4 = scmp.ne.s32.totalorder %s12144_s18, 0 }
  0x51   : > { %s6585_s6 = sshll.u32 %s9306_s5, 8  ;;  %s184_s8 = scalar_lea.sflag [#allocation4], %s9306_s5 }
  0x52   : > { %s9312_s30 = scalar_lea.vmem [#allocation3], %s6585_s6 }
  0x53   : > { %9115 = dma.done.wait (%p12151_p4), %s184_s8, 4096  }
  0x54   : > { %9117 = vsyncadd (%p12151_p4), %s184_s8, 4294963200  ;;  %p12152_p6 = scmp.eq.s32.totalorder %s9191_s16, 0 }
  0x56   : > { %9119 = dma.done.wait (%p12152_p6), [#allocation7], 36864   ;;  %p12153_p8 = pmov %p12152_p6 }
  0x57   : > { %v462_v0 = vld [vmem:[#allocation6 + $0xf8] sm:$0xff]  ;;  %v461_v2 = vld [vmem:[#allocation6 + $0xf0] sm:$0xff]  ;;  %v460_v4 = vld [vmem:[#allocation6 + $0xe8] sm:$0xff]  ;;  %s11966_s18 = scalar_lea.vmem [#allocation9], %s6585_s6  ;;  %s6595_s20 = sshll.u32 %s9191_s16, 12 }
  0x58   : > { %9121 = vsyncadd (%p12153_p8), [#allocation7], 4294930432  ;;  %v413_v1 = vld [vmem:[#allocation6 + $0x78] sm:$0xff]  ;;  %7460 = vmatprep.subr.mxu0 %v462_v0  ;;  %v412_v3 = vld [vmem:[#allocation6 + $0x70] sm:$0xff]  ;;  %s6484_s27 = sshll.u32 %s11966_s18, 4  ;;  %s12073_s29 = scalar_lea.hbm %s12139_s3, %s6595_s20  ;;  %s12077_s27 = int_to_ptr.vmem [resolvable:$true] %s6484_s27 }
  0x59   : > { %7540 = vmatprep.subr.mxu1 %v413_v1  ;;  %7461 = vmatpush3.msra.mxu0 %v462_v0  ;;  %v411_v5 = vld [vmem:[#allocation6 + $0x68] sm:$0xff]  ;;  %v459_v6 = vld [vmem:[#allocation6 + $0xe0] sm:$0xff]  ;;  %v458_v8 = vld [vmem:[#allocation6 + $0xd8] sm:$0xff]  ;;  %s6471_s16 = scalar_lea.sflag [#allocation5], %s9306_s5  ;;  %s9072_s4 = scalar_lea.vmem %s12077_s27, 4096 }
  0x5a   : > { %7541 = vmatpush3.msra.mxu1 %v413_v1  ;;  %7462 = vmatprep.subr.mxu0 %v461_v2  ;;  %v410_v7 = vld [vmem:[#allocation6 + $0x60] sm:$0xff]  ;;  %v409_v9 = vld [vmem:[#allocation6 + $0x58] sm:$0xff]  ;;  %v457_v10 = vld [vmem:[#allocation6 + $0xd0] sm:$0xff]  ;;  %p9073_p5 = scmp.ne.s32.totalorder %s12077_s27, %s9072_s4  ;;  %p12354_p2 = scmp.ne.s32.totalorder %s12148_s10, 0 }
  0x5b   : > { %7542 = vmatprep.subr.mxu1 %v412_v3  ;;  %7463 = vmatpush3.msra.mxu0 %v461_v2  ;;  %v408_v11 = vld [vmem:[#allocation6 + $0x50] sm:$0xff]  ;;  %v456_v12 = vld [vmem:[#allocation6 + $0xc8] sm:$0xff]  ;;  %v455_v15 = vld [vmem:[#allocation6 + $0xc0] sm:$0xff]  ;;  %s9147_s9 = smov [#allocation9]  }
  0x5c   : > { %7543 = vmatpush3.msra.mxu1 %v412_v3  ;;  %7464 = vmatprep.subr.mxu0 %v460_v4  ;;  %v407_v13 = vld [vmem:[#allocation6 + $0x48] sm:$0xff]  ;;  %v9323_v14 = vld [vmem:[%s9312_s30 + $0x10] sm:$0xff]  ;;  %v9328_v16 = vld [vmem:[%s9312_s30 + $0x18] sm:$0xff]  ;;  %p9074_p7 = pnand %p9073_p5, %p12354_p2  ;;  %s9076_s21 = sshll.u32 %s9147_s9, 4  ;;  %s9077_s21 = int_to_ptr.vmem [resolvable:$false] %s9076_s21 }
  0x5d   : > { %7544 = vmatprep.subr.mxu1 %v411_v5  ;;  %7465 = vmatpush3.msra.mxu0 %v460_v4  ;;  %253 = vst [vmem:[#allocation2 + $0x31] sm:$0xff] %v9323_v14  ;;  %286 = vst [vmem:[#allocation2 + $0x1] sm:$0xff] %v9323_v14  ;;  %v9331_v17 = vld [vmem:[%s9312_s30] sm:$0xff]  ;;  %v454_v19 = vld [vmem:[#allocation6 + $0xb8] sm:$0xff]  ;;  %s9078_s22 = scalar_lea.vmem %s9077_s21, 8192  ;;  %p9079_p13 = scmp.lt.s32.totalorder %s12077_s27, %s9077_s21 }
  0x5e   : > { %7545 = vmatpush3.msra.mxu1 %v411_v5  ;;  %7466 = vmatprep.subr.mxu0 %v459_v6  ;;  %v406_v18 = vld [vmem:[#allocation6 + $0x40] sm:$0xff]  ;;  %254 = vst [vmem:[#allocation2 + $0x39] sm:$0xff] %v9328_v16  ;;  %287 = vst [vmem:[#allocation2 + $0x9] sm:$0xff] %v9328_v16  ;;  %v9337_v20 = vld [vmem:[%s9312_s30 + $0x8] sm:$0xff]  ;;  %p9075_p12 = pneg %p9074_p7  ;;  %p9080_p0 = scmp.lt.s32.totalorder %s9078_s22, %s9072_s4 }
  0x5f   : > { %7546 = vmatprep.subr.mxu1 %v410_v7  ;;  %7467 = vmatpush3.msra.mxu0 %v459_v6  ;;  %251 = vst [vmem:[#allocation2 + $0x19] sm:$0xff] %v9331_v17  ;;  %v405_v21 = vld [vmem:[#allocation6 + $0x38] sm:$0xff]  ;;  %252 = vst [vmem:[#allocation2 + $0x21] sm:$0xff] %v9337_v20  ;;  %v9341_v22 = vld [vmem:[%s9312_s30 + $0x20] sm:$0xff] }
  0x60   : > { %7547 = vmatpush3.msra.mxu1 %v410_v7  ;;  %7468 = vmatprep.subr.mxu0 %v458_v8  ;;  %v9344_v23 = vld [vmem:[%s9312_s30 + $0x28] sm:$0xff]  ;;  %v453_v24 = vld [vmem:[#allocation6 + $0xb0] sm:$0xff]  ;;  %255 = vst [vmem:[#allocation2 + $0x49] sm:$0xff] %v9341_v22  ;;  %v9352_v26 = vld [vmem:[%s9312_s30 + $0x38] sm:$0xff]  ;;  %p9081_p10 = por %p9080_p0, %p9079_p13 }
  0x61   : > { %7548 = vmatprep.subr.mxu1 %v409_v9  ;;  %7469 = vmatpush3.msra.mxu0 %v458_v8  ;;  %256 = vst [vmem:[#allocation2 + $0x51] sm:$0xff] %v9344_v23  ;;  %v9349_v25 = vld [vmem:[%s9312_s30 + $0x30] sm:$0xff]  ;;  %258 = vst [vmem:[#allocation2 + $0x69] sm:$0xff] %v9352_v26  ;;  %v9357_v28 = vld [vmem:[%s9312_s30 + $0x40] sm:$0xff] }
  0x62   : > { %7549 = vmatpush3.msra.mxu1 %v409_v9  ;;  %7470 = vmatprep.subr.mxu0 %v457_v10  ;;  %v404_v27 = vld [vmem:[#allocation6 + $0x30] sm:$0xff]  ;;  %257 = vst [vmem:[#allocation2 + $0x61] sm:$0xff] %v9349_v25  ;;  %v9360_v29 = vld [vmem:[%s9312_s30 + $0x48] sm:$0xff]  ;;  %259 = vst [vmem:[#allocation2 + $0x79] sm:$0xff] %v9357_v28  ;;  %p9082_p3 = pnand %p9081_p10, %p9075_p12 }
  0x63   : > { %7550 = vmatprep.subr.mxu1 %v408_v11  ;;  %7471 = vmatpush3.msra.mxu0 %v457_v10  ;;  %v452_v30 = vld [vmem:[#allocation6 + $0xa8] sm:$0xff]  ;;  %260 = vst [vmem:[#allocation2 + $0x81] sm:$0xff] %v9360_v29  ;;  %v9365_v31 = vld [vmem:[%s9312_s30 + $0x50] sm:$0xff]  ;;  %v9368_v32 = vld [vmem:[%s9312_s30 + $0x58] sm:$0xff] }
  0x64   : > { %7551 = vmatpush3.msra.mxu1 %v408_v11  ;;  %7472 = vmatprep.subr.mxu0 %v456_v12  ;;  %v403_v33 = vld [vmem:[#allocation6 + $0x28] sm:$0xff]  ;;  %261 = vst [vmem:[#allocation2 + $0x91] sm:$0xff] %v9365_v31  ;;  %262 = vst [vmem:[#allocation2 + $0x99] sm:$0xff] %v9368_v32  ;;  %v9373_v34 = vld [vmem:[%s9312_s30 + $0x60] sm:$0xff] }
  0x65   : > { %7552 = vmatprep.subr.mxu1 %v407_v13  ;;  %7473 = vmatpush3.msra.mxu0 %v456_v12  ;;  %v9376_v35 = vld [vmem:[%s9312_s30 + $0x68] sm:$0xff]  ;;  %v294_v36 = vld [vmem:[#allocation2 + $0x2] sm:$0x1]  ;;  %v296_v37 = vld [vmem:[#allocation2 + $0x32] sm:$0x1]  ;;  %263 = vst [vmem:[#allocation2 + $0xa9] sm:$0xff] %v9373_v34 }
  0x66   : > { %7553 = vmatpush3.msra.mxu1 %v407_v13  ;;  %7474 = vmatprep.subr.mxu0 %v455_v15  ;;  %264 = vst [vmem:[#allocation2 + $0xb1] sm:$0xff] %v9376_v35  ;;  %v9381_v38 = vld [vmem:[%s9312_s30 + $0x70] sm:$0xff]  ;;  %312 = vst [vmem:[#allocation2] sm:$0x1] %v294_v36  ;;  %v295_v39 = vld [vmem:[#allocation2 + $0x1a] sm:$0x1] }
  0x67   : > { %7554 = vmatprep.subr.mxu1 %v406_v18  ;;  %7475 = vmatpush3.msra.mxu0 %v455_v15  ;;  %314 = vst [vmem:[#allocation2 + $0x30] sm:$0x1] %v296_v37  ;;  %265 = vst [vmem:[#allocation2 + $0xc1] sm:$0xff] %v9381_v38  ;;  %v451_v40 = vld [vmem:[#allocation6 + $0xa0] sm:$0xff]  ;;  %v9385_v42 = vld [vmem:[%s9312_s30 + $0x78] sm:$0xff] }
  0x68   : > { %7555 = vmatpush3.msra.mxu1 %v406_v18  ;;  %7476 = vmatprep.subr.mxu0 %v454_v19  ;;  %v402_v41 = vld [vmem:[#allocation6 + $0x20] sm:$0xff]  ;;  %313 = vst [vmem:[#allocation2 + $0x18] sm:$0x1] %v295_v39  ;;  %v450_v43 = vld [vmem:[#allocation6 + $0x98] sm:$0xff]  ;;  %266 = vst [vmem:[#allocation2 + $0xc9] sm:$0xff] %v9385_v42 }
  0x69   : > { %7556 = vmatprep.subr.mxu1 %v405_v21  ;;  %7477 = vmatpush3.msra.mxu0 %v454_v19  ;;  %v297_v44 = vld [vmem:[#allocation2 + $0x4a] sm:$0x1]  ;;  %v298_v46 = vld [vmem:[#allocation2 + $0x62] sm:$0x1]  ;;  %v9389_v47 = vld [vmem:[%s9312_s30 + $0x80] sm:$0xff] }
  0x6a   : > { %7557 = vmatpush3.msra.mxu1 %v405_v21  ;;  %7478 = vmatprep.subr.mxu0 %v453_v24  ;;  %v401_v45 = vld [vmem:[#allocation6 + $0x18] sm:$0xff]  ;;  %315 = vst [vmem:[#allocation2 + $0x48] sm:$0x1] %v297_v44  ;;  %316 = vst [vmem:[#allocation2 + $0x60] sm:$0x1] %v298_v46  ;;  %v9393_v49 = vld [vmem:[%s9312_s30 + $0x88] sm:$0xff] }
  0x6b   : > { %7558 = vmatprep.subr.mxu1 %v404_v27  ;;  %7479 = vmatpush3.msra.mxu0 %v453_v24  ;;  %v299_v48 = vld [vmem:[#allocation2 + $0x7a] sm:$0x1]  ;;  %267 = vst [vmem:[#allocation2 + $0xd9] sm:$0xff] %v9389_v47  ;;  %v449_v50 = vld [vmem:[#allocation6 + $0x90] sm:$0xff]  ;;  %v300_v52 = vld [vmem:[#allocation2 + $0x92] sm:$0x1] }
  0x6c   : > { %7559 = vmatpush3.msra.mxu1 %v404_v27  ;;  %7480 = vmatprep.subr.mxu0 %v452_v30  ;;  %v400_v51 = vld [vmem:[#allocation6 + $0x10] sm:$0xff]  ;;  %317 = vst [vmem:[#allocation2 + $0x78] sm:$0x1] %v299_v48  ;;  %268 = vst [vmem:[#allocation2 + $0xe1] sm:$0xff] %v9393_v49  ;;  %v301_v53 = vld [vmem:[#allocation2 + $0xaa] sm:$0x1] }
  0x6d   : > { %7560 = vmatprep.subr.mxu1 %v403_v33  ;;  %7481 = vmatpush3.msra.mxu0 %v452_v30  ;;  %318 = vst [vmem:[#allocation2 + $0x90] sm:$0x1] %v300_v52  ;;  %v448_v54 = vld [vmem:[#allocation6 + $0x88] sm:$0xff]  ;;  %319 = vst [vmem:[#allocation2 + $0xa8] sm:$0x1] %v301_v53  ;;  %v9397_v57 = vld [vmem:[%s9312_s30 + $0x90] sm:$0xff] }
  0x6e   : > { %7561 = vmatpush3.msra.mxu1 %v403_v33  ;;  %7482 = vmatprep.subr.mxu0 %v451_v40  ;;  %v399_v55 = vld [vmem:[#allocation6 + $0x8] sm:$0xff]  ;;  %v302_v56 = vld [vmem:[#allocation2 + $0xc2] sm:$0x1]  ;;  %v447_v58 = vld [vmem:[#allocation6 + $0x80] sm:$0xff]  ;;  %269 = vst [vmem:[#allocation2 + $0xf1] sm:$0xff] %v9397_v57 }
  0x6f   : > { %7562 = vmatprep.subr.mxu1 %v402_v41  ;;  %7483 = vmatpush3.msra.mxu0 %v451_v40  ;;  %320 = vst [vmem:[#allocation2 + $0xc0] sm:$0x1] %v302_v56  ;;  %v398_v59 = vld [vmem:[#allocation6] sm:$0xff]  ;;  %v9401_v60 = vld [vmem:[%s9312_s30 + $0x98] sm:$0xff]  ;;  %v366_v61 = vld [vmem:[#allocation2] sm:$0xff] }
  0x70   : > { %7563 = vmatpush3.msra.mxu1 %v402_v41  ;;  %7484 = vmatprep.subr.mxu0 %v450_v43  ;;  %270 = vst [vmem:[#allocation2 + $0xf9] sm:$0xff] %v9401_v60  ;;  %v9405_v63 = vld [vmem:[%s9312_s30 + $0xa0] sm:$0xff]  ;;  %v367_v0 = vld [vmem:[#allocation2 + $0x8] sm:$0xff]  ;;  %v9409_v1 = vld [vmem:[%s9312_s30 + $0xa8] sm:$0xff] }
  0x71   : > { %7564 = vmatprep.subr.mxu1 %v401_v45  ;;  %7485 = vmatpush3.msra.mxu0 %v450_v43  ;;  %271 = vst [vmem:[#allocation2 + $0x109] sm:$0xff] %v9405_v63  ;;  %v961_v2 = vld [vmem:[#allocation6 + $0x178] sm:$0xff]  ;;  %272 = vst [vmem:[#allocation2 + $0x111] sm:$0xff] %v9409_v1  ;;  %v9413_v3 = vld [vmem:[#allocation2 + $0x18] sm:$0xff] }
  0x72   : > { %7565 = vmatpush3.msra.mxu1 %v401_v45  ;;  %7486 = vmatprep.subr.mxu0 %v449_v50  ;;  %v303_v62 = vld [vmem:[#allocation2 + $0xda] sm:$0x1]  ;;  %v9416_v4 = vld [vmem:[%s9312_s30 + $0xb0] sm:$0xff]  ;;  %v1267_v6 = vld [vmem:[#allocation6 + $0x1f8] sm:$0xff] }
  0x73   : > { %7566 = vmatprep.subr.mxu1 %v400_v51  ;;  %7487 = vmatpush3.msra.mxu0 %v449_v50  ;;  %321 = vst [vmem:[#allocation2 + $0xd8] sm:$0x1] %v303_v62  ;;  %v960_v5 = vld [vmem:[#allocation6 + $0x170] sm:$0xff]  ;;  %273 = vst [vmem:[#allocation2 + $0x121] sm:$0xff] %v9416_v4  ;;  %v9421_v7 = vld [vmem:[%s9312_s30 + $0xb8] sm:$0xff] }
  0x74   : > { %7567 = vmatpush3.msra.mxu1 %v400_v51  ;;  %7488 = vmatprep.subr.mxu0 %v448_v54  ;;  %v9424_v8 = vld [vmem:[#allocation2 + $0x20] sm:$0xff]  ;;  %274 = vst [vmem:[#allocation2 + $0x129] sm:$0xff] %v9421_v7  ;;  %v9429_v10 = vld [vmem:[%s9312_s30 + $0xc0] sm:$0xff]  ;;  %v9432_v11 = vld [vmem:[%s9312_s30 + $0xc8] sm:$0xff] }
  0x75   : > { %7568 = vmatprep.subr.mxu1 %v399_v55  ;;  %7489 = vmatpush3.msra.mxu0 %v448_v54  ;;  %v304_v9 = vld [vmem:[#allocation2 + $0xf2] sm:$0x1]  ;;  %v959_v13 = vld [vmem:[#allocation6 + $0x168] sm:$0xff]  ;;  %275 = vst [vmem:[#allocation2 + $0x139] sm:$0xff] %v9429_v10  ;;  %276 = vst [vmem:[#allocation2 + $0x141] sm:$0xff] %v9432_v11 }
  0x76   : > { %7569 = vmatpush3.msra.mxu1 %v399_v55  ;;  %7490 = vmatprep.subr.mxu0 %v447_v58  ;;  %322 = vst [vmem:[#allocation2 + $0xf0] sm:$0x1] %v304_v9  ;;  %v9434_v12 = vld [vmem:[#allocation2 + $0x30] sm:$0xff]  ;;  %v9444_v18 = vld [vmem:[#allocation2 + $0x38] sm:$0xff]  ;;  %v9448_v19 = vld [vmem:[%s9312_s30 + $0xd8] sm:$0xff] }
  0x77   : > { %7570 = vmatprep.subr.mxu1 %v398_v59  ;;  %7491 = vmatpush3.msra.mxu0 %v447_v58  ;;  %v958_v21 = vld [vmem:[#allocation6 + $0x160] sm:$0xff]  ;;  %278 = vst [vmem:[#allocation2 + $0x159] sm:$0xff] %v9448_v19  ;;  %v9459_v30 = vld [vmem:[%s9312_s30 + $0xe8] sm:$0xff]  ;;  %v330_v36 = vld [vmem:[#allocation2 + $0xf] sm:$0x1] }
  0x78   : > { %7492 = vmatprep.mubr.f32.mxu0 %v9323_v14  ;;  %7571 = vmatpush3.msra.mxu1 %v398_v59  ;;  %v305_v15 = vld [vmem:[#allocation2 + $0x10a] sm:$0x1]  ;;  %v9455_v24 = vld [vmem:[%s9312_s30 + $0xe0] sm:$0xff]  ;;  %280 = vst [vmem:[#allocation2 + $0x171] sm:$0xff] %v9459_v30  ;;  %v9468_v37 = vld [vmem:[#allocation2 + $0x60] sm:$0xff] }
  0x79   : > { %7572 = vmatprep.mubr.f32.mxu1 %v366_v61  ;;  %7493 = vmatmul.mubr.f32.vlgmr.msra.gmra.mxu0 %v9328_v16  ;;  %323 = vst [vmem:[#allocation2 + $0x108] sm:$0x1] %v305_v15  ;;  %279 = vst [vmem:[#allocation2 + $0x169] sm:$0xff] %v9455_v24  ;;  %v9466_v33 = vld [vmem:[#allocation2 + $0x50] sm:$0xff]  ;;  %v1265_v40 = vld [vmem:[#allocation6 + $0x1e8] sm:$0xff] }
  0x7a   : > { %7573 = vmatmul.mubr.f32.vlgmr.msra.gmra.mxu1 %v367_v0  ;;  %7620 = vmatprep.subr.mxu0 %v961_v2  ;;  %v306_v27 = vld [vmem:[#allocation2 + $0x122] sm:$0x1]  ;;  %348 = vst [vmem:[#allocation2 + $0x11] sm:$0x1] %v330_v36  ;;  %v331_v41 = vld [vmem:[#allocation2 + $0x27] sm:$0x1] }
  0x7b   : > { %7495 = vmatprep.mubr.f32.mxu0 %v9331_v17  ;;  %7621 = vmatpush3.msra.mxu0 %v961_v2  ;;  %v9441_v17 = vld [vmem:[%s9312_s30 + $0xd0] sm:$0xff]  ;;  %324 = vst [vmem:[#allocation2 + $0x120] sm:$0x1] %v306_v27  ;;  %349 = vst [vmem:[#allocation2 + $0x29] sm:$0x1] %v331_v41  ;;  %v9474_v43 = vld [vmem:[#allocation2 + $0x68] sm:$0xff] }
  0x7c   : > { %7575 = vmatprep.mubr.f32.mxu1 %v9413_v3  ;;  %7622 = vmatprep.subr.mxu0 %v960_v5  ;;  %277 = vst [vmem:[#allocation2 + $0x151] sm:$0xff] %v9441_v17  ;;  %v307_v39 = vld [vmem:[#allocation2 + $0x13a] sm:$0x1]  ;;  %v332_v44 = vld [vmem:[#allocation2 + $0x3f] sm:$0x1]  ;;  %v1264_v48 = vld [vmem:[#allocation6 + $0x1e0] sm:$0xff] }
  0x7d   : > { %7700 = vmatprep.subr.mxu1 %v1267_v6  ;;  %7496 = vmatmul.mubr.f32.gmra.mxu0 %v9337_v20  ;;  %v9451_v20 = vld [vmem:[#allocation2 + $0x48] sm:$0xff]  ;;  %325 = vst [vmem:[#allocation2 + $0x138] sm:$0x1] %v307_v39  ;;  %v9476_v45 = vld [vmem:[#allocation2 + $0x78] sm:$0xff]  ;;  %350 = vst [vmem:[#allocation2 + $0x41] sm:$0x1] %v332_v44 }
  0x7e   : > { %7576 = vmatmul.mubr.f32.gmra.mxu1 %v9424_v8  ;;  %7623 = vmatpush3.msra.mxu0 %v960_v5  ;;  %v333_v50 = vld [vmem:[#allocation2 + $0x57] sm:$0x1]  ;;  %v9482_v51 = vld [vmem:[#allocation2 + $0x80] sm:$0xff]  ;;  %v955_v54 = vld [vmem:[#allocation6 + $0x148] sm:$0xff] }
  0x7f   : > { %7498 = vmatprep.mubr.f32.mxu0 %v9323_v14  ;;  %7578 = vmatprep.mubr.f32.mxu1 %v9434_v12  ;;  %v1266_v14 = vld [vmem:[#allocation6 + $0x1f0] sm:$0xff]  ;;  %351 = vst [vmem:[#allocation2 + $0x59] sm:$0x1] %v333_v50  ;;  %v9484_v52 = vld [vmem:[#allocation2 + $0x90] sm:$0xff]  ;;  %v336_v55 = vld [vmem:[#allocation2 + $0x9f] sm:$0x1] }
  0x80   : > { %7624 = vmatprep.subr.mxu0 %v959_v13  ;;  %7701 = vmatpush3.msra.mxu1 %v1267_v6  ;;  %v309_v46 = vld [vmem:[#allocation2 + $0x16a] sm:$0x1]  ;;  %v335_v53 = vld [vmem:[#allocation2 + $0x87] sm:$0x1]  ;;  %354 = vst [vmem:[#allocation2 + $0xa1] sm:$0x1] %v336_v55 }
  0x81   : > { %7625 = vmatpush3.msra.mxu0 %v959_v13  ;;  %7702 = vmatprep.subr.mxu1 %v1266_v14  ;;  %327 = vst [vmem:[#allocation2 + $0x168] sm:$0x1] %v309_v46  ;;  %353 = vst [vmem:[#allocation2 + $0x89] sm:$0x1] %v335_v53  ;;  %v337_v56 = vld [vmem:[#allocation2 + $0xb7] sm:$0x1] }
  0x82   : > { %7499 = vmatmul.mubr.f32.gmra.mxu0 %v9328_v16  ;;  %7579 = vmatmul.mubr.f32.gmra.mxu1 %v9444_v18  ;;  %v957_v16 = vld [vmem:[#allocation6 + $0x158] sm:$0xff]  ;;  %355 = vst [vmem:[#allocation2 + $0xb9] sm:$0x1] %v337_v56  ;;  %v954_v61 = vld [vmem:[#allocation6 + $0x140] sm:$0xff]  ;;  %v9500_v0 = vld [vmem:[#allocation2 + $0xc0] sm:$0xff] }
  0x83   : > { %7501 = vmatprep.mubr.f32.mxu0 %v9341_v22  ;;  %7581 = vmatprep.mubr.f32.mxu1 %v9451_v20  ;;  %v308_v22 = vld [vmem:[#allocation2 + $0x152] sm:$0x1]  ;;  %v9492_v58 = vld [vmem:[#allocation2 + $0xa8] sm:$0xff]  ;;  %v340_v2 = vld [vmem:[#allocation2 + $0xff] sm:$0x1] }
  0x84   : > { %7626 = vmatprep.subr.mxu0 %v958_v21  ;;  %7703 = vmatpush3.msra.mxu1 %v1266_v14  ;;  %326 = vst [vmem:[#allocation2 + $0x150] sm:$0x1] %v308_v22  ;;  %v338_v59 = vld [vmem:[#allocation2 + $0xcf] sm:$0x1]  ;;  %v9498_v62 = vld [vmem:[#allocation2 + $0xb0] sm:$0xff]  ;;  %v1261_v6 = vld [vmem:[#allocation6 + $0x1c8] sm:$0xff] }
  0x85   : > { %7627 = vmatpush3.msra.mxu0 %v958_v21  ;;  %7704 = vmatprep.subr.mxu1 %v1265_v40  ;;  %356 = vst [vmem:[#allocation2 + $0xd1] sm:$0x1] %v338_v59  ;;  %v953_v5 = vld [vmem:[#allocation6 + $0x138] sm:$0xff]  ;;  %358 = vst [vmem:[#allocation2 + $0x101] sm:$0x1] %v340_v2  ;;  %v9508_v9 = vld [vmem:[#allocation2 + $0xd8] sm:$0xff] }
  0x86   : > { %7502 = vmatmul.mubr.f32.gmra.mxu0 %v9344_v23  ;;  %7582 = vmatmul.mubr.f32.gmra.mxu1 %v9466_v33  ;;  %v956_v23 = vld [vmem:[#allocation6 + $0x150] sm:$0xff]  ;;  %v1260_v15 = vld [vmem:[#allocation6 + $0x1c0] sm:$0xff]  ;;  %v342_v21 = vld [vmem:[#allocation2 + $0x12f] sm:$0x1] }
  0x87   : > { %7504 = vmatprep.mubr.f32.mxu0 %v9349_v25  ;;  %7584 = vmatprep.mubr.f32.mxu1 %v9468_v37  ;;  %v334_v25 = vld [vmem:[#allocation2 + $0x6f] sm:$0x1]  ;;  %v952_v13 = vld [vmem:[#allocation6 + $0x130] sm:$0xff]  ;;  %360 = vst [vmem:[#allocation2 + $0x131] sm:$0x1] %v342_v21  ;;  %v9516_v14 = vld [vmem:[#allocation2 + $0xf0] sm:$0xff] }
  0x88   : > { %7628 = vmatprep.subr.mxu0 %v957_v16  ;;  %7705 = vmatpush3.msra.mxu1 %v1265_v40  ;;  %352 = vst [vmem:[#allocation2 + $0x71] sm:$0x1] %v334_v25  ;;  %v951_v27 = vld [vmem:[#allocation6 + $0x128] sm:$0xff]  ;;  %v345_v39 = vld [vmem:[#allocation2 + $0x177] sm:$0x1]  ;;  %v9527_v40 = vld [vmem:[%s9312_s30 + $0xf0] sm:$0xff] }
  0x89   : > { %7629 = vmatpush3.msra.mxu0 %v957_v16  ;;  %7706 = vmatprep.subr.mxu1 %v1264_v48  ;;  %v344_v36 = vld [vmem:[#allocation2 + $0x15f] sm:$0x1]  ;;  %v9524_v16 = vld [vmem:[#allocation2 + $0x108] sm:$0xff]  ;;  %363 = vst [vmem:[#allocation2 + $0x179] sm:$0x1] %v345_v39  ;;  %v1258_v22 = vld [vmem:[#allocation6 + $0x1b0] sm:$0xff] }
  0x8a   : > { %7505 = vmatmul.mubr.f32.gmra.mxu0 %v9352_v26  ;;  %7585 = vmatmul.mubr.f32.gmra.mxu1 %v9474_v43  ;;  %v1263_v26 = vld [vmem:[#allocation6 + $0x1d8] sm:$0xff]  ;;  %362 = vst [vmem:[#allocation2 + $0x161] sm:$0x1] %v344_v36  ;;  %281 = vst [vmem:[#allocation2 + $0x181] sm:$0xff] %v9527_v40  ;;  %v9540_v44 = vld [vmem:[#allocation2 + $0x120] sm:$0xff] }
  0x8b   : > { %7507 = vmatprep.mubr.f32.mxu0 %v9357_v28  ;;  %7587 = vmatprep.mubr.f32.mxu1 %v9476_v45  ;;  %v9490_v28 = vld [vmem:[#allocation2 + $0x98] sm:$0xff]  ;;  %v9530_v41 = vld [vmem:[%s9312_s30 + $0xf8] sm:$0xff]  ;;  %v948_v50 = vld [vmem:[#allocation6 + $0x110] sm:$0xff] }
  0x8c   : > { %7630 = vmatprep.subr.mxu0 %v956_v23  ;;  %7707 = vmatpush3.msra.mxu1 %v1264_v48  ;;  %282 = vst [vmem:[#allocation2 + $0x189] sm:$0xff] %v9530_v41  ;;  %v949_v46 = vld [vmem:[#allocation6 + $0x118] sm:$0xff]  ;;  %v1256_v25 = vld [vmem:[#allocation6 + $0x1a0] sm:$0xff]  ;;  %v947_v53 = vld [vmem:[#allocation6 + $0x108] sm:$0xff] }
  0x8d   : > { %7631 = vmatpush3.msra.mxu0 %v956_v23  ;;  %7708 = vmatprep.subr.mxu1 %v1263_v26  ;;  %v1257_v23 = vld [vmem:[#allocation6 + $0x1a8] sm:$0xff]  ;;  %v1254_v55 = vld [vmem:[#allocation6 + $0x190] sm:$0xff]  ;;  %v1875_v36 = vld [vmem:[#allocation6 + $0x2d8] sm:$0xff] }
  0x8e   : > { %7508 = vmatmul.mubr.f32.gmra.mxu0 %v9360_v29  ;;  %7588 = vmatmul.mubr.f32.gmra.mxu1 %v9482_v51  ;;  %v1262_v29 = vld [vmem:[#allocation6 + $0x1d0] sm:$0xff]  ;;  %v1253_v56 = vld [vmem:[#allocation6 + $0x188] sm:$0xff]  ;;  %v1565_v39 = vld [vmem:[#allocation6 + $0x238] sm:$0xff] }
  0x8f   : > { %7510 = vmatprep.mubr.f32.mxu0 %v9365_v31  ;;  %7590 = vmatprep.mubr.f32.mxu1 %v9484_v52  ;;  %v339_v31 = vld [vmem:[#allocation2 + $0xe7] sm:$0x1]  ;;  %v1571_v2 = vld [vmem:[#allocation6 + $0x268] sm:$0xff] }
  0x90   : > { %7632 = vmatprep.subr.mxu0 %v955_v54  ;;  %7709 = vmatpush3.msra.mxu1 %v1263_v26  ;;  %357 = vst [vmem:[#allocation2 + $0xe9] sm:$0x1] %v339_v31  ;;  %v946_v26 = vld [vmem:[#allocation6 + $0x100] sm:$0xff]  ;;  %v913_v59 = vld [vmem:[#allocation2 + $0x2] sm:$0xff]  ;;  %v1877_v21 = vld [vmem:[#allocation6 + $0x2e8] sm:$0xff] }
  0x91   : > { %7633 = vmatpush3.msra.mxu0 %v955_v54  ;;  %7710 = vmatprep.subr.mxu1 %v1262_v29  ;;  %v310_v48 = vld [vmem:[#allocation2 + $0x182] sm:$0x1]  ;;  %v1255_v54 = vld [vmem:[#allocation6 + $0x198] sm:$0xff] }
  0x92   : > { %7511 = vmatmul.mubr.f32.gmra.mxu0 %v9368_v32  ;;  %7591 = vmatmul.mubr.f32.gmra.mxu1 %v9490_v28  ;;  %v341_v32 = vld [vmem:[#allocation2 + $0x117] sm:$0x1]  ;;  %328 = vst [vmem:[#allocation2 + $0x180] sm:$0x1] %v310_v48  ;;  %v1572_v31 = vld [vmem:[#allocation6 + $0x270] sm:$0xff] }
  0x93   : > { %7513 = vmatprep.mubr.f32.mxu0 %v9373_v34  ;;  %7593 = vmatprep.mubr.f32.mxu1 %v9492_v58  ;;  %v9506_v34 = vld [vmem:[#allocation2 + $0xc8] sm:$0xff]  ;;  %359 = vst [vmem:[#allocation2 + $0x119] sm:$0x1] %v341_v32  ;;  %v1872_v48 = vld [vmem:[#allocation6 + $0x2c0] sm:$0xff] }
  0x94   : > { %7634 = vmatprep.subr.mxu0 %v954_v61  ;;  %7711 = vmatpush3.msra.mxu1 %v1262_v29  ;;  %v9575_v29 = vld [vmem:[#allocation2 + $0x1a] sm:$0xff]  ;;  %v9590_v32 = vld [vmem:[#allocation2 + $0x4a] sm:$0xff] }
  0x95   : > { %7635 = vmatpush3.msra.mxu0 %v954_v61  ;;  %7712 = vmatprep.subr.mxu1 %v1261_v6  ;;  %v1573_v61 = vld [vmem:[#allocation6 + $0x278] sm:$0xff] }
  0x96   : > { %7514 = vmatmul.mubr.f32.gmra.mxu0 %v9376_v35  ;;  %7594 = vmatmul.mubr.f32.gmra.mxu1 %v9498_v62  ;;  %v9514_v35 = vld [vmem:[#allocation2 + $0xe0] sm:$0xff] }
  0x97   : > { %7516 = vmatprep.mubr.f32.mxu0 %v9381_v38  ;;  %7596 = vmatprep.mubr.f32.mxu1 %v9500_v0  ;;  %v343_v38 = vld [vmem:[#allocation2 + $0x147] sm:$0x1] }
  0x98   : > { %7636 = vmatprep.subr.mxu0 %v953_v5  ;;  %7713 = vmatpush3.msra.mxu1 %v1261_v6  ;;  %361 = vst [vmem:[#allocation2 + $0x149] sm:$0x1] %v343_v38  ;;  %v1879_v6 = vld [vmem:[#allocation6 + $0x2f8] sm:$0xff]  ;;  %v1567_v38 = vld [vmem:[#allocation6 + $0x248] sm:$0xff] }
  0x99   : > { %7637 = vmatpush3.msra.mxu0 %v953_v5  ;;  %7714 = vmatprep.subr.mxu1 %v1260_v15  ;;  %v9581_v5 = vld [vmem:[#allocation2 + $0x32] sm:$0xff] }
  0x9a   : > { %7517 = vmatmul.mubr.f32.gmra.mxu0 %v9385_v42  ;;  %7597 = vmatmul.mubr.f32.gmra.mxu1 %v9506_v34  ;;  %v1259_v42 = vld [vmem:[#allocation6 + $0x1b8] sm:$0xff] }
  0x9b   : > { %7519 = vmatprep.mubr.f32.mxu0 %v9389_v47  ;;  %7599 = vmatprep.mubr.f32.mxu1 %v9508_v9  ;;  %v9522_v47 = vld [vmem:[#allocation2 + $0xf8] sm:$0xff] }
  0x9c   : > { %7638 = vmatprep.subr.mxu0 %v952_v13  ;;  %7715 = vmatpush3.msra.mxu1 %v1260_v15  ;;  %v1568_v15 = vld [vmem:[#allocation6 + $0x250] sm:$0xff] }
  0x9d   : > { %7639 = vmatpush3.msra.mxu0 %v952_v13  ;;  %7716 = vmatprep.subr.mxu1 %v1259_v42  ;;  %v1878_v13 = vld [vmem:[#allocation6 + $0x2f0] sm:$0xff] }
  0x9e   : > { %7520 = vmatmul.mubr.f32.gmra.mxu0 %v9393_v49  ;;  %7600 = vmatmul.mubr.f32.gmra.mxu1 %v9514_v35  ;;  %v950_v49 = vld [vmem:[#allocation6 + $0x120] sm:$0xff] }
  0x9f   : > { %7522 = vmatprep.mubr.f32.mxu0 %v9397_v57  ;;  %7602 = vmatprep.mubr.f32.mxu1 %v9516_v14  ;;  %v9538_v57 = vld [vmem:[#allocation2 + $0x110] sm:$0xff] }
  0xa0   : > { %7640 = vmatprep.subr.mxu0 %v951_v27  ;;  %7717 = vmatpush3.msra.mxu1 %v1259_v42  ;;  %v1566_v42 = vld [vmem:[#allocation6 + $0x240] sm:$0xff] }
  0xa1   : > { %7641 = vmatpush3.msra.mxu0 %v951_v27  ;;  %7718 = vmatprep.subr.mxu1 %v1258_v22  ;;  %v1876_v27 = vld [vmem:[#allocation6 + $0x2e0] sm:$0xff] }
  0xa2   : > { %7523 = vmatmul.mubr.f32.gmra.mxu0 %v9401_v60  ;;  %7603 = vmatmul.mubr.f32.gmra.mxu1 %v9522_v47  ;;  %v9546_v60 = vld [vmem:[#allocation2 + $0x128] sm:$0xff] }
  0xa3   : > { %7525 = vmatprep.mubr.f32.mxu0 %v9405_v63  ;;  %7605 = vmatprep.mubr.f32.mxu1 %v9524_v16  ;;  %v9548_v63 = vld [vmem:[#allocation2 + $0x138] sm:$0xff] }
  0xa4   : > { %7642 = vmatprep.subr.mxu0 %v950_v49  ;;  %7719 = vmatpush3.msra.mxu1 %v1258_v22  ;;  %v1564_v22 = vld [vmem:[#allocation6 + $0x230] sm:$0xff] }
  0xa5   : > { %7643 = vmatpush3.msra.mxu0 %v950_v49  ;;  %7720 = vmatprep.subr.mxu1 %v1257_v23  ;;  %v1874_v49 = vld [vmem:[#allocation6 + $0x2d0] sm:$0xff] }
  0xa6   : > { %7526 = vmatmul.mubr.f32.gmra.mxu0 %v9409_v1  ;;  %7606 = vmatmul.mubr.f32.gmra.mxu1 %v9538_v57  ;;  %v9554_v1 = vld [vmem:[#allocation2 + $0x140] sm:$0xff] }
  0xa7   : > { %7528 = vmatprep.mubr.f32.mxu0 %v9416_v4  ;;  %7608 = vmatprep.mubr.f32.mxu1 %v9540_v44  ;;  %v9556_v4 = vld [vmem:[#allocation2 + $0x150] sm:$0xff] }
  0xa8   : > { %7644 = vmatprep.subr.mxu0 %v949_v46  ;;  %7721 = vmatpush3.msra.mxu1 %v1257_v23  ;;  %v1563_v23 = vld [vmem:[#allocation6 + $0x228] sm:$0xff] }
  0xa9   : > { %7645 = vmatpush3.msra.mxu0 %v949_v46  ;;  %7722 = vmatprep.subr.mxu1 %v1256_v25  ;;  %v1873_v46 = vld [vmem:[#allocation6 + $0x2c8] sm:$0xff] }
  0xaa   : > { %7529 = vmatmul.mubr.f32.gmra.mxu0 %v9421_v7  ;;  %7609 = vmatmul.mubr.f32.gmra.mxu1 %v9546_v60  ;;  %v9562_v7 = vld [vmem:[#allocation2 + $0x158] sm:$0xff] }
  0xab   : > { %7531 = vmatprep.mubr.f32.mxu0 %v9429_v10  ;;  %7611 = vmatprep.mubr.f32.mxu1 %v9548_v63  ;;  %v9564_v10 = vld [vmem:[#allocation2 + $0x168] sm:$0xff] }
  0xac   : > { %7646 = vmatprep.subr.mxu0 %v948_v50  ;;  %7723 = vmatpush3.msra.mxu1 %v1256_v25  ;;  %v1871_v25 = vld [vmem:[#allocation6 + $0x2b8] sm:$0xff] }
  0xad   : > { %7647 = vmatpush3.msra.mxu0 %v948_v50  ;;  %7724 = vmatprep.subr.mxu1 %v1255_v54  ;;  %v1562_v50 = vld [vmem:[#allocation6 + $0x220] sm:$0xff] }
  0xae   : > { %7532 = vmatmul.mubr.f32.gmra.mxu0 %v9432_v11  ;;  %7612 = vmatmul.mubr.f32.gmra.mxu1 %v9554_v1  ;;  %v346_v11 = vld [vmem:[#allocation2 + $0x18f] sm:$0x1] }
  0xaf   : > { %7534 = vmatprep.mubr.f32.mxu0 %v9441_v17  ;;  %7614 = vmatprep.mubr.f32.mxu1 %v9556_v4  ;;  %v9570_v17 = vld [vmem:[#allocation2 + $0x170] sm:$0xff]  ;;  %364 = vst [vmem:[#allocation2 + $0x191] sm:$0x1] %v346_v11 }
  0xb0   : > { %7648 = vmatprep.subr.mxu0 %v947_v53  ;;  %7725 = vmatpush3.msra.mxu1 %v1255_v54  ;;  %v1870_v54 = vld [vmem:[#allocation6 + $0x2b0] sm:$0xff]  ;;  %v9670_v11 = vld [vmem:[#allocation2 + $0x12a] sm:$0xff] }
  0xb1   : > { %7649 = vmatpush3.msra.mxu0 %v947_v53  ;;  %7726 = vmatprep.subr.mxu1 %v1254_v55  ;;  %v1561_v53 = vld [vmem:[#allocation6 + $0x218] sm:$0xff] }
  0xb2   : > { %7535 = vmatmul.mubr.f32.gmra.mxu0 %v9448_v19  ;;  %7615 = vmatmul.mubr.f32.gmra.mxu1 %v9562_v7  ;;  %v1252_v19 = vld [vmem:[#allocation6 + $0x180] sm:$0xff] }
  0xb3   : > { %7537 = vmatprep.mubr.f32.mxu0 %v9455_v24  ;;  %7617 = vmatprep.mubr.f32.mxu1 %v9564_v10  ;;  %v914_v24 = vld [vmem:[#allocation2 + $0xa] sm:$0xff] }
  0xb4   : > { %7650 = vmatprep.subr.mxu0 %v946_v26  ;;  %7727 = vmatpush3.msra.mxu1 %v1254_v55  ;;  %v1560_v55 = vld [vmem:[#allocation6 + $0x210] sm:$0xff] }
  0xb5   : > { %7651 = vmatpush3.msra.mxu0 %v946_v26  ;;  %7728 = vmatprep.subr.mxu1 %v1253_v56  ;;  %v9664_v26 = vld [vmem:[#allocation2 + $0x169] sm:$0xff] }
  0xb6   : > { %7538 = vmatmul.mubr.f32.gmra.mxu0 %v9459_v30  ;;  %7618 = vmatmul.mubr.f32.gmra.mxu1 %v9570_v17  ;;  %v9578_v30 = vld [vmem:[#allocation2 + $0x22] sm:$0xff]  ;;  %292 = vst [vmem:[#allocation2 + $0x199] sm:$0xff] %v9664_v26 }
  0xb7   : > { %7652 = vmatprep.mubr.f32.mxu0 %v913_v59  ;;  %7729 = vmatpush3.msra.mxu1 %v1253_v56  ;;  %v1559_v56 = vld [vmem:[#allocation6 + $0x208] sm:$0xff]  ;;  %v1868_v59 = vld [vmem:[#allocation6 + $0x2a0] sm:$0xff] }
  0xb8   : > { %7780 = vmatprep.subr.mxu0 %v1573_v61  ;;  %7730 = vmatprep.subr.mxu1 %v1252_v19 }
  0xb9   : > { %7732 = vmatprep.mubr.f32.mxu1 %v9413_v3  ;;  %7731 = vmatpush3.msra.mxu1 %v1252_v19  ;;  %v1570_v3 = vld [vmem:[#allocation6 + $0x260] sm:$0xff] }
  0xba   : > { %7653 = vmatmul.mubr.f32.vlgmr.msra.gmra.mxu0 %v914_v24  ;;  %7733 = vmatmul.mubr.f32.vlgmr.msra.gmra.mxu1 %v9424_v8  ;;  %v9587_v8 = vld [vmem:[#allocation2 + $0x3a] sm:$0xff]  ;;  %v9683_v19 = vld [vmem:[#allocation2 + $0x171] sm:$0xff]  ;;  %v1867_v24 = vld [vmem:[#allocation6 + $0x298] sm:$0xff] }
  0xbb   : > { %7781 = vmatpush3.msra.mxu0 %v1573_v61  ;;  %7655 = vmatprep.mubr.f32.mxu0 %v9575_v29  ;;  %293 = vst [vmem:[#allocation2 + $0x1a1] sm:$0xff] %v9683_v19 }
  0xbc   : > { %7782 = vmatprep.subr.mxu0 %v1572_v31  ;;  %7735 = vmatprep.mubr.f32.mxu1 %v9434_v12  ;;  %v1569_v12 = vld [vmem:[#allocation6 + $0x258] sm:$0xff] }
  0xbd   : > { %7783 = vmatpush3.msra.mxu0 %v1572_v31  ;;  %7860 = vmatprep.subr.mxu1 %v1879_v6  ;;  %v311_v61 = vld [vmem:[#allocation2 + $0x19a] sm:$0x1]  ;;  %v9692_v31 = vld [vmem:[#allocation2 + $0x16a] sm:$0xff] }
  0xbe   : > { %7656 = vmatmul.mubr.f32.gmra.mxu0 %v9578_v30  ;;  %7784 = vmatprep.subr.mxu0 %v1571_v2  ;;  %329 = vst [vmem:[#allocation2 + $0x198] sm:$0x1] %v311_v61  ;;  %v8976_v61 = vld [vmem:[#allocation2 + $0xf1] sm:$0xff] }
  0xbf   : > { %7736 = vmatmul.mubr.f32.gmra.mxu1 %v9444_v18  ;;  %7658 = vmatprep.mubr.f32.mxu0 %v9581_v5  ;;  %v9595_v18 = vld [vmem:[#allocation2 + $0x52] sm:$0xff] }
  0xc0   : > { %7738 = vmatprep.mubr.f32.mxu1 %v9451_v20  ;;  %7785 = vmatpush3.msra.mxu0 %v1571_v2  ;;  %v9598_v20 = vld [vmem:[#allocation2 + $0x62] sm:$0xff] }
  0xc1   : > { %7786 = vmatprep.subr.mxu0 %v1570_v3  ;;  %7861 = vmatpush3.msra.mxu1 %v1879_v6  ;;  %v1866_v2 = vld [vmem:[#allocation6 + $0x290] sm:$0xff]  ;;  %v1865_v6 = vld [vmem:[#allocation6 + $0x288] sm:$0xff] }
  0xc2   : > { %7659 = vmatmul.mubr.f32.gmra.mxu0 %v9587_v8  ;;  %7862 = vmatprep.subr.mxu1 %v1878_v13 }
  0xc3   : > { %7739 = vmatmul.mubr.f32.gmra.mxu1 %v9466_v33  ;;  %7661 = vmatprep.mubr.f32.mxu0 %v9590_v32  ;;  %v9603_v33 = vld [vmem:[#allocation2 + $0x6a] sm:$0xff] }
  0xc4   : > { %7741 = vmatprep.mubr.f32.mxu1 %v9468_v37  ;;  %7787 = vmatpush3.msra.mxu0 %v1570_v3  ;;  %v9606_v37 = vld [vmem:[#allocation2 + $0x7a] sm:$0xff] }
  0xc5   : > { %7788 = vmatprep.subr.mxu0 %v1569_v12  ;;  %7863 = vmatpush3.msra.mxu1 %v1878_v13  ;;  %v9694_v3 = vld [vmem:[#allocation2 + $0x180] sm:$0xff]  ;;  %v2185_v13 = vld [vmem:[#allocation6 + $0x378] sm:$0xff] }
  0xc6   : > { %7662 = vmatmul.mubr.f32.gmra.mxu0 %v9595_v18  ;;  %7864 = vmatprep.subr.mxu1 %v1877_v21 }
  0xc7   : > { %7742 = vmatmul.mubr.f32.gmra.mxu1 %v9474_v43  ;;  %7664 = vmatprep.mubr.f32.mxu0 %v9598_v20  ;;  %v9611_v43 = vld [vmem:[#allocation2 + $0x82] sm:$0xff] }
  0xc8   : > { %7744 = vmatprep.mubr.f32.mxu1 %v9476_v45  ;;  %7789 = vmatpush3.msra.mxu0 %v1569_v12  ;;  %v9614_v45 = vld [vmem:[#allocation2 + $0x92] sm:$0xff] }
  0xc9   : > { %7790 = vmatprep.subr.mxu0 %v1568_v15  ;;  %7865 = vmatpush3.msra.mxu1 %v1877_v21  ;;  %v1525_v12 = vld [vmem:[#allocation2 + $0x19] sm:$0xff]  ;;  %v9707_v21 = vld [vmem:[#allocation2 + $0x31] sm:$0xff] }
  0xca   : > { %7665 = vmatmul.mubr.f32.gmra.mxu0 %v9603_v33  ;;  %7866 = vmatprep.subr.mxu1 %v1876_v27 }
  0xcb   : > { %7745 = vmatmul.mubr.f32.gmra.mxu1 %v9482_v51  ;;  %7667 = vmatprep.mubr.f32.mxu0 %v9606_v37  ;;  %v9619_v51 = vld [vmem:[#allocation2 + $0x9a] sm:$0xff] }
  0xcc   : > { %7747 = vmatprep.mubr.f32.mxu1 %v9484_v52  ;;  %7791 = vmatpush3.msra.mxu0 %v1568_v15  ;;  %v9622_v52 = vld [vmem:[#allocation2 + $0xaa] sm:$0xff] }
  0xcd   : > { %7792 = vmatprep.subr.mxu0 %v1567_v38  ;;  %7867 = vmatpush3.msra.mxu1 %v1876_v27  ;;  %v1864_v15 = vld [vmem:[#allocation6 + $0x280] sm:$0xff]  ;;  %v9710_v27 = vld [vmem:[#allocation2 + $0x39] sm:$0xff] }
  0xce   : > { %7668 = vmatmul.mubr.f32.gmra.mxu0 %v9611_v43  ;;  %7868 = vmatprep.subr.mxu1 %v1875_v36 }
  0xcf   : > { %7748 = vmatmul.mubr.f32.gmra.mxu1 %v9490_v28  ;;  %7670 = vmatprep.mubr.f32.mxu0 %v9614_v45  ;;  %v9627_v28 = vld [vmem:[#allocation2 + $0xb2] sm:$0xff] }
  0xd0   : > { %7750 = vmatprep.mubr.f32.mxu1 %v9492_v58  ;;  %7793 = vmatpush3.msra.mxu0 %v1567_v38  ;;  %v9630_v58 = vld [vmem:[#allocation2 + $0xc2] sm:$0xff] }
  0xd1   : > { %7794 = vmatprep.subr.mxu0 %v1566_v42  ;;  %7869 = vmatpush3.msra.mxu1 %v1875_v36  ;;  %v2184_v38 = vld [vmem:[#allocation6 + $0x370] sm:$0xff]  ;;  %v9713_v36 = vld [vmem:[#allocation2 + $0x49] sm:$0xff] }
  0xd2   : > { %7671 = vmatmul.mubr.f32.gmra.mxu0 %v9619_v51  ;;  %7870 = vmatprep.subr.mxu1 %v1874_v49 }
  0xd3   : > { %7751 = vmatmul.mubr.f32.gmra.mxu1 %v9498_v62  ;;  %7673 = vmatprep.mubr.f32.mxu0 %v9622_v52  ;;  %v9635_v62 = vld [vmem:[#allocation2 + $0xca] sm:$0xff] }
  0xd4   : > { %7753 = vmatprep.mubr.f32.mxu1 %v9500_v0  ;;  %7795 = vmatpush3.msra.mxu0 %v1566_v42  ;;  %v9638_v0 = vld [vmem:[#allocation2 + $0xda] sm:$0xff] }
  0xd5   : > { %7796 = vmatprep.subr.mxu0 %v1565_v39  ;;  %7871 = vmatpush3.msra.mxu1 %v1874_v49  ;;  %v2183_v42 = vld [vmem:[#allocation6 + $0x368] sm:$0xff]  ;;  %v9722_v49 = vld [vmem:[#allocation2 + $0x61] sm:$0xff] }
  0xd6   : > { %7674 = vmatmul.mubr.f32.gmra.mxu0 %v9627_v28  ;;  %7872 = vmatprep.subr.mxu1 %v1873_v46 }
  0xd7   : > { %7754 = vmatmul.mubr.f32.gmra.mxu1 %v9506_v34  ;;  %7676 = vmatprep.mubr.f32.mxu0 %v9630_v58  ;;  %v9643_v34 = vld [vmem:[#allocation2 + $0xe2] sm:$0xff] }
  0xd8   : > { %7756 = vmatprep.mubr.f32.mxu1 %v9508_v9  ;;  %7797 = vmatpush3.msra.mxu0 %v1565_v39  ;;  %v9646_v9 = vld [vmem:[#allocation2 + $0xf2] sm:$0xff]  ;;  %v2491_v39 = vld [vmem:[#allocation6 + $0x3f8] sm:$0xff] }
  0xd9   : > { %7798 = vmatprep.subr.mxu0 %v1564_v22  ;;  %7873 = vmatpush3.msra.mxu1 %v1873_v46  ;;  %v2180_v46 = vld [vmem:[#allocation6 + $0x350] sm:$0xff] }
  0xda   : > { %7677 = vmatmul.mubr.f32.gmra.mxu0 %v9635_v62  ;;  %7874 = vmatprep.subr.mxu1 %v1872_v48 }
  0xdb   : > { %7757 = vmatmul.mubr.f32.gmra.mxu1 %v9514_v35  ;;  %7679 = vmatprep.mubr.f32.mxu0 %v9638_v0  ;;  %v9651_v35 = vld [vmem:[#allocation2 + $0xfa] sm:$0xff] }
  0xdc   : > { %7759 = vmatprep.mubr.f32.mxu1 %v9516_v14  ;;  %7799 = vmatpush3.msra.mxu0 %v1564_v22  ;;  %v9654_v14 = vld [vmem:[#allocation2 + $0x10a] sm:$0xff]  ;;  %v2490_v22 = vld [vmem:[#allocation6 + $0x3f0] sm:$0xff] }
  0xdd   : > { %7800 = vmatprep.subr.mxu0 %v1563_v23  ;;  %7875 = vmatpush3.msra.mxu1 %v1872_v48  ;;  %v2179_v48 = vld [vmem:[#allocation6 + $0x348] sm:$0xff] }
  0xde   : > { %7680 = vmatmul.mubr.f32.gmra.mxu0 %v9643_v34  ;;  %7876 = vmatprep.subr.mxu1 %v1871_v25 }
  0xdf   : > { %7760 = vmatmul.mubr.f32.gmra.mxu1 %v9522_v47  ;;  %7682 = vmatprep.mubr.f32.mxu0 %v9646_v9  ;;  %v9659_v47 = vld [vmem:[#allocation2 + $0x112] sm:$0xff] }
  0xe0   : > { %7762 = vmatprep.mubr.f32.mxu1 %v9524_v16  ;;  %7801 = vmatpush3.msra.mxu0 %v1563_v23  ;;  %v9662_v16 = vld [vmem:[#allocation2 + $0x122] sm:$0xff]  ;;  %v2489_v23 = vld [vmem:[#allocation6 + $0x3e8] sm:$0xff] }
  0xe1   : > { %7802 = vmatprep.subr.mxu0 %v1562_v50  ;;  %7877 = vmatpush3.msra.mxu1 %v1871_v25  ;;  %v2178_v25 = vld [vmem:[#allocation6 + $0x340] sm:$0xff] }
  0xe2   : > { %7683 = vmatmul.mubr.f32.gmra.mxu0 %v9651_v35  ;;  %7878 = vmatprep.subr.mxu1 %v1870_v54 }
  0xe3   : > { %7763 = vmatmul.mubr.f32.gmra.mxu1 %v9538_v57  ;;  %7685 = vmatprep.mubr.f32.mxu0 %v9654_v14  ;;  %v1869_v57 = vld [vmem:[#allocation6 + $0x2a8] sm:$0xff] }
  0xe4   : > { %7765 = vmatprep.mubr.f32.mxu1 %v9540_v44  ;;  %7803 = vmatpush3.msra.mxu0 %v1562_v50  ;;  %v9673_v44 = vld [vmem:[#allocation2 + $0x13a] sm:$0xff]  ;;  %v2488_v50 = vld [vmem:[#allocation6 + $0x3e0] sm:$0xff] }
  0xe5   : > { %7804 = vmatprep.subr.mxu0 %v1561_v53  ;;  %7879 = vmatpush3.msra.mxu1 %v1870_v54  ;;  %v2177_v54 = vld [vmem:[#allocation6 + $0x338] sm:$0xff] }
  0xe6   : > { %7686 = vmatmul.mubr.f32.gmra.mxu0 %v9659_v47  ;;  %7880 = vmatprep.subr.mxu1 %v1869_v57 }
  0xe7   : > { %7766 = vmatmul.mubr.f32.gmra.mxu1 %v9546_v60  ;;  %7688 = vmatprep.mubr.f32.mxu0 %v9662_v16  ;;  %v9678_v60 = vld [vmem:[#allocation2 + $0x142] sm:$0xff] }
  0xe8   : > { %7768 = vmatprep.mubr.f32.mxu1 %v9548_v63  ;;  %7805 = vmatpush3.msra.mxu0 %v1561_v53  ;;  %v9681_v63 = vld [vmem:[#allocation2 + $0x152] sm:$0xff]  ;;  %v2487_v53 = vld [vmem:[#allocation6 + $0x3d8] sm:$0xff] }
  0xe9   : > { %7806 = vmatprep.subr.mxu0 %v1560_v55  ;;  %7881 = vmatpush3.msra.mxu1 %v1869_v57  ;;  %v2176_v57 = vld [vmem:[#allocation6 + $0x330] sm:$0xff] }
  0xea   : > { %7689 = vmatmul.mubr.f32.gmra.mxu0 %v9670_v11  ;;  %7882 = vmatprep.subr.mxu1 %v1868_v59 }
  0xeb   : > { %7769 = vmatmul.mubr.f32.gmra.mxu1 %v9554_v1  ;;  %7691 = vmatprep.mubr.f32.mxu0 %v9673_v44  ;;  %v1558_v1 = vld [vmem:[#allocation6 + $0x200] sm:$0xff] }
  0xec   : > { %7771 = vmatprep.mubr.f32.mxu1 %v9556_v4  ;;  %7807 = vmatpush3.msra.mxu0 %v1560_v55  ;;  %v9689_v4 = vld [vmem:[#allocation2 + $0x15a] sm:$0xff] }
  0xed   : > { %7808 = vmatprep.subr.mxu0 %v1559_v56  ;;  %7883 = vmatpush3.msra.mxu1 %v1868_v59  ;;  %v2486_v55 = vld [vmem:[#allocation6 + $0x3d0] sm:$0xff]  ;;  %v2484_v59 = vld [vmem:[#allocation6 + $0x3c0] sm:$0xff] }
  0xee   : > { %7692 = vmatmul.mubr.f32.gmra.mxu0 %v9678_v60  ;;  %7884 = vmatprep.subr.mxu1 %v1867_v24 }
  0xef   : > { %7772 = vmatmul.mubr.f32.gmra.mxu1 %v9562_v7  ;;  %7694 = vmatprep.mubr.f32.mxu0 %v9681_v63  ;;  %v9699_v7 = vld [vmem:[#allocation2 + $0x172] sm:$0xff] }
  0xf0   : > { %7774 = vmatprep.mubr.f32.mxu1 %v9564_v10  ;;  %7809 = vmatpush3.msra.mxu0 %v1559_v56  ;;  %v9702_v10 = vld [vmem:[#allocation2 + $0x188] sm:$0xff]  ;;  %v2485_v56 = vld [vmem:[#allocation6 + $0x3c8] sm:$0xff] }
  0xf1   : > { %7810 = vmatprep.subr.mxu0 %v1558_v1  ;;  %7885 = vmatpush3.msra.mxu1 %v1867_v24  ;;  %v2483_v24 = vld [vmem:[#allocation6 + $0x3b8] sm:$0xff] }
  0xf2   : > { %7695 = vmatmul.mubr.f32.gmra.mxu0 %v9689_v4  ;;  %7886 = vmatprep.subr.mxu1 %v1866_v2 }
  0xf3   : > { %7775 = vmatmul.mubr.f32.gmra.mxu1 %v9570_v17  ;;  %7697 = vmatprep.mubr.f32.mxu0 %v9692_v31  ;;  %v1526_v17 = vld [vmem:[#allocation2 + $0x21] sm:$0xff] }
  0xf4   : > { %7777 = vmatprep.mubr.f32.mxu1 %v9694_v3  ;;  %7811 = vmatpush3.msra.mxu0 %v1558_v1  ;;  %v8978_v1 = vld [vmem:[#allocation2 + $0x109] sm:$0xff] }
  0xf5   : > { %7887 = vmatpush3.msra.mxu1 %v1866_v2  ;;  %7940 = vmatprep.subr.mxu0 %v2185_v13  ;;  %v2482_v2 = vld [vmem:[#allocation6 + $0x3b0] sm:$0xff] }
  0xf6   : > { %7698 = vmatmul.mubr.f32.gmra.mxu0 %v9699_v7  ;;  %7888 = vmatprep.subr.mxu1 %v1865_v6 }
  0xf7   : > { %7778 = vmatmul.mubr.f32.gmra.mxu1 %v9702_v10  ;;  %7812 = vmatprep.mubr.f32.mxu0 %v1525_v12  ;;  %v2481_v12 = vld [vmem:[#allocation6 + $0x3a8] sm:$0xff] }
  0xf8   : > { %7889 = vmatpush3.msra.mxu1 %v1865_v6  ;;  %7892 = vmatprep.mubr.f32.mxu1 %v9575_v29  ;;  %v2182_v29 = vld [vmem:[#allocation6 + $0x360] sm:$0xff]  ;;  %v8980_v6 = vld [vmem:[#allocation2 + $0x121] sm:$0xff] }
  0xf9   : > { %7890 = vmatprep.subr.mxu1 %v1864_v15 }
  0xfa   : > { %7813 = vmatmul.mubr.f32.vlgmr.msra.gmra.mxu0 %v1526_v17  ;;  %7891 = vmatpush3.msra.mxu1 %v1864_v15  ;;  %v2480_v15 = vld [vmem:[#allocation6 + $0x3a0] sm:$0xff] }
  0xfb   : > { %7941 = vmatpush3.msra.mxu0 %v2185_v13  ;;  %7893 = vmatmul.mubr.f32.vlgmr.msra.gmra.mxu1 %v9578_v30  ;;  %v9719_v30 = vld [vmem:[#allocation2 + $0x51] sm:$0xff]  ;;  %v8982_v13 = vld [vmem:[#allocation2 + $0x139] sm:$0xff] }
  0xfc   : > { %7815 = vmatprep.mubr.f32.mxu0 %v9707_v21  ;;  %7942 = vmatprep.subr.mxu0 %v2184_v38  ;;  %v8984_v17 = vld [vmem:[#allocation2 + $0x151] sm:$0xff] }
  0xfd   : > { %7895 = vmatprep.mubr.f32.mxu1 %v9581_v5  ;;  %7943 = vmatpush3.msra.mxu0 %v2184_v38  ;;  %v2181_v5 = vld [vmem:[#allocation6 + $0x358] sm:$0xff]  ;;  %v8985_v38 = vld [vmem:[#allocation2 + $0x159] sm:$0xff] }
  0xfe   : > { %7816 = vmatmul.mubr.f32.gmra.mxu0 %v9710_v27  ;;  %7944 = vmatprep.subr.mxu0 %v2183_v42 }
  0xff   : > { %7896 = vmatmul.mubr.f32.gmra.mxu1 %v9587_v8  ;;  %7818 = vmatprep.mubr.f32.mxu0 %v9713_v36  ;;  %v9727_v8 = vld [vmem:[#allocation2 + $0x69] sm:$0xff] }
 0x100   : > { %7898 = vmatprep.mubr.f32.mxu1 %v9590_v32  ;;  %7945 = vmatpush3.msra.mxu0 %v2183_v42  ;;  %v9730_v32 = vld [vmem:[#allocation2 + $0x79] sm:$0xff]  ;;  %v2170_v42 = vld [vmem:[#allocation6 + $0x300] sm:$0xff] }
 0x101   : > { %7946 = vmatprep.subr.mxu0 %v2182_v29  ;;  %8020 = vmatprep.subr.mxu1 %v2491_v39 }
 0x102   : > { %7819 = vmatmul.mubr.f32.gmra.mxu0 %v9719_v30  ;;  %8021 = vmatpush3.msra.mxu1 %v2491_v39  ;;  %v8987_v39 = vld [vmem:[#allocation2 + $0x171] sm:$0xff] }
 0x103   : > { %7899 = vmatmul.mubr.f32.gmra.mxu1 %v9595_v18  ;;  %7821 = vmatprep.mubr.f32.mxu0 %v9722_v49  ;;  %v9735_v18 = vld [vmem:[#allocation2 + $0x81] sm:$0xff] }
 0x104   : > { %7901 = vmatprep.mubr.f32.mxu1 %v9598_v20  ;;  %7947 = vmatpush3.msra.mxu0 %v2182_v29  ;;  %v9738_v20 = vld [vmem:[#allocation2 + $0x91] sm:$0xff]  ;;  %v8986_v29 = vld [vmem:[#allocation2 + $0x169] sm:$0xff] }
 0x105   : > { %7948 = vmatprep.subr.mxu0 %v2181_v5  ;;  %8022 = vmatprep.subr.mxu1 %v2490_v22 }
 0x106   : > { %7822 = vmatmul.mubr.f32.gmra.mxu0 %v9727_v8  ;;  %8023 = vmatpush3.msra.mxu1 %v2490_v22  ;;  %v2797_v22 = vld [vmem:[#allocation6 + $0x478] sm:$0xff] }
 0x107   : > { %7902 = vmatmul.mubr.f32.gmra.mxu1 %v9603_v33  ;;  %7824 = vmatprep.mubr.f32.mxu0 %v9730_v32  ;;  %v9743_v33 = vld [vmem:[#allocation2 + $0x99] sm:$0xff] }
 0x108   : > { %7904 = vmatprep.mubr.f32.mxu1 %v9606_v37  ;;  %7949 = vmatpush3.msra.mxu0 %v2181_v5  ;;  %v9746_v37 = vld [vmem:[#allocation2 + $0xa9] sm:$0xff]  ;;  %v2477_v5 = vld [vmem:[#allocation6 + $0x388] sm:$0xff] }
 0x109   : > { %7950 = vmatprep.subr.mxu0 %v2180_v46  ;;  %8024 = vmatprep.subr.mxu1 %v2489_v23 }
 0x10a   : > { %7825 = vmatmul.mubr.f32.gmra.mxu0 %v9735_v18  ;;  %8025 = vmatpush3.msra.mxu1 %v2489_v23  ;;  %v2796_v23 = vld [vmem:[#allocation6 + $0x470] sm:$0xff] }
 0x10b   : > { %7905 = vmatmul.mubr.f32.gmra.mxu1 %v9611_v43  ;;  %7827 = vmatprep.mubr.f32.mxu0 %v9738_v20  ;;  %v9751_v43 = vld [vmem:[#allocation2 + $0xb1] sm:$0xff] }
 0x10c   : > { %7907 = vmatprep.mubr.f32.mxu1 %v9614_v45  ;;  %7951 = vmatpush3.msra.mxu0 %v2180_v46  ;;  %v9754_v45 = vld [vmem:[#allocation2 + $0xc1] sm:$0xff]  ;;  %v2476_v46 = vld [vmem:[#allocation6 + $0x380] sm:$0xff] }
 0x10d   : > { %7952 = vmatprep.subr.mxu0 %v2179_v48  ;;  %8026 = vmatprep.subr.mxu1 %v2488_v50 }
 0x10e   : > { %7828 = vmatmul.mubr.f32.gmra.mxu0 %v9743_v33  ;;  %8027 = vmatpush3.msra.mxu1 %v2488_v50 }
 0x10f   : > { %7908 = vmatmul.mubr.f32.gmra.mxu1 %v9619_v51  ;;  %7830 = vmatprep.mubr.f32.mxu0 %v9746_v37  ;;  %v9759_v51 = vld [vmem:[#allocation2 + $0xc9] sm:$0xff] }
 0x110   : > { %7910 = vmatprep.mubr.f32.mxu1 %v9622_v52  ;;  %7953 = vmatpush3.msra.mxu0 %v2179_v48  ;;  %v9762_v52 = vld [vmem:[#allocation2 + $0xd9] sm:$0xff] }
 0x111   : > { %7954 = vmatprep.subr.mxu0 %v2178_v25  ;;  %8028 = vmatprep.subr.mxu1 %v2487_v53 }
 0x112   : > { %7831 = vmatmul.mubr.f32.gmra.mxu0 %v9751_v43  ;;  %8029 = vmatpush3.msra.mxu1 %v2487_v53  ;;  %v2795_v53 = vld [vmem:[#allocation6 + $0x468] sm:$0xff] }
 0x113   : > { %7911 = vmatmul.mubr.f32.gmra.mxu1 %v9627_v28  ;;  %7833 = vmatprep.mubr.f32.mxu0 %v9754_v45  ;;  %v8975_v28 = vld [vmem:[#allocation2 + $0xe1] sm:$0xff] }
 0x114   : > { %7913 = vmatprep.mubr.f32.mxu1 %v9630_v58  ;;  %7955 = vmatpush3.msra.mxu0 %v2178_v25  ;;  %v2175_v58 = vld [vmem:[#allocation6 + $0x328] sm:$0xff] }
 0x115   : > { %7956 = vmatprep.subr.mxu0 %v2177_v54  ;;  %8030 = vmatprep.subr.mxu1 %v2486_v55 }
 0x116   : > { %7834 = vmatmul.mubr.f32.gmra.mxu0 %v9759_v51  ;;  %8031 = vmatpush3.msra.mxu1 %v2486_v55 }
 0x117   : > { %7914 = vmatmul.mubr.f32.gmra.mxu1 %v9635_v62  ;;  %7836 = vmatprep.mubr.f32.mxu0 %v9762_v52  ;;  %v8977_v62 = vld [vmem:[#allocation2 + $0xf9] sm:$0xff] }
 0x118   : > { %7916 = vmatprep.mubr.f32.mxu1 %v9638_v0  ;;  %7957 = vmatpush3.msra.mxu0 %v2177_v54  ;;  %v2174_v0 = vld [vmem:[#allocation6 + $0x320] sm:$0xff] }
 0x119   : > { %7958 = vmatprep.subr.mxu0 %v2176_v57  ;;  %8032 = vmatprep.subr.mxu1 %v2485_v56 }
 0x11a   : > { %7837 = vmatmul.mubr.f32.gmra.mxu0 %v8975_v28  ;;  %8033 = vmatpush3.msra.mxu1 %v2485_v56 }
 0x11b   : > { %7917 = vmatmul.mubr.f32.gmra.mxu1 %v9643_v34  ;;  %7839 = vmatprep.mubr.f32.mxu0 %v8976_v61  ;;  %v8979_v34 = vld [vmem:[#allocation2 + $0x111] sm:$0xff] }
 0x11c   : > { %7919 = vmatprep.mubr.f32.mxu1 %v9646_v9  ;;  %7959 = vmatpush3.msra.mxu0 %v2176_v57  ;;  %v2173_v9 = vld [vmem:[#allocation6 + $0x318] sm:$0xff]  ;;  %v2141_v57 = vld [vmem:[#allocation2 + $0x60] sm:$0xff] }
 0x11d   : > { %7960 = vmatprep.subr.mxu0 %v2175_v58  ;;  %8034 = vmatprep.subr.mxu1 %v2484_v59 }
 0x11e   : > { %7840 = vmatmul.mubr.f32.gmra.mxu0 %v8977_v62  ;;  %8035 = vmatpush3.msra.mxu1 %v2484_v59 }
 0x11f   : > { %7920 = vmatmul.mubr.f32.gmra.mxu1 %v9651_v35  ;;  %7842 = vmatprep.mubr.f32.mxu0 %v8978_v1  ;;  %v8981_v35 = vld [vmem:[#allocation2 + $0x129] sm:$0xff] }
 0x120   : > { %7922 = vmatprep.mubr.f32.mxu1 %v9654_v14  ;;  %7961 = vmatpush3.msra.mxu0 %v2175_v58  ;;  %v2172_v14 = vld [vmem:[#allocation6 + $0x310] sm:$0xff]  ;;  %v2794_v58 = vld [vmem:[#allocation6 + $0x460] sm:$0xff] }
 0x121   : > { %7962 = vmatprep.subr.mxu0 %v2174_v0  ;;  %8036 = vmatprep.subr.mxu1 %v2483_v24 }
 0x122   : > { %7843 = vmatmul.mubr.f32.gmra.mxu0 %v8979_v34  ;;  %8037 = vmatpush3.msra.mxu1 %v2483_v24  ;;  %v2793_v34 = vld [vmem:[#allocation6 + $0x458] sm:$0xff] }
 0x123   : > { %7923 = vmatmul.mubr.f32.gmra.mxu1 %v9659_v47  ;;  %7845 = vmatprep.mubr.f32.mxu0 %v8980_v6  ;;  %v8983_v47 = vld [vmem:[#allocation2 + $0x141] sm:$0xff] }
 0x124   : > { %7925 = vmatprep.mubr.f32.mxu1 %v9662_v16  ;;  %7963 = vmatpush3.msra.mxu0 %v2174_v0  ;;  %v2171_v16 = vld [vmem:[#allocation6 + $0x308] sm:$0xff] }
 0x125   : > { %7964 = vmatprep.subr.mxu0 %v2173_v9  ;;  %8038 = vmatprep.subr.mxu1 %v2482_v2  ;;  %v2143_v0 = vld [vmem:[#allocation2 + $0x78] sm:$0xff] }
 0x126   : > { %7846 = vmatmul.mubr.f32.gmra.mxu0 %v8981_v35  ;;  %8039 = vmatpush3.msra.mxu1 %v2482_v2 }
 0x127   : > { %7926 = vmatmul.mubr.f32.gmra.mxu1 %v9670_v11  ;;  %7848 = vmatprep.mubr.f32.mxu0 %v8982_v13  ;;  %v347_v11 = vld [vmem:[#allocation2 + $0x1a7] sm:$0x1] }
 0x128   : > { %7928 = vmatprep.mubr.f32.mxu1 %v9673_v44  ;;  %7965 = vmatpush3.msra.mxu0 %v2173_v9  ;;  %v2479_v44 = vld [vmem:[#allocation6 + $0x398] sm:$0xff]  ;;  %365 = vst [vmem:[#allocation2 + $0x1a9] sm:$0x1] %v347_v11  ;;  %v2792_v13 = vld [vmem:[#allocation6 + $0x450] sm:$0xff] }
 0x129   : > { %7966 = vmatprep.subr.mxu0 %v2172_v14  ;;  %8040 = vmatprep.subr.mxu1 %v2481_v12 }
 0x12a   : > { %7849 = vmatmul.mubr.f32.gmra.mxu0 %v8983_v47  ;;  %8041 = vmatpush3.msra.mxu1 %v2481_v12 }
 0x12b   : > { %7929 = vmatmul.mubr.f32.gmra.mxu1 %v9678_v60  ;;  %7851 = vmatprep.mubr.f32.mxu0 %v8984_v17  ;;  %v2478_v60 = vld [vmem:[#allocation6 + $0x390] sm:$0xff] }
 0x12c   : > { %7931 = vmatprep.mubr.f32.mxu1 %v9681_v63  ;;  %7967 = vmatpush3.msra.mxu0 %v2172_v14  ;;  %v9780_v63 = vld [vmem:[#allocation2 + $0x182] sm:$0xff] }
 0x12d   : > { %7968 = vmatprep.subr.mxu0 %v2171_v16  ;;  %8042 = vmatprep.subr.mxu1 %v2480_v15 }
 0x12e   : > { %7852 = vmatmul.mubr.f32.gmra.mxu0 %v8985_v38  ;;  %8043 = vmatpush3.msra.mxu1 %v2480_v15 }
 0x12f   : > { %7932 = vmatmul.mubr.f32.gmra.mxu1 %v9689_v4  ;;  %7854 = vmatprep.mubr.f32.mxu0 %v8986_v29  ;;  %v9785_v4 = vld [vmem:[#allocation2 + $0x18a] sm:$0xff] }
 0x130   : > { %7934 = vmatprep.mubr.f32.mxu1 %v9692_v31  ;;  %7969 = vmatpush3.msra.mxu0 %v2171_v16  ;;  %v2137_v31 = vld [vmem:[#allocation2 + $0x30] sm:$0xff] }
 0x131   : > { %8044 = vmatprep.subr.mxu1 %v2479_v44  ;;  %7970 = vmatprep.subr.mxu0 %v2170_v42 }
 0x132   : > { %7855 = vmatmul.mubr.f32.gmra.mxu0 %v8987_v39  ;;  %8045 = vmatpush3.msra.mxu1 %v2479_v44  ;;  %v2791_v44 = vld [vmem:[#allocation6 + $0x448] sm:$0xff] }
 0x133   : > { %7935 = vmatmul.mubr.f32.gmra.mxu1 %v9699_v7  ;;  %7857 = vmatprep.mubr.f32.mxu0 %v9527_v40  ;;  %v2138_v7 = vld [vmem:[#allocation2 + $0x38] sm:$0xff]  ;;  %v2139_v40 = vld [vmem:[#allocation2 + $0x48] sm:$0xff] }
 0x134   : > { %8046 = vmatprep.subr.mxu1 %v2478_v60  ;;  %7937 = vmatprep.mubr.f32.mxu1 %v9780_v63 }
 0x135   : > { %7971 = vmatpush3.msra.mxu0 %v2170_v42  ;;  %8047 = vmatpush3.msra.mxu1 %v2478_v60 }
 0x136   : > { %7858 = vmatmul.mubr.f32.gmra.mxu0 %v9530_v41  ;;  %8048 = vmatprep.subr.mxu1 %v2477_v5  ;;  %v2140_v41 = vld [vmem:[#allocation2 + $0x50] sm:$0xff] }
 0x137   : > { %7938 = vmatmul.mubr.f32.gmra.mxu1 %v9785_v4  ;;  %7972 = vmatprep.mubr.f32.mxu0 %v2137_v31 }
 0x138   : > { %8049 = vmatpush3.msra.mxu1 %v2477_v5  ;;  %8100 = vmatprep.subr.mxu0 %v2797_v22 }
 0x139   : > { %8050 = vmatprep.subr.mxu1 %v2476_v46  ;;  %8052 = vmatprep.mubr.f32.mxu1 %v9707_v21  ;;  %v7494_v48 = vpop.f32.mrf.mxu0 }
 0x13a   : > { %v7574_v50 = vpop.f32.mrf.mxu1  ;;  %7973 = vmatmul.mubr.f32.vlgmr.msra.gmra.mxu0 %v2138_v7  ;;  %8051 = vmatpush3.msra.mxu1 %v2476_v46 }
 0x13b   : > { %v9790_v25 = vadd.f32 %v7574_v50, %v7494_v48  ;;  %8101 = vmatpush3.msra.mxu0 %v2797_v22  ;;  %8053 = vmatmul.mubr.f32.vlgmr.msra.gmra.mxu1 %v9710_v27  ;;  %v529_v54 = vpop.f32.mrf.mxu0  ;;  %v2142_v27 = vld [vmem:[#allocation2 + $0x68] sm:$0xff]  ;;  %v2790_v22 = vld [vmem:[#allocation6 + $0x440] sm:$0xff] }
 0x13c   : > { %v754_v55 = vpop.f32.mrf.mxu1  ;;  %7975 = vmatprep.mubr.f32.mxu0 %v2139_v40  ;;  %8102 = vmatprep.subr.mxu0 %v2796_v23 }
 0x13d   : > { %v9793_v56 = vadd.f32 %v754_v55, %v529_v54  ;;  %8055 = vmatprep.mubr.f32.mxu1 %v9713_v36  ;;  %8103 = vmatpush3.msra.mxu0 %v2796_v23  ;;  %v7497_v21 = vpop.f32.mrf.mxu0 }
 0x13e   : > { %v7577_v28 = vpop.f32.mrf.mxu1  ;;  %7976 = vmatmul.mubr.f32.gmra.mxu0 %v2140_v41  ;;  %8104 = vmatprep.subr.mxu0 %v2795_v53  ;;  %v2789_v41 = vld [vmem:[#allocation6 + $0x438] sm:$0xff] }
 0x13f   : > { %v9796_v59 = vadd.f32 %v7577_v28, %v7497_v21  ;;  %8056 = vmatmul.mubr.f32.gmra.mxu1 %v9719_v30  ;;  %7978 = vmatprep.mubr.f32.mxu0 %v2141_v57  ;;  %v539_v61 = vpop.f32.mrf.mxu0  ;;  %v2144_v30 = vld [vmem:[#allocation2 + $0x80] sm:$0xff]  ;;  %v2153_v57 = vld [vmem:[#allocation2 + $0xf0] sm:$0xff] }
 0x140   : > { %v764_v62 = vpop.f32.mrf.mxu1  ;;  %8058 = vmatprep.mubr.f32.mxu1 %v9722_v49  ;;  %8105 = vmatpush3.msra.mxu0 %v2795_v53  ;;  %v2145_v49 = vld [vmem:[#allocation2 + $0x90] sm:$0xff] }
 0x141   : > { %v9800_v24 = vadd.f32 %v764_v62, %v539_v61  ;;  %8106 = vmatprep.subr.mxu0 %v2794_v58  ;;  %v2459_v28 = vld [vmem:[#allocation2 + $0xf1] sm:$0xff]  ;;  %v2788_v61 = vld [vmem:[#allocation6 + $0x430] sm:$0xff] }
 0x142   : > { %v7500_v36 = vpop.f32.mrf.mxu0  ;;  %v7580_v1 = vpop.f32.mrf.mxu1  ;;  %7979 = vmatmul.mubr.f32.gmra.mxu0 %v2142_v27 }
 0x143   : > { %v9802_v9 = vadd.f32 %v7580_v1, %v7500_v36  ;;  %8059 = vmatmul.mubr.f32.gmra.mxu1 %v9727_v8  ;;  %7981 = vmatprep.mubr.f32.mxu0 %v2143_v0  ;;  %v2146_v8 = vld [vmem:[#allocation2 + $0x98] sm:$0xff]  ;;  %v2155_v1 = vld [vmem:[#allocation2 + $0x108] sm:$0xff] }
 0x144   : > { %v549_v2 = vpop.f32.mrf.mxu0  ;;  %v774_v6 = vpop.f32.mrf.mxu1  ;;  %8061 = vmatprep.mubr.f32.mxu1 %v9730_v32  ;;  %8107 = vmatpush3.msra.mxu0 %v2794_v58  ;;  %v2147_v32 = vld [vmem:[#allocation2 + $0xa8] sm:$0xff] }
 0x145   : > { %v9806_v35 = vadd.f32 %v774_v6, %v549_v2  ;;  %8108 = vmatprep.subr.mxu0 %v2793_v34 }
 0x146   : > { %v7503_v14 = vpop.f32.mrf.mxu0  ;;  %v7583_v12 = vpop.f32.mrf.mxu1  ;;  %7982 = vmatmul.mubr.f32.gmra.mxu0 %v2144_v30  ;;  %v2461_v30 = vld [vmem:[#allocation2 + $0x109] sm:$0xff] }
 0x147   : > { %v9808_v47 = vadd.f32 %v7583_v12, %v7503_v14  ;;  %8062 = vmatmul.mubr.f32.gmra.mxu1 %v9735_v18  ;;  %7984 = vmatprep.mubr.f32.mxu0 %v2145_v49  ;;  %v2148_v18 = vld [vmem:[#allocation2 + $0xb0] sm:$0xff]  ;;  %v2787_v49 = vld [vmem:[#allocation6 + $0x428] sm:$0xff] }
 0x148   : > { %v559_v16 = vpop.f32.mrf.mxu0  ;;  %v784_v15 = vpop.f32.mrf.mxu1  ;;  %8064 = vmatprep.mubr.f32.mxu1 %v9738_v20  ;;  %8109 = vmatpush3.msra.mxu0 %v2793_v34  ;;  %v2149_v20 = vld [vmem:[#allocation2 + $0xc0] sm:$0xff]  ;;  %v2156_v12 = vld [vmem:[#allocation2 + $0x110] sm:$0xff] }
 0x149   : > { %v9812_v17 = vadd.f32 %v784_v15, %v559_v16  ;;  %8110 = vmatprep.subr.mxu0 %v2792_v13  ;;  %v2462_v16 = vld [vmem:[#allocation2 + $0x111] sm:$0xff]  ;;  %v2157_v15 = vld [vmem:[#allocation2 + $0x120] sm:$0xff] }
 0x14a   : > { %v7506_v11 = vpop.f32.mrf.mxu0  ;;  %v7586_v38 = vpop.f32.mrf.mxu1  ;;  %7985 = vmatmul.mubr.f32.gmra.mxu0 %v2146_v8 }
 0x14b   : > { %v9814_v42 = vadd.f32 %v7586_v38, %v7506_v11  ;;  %8065 = vmatmul.mubr.f32.gmra.mxu1 %v9743_v33  ;;  %7987 = vmatprep.mubr.f32.mxu0 %v2147_v32  ;;  %v2150_v33 = vld [vmem:[#allocation2 + $0xc8] sm:$0xff] }
 0x14c   : > { %v569_v29 = vpop.f32.mrf.mxu0  ;;  %v794_v60 = vpop.f32.mrf.mxu1  ;;  %8067 = vmatprep.mubr.f32.mxu1 %v9746_v37  ;;  %8111 = vmatpush3.msra.mxu0 %v2792_v13  ;;  %v2151_v37 = vld [vmem:[#allocation2 + $0xd8] sm:$0xff]  ;;  %v2463_v32 = vld [vmem:[#allocation2 + $0x121] sm:$0xff] }
 0x14d   : > { %v9818_v39 = vadd.f32 %v794_v60, %v569_v29  ;;  %8112 = vmatprep.subr.mxu0 %v2791_v44  ;;  %v2158_v29 = vld [vmem:[#allocation2 + $0x128] sm:$0xff] }
 0x14e   : > { %v7509_v5 = vpop.f32.mrf.mxu0  ;;  %v7589_v31 = vpop.f32.mrf.mxu1  ;;  %7988 = vmatmul.mubr.f32.gmra.mxu0 %v2148_v18 }
 0x14f   : > { %v9820_v46 = vadd.f32 %v7589_v31, %v7509_v5  ;;  %8068 = vmatmul.mubr.f32.gmra.mxu1 %v9751_v43  ;;  %7990 = vmatprep.mubr.f32.mxu0 %v2149_v20  ;;  %v2152_v43 = vld [vmem:[#allocation2 + $0xe0] sm:$0xff]  ;;  %v2464_v5 = vld [vmem:[#allocation2 + $0x129] sm:$0xff]  ;;  %v2159_v31 = vld [vmem:[#allocation2 + $0x138] sm:$0xff] }
 0x150   : > { %v579_v7 = vpop.f32.mrf.mxu0  ;;  %v804_v40 = vpop.f32.mrf.mxu1  ;;  %8070 = vmatprep.mubr.f32.mxu1 %v9754_v45  ;;  %8113 = vmatpush3.msra.mxu0 %v2791_v44  ;;  %v2458_v45 = vld [vmem:[#allocation2 + $0xe1] sm:$0xff]  ;;  %v2786_v44 = vld [vmem:[#allocation6 + $0x420] sm:$0xff] }
 0x151   : > { %v9824_v23 = vadd.f32 %v804_v40, %v579_v7  ;;  %8114 = vmatprep.subr.mxu0 %v2790_v22  ;;  %v2785_v40 = vld [vmem:[#allocation6 + $0x418] sm:$0xff] }
 0x152   : > { %v7512_v48 = vpop.f32.mrf.mxu0  ;;  %v7592_v50 = vpop.f32.mrf.mxu1  ;;  %7991 = vmatmul.mubr.f32.gmra.mxu0 %v2150_v33 }
 0x153   : > { %v9826_v53 = vadd.f32 %v7592_v50, %v7512_v48  ;;  %8071 = vmatmul.mubr.f32.gmra.mxu1 %v9759_v51  ;;  %7993 = vmatprep.mubr.f32.mxu0 %v2151_v37  ;;  %v2154_v51 = vld [vmem:[#allocation2 + $0xf8] sm:$0xff]  ;;  %v2160_v48 = vld [vmem:[#allocation2 + $0x140] sm:$0xff] }
 0x154   : > { %v589_v54 = vpop.f32.mrf.mxu0  ;;  %v814_v55 = vpop.f32.mrf.mxu1  ;;  %8073 = vmatprep.mubr.f32.mxu1 %v9762_v52  ;;  %8115 = vmatpush3.msra.mxu0 %v2790_v22  ;;  %v2460_v52 = vld [vmem:[#allocation2 + $0xf9] sm:$0xff] }
 0x155   : > { %v9830_v21 = vadd.f32 %v814_v55, %v589_v54  ;;  %8116 = vmatprep.subr.mxu0 %v2789_v41  ;;  %v2465_v22 = vld [vmem:[#allocation2 + $0x139] sm:$0xff]  ;;  %v2161_v54 = vld [vmem:[#allocation2 + $0x150] sm:$0xff] }
 0x156   : > { %v7515_v58 = vpop.f32.mrf.mxu0  ;;  %v7595_v27 = vpop.f32.mrf.mxu1  ;;  %7994 = vmatmul.mubr.f32.gmra.mxu0 %v2152_v43  ;;  %v2466_v43 = vld [vmem:[#allocation2 + $0x141] sm:$0xff]  ;;  %v2467_v55 = vld [vmem:[#allocation2 + $0x151] sm:$0xff] }
 0x157   : > { %v9832_v62 = vadd.f32 %v7595_v27, %v7515_v58  ;;  %8074 = vmatmul.mubr.f32.gmra.mxu1 %v2458_v45  ;;  %7996 = vmatprep.mubr.f32.mxu0 %v2153_v57  ;;  %v2162_v27 = vld [vmem:[#allocation2 + $0x158] sm:$0xff] }
 0x158   : > { %v599_v0 = vpop.f32.mrf.mxu0  ;;  %v824_v36 = vpop.f32.mrf.mxu1  ;;  %8076 = vmatprep.mubr.f32.mxu1 %v2459_v28  ;;  %8117 = vmatpush3.msra.mxu0 %v2789_v41  ;;  %v2784_v28 = vld [vmem:[#allocation6 + $0x410] sm:$0xff] }
 0x159   : > { %v9834_v34 = vadd.f32 %v824_v36, %v599_v0  ;;  %8118 = vmatprep.subr.mxu0 %v2788_v61  ;;  %v2468_v0 = vld [vmem:[#allocation2 + $0x159] sm:$0xff]  ;;  %v2163_v36 = vld [vmem:[#allocation2 + $0x168] sm:$0xff] }
 0x15a   : > { %v7518_v2 = vpop.f32.mrf.mxu0  ;;  %v7598_v6 = vpop.f32.mrf.mxu1  ;;  %7997 = vmatmul.mubr.f32.gmra.mxu0 %v2154_v51 }
 0x15b   : > { %v9836_v14 = vadd.f32 %v7598_v6, %v7518_v2  ;;  %8077 = vmatmul.mubr.f32.gmra.mxu1 %v2460_v52  ;;  %7999 = vmatprep.mubr.f32.mxu0 %v2155_v1  ;;  %v2164_v6 = vld [vmem:[#allocation2 + $0x170] sm:$0xff] }
 0x15c   : > { %v9838_v13 = vpop.f32.mrf.mxu0  ;;  %v9840_v8 = vpop.f32.mrf.mxu1  ;;  %8079 = vmatprep.mubr.f32.mxu1 %v2461_v30  ;;  %8119 = vmatpush3.msra.mxu0 %v2788_v61  ;;  %v2783_v30 = vld [vmem:[#allocation6 + $0x408] sm:$0xff] }
 0x15d   : > { %8120 = vmatprep.subr.mxu0 %v2787_v49 }
 0x15e   : > { %v7521_v11 = vpop.f32.mrf.mxu0  ;;  %v7601_v38 = vpop.f32.mrf.mxu1  ;;  %8000 = vmatmul.mubr.f32.gmra.mxu0 %v2156_v12 }
 0x15f   : > { %v9842_v18 = vadd.f32 %v7601_v38, %v7521_v11  ;;  %8080 = vmatmul.mubr.f32.gmra.mxu1 %v2462_v16  ;;  %8002 = vmatprep.mubr.f32.mxu0 %v2157_v15 }
 0x160   : > { %v9844_v60 = vpop.f32.mrf.mxu0  ;;  %v9846_v20 = vpop.f32.mrf.mxu1  ;;  %8082 = vmatprep.mubr.f32.mxu1 %v2463_v32  ;;  %8121 = vmatpush3.msra.mxu0 %v2787_v49  ;;  %v2782_v32 = vld [vmem:[#allocation6 + $0x400] sm:$0xff] }
 0x161   : > { %12154 = vst [vmem:[#allocation13_spill] sm:$0xff] %v9844_v60  ;;  %12155 = vst [vmem:[#allocation14_spill] sm:$0xff] %v9846_v20  ;;  %8122 = vmatprep.subr.mxu0 %v2786_v44 }
 0x162   : > { %v7524_v33 = vpop.f32.mrf.mxu0  ;;  %v7604_v7 = vpop.f32.mrf.mxu1  ;;  %8003 = vmatmul.mubr.f32.gmra.mxu0 %v2158_v29  ;;  %v8988_v29 = vld [vmem:[#allocation2 + $0x181] sm:$0xff] }
 0x163   : > { %v9848_v37 = vadd.f32 %v7604_v7, %v7524_v33  ;;  %8083 = vmatmul.mubr.f32.gmra.mxu1 %v2464_v5  ;;  %8005 = vmatprep.mubr.f32.mxu0 %v2159_v31  ;;  %v2167_v5 = vld [vmem:[#allocation2 + $0x198] sm:$0xff]  ;;  %v8989_v7 = vld [vmem:[#allocation2 + $0x189] sm:$0xff] }
 0x164   : > { %v9850_v50 = vpop.f32.mrf.mxu0  ;;  %v9852_v41 = vpop.f32.mrf.mxu1  ;;  %8085 = vmatprep.mubr.f32.mxu1 %v2465_v22  ;;  %8123 = vmatpush3.msra.mxu0 %v2786_v44 }
 0x165   : > { %12156 = vst [vmem:[#allocation15_spill] sm:$0xff] %v9850_v50  ;;  %12157 = vst [vmem:[#allocation16_spill] sm:$0xff] %v9852_v41  ;;  %8124 = vmatprep.subr.mxu0 %v2785_v40 }
 0x166   : > { %v7527_v45 = vpop.f32.mrf.mxu0  ;;  %v7607_v57 = vpop.f32.mrf.mxu1  ;;  %8006 = vmatmul.mubr.f32.gmra.mxu0 %v2160_v48 }
 0x167   : > { %v9854_v58 = vadd.f32 %v7607_v57, %v7527_v45  ;;  %8086 = vmatmul.mubr.f32.gmra.mxu1 %v2466_v43  ;;  %8008 = vmatprep.mubr.f32.mxu0 %v2161_v54  ;;  %v2749_v43 = vld [vmem:[#allocation2 + $0x32] sm:$0xff] }
 0x168   : > { %v9856_v61 = vpop.f32.mrf.mxu0  ;;  %v9858_v51 = vpop.f32.mrf.mxu1  ;;  %8088 = vmatprep.mubr.f32.mxu1 %v2467_v55  ;;  %8125 = vmatpush3.msra.mxu0 %v2785_v40  ;;  %v2168_v40 = vld [vmem:[#allocation2 + $0x1a0] sm:$0xff] }
 0x169   : > { %12158 = vst [vmem:[#allocation17_spill] sm:$0xff] %v9856_v61  ;;  %12159 = vst [vmem:[#allocation18_spill] sm:$0xff] %v9858_v51  ;;  %8126 = vmatprep.subr.mxu0 %v2784_v28 }
 0x16a   : > { %v7530_v52 = vpop.f32.mrf.mxu0  ;;  %v7610_v1 = vpop.f32.mrf.mxu1  ;;  %8009 = vmatmul.mubr.f32.gmra.mxu0 %v2162_v27 }
 0x16b   : > { %v9860_v2 = vadd.f32 %v7610_v1, %v7530_v52  ;;  %8089 = vmatmul.mubr.f32.gmra.mxu1 %v2468_v0  ;;  %8011 = vmatprep.mubr.f32.mxu0 %v2163_v36  ;;  %v2752_v52 = vld [vmem:[#allocation2 + $0x52] sm:$0xff] }
 0x16c   : > { %v9862_v49 = vpop.f32.mrf.mxu0  ;;  %v9864_v12 = vpop.f32.mrf.mxu1  ;;  %8091 = vmatprep.mubr.f32.mxu1 %v9664_v26  ;;  %8127 = vmatpush3.msra.mxu0 %v2784_v28  ;;  %v2751_v28 = vld [vmem:[#allocation2 + $0x4a] sm:$0xff] }
 0x16d   : > { %12160 = vst [vmem:[#allocation19_spill] sm:$0xff] %v9862_v49  ;;  %12161 = vst [vmem:[#allocation20_spill] sm:$0xff] %v9864_v12  ;;  %8128 = vmatprep.subr.mxu0 %v2783_v30 }
 0x16e   : > { %v7533_v16 = vpop.f32.mrf.mxu0  ;;  %v7613_v15 = vpop.f32.mrf.mxu1  ;;  %8012 = vmatmul.mubr.f32.gmra.mxu0 %v2164_v6 }
 0x16f   : > { %v9867_v11 = vadd.f32 %v7613_v15, %v7533_v16  ;;  %8092 = vmatmul.mubr.f32.gmra.mxu1 %v9683_v19  ;;  %8014 = vmatprep.mubr.f32.mxu0 %v9694_v3 }
 0x170   : > { %v9871_v38 = vpop.f32.mrf.mxu0  ;;  %v9873_v44 = vpop.f32.mrf.mxu1  ;;  %8094 = vmatprep.mubr.f32.mxu1 %v8988_v29  ;;  %8129 = vmatpush3.msra.mxu0 %v2783_v30  ;;  %v2753_v30 = vld [vmem:[#allocation2 + $0x62] sm:$0xff] }
 0x171   : > { %12162 = vst [vmem:[#allocation21_spill] sm:$0xff] %v9871_v38  ;;  %12163 = vst [vmem:[#allocation22_spill] sm:$0xff] %v9873_v44  ;;  %8130 = vmatprep.subr.mxu0 %v2782_v32  ;;  %v2776_v38 = vld [vmem:[#allocation2 + $0x172] sm:$0xff] }
 0x172   : > { %v7536_v31 = vpop.f32.mrf.mxu0  ;;  %v7616_v22 = vpop.f32.mrf.mxu1  ;;  %8015 = vmatmul.mubr.f32.gmra.mxu0 %v9702_v10  ;;  %v2750_v10 = vld [vmem:[#allocation2 + $0x3a] sm:$0xff] }
 0x173   : > { %v9876_v33 = vadd.f32 %v7616_v22, %v7536_v31  ;;  %8095 = vmatmul.mubr.f32.gmra.mxu1 %v8989_v7  ;;  %8017 = vmatprep.mubr.f32.mxu0 %v2167_v5  ;;  %v2754_v5 = vld [vmem:[#allocation2 + $0x6a] sm:$0xff]  ;;  %v2755_v31 = vld [vmem:[#allocation2 + $0x7a] sm:$0xff] }
 0x174   : > { %v9878_v3 = vpop.f32.mrf.mxu0  ;;  %v9880_v48 = vpop.f32.mrf.mxu1  ;;  %8097 = vmatprep.mubr.f32.mxu1 %v9664_v26  ;;  %8131 = vmatpush3.msra.mxu0 %v2782_v32 }
 0x175   : > { %12164 = vst [vmem:[#allocation23_spill] sm:$0xff] %v9878_v3  ;;  %12165 = vst [vmem:[#allocation24_spill] sm:$0xff] %v9880_v48  ;;  %v2774_v3 = vld [vmem:[#allocation2 + $0x15a] sm:$0xff] }
 0x176   : > { %v7539_v54 = vpop.f32.mrf.mxu0  ;;  %v7619_v55 = vpop.f32.mrf.mxu1  ;;  %8018 = vmatmul.mubr.f32.gmra.mxu0 %v2168_v40 }
 0x177   : > { %v9883_v45 = vadd.f32 %v7619_v55, %v7539_v54  ;;  %8098 = vmatmul.mubr.f32.gmra.mxu1 %v9683_v19  ;;  %8132 = vmatprep.mubr.f32.mxu0 %v2749_v43  ;;  %v2756_v55 = vld [vmem:[#allocation2 + $0x82] sm:$0xff] }
 0x178   : > { %v9886_v57 = vpop.f32.mrf.mxu0  ;;  %v9888_v27 = vpop.f32.mrf.mxu1 }
 0x179   : > { %12166 = vst [vmem:[#allocation25_spill] sm:$0xff] %v9886_v57  ;;  %12167 = vst [vmem:[#allocation26_spill] sm:$0xff] %v9888_v27  ;;  %v2772_v57 = vld [vmem:[#allocation2 + $0x142] sm:$0xff] }
 0x17a   : > { %v7654_v0 = vpop.f32.mrf.mxu0  ;;  %8133 = vmatmul.mubr.f32.vlgmr.msra.gmra.mxu0 %v2750_v10  ;;  %v7734_v36 = vpop.f32.mrf.mxu1  ;;  %v2757_v10 = vld [vmem:[#allocation2 + $0x92] sm:$0xff] }
 0x17b   : > { %v1188_v26 = vadd.f32 %v7654_v0, %v9790_v25  ;;  %8135 = vmatprep.mubr.f32.mxu0 %v2751_v28 }
 0x17c   : > { %v1028_v1 = vpop.f32.mrf.mxu0  ;;  %v9896_v16 = vpop.f32.mrf.mxu1 }
 0x17d   : > { %v9892_v6 = vadd.f32 %v1028_v1, %v9793_v56  ;;  %v9894_v19 = vadd.f32 %v7734_v36, %v1188_v26  ;;  %v2758_v1 = vld [vmem:[#allocation2 + $0x9a] sm:$0xff] }
 0x17e   : > { %v7657_v15 = vpop.f32.mrf.mxu0  ;;  %8136 = vmatmul.mubr.f32.gmra.mxu0 %v2752_v52 }
 0x17f   : > { %v1190_v32 = vadd.f32 %v7657_v15, %v9796_v59  ;;  %v7737_v29 = vpop.f32.mrf.mxu1  ;;  %8138 = vmatprep.mubr.f32.mxu0 %v2753_v30  ;;  %v2759_v30 = vld [vmem:[#allocation2 + $0xaa] sm:$0xff] }
 0x180   : > { %v1038_v25 = vpop.f32.mrf.mxu0 }
 0x181   : > { %v9900_v22 = vadd.f32 %v1038_v25, %v9800_v24  ;;  %v9902_v7 = vadd.f32 %v7737_v29, %v1190_v32  ;;  %v9904_v56 = vpop.f32.mrf.mxu1 }
 0x182   : > { %v7660_v40 = vpop.f32.mrf.mxu0  ;;  %8139 = vmatmul.mubr.f32.gmra.mxu0 %v2754_v5 }
 0x183   : > { %v1192_v43 = vadd.f32 %v7660_v40, %v9802_v9  ;;  %v7740_v54 = vpop.f32.mrf.mxu1  ;;  %8141 = vmatprep.mubr.f32.mxu0 %v2755_v31  ;;  %v2760_v31 = vld [vmem:[#allocation2 + $0xb2] sm:$0xff]  ;;  %v2761_v40 = vld [vmem:[#allocation2 + $0xc2] sm:$0xff] }
 0x184   : > { %v1048_v59 = vpop.f32.mrf.mxu0 }
 0x185   : > { %v9908_v28 = vadd.f32 %v1048_v59, %v9806_v35  ;;  %v9910_v0 = vadd.f32 %v7740_v54, %v1192_v43  ;;  %v9912_v24 = vpop.f32.mrf.mxu1 }
 0x186   : > { %v7663_v26 = vpop.f32.mrf.mxu0  ;;  %8142 = vmatmul.mubr.f32.gmra.mxu0 %v2756_v55 }
 0x187   : > { %v1194_v36 = vadd.f32 %v7663_v26, %v9808_v47  ;;  %v7743_v52 = vpop.f32.mrf.mxu1  ;;  %8144 = vmatprep.mubr.f32.mxu0 %v2757_v10  ;;  %v2762_v26 = vld [vmem:[#allocation2 + $0xca] sm:$0xff] }
 0x188   : > { %v1058_v9 = vpop.f32.mrf.mxu0 }
 0x189   : > { %v9916_v15 = vadd.f32 %v1058_v9, %v9812_v17  ;;  %v9918_v32 = vadd.f32 %v7743_v52, %v1194_v36  ;;  %v9920_v35 = vpop.f32.mrf.mxu1  ;;  %v2763_v36 = vld [vmem:[#allocation2 + $0xda] sm:$0xff] }
 0x18a   : > { %v7666_v29 = vpop.f32.mrf.mxu0  ;;  %8145 = vmatmul.mubr.f32.gmra.mxu0 %v2758_v1 }
 0x18b   : > { %v1196_v5 = vadd.f32 %v7666_v29, %v9814_v42  ;;  %v7746_v25 = vpop.f32.mrf.mxu1  ;;  %8147 = vmatprep.mubr.f32.mxu0 %v2759_v30 }
 0x18c   : > { %v1068_v47 = vpop.f32.mrf.mxu0 }
 0x18d   : > { %v9924_v43 = vadd.f32 %v1068_v47, %v9818_v39  ;;  %v9926_v54 = vadd.f32 %v7746_v25, %v1196_v5  ;;  %v9928_v17 = vpop.f32.mrf.mxu1  ;;  %v2764_v5 = vld [vmem:[#allocation2 + $0xe2] sm:$0xff]  ;;  %v2765_v25 = vld [vmem:[#allocation2 + $0xf2] sm:$0xff] }
 0x18e   : > { %v7669_v55 = vpop.f32.mrf.mxu0  ;;  %8148 = vmatmul.mubr.f32.gmra.mxu0 %v2760_v31 }
 0x18f   : > { %v1198_v59 = vadd.f32 %v7669_v55, %v9820_v46  ;;  %v7749_v10 = vpop.f32.mrf.mxu1  ;;  %8150 = vmatprep.mubr.f32.mxu0 %v2761_v40 }
 0x190   : > { %v1078_v42 = vpop.f32.mrf.mxu0 }
 0x191   : > { %v9932_v52 = vadd.f32 %v1078_v42, %v9824_v23  ;;  %v9934_v1 = vadd.f32 %v7749_v10, %v1198_v59  ;;  %v9936_v39 = vpop.f32.mrf.mxu1  ;;  %v2766_v10 = vld [vmem:[#allocation2 + $0xfa] sm:$0xff] }
 0x192   : > { %v7672_v9 = vpop.f32.mrf.mxu0  ;;  %8151 = vmatmul.mubr.f32.gmra.mxu0 %v2762_v26  ;;  %v2767_v26 = vld [vmem:[#allocation2 + $0x10a] sm:$0xff] }
 0x193   : > { %v1200_v30 = vadd.f32 %v7672_v9, %v9826_v53  ;;  %v7752_v29 = vpop.f32.mrf.mxu1  ;;  %8153 = vmatprep.mubr.f32.mxu0 %v2763_v36 }
 0x194   : > { %v1088_v46 = vpop.f32.mrf.mxu0 }
 0x195   : > { %v9940_v31 = vadd.f32 %v1088_v46, %v9830_v21  ;;  %v9942_v47 = vadd.f32 %v7752_v29, %v1200_v30  ;;  %v9944_v23 = vpop.f32.mrf.mxu1  ;;  %v2769_v46 = vld [vmem:[#allocation2 + $0x122] sm:$0xff] }
 0x196   : > { %v7675_v40 = vpop.f32.mrf.mxu0  ;;  %8154 = vmatmul.mubr.f32.gmra.mxu0 %v2764_v5  ;;  %v2768_v5 = vld [vmem:[#allocation2 + $0x112] sm:$0xff] }
 0x197   : > { %v1202_v55 = vadd.f32 %v7675_v40, %v9832_v62  ;;  %v7755_v59 = vpop.f32.mrf.mxu1  ;;  %8156 = vmatprep.mubr.f32.mxu0 %v2765_v25 }
 0x198   : > { %v1098_v53 = vpop.f32.mrf.mxu0 }
 0x199   : > { %v9948_v42 = vadd.f32 %v1098_v53, %v9834_v34  ;;  %v9950_v36 = vadd.f32 %v7755_v59, %v1202_v55  ;;  %v9952_v21 = vpop.f32.mrf.mxu1  ;;  %v2770_v53 = vld [vmem:[#allocation2 + $0x12a] sm:$0xff] }
 0x19a   : > { %12169 = vst [vmem:[#allocation28_spill] sm:$0xff] %v9952_v21  ;;  %v7678_v9 = vpop.f32.mrf.mxu0  ;;  %8157 = vmatmul.mubr.f32.gmra.mxu0 %v2766_v10 }
 0x19b   : > { %12168 = vst [vmem:[#allocation27_spill] sm:$0xff] %v9948_v42  ;;  %v1204_v30 = vadd.f32 %v7678_v9, %v9836_v14  ;;  %v7758_v29 = vpop.f32.mrf.mxu1  ;;  %8159 = vmatprep.mubr.f32.mxu0 %v2767_v26  ;;  %v2771_v14 = vld [vmem:[#allocation2 + $0x13a] sm:$0xff] }
 0x19c   : > { %v9955_v62 = vpop.f32.mrf.mxu0 }
 0x19d   : > { %12170 = vst [vmem:[#allocation29_spill] sm:$0xff] %v9955_v62  ;;  %v9957_v25 = vadd.f32 %v7758_v29, %v1204_v30  ;;  %v9959_v40 = vpop.f32.mrf.mxu1 }
 0x19e   : > { %12171 = vst [vmem:[#allocation30_spill] sm:$0xff] %v9959_v40  ;;  %v7681_v34 = vpop.f32.mrf.mxu0  ;;  %8160 = vmatmul.mubr.f32.gmra.mxu0 %v2768_v5 }
 0x19f   : > { %v1206_v55 = vadd.f32 %v7681_v34, %v9842_v18  ;;  %v7761_v59 = vpop.f32.mrf.mxu1  ;;  %8162 = vmatprep.mubr.f32.mxu0 %v2769_v46  ;;  %v2773_v18 = vld [vmem:[#allocation2 + $0x152] sm:$0xff] }
 0x1a0   : > { %v9962_v10 = vpop.f32.mrf.mxu0 }
 0x1a1   : > { %12172 = vst [vmem:[#allocation31_spill] sm:$0xff] %v9962_v10  ;;  %v9964_v9 = vadd.f32 %v7761_v59, %v1206_v55  ;;  %v9966_v26 = vpop.f32.mrf.mxu1 }
 0x1a2   : > { %12173 = vst [vmem:[#allocation32_spill] sm:$0xff] %v9966_v26  ;;  %v7684_v27 = vpop.f32.mrf.mxu0  ;;  %8163 = vmatmul.mubr.f32.gmra.mxu0 %v2770_v53 }
 0x1a3   : > { %v1208_v30 = vadd.f32 %v7684_v27, %v9848_v37  ;;  %v7764_v29 = vpop.f32.mrf.mxu1  ;;  %8165 = vmatprep.mubr.f32.mxu0 %v2771_v14  ;;  %v2775_v37 = vld [vmem:[#allocation2 + $0x16a] sm:$0xff] }
 0x1a4   : > { %v9969_v5 = vpop.f32.mrf.mxu0 }
 0x1a5   : > { %12174 = vst [vmem:[#allocation33_spill] sm:$0xff] %v9969_v5  ;;  %v9971_v34 = vadd.f32 %v7764_v29, %v1208_v30  ;;  %v9973_v46 = vpop.f32.mrf.mxu1 }
 0x1a6   : > { %12175 = vst [vmem:[#allocation34_spill] sm:$0xff] %v9973_v46  ;;  %v7687_v48 = vpop.f32.mrf.mxu0  ;;  %8166 = vmatmul.mubr.f32.gmra.mxu0 %v2772_v57 }
 0x1a7   : > { %v1210_v55 = vadd.f32 %v7687_v48, %v9854_v58  ;;  %v7767_v59 = vpop.f32.mrf.mxu1  ;;  %8168 = vmatprep.mubr.f32.mxu0 %v2773_v18 }
 0x1a8   : > { %v9976_v53 = vpop.f32.mrf.mxu0 }
 0x1a9   : > { %12176 = vst [vmem:[#allocation35_spill] sm:$0xff] %v9976_v53  ;;  %v9978_v27 = vadd.f32 %v7767_v59, %v1210_v55  ;;  %v9980_v14 = vpop.f32.mrf.mxu1 }
 0x1aa   : > { %12177 = vst [vmem:[#allocation36_spill] sm:$0xff] %v9980_v14  ;;  %v7690_v44 = vpop.f32.mrf.mxu0  ;;  %8169 = vmatmul.mubr.f32.gmra.mxu0 %v2774_v3  ;;  %v2779_v3 = vld [vmem:[#allocation2 + $0x19a] sm:$0xff] }
 0x1ab   : > { %v1212_v30 = vadd.f32 %v7690_v44, %v9860_v2  ;;  %v7770_v29 = vpop.f32.mrf.mxu1  ;;  %8171 = vmatprep.mubr.f32.mxu0 %v2775_v37 }
 0x1ac   : > { %v9983_v57 = vpop.f32.mrf.mxu0 }
 0x1ad   : > { %12178 = vst [vmem:[#allocation37_spill] sm:$0xff] %v9983_v57  ;;  %v9985_v58 = vadd.f32 %v7770_v29, %v1212_v30  ;;  %v9987_v48 = vpop.f32.mrf.mxu1 }
 0x1ae   : > { %12179 = vst [vmem:[#allocation38_spill] sm:$0xff] %v9987_v48  ;;  %v7693_v18 = vpop.f32.mrf.mxu0  ;;  %8172 = vmatmul.mubr.f32.gmra.mxu0 %v2776_v38  ;;  %v2780_v38 = vld [vmem:[#allocation2 + $0x1a2] sm:$0xff] }
 0x1af   : > { %v1214_v55 = vadd.f32 %v7693_v18, %v9867_v11  ;;  %v7773_v59 = vpop.f32.mrf.mxu1  ;;  %8174 = vmatprep.mubr.f32.mxu0 %v9780_v63 }
 0x1b0   : > { %v9991_v14 = vpop.f32.mrf.mxu0 }
 0x1b1   : > { %12180 = vst [vmem:[#allocation39_spill] sm:$0xff] %v9991_v14  ;;  %v9993_v2 = vadd.f32 %v7773_v59, %v1214_v55  ;;  %v9995_v44 = vpop.f32.mrf.mxu1 }
 0x1b2   : > { %12181 = vst [vmem:[#allocation40_spill] sm:$0xff] %v9995_v44  ;;  %v7696_v37 = vpop.f32.mrf.mxu0  ;;  %8175 = vmatmul.mubr.f32.gmra.mxu0 %v9785_v4 }
 0x1b3   : > { %v1216_v30 = vadd.f32 %v7696_v37, %v9876_v33  ;;  %v7776_v29 = vpop.f32.mrf.mxu1  ;;  %8177 = vmatprep.mubr.f32.mxu0 %v2779_v3 }
 0x1b4   : > { %v9999_v48 = vpop.f32.mrf.mxu0 }
 0x1b5   : > { %12182 = vst [vmem:[#allocation41_spill] sm:$0xff] %v9999_v48  ;;  %v10001_v11 = vadd.f32 %v7776_v29, %v1216_v30  ;;  %v10003_v63 = vpop.f32.mrf.mxu1 }
 0x1b6   : > { %12183 = vst [vmem:[#allocation42_spill] sm:$0xff] %v10003_v63  ;;  %v7699_v18 = vpop.f32.mrf.mxu0  ;;  %8178 = vmatmul.mubr.f32.gmra.mxu0 %v2780_v38 }
 0x1b7   : > { %v1218_v55 = vadd.f32 %v7699_v18, %v9883_v45  ;;  %v7779_v59 = vpop.f32.mrf.mxu1 }
 0x1b8   : > { %v10006_v44 = vpop.f32.mrf.mxu0 }
 0x1b9   : > { %12184 = vst [vmem:[#allocation43_spill] sm:$0xff] %v10006_v44  ;;  %v10008_v14 = vadd.f32 %v7779_v59, %v1218_v55  ;;  %v10010_v4 = vpop.f32.mrf.mxu1 }
 0x1ba   : > { %12185 = vst [vmem:[#allocation44_spill] sm:$0xff] %v10010_v4  ;;  %v7814_v33 = vpop.f32.mrf.mxu0 }
 0x1bb   : > { %v1800_v3 = vadd.f32 %v7814_v33, %v9894_v19  ;;  %v7894_v37 = vpop.f32.mrf.mxu1 }
 0x1bc   : > { %v10013_v48 = vpop.f32.mrf.mxu0 }
 0x1bd   : > { %v10015_v30 = vadd.f32 %v7894_v37, %v1800_v3  ;;  %v10017_v29 = vpop.f32.mrf.mxu1 }
 0x1be   : > { %v7817_v38 = vpop.f32.mrf.mxu0 }
 0x1bf   : > { %v1802_v45 = vadd.f32 %v7817_v38, %v9902_v7  ;;  %v7897_v18 = vpop.f32.mrf.mxu1 }
 0x1c0   : > { %v10020_v63 = vpop.f32.mrf.mxu0 }
 0x1c1   : > { %v10022_v55 = vadd.f32 %v7897_v18, %v1802_v45  ;;  %v10024_v59 = vpop.f32.mrf.mxu1 }
 0x1c2   : > { %v7820_v4 = vpop.f32.mrf.mxu0 }
 0x1c3   : > { %v1804_v19 = vadd.f32 %v7820_v4, %v9910_v0  ;;  %v7900_v33 = vpop.f32.mrf.mxu1 }
 0x1c4   : > { %v10027_v44 = vpop.f32.mrf.mxu0 }
 0x1c5   : > { %v10029_v3 = vadd.f32 %v7900_v33, %v1804_v19  ;;  %v10031_v37 = vpop.f32.mrf.mxu1 }
 0x1c6   : > { %v7823_v57 = vpop.f32.mrf.mxu0 }
 0x1c7   : > { %v1806_v7 = vadd.f32 %v7823_v57, %v9918_v32  ;;  %v7903_v38 = vpop.f32.mrf.mxu1 }
 0x1c8   : > { %v10034_v12 = vpop.f32.mrf.mxu0 }
 0x1c9   : > { %v10036_v45 = vadd.f32 %v7903_v38, %v1806_v7  ;;  %v10038_v18 = vpop.f32.mrf.mxu1 }
 0x1ca   : > { %v7826_v49 = vpop.f32.mrf.mxu0 }
 0x1cb   : > { %v1808_v0 = vadd.f32 %v7826_v49, %v9926_v54  ;;  %v7906_v4 = vpop.f32.mrf.mxu1 }
 0x1cc   : > { %v10041_v53 = vpop.f32.mrf.mxu0 }
 0x1cd   : > { %v10043_v19 = vadd.f32 %v7906_v4, %v1808_v0  ;;  %v10045_v33 = vpop.f32.mrf.mxu1 }
 0x1ce   : > { %v7829_v46 = vpop.f32.mrf.mxu0 }
 0x1cf   : > { %v1810_v32 = vadd.f32 %v7829_v46, %v9934_v1  ;;  %v7909_v57 = vpop.f32.mrf.mxu1 }
 0x1d0   : > { %v10048_v51 = vpop.f32.mrf.mxu0 }
 0x1d1   : > { %v10050_v7 = vadd.f32 %v7909_v57, %v1810_v32  ;;  %v10052_v38 = vpop.f32.mrf.mxu1 }
 0x1d2   : > { %12186 = vst [vmem:[#allocation45_spill] sm:$0xff] %v10052_v38  ;;  %v7832_v61 = vpop.f32.mrf.mxu0  ;;  %v3537_v38 = vld [vmem:[#allocation8 + $0xf0] sm:$0xff] }
 0x1d3   : > { %v1812_v49 = vadd.f32 %v7832_v61, %v9942_v47  ;;  %v7912_v54 = vpop.f32.mrf.mxu1 }
 0x1d4   : > { %v10055_v5 = vpop.f32.mrf.mxu0 }
 0x1d5   : > { %12187 = vst [vmem:[#allocation46_spill] sm:$0xff] %v10055_v5  ;;  %v10057_v0 = vadd.f32 %v7912_v54, %v1812_v49  ;;  %v10059_v4 = vpop.f32.mrf.mxu1 }
 0x1d6   : > { %12188 = vst [vmem:[#allocation47_spill] sm:$0xff] %v10059_v4  ;;  %v7835_v26 = vpop.f32.mrf.mxu0 }
 0x1d7   : > { %v1814_v1 = vadd.f32 %v7835_v26, %v9950_v36  ;;  %v7915_v46 = vpop.f32.mrf.mxu1 }
 0x1d8   : > { %v10062_v41 = vpop.f32.mrf.mxu0 }
 0x1d9   : > { %12189 = vst [vmem:[#allocation48_spill] sm:$0xff] %v10062_v41  ;;  %v10064_v32 = vadd.f32 %v7915_v46, %v1814_v1  ;;  %v10066_v57 = vpop.f32.mrf.mxu1 }
 0x1da   : > { %12190 = vst [vmem:[#allocation49_spill] sm:$0xff] %v10066_v57  ;;  %v7838_v50 = vpop.f32.mrf.mxu0 }
 0x1db   : > { %v1816_v61 = vadd.f32 %v7838_v50, %v9957_v25  ;;  %v7918_v47 = vpop.f32.mrf.mxu1 }
 0x1dc   : > { %v10069_v10 = vpop.f32.mrf.mxu0 }
 0x1dd   : > { %12191 = vst [vmem:[#allocation50_spill] sm:$0xff] %v10069_v10  ;;  %v10071_v49 = vadd.f32 %v7918_v47, %v1816_v61  ;;  %v10073_v54 = vpop.f32.mrf.mxu1 }
 0x1de   : > { %12192 = vst [vmem:[#allocation51_spill] sm:$0xff] %v10073_v54  ;;  %v7841_v40 = vpop.f32.mrf.mxu0 }
 0x1df   : > { %v1818_v36 = vadd.f32 %v7841_v40, %v9964_v9  ;;  %v7921_v26 = vpop.f32.mrf.mxu1 }
 0x1e0   : > { %v10076_v4 = vpop.f32.mrf.mxu0 }
 0x1e1   : > { %12193 = vst [vmem:[#allocation52_spill] sm:$0xff] %v10076_v4  ;;  %v10078_v1 = vadd.f32 %v7921_v26, %v1818_v36  ;;  %v10080_v46 = vpop.f32.mrf.mxu1 }
 0x1e2   : > { %12194 = vst [vmem:[#allocation53_spill] sm:$0xff] %v10080_v46  ;;  %v7844_v57 = vpop.f32.mrf.mxu0 }
 0x1e3   : > { %v1820_v50 = vadd.f32 %v7844_v57, %v9971_v34  ;;  %v7924_v25 = vpop.f32.mrf.mxu1 }
 0x1e4   : > { %v10083_v41 = vpop.f32.mrf.mxu0 }
 0x1e5   : > { %12195 = vst [vmem:[#allocation54_spill] sm:$0xff] %v10083_v41  ;;  %v10085_v61 = vadd.f32 %v7924_v25, %v1820_v50  ;;  %v10087_v47 = vpop.f32.mrf.mxu1 }
 0x1e6   : > { %12196 = vst [vmem:[#allocation55_spill] sm:$0xff] %v10087_v47  ;;  %v7847_v54 = vpop.f32.mrf.mxu0 }
 0x1e7   : > { %v1822_v40 = vadd.f32 %v7847_v54, %v9978_v27  ;;  %v7927_v9 = vpop.f32.mrf.mxu1 }
 0x1e8   : > { %v10090_v10 = vpop.f32.mrf.mxu0 }
 0x1e9   : > { %12197 = vst [vmem:[#allocation56_spill] sm:$0xff] %v10090_v10  ;;  %v10092_v36 = vadd.f32 %v7927_v9, %v1822_v40  ;;  %v10094_v26 = vpop.f32.mrf.mxu1 }
 0x1ea   : > { %12198 = vst [vmem:[#allocation57_spill] sm:$0xff] %v10094_v26  ;;  %v7850_v46 = vpop.f32.mrf.mxu0 }
 0x1eb   : > { %v1824_v34 = vadd.f32 %v7850_v46, %v9985_v58  ;;  %v7930_v57 = vpop.f32.mrf.mxu1 }
 0x1ec   : > { %v10097_v4 = vpop.f32.mrf.mxu0 }
 0x1ed   : > { %12199 = vst [vmem:[#allocation58_spill] sm:$0xff] %v10097_v4  ;;  %v10099_v50 = vadd.f32 %v7930_v57, %v1824_v34  ;;  %v10101_v25 = vpop.f32.mrf.mxu1 }
 0x1ee   : > { %12200 = vst [vmem:[#allocation59_spill] sm:$0xff] %v10101_v25  ;;  %v7853_v47 = vpop.f32.mrf.mxu0 }
 0x1ef   : > { %v1826_v27 = vadd.f32 %v7853_v47, %v9993_v2  ;;  %v7933_v54 = vpop.f32.mrf.mxu1 }
 0x1f0   : > { %v10104_v41 = vpop.f32.mrf.mxu0 }
 0x1f1   : > { %12201 = vst [vmem:[#allocation60_spill] sm:$0xff] %v10104_v41  ;;  %v10106_v40 = vadd.f32 %v7933_v54, %v1826_v27  ;;  %v10108_v9 = vpop.f32.mrf.mxu1 }
 0x1f2   : > { %12202 = vst [vmem:[#allocation61_spill] sm:$0xff] %v10108_v9  ;;  %v7856_v26 = vpop.f32.mrf.mxu0 }
 0x1f3   : > { %v1828_v58 = vadd.f32 %v7856_v26, %v10001_v11  ;;  %v7936_v46 = vpop.f32.mrf.mxu1 }
 0x1f4   : > { %v10111_v10 = vpop.f32.mrf.mxu0 }
 0x1f5   : > { %12203 = vst [vmem:[#allocation62_spill] sm:$0xff] %v10111_v10  ;;  %v10113_v34 = vadd.f32 %v7936_v46, %v1828_v58  ;;  %v10115_v57 = vpop.f32.mrf.mxu1 }
 0x1f6   : > { %12204 = vst [vmem:[#allocation63_spill] sm:$0xff] %v10115_v57  ;;  %v7859_v25 = vpop.f32.mrf.mxu0 }
 0x1f7   : > { %v1830_v2 = vadd.f32 %v7859_v25, %v10008_v14  ;;  %v7939_v47 = vpop.f32.mrf.mxu1 }
 0x1f8   : > { %v10118_v4 = vpop.f32.mrf.mxu0 }
 0x1f9   : > { %12205 = vst [vmem:[#allocation64_spill] sm:$0xff] %v10118_v4  ;;  %v10120_v27 = vadd.f32 %v7939_v47, %v1830_v2  ;;  %v10122_v54 = vpop.f32.mrf.mxu1 }
 0x1fa   : > { %12206 = vst [vmem:[#allocation65_spill] sm:$0xff] %v10122_v54  ;;  %v7974_v9 = vpop.f32.mrf.mxu0 }
 0x1fb   : > { %v10125_v11 = vadd.f32 %v7974_v9, %v10015_v30  ;;  %v10127_v26 = vpop.f32.mrf.mxu1 }
 0x1fc   : > { %v10129_v58 = vpop.f32.mrf.mxu0 }
 0x1fd   : > { %v10131_v46 = vpop.f32.mrf.mxu1 }
 0x1fe   : > { %v7977_v57 = vpop.f32.mrf.mxu0 }
 0x1ff   : > { %v10134_v14 = vadd.f32 %v7977_v57, %v10022_v55  ;;  %v10138_v2 = vpop.f32.mrf.mxu1 }
 0x200   : > { %v10136_v25 = vpop.f32.mrf.mxu0 }
 0x201   : > { %v10143_v30 = vpop.f32.mrf.mxu1 }
 0x202   : > { %v7980_v47 = vpop.f32.mrf.mxu0 }
 0x203   : > { %v10141_v54 = vadd.f32 %v7980_v47, %v10029_v3  ;;  %v10150_v41 = vpop.f32.mrf.mxu1 }
 0x204   : > { %v10145_v9 = vpop.f32.mrf.mxu0 }
 0x205   : > { %v10157_v60 = vpop.f32.mrf.mxu1 }
 0x206   : > { %v7983_v4 = vpop.f32.mrf.mxu0 }
 0x207   : > { %v10148_v10 = vadd.f32 %v7983_v4, %v10036_v45  ;;  %v10164_v21 = vpop.f32.mrf.mxu1 }
 0x208   : > { %v10152_v55 = vpop.f32.mrf.mxu0 }
 0x209   : > { %v10171_v5 = vpop.f32.mrf.mxu1 }
 0x20a   : > { %v7986_v57 = vpop.f32.mrf.mxu0 }
 0x20b   : > { %v10155_v20 = vadd.f32 %v7986_v57, %v10043_v19  ;;  %v3538_v57 = vld [vmem:[#allocation8 + $0xf8] sm:$0xff] }
 0x20c   : > { %v10159_v3 = vpop.f32.mrf.mxu0  ;;  %8180 = vmatprep.subr.mxu1 %v3538_v57 }
 0x20d   : > { %12207 = vst [vmem:[#allocation66_spill] sm:$0xff] %v10155_v20  ;;  %8181 = vmatpush3.msra.mxu1 %v3538_v57 }
 0x20e   : > { %v7989_v47 = vpop.f32.mrf.mxu0  ;;  %8182 = vmatprep.subr.mxu1 %v3537_v38 }
 0x20f   : > { %v10162_v62 = vadd.f32 %v7989_v47, %v10050_v7  ;;  %v10178_v47 = vpop.f32.mrf.mxu1  ;;  %8183 = vmatpush3.msra.mxu1 %v3537_v38 }
 0x210   : > { %v10166_v45 = vpop.f32.mrf.mxu0 }
 0x211   : > { %12208 = vst [vmem:[#allocation67_spill] sm:$0xff] %v10162_v62  ;;  %12209 = vst [vmem:[#allocation68_spill] sm:$0xff] %v10166_v45  ;;  %v10185_v57 = vpop.f32.mrf.mxu1 }
 0x212   : > { %v7992_v4 = vpop.f32.mrf.mxu0 }
 0x213   : > { %v10169_v42 = vadd.f32 %v7992_v4, %v10057_v0  ;;  %v3536_v0 = vld [vmem:[#allocation8 + $0xe8] sm:$0xff] }
 0x214   : > { %v10173_v19 = vpop.f32.mrf.mxu0  ;;  %8184 = vmatprep.subr.mxu1 %v3536_v0 }
 0x215   : > { %12210 = vst [vmem:[#allocation69_spill] sm:$0xff] %v10169_v42  ;;  %12211 = vst [vmem:[#allocation70_spill] sm:$0xff] %v10173_v19  ;;  %8185 = vmatpush3.msra.mxu1 %v3536_v0  ;;  %v3535_v42 = vld [vmem:[#allocation8 + $0xe0] sm:$0xff]  ;;  %v10192_v0 = vpop.f32.mrf.mxu1 }
 0x216   : > { %v7995_v20 = vpop.f32.mrf.mxu0  ;;  %8186 = vmatprep.subr.mxu1 %v3535_v42 }
 0x217   : > { %v10176_v7 = vadd.f32 %v7995_v20, %v10064_v32  ;;  %8187 = vmatpush3.msra.mxu1 %v3535_v42  ;;  %v3534_v20 = vld [vmem:[#allocation8 + $0xd8] sm:$0xff] }
 0x218   : > { %v10180_v62 = vpop.f32.mrf.mxu0  ;;  %8188 = vmatprep.subr.mxu1 %v3534_v20 }
 0x219   : > { %12212 = vst [vmem:[#allocation71_spill] sm:$0xff] %v10176_v7  ;;  %12213 = vst [vmem:[#allocation72_spill] sm:$0xff] %v10180_v62  ;;  %8189 = vmatpush3.msra.mxu1 %v3534_v20  ;;  %v3533_v7 = vld [vmem:[#allocation8 + $0xd0] sm:$0xff]  ;;  %v10199_v20 = vpop.f32.mrf.mxu1 }
 0x21a   : > { %v7998_v4 = vpop.f32.mrf.mxu0  ;;  %8190 = vmatprep.subr.mxu1 %v3533_v7 }
 0x21b   : > { %v10183_v19 = vadd.f32 %v7998_v4, %v10071_v49  ;;  %8191 = vmatpush3.msra.mxu1 %v3533_v7  ;;  %v3532_v49 = vld [vmem:[#allocation8 + $0xc8] sm:$0xff]  ;;  %v3529_v7 = vld [vmem:[#allocation8 + $0xb0] sm:$0xff] }
 0x21c   : > { %v10187_v45 = vpop.f32.mrf.mxu0  ;;  %8192 = vmatprep.subr.mxu1 %v3532_v49 }
 0x21d   : > { %12214 = vst [vmem:[#allocation73_spill] sm:$0xff] %v10183_v19  ;;  %12215 = vst [vmem:[#allocation74_spill] sm:$0xff] %v10187_v45  ;;  %8193 = vmatpush3.msra.mxu1 %v3532_v49  ;;  %v3531_v19 = vld [vmem:[#allocation8 + $0xc0] sm:$0xff] }
 0x21e   : > { %v8001_v32 = vpop.f32.mrf.mxu0  ;;  %8194 = vmatprep.subr.mxu1 %v3531_v19 }
 0x21f   : > { %v10190_v38 = vadd.f32 %v8001_v32, %v10078_v1  ;;  %8195 = vmatpush3.msra.mxu1 %v3531_v19  ;;  %v3530_v1 = vld [vmem:[#allocation8 + $0xb8] sm:$0xff]  ;;  %v3528_v19 = vld [vmem:[#allocation8 + $0xa8] sm:$0xff] }
 0x220   : > { %v10194_v62 = vpop.f32.mrf.mxu0  ;;  %v3489_v32 = vld [vmem:[#allocation8 + $0x78] sm:$0xff]  ;;  %8196 = vmatprep.subr.mxu1 %v3530_v1 }
 0x221   : > { %12216 = vst [vmem:[#allocation75_spill] sm:$0xff] %v10190_v38  ;;  %12217 = vst [vmem:[#allocation76_spill] sm:$0xff] %v10194_v62  ;;  %8260 = vmatprep.subr.mxu0 %v3489_v32  ;;  %8197 = vmatpush3.msra.mxu1 %v3530_v1  ;;  %v3488_v62 = vld [vmem:[#allocation8 + $0x70] sm:$0xff]  ;;  %v3527_v1 = vld [vmem:[#allocation8 + $0xa0] sm:$0xff] }
 0x222   : > { %v8004_v4 = vpop.f32.mrf.mxu0  ;;  %8261 = vmatpush3.msra.mxu0 %v3489_v32  ;;  %8198 = vmatprep.subr.mxu1 %v3529_v7  ;;  %v3486_v32 = vld [vmem:[#allocation8 + $0x60] sm:$0xff] }
 0x223   : > { %v10197_v42 = vadd.f32 %v8004_v4, %v10085_v61  ;;  %8262 = vmatprep.subr.mxu0 %v3488_v62  ;;  %v10206_v61 = vpop.f32.mrf.mxu1  ;;  %8199 = vmatpush3.msra.mxu1 %v3529_v7  ;;  %v3485_v7 = vld [vmem:[#allocation8 + $0x58] sm:$0xff] }
 0x224   : > { %v10201_v45 = vpop.f32.mrf.mxu0  ;;  %8263 = vmatpush3.msra.mxu0 %v3488_v62  ;;  %8200 = vmatprep.subr.mxu1 %v3528_v19  ;;  %v3526_v62 = vld [vmem:[#allocation8 + $0x98] sm:$0xff] }
 0x225   : > { %12218 = vst [vmem:[#allocation77_spill] sm:$0xff] %v10197_v42  ;;  %12219 = vst [vmem:[#allocation78_spill] sm:$0xff] %v10201_v45  ;;  %v3487_v42 = vld [vmem:[#allocation8 + $0x68] sm:$0xff]  ;;  %8201 = vmatpush3.msra.mxu1 %v3528_v19  ;;  %v3525_v19 = vld [vmem:[#allocation8 + $0x90] sm:$0xff] }
 0x226   : > { %v8007_v38 = vpop.f32.mrf.mxu0  ;;  %8264 = vmatprep.subr.mxu0 %v3487_v42  ;;  %8202 = vmatprep.subr.mxu1 %v3527_v1 }
 0x227   : > { %v10204_v49 = vadd.f32 %v8007_v38, %v10092_v36  ;;  %8265 = vmatpush3.msra.mxu0 %v3487_v42  ;;  %v10213_v38 = vpop.f32.mrf.mxu1  ;;  %8203 = vmatpush3.msra.mxu1 %v3527_v1  ;;  %v3484_v42 = vld [vmem:[#allocation8 + $0x50] sm:$0xff] }
 0x228   : > { %v10208_v4 = vpop.f32.mrf.mxu0  ;;  %8266 = vmatprep.subr.mxu0 %v3486_v32  ;;  %8204 = vmatprep.subr.mxu1 %v3526_v62 }
 0x229   : > { %12220 = vst [vmem:[#allocation79_spill] sm:$0xff] %v10204_v49  ;;  %12221 = vst [vmem:[#allocation80_spill] sm:$0xff] %v10208_v4  ;;  %8267 = vmatpush3.msra.mxu0 %v3486_v32  ;;  %8205 = vmatpush3.msra.mxu1 %v3526_v62  ;;  %v3483_v32 = vld [vmem:[#allocation8 + $0x48] sm:$0xff] }
 0x22a   : > { %v8010_v45 = vpop.f32.mrf.mxu0  ;;  %8268 = vmatprep.subr.mxu0 %v3485_v7  ;;  %8206 = vmatprep.subr.mxu1 %v3525_v19 }
 0x22b   : > { %v10211_v36 = vadd.f32 %v8010_v45, %v10099_v50  ;;  %8269 = vmatpush3.msra.mxu0 %v3485_v7  ;;  %v1493_v50 = vadd.f32 %v9896_v16, %v9892_v6  ;;  %8207 = vmatpush3.msra.mxu1 %v3525_v19  ;;  %v3482_v6 = vld [vmem:[#allocation8 + $0x40] sm:$0xff] }
 0x22c   : > { %v10215_v49 = vpop.f32.mrf.mxu0  ;;  %8270 = vmatprep.subr.mxu0 %v3484_v42  ;;  %v3523_v16 = vld [vmem:[#allocation8 + $0x80] sm:$0xff] }
 0x22d   : > { %12222 = vst [vmem:[#allocation81_spill] sm:$0xff] %v10211_v36  ;;  %12223 = vst [vmem:[#allocation82_spill] sm:$0xff] %v10215_v49  ;;  %v10222_v36 = vpop.f32.mrf.mxu1  ;;  %8271 = vmatpush3.msra.mxu0 %v3484_v42  ;;  %v3524_v49 = vld [vmem:[#allocation8 + $0x88] sm:$0xff]  ;;  %v1799_v62 = vadd.f32 %v10013_v48, %v1493_v50  ;;  %v3481_v48 = vld [vmem:[#allocation8 + $0x38] sm:$0xff] }
 0x22e   : > { %v8013_v4 = vpop.f32.mrf.mxu0  ;;  %8272 = vmatprep.subr.mxu0 %v3483_v32  ;;  %8208 = vmatprep.subr.mxu1 %v3524_v49  ;;  %v3480_v50 = vld [vmem:[#allocation8 + $0x30] sm:$0xff] }
 0x22f   : > { %v10220_v45 = vadd.f32 %v8013_v4, %v10106_v40  ;;  %8273 = vmatpush3.msra.mxu0 %v3483_v32  ;;  %8209 = vmatpush3.msra.mxu1 %v3524_v49  ;;  %v1495_v40 = vadd.f32 %v9904_v56, %v9900_v22  ;;  %v10232_v42 = vpop.f32.mrf.mxu1  ;;  %v2105_v32 = vadd.f32 %v10017_v29, %v1799_v62 }
 0x230   : > { %v10224_v1 = vpop.f32.mrf.mxu0  ;;  %8274 = vmatprep.subr.mxu0 %v3482_v6  ;;  %8210 = vmatprep.subr.mxu1 %v3523_v16  ;;  %v1497_v22 = vadd.f32 %v9912_v24, %v9908_v28  ;;  %v1499_v24 = vadd.f32 %v9920_v35, %v9916_v15  ;;  %v3476_v15 = vld [vmem:[#allocation8 + $0x10] sm:$0xff] }
 0x231   : > { %12224 = vst [vmem:[#allocation83_spill] sm:$0xff] %v10220_v45  ;;  %8275 = vmatpush3.msra.mxu0 %v3482_v6  ;;  %8211 = vmatpush3.msra.mxu1 %v3523_v16  ;;  %v1801_v49 = vadd.f32 %v10020_v63, %v1495_v40  ;;  %v10238_v45 = vld [vmem:[#allocation8 + $0x178] sm:$0xff]  ;;  %v10248_v63 = vpop.f32.mrf.mxu1  ;;  %v3478_v16 = vld [vmem:[#allocation8 + $0x20] sm:$0xff] }
 0x232   : > { %v8016_v7 = vpop.f32.mrf.mxu0  ;;  %8276 = vmatprep.subr.mxu0 %v3481_v48  ;;  %8340 = vmatprep.subr.mxu1 %v10238_v45  ;;  %v1803_v29 = vadd.f32 %v10027_v44, %v1497_v22 }
 0x233   : > { %v10230_v4 = vadd.f32 %v8016_v7, %v10113_v34  ;;  %8277 = vmatpush3.msra.mxu0 %v3481_v48  ;;  %v3479_v34 = vld [vmem:[#allocation8 + $0x28] sm:$0xff]  ;;  %v2411_v7 = vadd.f32 %v10129_v58, %v2105_v32  ;;  %v2107_v28 = vadd.f32 %v10024_v59, %v1801_v49  ;;  %v3477_v58 = vld [vmem:[#allocation8 + $0x18] sm:$0xff]  ;;  %v1805_v32 = vadd.f32 %v10034_v12, %v1499_v24  ;;  %v10261_v59 = vpop.f32.mrf.mxu1 }
 0x234   : > { %v10234_v19 = vpop.f32.mrf.mxu0  ;;  %8278 = vmatprep.subr.mxu0 %v3480_v50  ;;  %v2720_v12 = vadd.f32 %v10138_v2, %v10134_v14 }
 0x235   : > { %8279 = vmatpush3.msra.mxu0 %v3480_v50  ;;  %v2717_v44 = vadd.f32 %v10131_v46, %v2411_v7  ;;  %v2413_v48 = vadd.f32 %v10136_v25, %v2107_v28  ;;  %v2109_v50 = vadd.f32 %v10031_v37, %v1803_v29  ;;  %v3475_v37 = vld [vmem:[#allocation8 + $0x8] sm:$0xff]  ;;  %v10277_v29 = vpop.f32.mrf.mxu1 }
 0x236   : > { %v8019_v56 = vpop.f32.mrf.mxu0  ;;  %8280 = vmatprep.subr.mxu0 %v3479_v34 }
 0x237   : > { %v10245_v6 = vadd.f32 %v8019_v56, %v10120_v27  ;;  %8281 = vmatpush3.msra.mxu0 %v3479_v34  ;;  %v2718_v27 = vadd.f32 %v10127_v26, %v10125_v11  ;;  %v1501_v11 = vadd.f32 %v9928_v17, %v9924_v43  ;;  %v2415_v26 = vadd.f32 %v10145_v9, %v2109_v50  ;;  %v3474_v17 = vld [vmem:[#allocation8] sm:$0xff] }
 0x238   : > { %v10250_v62 = vpop.f32.mrf.mxu0  ;;  %8282 = vmatprep.subr.mxu0 %v3478_v16  ;;  %v2719_v25 = vadd.f32 %v10143_v30, %v2413_v48  ;;  %v2111_v34 = vadd.f32 %v10038_v18, %v1805_v32  ;;  %v1503_v18 = vadd.f32 %v9936_v39, %v9932_v52  ;;  %v10298_v39 = vpop.f32.mrf.mxu1  ;;  %v1505_v32 = vadd.f32 %v9944_v23, %v9940_v31  ;;  %v12226_v31 = vld [vmem:[#allocation46_spill] sm:$0xff] }
 0x239   : > { %8283 = vmatpush3.msra.mxu0 %v3478_v16  ;;  %v1807_v7 = vadd.f32 %v10041_v53, %v1501_v11  ;;  %v2722_v53 = vadd.f32 %v10150_v41, %v10141_v54  ;;  %v2721_v16 = vadd.f32 %v10157_v60, %v2415_v26 }
 0x23a   : > { %v8134_v40 = vpop.f32.mrf.mxu0  ;;  %8284 = vmatprep.subr.mxu0 %v3477_v58  ;;  %v2417_v24 = vadd.f32 %v10152_v55, %v2111_v34  ;;  %v1809_v52 = vadd.f32 %v10048_v51, %v1503_v18  ;;  %v2724_v51 = vadd.f32 %v10164_v21, %v10148_v10  ;;  %v1811_v23 = vadd.f32 %v12226_v31, %v1505_v32 }
 0x23b   : > { %v10263_v35 = vadd.f32 %v8134_v40, %v2718_v27  ;;  %8285 = vmatpush3.msra.mxu0 %v3477_v58 }
 0x23c   : > { %v2864_v49 = vpop.f32.mrf.mxu0  ;;  %8286 = vmatprep.subr.mxu0 %v3476_v15 }
 0x23d   : > { %v10265_v22 = vadd.f32 %v2864_v49, %v2717_v44  ;;  %8287 = vmatpush3.msra.mxu0 %v3476_v15  ;;  %v3126_v9 = vmul.f32 %v10263_v35, %v10263_v35  ;;  %v2113_v44 = vadd.f32 %v10045_v33, %v1807_v7  ;;  %v2723_v15 = vadd.f32 %v10171_v5, %v2417_v24 }
 0x23e   : > { %v8137_v46 = vpop.f32.mrf.mxu0  ;;  %8288 = vmatprep.subr.mxu0 %v3475_v37 }
 0x23f   : > { %v3125_v56 = vmul.f32 %v10265_v22, %v10265_v22  ;;  %v3087_v14 = vadd.f32 %v10263_v35, %v10265_v22  ;;  %v10283_v2 = vadd.f32 %v8137_v46, %v2720_v12  ;;  %8289 = vmatpush3.msra.mxu0 %v3475_v37  ;;  %v2419_v33 = vadd.f32 %v10159_v3, %v2113_v44  ;;  %v12225_v12 = vld [vmem:[#allocation45_spill] sm:$0xff] }
 0x240   : > { %v2874_v43 = vpop.f32.mrf.mxu0  ;;  %8290 = vmatprep.subr.mxu0 %v3474_v17  ;;  %v835_v37 = vadd.f32 %v9840_v8, %v9838_v13  ;;  %v12229_v8 = vld [vmem:[#allocation29_spill] sm:$0xff] }
 0x241   : > { %v10285_v30 = vadd.f32 %v2874_v43, %v2719_v25  ;;  %v3157_v40 = vadd.f32 %v3126_v9, %v3125_v56  ;;  %8291 = vmatpush3.msra.mxu0 %v3474_v17  ;;  %v3128_v54 = vmul.f32 %v10283_v2, %v10283_v2  ;;  %v2115_v25 = vadd.f32 %v12225_v12, %v1809_v52  ;;  %v10320_v56 = vpop.f32.mrf.mxu1  ;;  %v12227_v43 = vld [vmem:[#allocation27_spill] sm:$0xff]  ;;  %v12228_v17 = vld [vmem:[#allocation28_spill] sm:$0xff]  ;;  %v12232_v44 = vld [vmem:[#allocation13_spill] sm:$0xff] }
 0x242   : > { %v8140_v28 = vpop.f32.mrf.mxu0  ;;  %v1507_v13 = vadd.f32 %v12228_v17, %v12227_v43  ;;  %v1203_v9 = vadd.f32 %v12229_v8, %v835_v37  ;;  %v12233_v52 = vld [vmem:[#allocation14_spill] sm:$0xff]  ;;  %v12237_v37 = vld [vmem:[#allocation31_spill] sm:$0xff]  ;;  %v12241_v8 = vld [vmem:[#allocation16_spill] sm:$0xff] }
 0x243   : > { %v3088_v58 = vadd.f32 %v3087_v14, %v10285_v30  ;;  %v3127_v27 = vmul.f32 %v10285_v30, %v10285_v30  ;;  %v10300_v41 = vadd.f32 %v8140_v28, %v2722_v53  ;;  %v12230_v14 = vld [vmem:[#allocation66_spill] sm:$0xff]  ;;  %v2725_v53 = vadd.f32 %v10185_v57, %v2419_v33  ;;  %v12231_v28 = vld [vmem:[#allocation68_spill] sm:$0xff] }
 0x244   : > { %v2884_v60 = vpop.f32.mrf.mxu0  ;;  %v2726_v18 = vadd.f32 %v10178_v47, %v12230_v14  ;;  %v2421_v24 = vadd.f32 %v12231_v28, %v2115_v25  ;;  %v12238_v25 = vld [vmem:[#allocation67_spill] sm:$0xff] }
 0x245   : > { %v3158_v55 = vadd.f32 %v3157_v40, %v3127_v27  ;;  %v10304_v48 = vadd.f32 %v2884_v60, %v2721_v16  ;;  %v3089_v50 = vadd.f32 %v3088_v58, %v10283_v2  ;;  %v3130_v21 = vmul.f32 %v10300_v41, %v10300_v41 }
 0x246   : > { %v8143_v49 = vpop.f32.mrf.mxu0  ;;  %v845_v60 = vadd.f32 %v12233_v52, %v12232_v44  ;;  %v2728_v31 = vadd.f32 %v10192_v0, %v12238_v25  ;;  %v12244_v44 = vld [vmem:[#allocation32_spill] sm:$0xff]  ;;  %v12249_v25 = vld [vmem:[#allocation18_spill] sm:$0xff] }
 0x247   : > { %v3090_v11 = vadd.f32 %v3089_v50, %v10304_v48  ;;  %v3129_v26 = vmul.f32 %v10304_v48, %v10304_v48  ;;  %v3159_v46 = vadd.f32 %v3158_v55, %v3128_v54  ;;  %v10324_v3 = vadd.f32 %v8143_v49, %v2724_v51  ;;  %v12234_v54 = vld [vmem:[#allocation47_spill] sm:$0xff]  ;;  %v12235_v50 = vld [vmem:[#allocation48_spill] sm:$0xff]  ;;  %v10343_v51 = vpop.f32.mrf.mxu1 }
 0x248   : > { %v2894_v10 = vpop.f32.mrf.mxu0  ;;  %v2117_v55 = vadd.f32 %v12234_v54, %v1811_v23  ;;  %v1813_v32 = vadd.f32 %v12235_v50, %v1507_v13  ;;  %v1205_v12 = vadd.f32 %v12237_v37, %v845_v60  ;;  %v12239_v23 = vld [vmem:[#allocation70_spill] sm:$0xff]  ;;  %v12240_v13 = vld [vmem:[#allocation15_spill] sm:$0xff]  ;;  %v12245_v60 = vld [vmem:[#allocation33_spill] sm:$0xff] }
 0x249   : > { %v3160_v5 = vadd.f32 %v3159_v46, %v3129_v26  ;;  %v10326_v34 = vadd.f32 %v2894_v10, %v2723_v15  ;;  %v3091_v7 = vadd.f32 %v3090_v11, %v10300_v41  ;;  %v3132_v33 = vmul.f32 %v10324_v3, %v10324_v3  ;;  %v12236_v26 = vld [vmem:[#allocation30_spill] sm:$0xff]  ;;  %v10365_v28 = vpop.f32.mrf.mxu1  ;;  %v12248_v37 = vld [vmem:[#allocation17_spill] sm:$0xff] }
 0x24a   : > { %v8146_v16 = vpop.f32.mrf.mxu0  ;;  %v1509_v46 = vadd.f32 %v12236_v26, %v1203_v9  ;;  %v855_v14 = vadd.f32 %v12241_v8, %v12240_v13  ;;  %v12242_v9 = vld [vmem:[#allocation49_spill] sm:$0xff]  ;;  %v1511_v52 = vadd.f32 %v12244_v44, %v1205_v12  ;;  %v12250_v12 = vld [vmem:[#allocation51_spill] sm:$0xff]  ;;  %v12252_v8 = vld [vmem:[#allocation34_spill] sm:$0xff] }
 0x24b   : > { %v3092_v40 = vadd.f32 %v3091_v7, %v10326_v34  ;;  %v3131_v58 = vmul.f32 %v10326_v34, %v10326_v34  ;;  %v3161_v27 = vadd.f32 %v3160_v5, %v3130_v21  ;;  %v10345_v47 = vadd.f32 %v8146_v16, %v2726_v18 }
 0x24c   : > { %v2904_v57 = vpop.f32.mrf.mxu0  ;;  %v2423_v21 = vadd.f32 %v12239_v23, %v2117_v55  ;;  %v2727_v5 = vadd.f32 %v10199_v20, %v2421_v24  ;;  %v2119_v18 = vadd.f32 %v12242_v9, %v1813_v32  ;;  %v1207_v54 = vadd.f32 %v12245_v60, %v855_v14  ;;  %v12246_v55 = vld [vmem:[#allocation69_spill] sm:$0xff]  ;;  %v12253_v9 = vld [vmem:[#allocation35_spill] sm:$0xff] }
 0x24d   : > { %v3162_v49 = vadd.f32 %v3161_v27, %v3131_v58  ;;  %v10349_v15 = vadd.f32 %v2904_v57, %v2725_v53  ;;  %v3093_v11 = vadd.f32 %v3092_v40, %v10324_v3  ;;  %v12243_v53 = vld [vmem:[#allocation50_spill] sm:$0xff]  ;;  %v3134_v0 = vmul.f32 %v10345_v47, %v10345_v47 }
 0x24e   : > { %v8149_v10 = vpop.f32.mrf.mxu0  ;;  %v1815_v16 = vadd.f32 %v12243_v53, %v1509_v46  ;;  %v2730_v50 = vadd.f32 %v10206_v61, %v12246_v55  ;;  %v2729_v32 = vadd.f32 %v10213_v38, %v2423_v21  ;;  %v1513_v14 = vadd.f32 %v12252_v8, %v1207_v54  ;;  %v12254_v53 = vld [vmem:[#allocation71_spill] sm:$0xff]  ;;  %v12258_v54 = vld [vmem:[#allocation53_spill] sm:$0xff] }
 0x24f   : > { %v3094_v7 = vadd.f32 %v3093_v11, %v10349_v15  ;;  %v3133_v43 = vmul.f32 %v10349_v15, %v10349_v15  ;;  %v3163_v17 = vadd.f32 %v3162_v49, %v3132_v33  ;;  %v10369_v24 = vadd.f32 %v8149_v10, %v2728_v31  ;;  %v12247_v33 = vld [vmem:[#allocation72_spill] sm:$0xff]  ;;  %v12256_v55 = vld [vmem:[#allocation19_spill] sm:$0xff] }
 0x250   : > { %v2914_v40 = vpop.f32.mrf.mxu0  ;;  %v2425_v49 = vadd.f32 %v12247_v33, %v2119_v18  ;;  %v865_v31 = vadd.f32 %v12249_v25, %v12248_v37  ;;  %v2121_v23 = vadd.f32 %v12250_v12, %v1815_v16  ;;  %v12251_v10 = vld [vmem:[#allocation52_spill] sm:$0xff]  ;;  %v2732_v16 = vadd.f32 %v10222_v36, %v12254_v53  ;;  %v12259_v33 = vld [vmem:[#allocation54_spill] sm:$0xff] }
 0x251   : > { %v3164_v20 = vadd.f32 %v3163_v17, %v3133_v43  ;;  %v10371_v58 = vadd.f32 %v2914_v40, %v2727_v5  ;;  %v3095_v27 = vadd.f32 %v3094_v7, %v10345_v47  ;;  %v1817_v5 = vadd.f32 %v12251_v10, %v1511_v52  ;;  %v10387_v7 = vpop.f32.mrf.mxu1 }
 0x252   : > { %v8152_v57 = vpop.f32.mrf.mxu0  ;;  %v3136_v21 = vmul.f32 %v10369_v24, %v10369_v24  ;;  %v1209_v18 = vadd.f32 %v12253_v9, %v865_v31  ;;  %v12260_v31 = vld [vmem:[#allocation36_spill] sm:$0xff] }
 0x253   : > { %v3096_v11 = vadd.f32 %v3095_v27, %v10371_v58  ;;  %v3135_v26 = vmul.f32 %v10371_v58, %v10371_v58  ;;  %v3165_v46 = vadd.f32 %v3164_v20, %v3134_v0  ;;  %v10389_v61 = vadd.f32 %v8152_v57, %v2730_v50  ;;  %v12255_v0 = vld [vmem:[#allocation74_spill] sm:$0xff]  ;;  %v12257_v50 = vld [vmem:[#allocation20_spill] sm:$0xff] }
 0x254   : > { %v2924_v38 = vpop.f32.mrf.mxu0  ;;  %v2427_v40 = vadd.f32 %v12255_v0, %v2121_v23  ;;  %v2731_v27 = vadd.f32 %v10232_v42, %v2425_v49  ;;  %v2123_v57 = vadd.f32 %v12258_v54, %v1817_v5  ;;  %v1515_v12 = vadd.f32 %v12260_v31, %v1209_v18  ;;  %v12261_v23 = vld [vmem:[#allocation37_spill] sm:$0xff]  ;;  %v12265_v0 = vld [vmem:[#allocation22_spill] sm:$0xff]  ;;  %v12266_v18 = vld [vmem:[#allocation55_spill] sm:$0xff] }
 0x255   : > { %v3166_v43 = vadd.f32 %v3165_v46, %v3135_v26  ;;  %v10393_v17 = vadd.f32 %v2924_v38, %v2729_v32  ;;  %v3097_v13 = vadd.f32 %v3096_v11, %v10369_v24  ;;  %v875_v32 = vadd.f32 %v12257_v50, %v12256_v55  ;;  %v10409_v26 = vpop.f32.mrf.mxu1  ;;  %v12262_v5 = vld [vmem:[#allocation73_spill] sm:$0xff]  ;;  %v12268_v54 = vld [vmem:[#allocation38_spill] sm:$0xff] }
 0x256   : > { %v8155_v20 = vpop.f32.mrf.mxu0  ;;  %v1819_v11 = vadd.f32 %v12259_v33, %v1513_v14  ;;  %v3138_v36 = vmul.f32 %v10389_v61, %v10389_v61  ;;  %v2734_v38 = vadd.f32 %v10248_v63, %v12262_v5  ;;  %v12269_v33 = vld [vmem:[#allocation39_spill] sm:$0xff] }
 0x257   : > { %v3098_v44 = vadd.f32 %v3097_v13, %v10393_v17  ;;  %v3137_v52 = vmul.f32 %v10393_v17, %v10393_v17  ;;  %v3167_v60 = vadd.f32 %v3166_v43, %v3136_v21  ;;  %v10413_v49 = vadd.f32 %v8155_v20, %v2732_v16  ;;  %v12263_v13 = vld [vmem:[#allocation76_spill] sm:$0xff]  ;;  %v12264_v16 = vld [vmem:[#allocation21_spill] sm:$0xff] }
 0x258   : > { %v2934_v46 = vpop.f32.mrf.mxu0  ;;  %v1211_v10 = vadd.f32 %v12261_v23, %v875_v32  ;;  %v2733_v21 = vadd.f32 %v10261_v59, %v2427_v40  ;;  %v2429_v8 = vadd.f32 %v12263_v13, %v2123_v57  ;;  %v885_v20 = vadd.f32 %v12265_v0, %v12264_v16 }
 0x259   : > { %v3168_v42 = vadd.f32 %v3167_v60, %v3137_v52  ;;  %v10415_v37 = vadd.f32 %v2934_v46, %v2731_v27  ;;  %v3099_v25 = vadd.f32 %v3098_v44, %v10389_v61  ;;  %v2125_v27 = vadd.f32 %v12266_v18, %v1819_v11  ;;  %v12267_v44 = vld [vmem:[#allocation56_spill] sm:$0xff]  ;;  %v10431_v60 = vpop.f32.mrf.mxu1  ;;  %v12270_v11 = vld [vmem:[#allocation75_spill] sm:$0xff] }
 0x25a   : > { %v8158_v43 = vpop.f32.mrf.mxu0  ;;  %v1821_v52 = vadd.f32 %v12267_v44, %v1515_v12  ;;  %v3140_v40 = vmul.f32 %v10413_v49, %v10413_v49  ;;  %v1517_v57 = vadd.f32 %v12268_v54, %v1211_v10  ;;  %v2736_v46 = vadd.f32 %v10277_v29, %v12270_v11  ;;  %v10445_v12 = vld [vmem:[#allocation8 + $0x1f8] sm:$0xff]  ;;  %v12272_v10 = vld [vmem:[#allocation23_spill] sm:$0xff] }
 0x25b   : > { %v3100_v14 = vadd.f32 %v3099_v25, %v10415_v37  ;;  %v3139_v9 = vmul.f32 %v10415_v37, %v10415_v37  ;;  %v3169_v53 = vadd.f32 %v3168_v42, %v3138_v36  ;;  %v10433_v63 = vadd.f32 %v8158_v43, %v2734_v38  ;;  %v12271_v42 = vld [vmem:[#allocation78_spill] sm:$0xff]  ;;  %8420 = vmatprep.subr.mxu0 %v10445_v12  ;;  %v12273_v43 = vld [vmem:[#allocation24_spill] sm:$0xff]  ;;  %v8093_v16 = vpop.f32.mrf.mxu1 }
 0x25c   : > { %v2944_v59 = vpop.f32.mrf.mxu0  ;;  %v1213_v36 = vadd.f32 %v12269_v33, %v885_v20  ;;  %v2431_v25 = vadd.f32 %v12271_v42, %v2125_v27  ;;  %v2735_v23 = vadd.f32 %v10298_v39, %v2429_v8  ;;  %v895_v13 = vadd.f32 %v12273_v43, %v12272_v10  ;;  %v12276_v44 = vld [vmem:[#allocation40_spill] sm:$0xff] }
 0x25d   : > { %v3170_v55 = vadd.f32 %v3169_v53, %v3139_v9  ;;  %v10437_v50 = vadd.f32 %v2944_v59, %v2733_v21  ;;  %v3101_v32 = vadd.f32 %v3100_v14, %v10413_v49  ;;  %v12274_v14 = vld [vmem:[#allocation57_spill] sm:$0xff]  ;;  %v12275_v9 = vld [vmem:[#allocation58_spill] sm:$0xff]  ;;  %v3142_v0 = vmul.f32 %v10433_v63, %v10433_v63  ;;  %v12279_v33 = vld [vmem:[#allocation80_spill] sm:$0xff] }
 0x25e   : > { %v8161_v31 = vpop.f32.mrf.mxu0  ;;  %v2127_v29 = vadd.f32 %v12274_v14, %v1821_v52  ;;  %v1823_v53 = vadd.f32 %v12275_v9, %v1517_v57  ;;  %v1519_v59 = vadd.f32 %v12276_v44, %v1213_v36  ;;  %v2737_v54 = vadd.f32 %v10343_v51, %v2431_v25  ;;  %v12282_v36 = vld [vmem:[#allocation59_spill] sm:$0xff]  ;;  %v12283_v10 = vld [vmem:[#allocation60_spill] sm:$0xff] }
 0x25f   : > { %v3102_v5 = vadd.f32 %v3101_v32, %v10437_v50  ;;  %v3141_v38 = vmul.f32 %v10437_v50, %v10437_v50  ;;  %v3171_v21 = vadd.f32 %v3170_v55, %v3140_v40  ;;  %v10458_v20 = vadd.f32 %v8161_v31, %v2736_v46  ;;  %v12277_v40 = vld [vmem:[#allocation41_spill] sm:$0xff]  ;;  %v12286_v44 = vld [vmem:[#allocation79_spill] sm:$0xff] }
 0x260   : > { %v2954_v39 = vpop.f32.mrf.mxu0  ;;  %v1215_v55 = vadd.f32 %v12277_v40, %v895_v13  ;;  %v12278_v32 = vld [vmem:[#allocation77_spill] sm:$0xff]  ;;  %v2433_v11 = vadd.f32 %v12279_v33, %v2127_v29  ;;  %v1825_v43 = vadd.f32 %v12283_v10, %v1519_v59  ;;  %v2688_v13 = vpop.f32.mrf.mxu1  ;;  %v12287_v59 = vld [vmem:[#allocation82_spill] sm:$0xff] }
 0x261   : > { %v3172_v8 = vadd.f32 %v3171_v21, %v3141_v38  ;;  %v10460_v18 = vadd.f32 %v2954_v39, %v2735_v23  ;;  %v3103_v27 = vadd.f32 %v3102_v5, %v10433_v63  ;;  %v2738_v52 = vadd.f32 %v10320_v56, %v12278_v32  ;;  %v12280_v23 = vld [vmem:[#allocation25_spill] sm:$0xff]  ;;  %v12281_v5 = vld [vmem:[#allocation26_spill] sm:$0xff] }
 0x262   : > { %v8164_v57 = vpop.f32.mrf.mxu0  ;;  %v905_v38 = vadd.f32 %v12281_v5, %v12280_v23  ;;  %v2129_v21 = vadd.f32 %v12282_v36, %v1823_v53  ;;  %v3144_v25 = vmul.f32 %v10458_v20, %v10458_v20  ;;  %v2740_v53 = vadd.f32 %v10365_v28, %v12286_v44  ;;  %v8096_v23 = vpop.f32.mrf.mxu1  ;;  %v12292_v44 = vld [vmem:[#allocation63_spill] sm:$0xff] }
 0x263   : > { %v3104_v42 = vadd.f32 %v3103_v27, %v10460_v18  ;;  %v3143_v46 = vmul.f32 %v10460_v18, %v10460_v18  ;;  %v3173_v31 = vadd.f32 %v3172_v8, %v3142_v0  ;;  %v10476_v56 = vadd.f32 %v8164_v57, %v2738_v52  ;;  %v12284_v0 = vld [vmem:[#allocation42_spill] sm:$0xff]  ;;  %v12285_v8 = vld [vmem:[#allocation43_spill] sm:$0xff] }
 0x264   : > { %v2964_v51 = vpop.f32.mrf.mxu0  ;;  %v1521_v39 = vadd.f32 %v12284_v0, %v1215_v55  ;;  %v1217_v27 = vadd.f32 %v12285_v8, %v905_v38  ;;  %v2435_v40 = vadd.f32 %v12287_v59, %v2129_v21  ;;  %v2739_v52 = vadd.f32 %v10387_v7, %v2433_v11  ;;  %v12290_v11 = vld [vmem:[#allocation44_spill] sm:$0xff] }
 0x265   : > { %v3174_v14 = vadd.f32 %v3173_v31, %v3143_v46  ;;  %v10480_v29 = vadd.f32 %v2964_v51, %v2737_v54  ;;  %v3105_v9 = vadd.f32 %v3104_v42, %v10458_v20  ;;  %v12288_v46 = vld [vmem:[#allocation61_spill] sm:$0xff]  ;;  %v12289_v31 = vld [vmem:[#allocation62_spill] sm:$0xff]  ;;  %v3146_v5 = vmul.f32 %v10476_v56, %v10476_v56  ;;  %v12293_v59 = vld [vmem:[#allocation64_spill] sm:$0xff] }
 0x266   : > { %v8167_v32 = vpop.f32.mrf.mxu0  ;;  %v2131_v42 = vadd.f32 %v12288_v46, %v1825_v43  ;;  %v1827_v55 = vadd.f32 %v12289_v31, %v1521_v39  ;;  %v1523_v10 = vadd.f32 %v12290_v11, %v1217_v27  ;;  %v12291_v51 = vld [vmem:[#allocation81_spill] sm:$0xff]  ;;  %v2741_v43 = vadd.f32 %v10431_v60, %v2435_v40 }
 0x267   : > { %v3106_v57 = vadd.f32 %v3105_v9, %v10480_v29  ;;  %v3145_v54 = vmul.f32 %v10480_v29, %v10480_v29  ;;  %v3175_v33 = vadd.f32 %v3174_v14, %v3144_v25  ;;  %v10496_v36 = vadd.f32 %v8167_v32, %v2740_v53 }
 0x268   : > { %v2974_v28 = vpop.f32.mrf.mxu0  ;;  %v2742_v25 = vadd.f32 %v10409_v26, %v12291_v51  ;;  %v2437_v9 = vadd.f32 %v10224_v1, %v2131_v42  ;;  %v2133_v53 = vadd.f32 %v12292_v44, %v1827_v55  ;;  %v1829_v32 = vadd.f32 %v12293_v59, %v1523_v10 }
 0x269   : > { %v3176_v38 = vadd.f32 %v3175_v33, %v3145_v54  ;;  %v10498_v21 = vadd.f32 %v2974_v28, %v2739_v52  ;;  %v3107_v7 = vadd.f32 %v3106_v57, %v10476_v56  ;;  %v2698_v52 = vpop.f32.mrf.mxu1  ;;  %v3148_v26 = vmul.f32 %v10496_v36, %v10496_v36  ;;  %v12294_v54 = vld [vmem:[#allocation83_spill] sm:$0xff] }
 0x26a   : > { %v8170_v14 = vpop.f32.mrf.mxu0  ;;  %v2744_v33 = vadd.f32 %v8093_v16, %v12294_v54  ;;  %v2439_v46 = vadd.f32 %v10234_v19, %v2133_v53  ;;  %v2743_v31 = vadd.f32 %v2688_v13, %v2437_v9  ;;  %v2746_v13 = vadd.f32 %v8096_v23, %v10230_v4 }
 0x26b   : > { %v3108_v0 = vadd.f32 %v3107_v7, %v10498_v21  ;;  %v3147_v39 = vmul.f32 %v10498_v21, %v10498_v21  ;;  %v3177_v8 = vadd.f32 %v3176_v38, %v3146_v5  ;;  %v10511_v27 = vadd.f32 %v8170_v14, %v2742_v25  ;;  %v12295_v38 = vld [vmem:[#allocation65_spill] sm:$0xff]  ;;  %v8099_v11 = vpop.f32.mrf.mxu1 }
 0x26c   : > { %v2984_v57 = vpop.f32.mrf.mxu0  ;;  %v2135_v7 = vadd.f32 %v12295_v38, %v1829_v32  ;;  %v2745_v14 = vadd.f32 %v2698_v52, %v2439_v46 }
 0x26d   : > { %v3178_v60 = vadd.f32 %v3177_v8, %v3147_v39  ;;  %v10515_v40 = vadd.f32 %v2984_v57, %v2741_v43  ;;  %v3109_v1 = vadd.f32 %v3108_v0, %v10496_v36  ;;  %v3150_v10 = vmul.f32 %v10511_v27, %v10511_v27  ;;  %v2708_v53 = vpop.f32.mrf.mxu1 }
 0x26e   : > { %v8173_v42 = vpop.f32.mrf.mxu0  ;;  %v2441_v0 = vadd.f32 %v10250_v62, %v2135_v7  ;;  %v2748_v62 = vadd.f32 %v8099_v11, %v10245_v6 }
 0x26f   : > { %v3110_v55 = vadd.f32 %v3109_v1, %v10515_v40  ;;  %v3149_v5 = vmul.f32 %v10515_v40, %v10515_v40  ;;  %v3179_v28 = vadd.f32 %v3178_v60, %v3148_v26  ;;  %v10526_v43 = vadd.f32 %v8173_v42, %v2744_v33 }
 0x270   : > { %v2994_v51 = vpop.f32.mrf.mxu0  ;;  %v2747_v52 = vadd.f32 %v2708_v53, %v2441_v0 }
 0x271   : > { %v3180_v25 = vadd.f32 %v3179_v28, %v3149_v5  ;;  %v10528_v16 = vadd.f32 %v2994_v51, %v2743_v31  ;;  %v3111_v19 = vadd.f32 %v3110_v55, %v10511_v27  ;;  %v3152_v57 = vmul.f32 %v10526_v43, %v10526_v43 }
 0x272   : > { %v8176_v9 = vpop.f32.mrf.mxu0 }
 0x273   : > { %v3112_v39 = vadd.f32 %v3111_v19, %v10528_v16  ;;  %v3151_v8 = vmul.f32 %v10528_v16, %v10528_v16  ;;  %v3181_v44 = vadd.f32 %v3180_v25, %v3150_v10  ;;  %v10536_v59 = vadd.f32 %v8176_v9, %v2746_v13 }
 0x274   : > { %v3004_v32 = vpop.f32.mrf.mxu0 }
 0x275   : > { %v3182_v26 = vadd.f32 %v3181_v44, %v3151_v8  ;;  %v10540_v60 = vadd.f32 %v3004_v32, %v2745_v14  ;;  %v3113_v4 = vadd.f32 %v3112_v39, %v10526_v43  ;;  %v3154_v46 = vmul.f32 %v10536_v59, %v10536_v59 }
 0x276   : > { %v8179_v23 = vpop.f32.mrf.mxu0 }
 0x277   : > { %v3114_v1 = vadd.f32 %v3113_v4, %v10540_v60  ;;  %v3153_v54 = vmul.f32 %v10540_v60, %v10540_v60  ;;  %v3183_v33 = vadd.f32 %v3182_v26, %v3152_v57  ;;  %v10549_v55 = vadd.f32 %v8179_v23, %v2748_v62 }
 0x278   : > { %v3014_v42 = vpop.f32.mrf.mxu0 }
 0x279   : > { %v3184_v31 = vadd.f32 %v3183_v33, %v3153_v54  ;;  %v3053_v5 = vadd.f32 %v3014_v42, %v2747_v52  ;;  %v3115_v28 = vadd.f32 %v3114_v1, %v10536_v59  ;;  %v3156_v11 = vmul.f32 %v10549_v55, %v10549_v55 }
 0x27b   : > { %v3116_v38 = vadd.f32 %v3115_v28, %v3053_v5  ;;  %v3155_v6 = vmul.f32 %v3053_v5, %v3053_v5  ;;  %v3185_v7 = vadd.f32 %v3184_v31, %v3154_v46 }
 0x27d   : > { %v3117_v10 = vadd.f32 %v3116_v38, %v10549_v55  ;;  %v3186_v51 = vadd.f32 %v3185_v7, %v3155_v6 }
 0x27f   : > { %v3118_v25 = vrot.slane %v3117_v10, 4  ;;  %v3187_v19 = vadd.f32 %v3186_v51, %v3156_v11 }
 0x281   : > { %v3119_v13 = vadd.f32 %v3118_v25, %v3117_v10  ;;  %v3188_v14 = vrot.slane %v3187_v19, 4 }
 0x283   : > { %v3120_v9 = vrot.slane %v3119_v13, 2  ;;  %v3189_v0 = vadd.f32 %v3188_v14, %v3187_v19 }
 0x285   : > { %v3121_v39 = vadd.f32 %v3120_v9, %v3119_v13  ;;  %v3190_v8 = vrot.slane %v3189_v0, 2 }
 0x287   : > { %v3122_v44 = vrot.slane %v3121_v39, 1  ;;  %v3191_v53 = vadd.f32 %v3190_v8, %v3189_v0 }
 0x289   : > { %v3123_v32 = vadd.f32 %v3122_v44, %v3121_v39  ;;  %v3192_v57 = vrot.slane %v3191_v53, 1 }
 0x28b   : > { %v3193_v26 = vadd.f32 %v3192_v57, %v3191_v53  ;;  %v10555_v4 = vmul.f32 0.00390625, %v3123_v32 }
 0x28d   : > { %v3196_v62 = vmul.f32 0.00390625, %v3193_v26  ;;  %v3197_v23 = vmul.f32 %v10555_v4, %v10555_v4  ;;  %v3264_v52 = vsub.f32 %v3053_v5, %v10555_v4  ;;  %v3244_v54 = vsub.f32 %v10371_v58, %v10555_v4 }
 0x28e   : > { %v3245_v33 = vsub.f32 %v10369_v24, %v10555_v4  ;;  %v3246_v42 = vsub.f32 %v10393_v17, %v10555_v4  ;;  %v3247_v31 = vsub.f32 %v10389_v61, %v10555_v4  ;;  %v3248_v28 = vsub.f32 %v10415_v37, %v10555_v4 }
 0x28f   : > { %v3198_v1 = vsub.f32 %v3196_v62, %v3197_v23  ;;  %v3249_v5 = vsub.f32 %v10413_v49, %v10555_v4  ;;  %v3250_v38 = vsub.f32 %v10437_v50, %v10555_v4  ;;  %v3251_v58 = vsub.f32 %v10433_v63, %v10555_v4 }
 0x290   : > { %v3252_v24 = vsub.f32 %v10460_v18, %v10555_v4  ;;  %v3253_v17 = vsub.f32 %v10458_v20, %v10555_v4  ;;  %v3254_v61 = vsub.f32 %v10480_v29, %v10555_v4  ;;  %v3255_v37 = vsub.f32 %v10476_v56, %v10555_v4 }
 0x291   : > { %v3199_v46 = vmax.f32 %v3198_v1, 0.0  ;;  %v3256_v49 = vsub.f32 %v10498_v21, %v10555_v4  ;;  %v3257_v50 = vsub.f32 %v10496_v36, %v10555_v4  ;;  %v3258_v63 = vsub.f32 %v10515_v40, %v10555_v4 }
 0x292   : > { %v3259_v18 = vsub.f32 %v10511_v27, %v10555_v4  ;;  %v3260_v20 = vsub.f32 %v10528_v16, %v10555_v4  ;;  %v3261_v29 = vsub.f32 %v10526_v43, %v10555_v4  ;;  %v3262_v56 = vsub.f32 %v10540_v60, %v10555_v4 }
 0x293   : > { %v3200_v6 = vadd.f32 1e-05, %v3199_v46  ;;  %v3263_v21 = vsub.f32 %v10536_v59, %v10555_v4  ;;  %v3265_v36 = vsub.f32 %v10549_v55, %v10555_v4  ;;  %v3234_v40 = vsub.f32 %v10265_v22, %v10555_v4 }
 0x294   : > { %v3235_v27 = vsub.f32 %v10263_v35, %v10555_v4  ;;  %v3236_v16 = vsub.f32 %v10285_v30, %v10555_v4  ;;  %v3237_v43 = vsub.f32 %v10283_v2, %v10555_v4  ;;  %v3238_v60 = vsub.f32 %v10304_v48, %v10555_v4 }
 0x295   : > { %8971 = vrsqrt.f32 %v3200_v6  ;;  %v3239_v59 = vsub.f32 %v10300_v41, %v10555_v4  ;;  %v3240_v55 = vsub.f32 %v10326_v34, %v10555_v4  ;;  %v3241_v22 = vsub.f32 %v10324_v3, %v10555_v4 }
 0x296   : > { %v3242_v35 = vsub.f32 %v10349_v15, %v10555_v4  ;;  %v3243_v30 = vsub.f32 %v10345_v47, %v10555_v4 }
 0x2a2   : > { %v8972_v7 = vpop.eup %8971 }
 0x2a3   : > { %v3296_v2 = vmul.f32 %v8972_v7, %v3264_v52  ;;  %v10622_v11 = vmul.f32 %v8972_v7, %v3234_v40  ;;  %v10624_v48 = vmul.f32 %v8972_v7, %v3235_v27  ;;  %v3268_v10 = vmul.f32 %v8972_v7, %v3236_v16  ;;  %v4035_v16 = vld [vmem:[#allocation8 + $0x168] sm:$0xff] }
 0x2a4   : > { %v3269_v41 = vmul.f32 %v8972_v7, %v3237_v43  ;;  %v10626_v51 = vmul.f32 %v8972_v7, %v3238_v60  ;;  %v10628_v25 = vmul.f32 %v8972_v7, %v3239_v59  ;;  %v10630_v34 = vmul.f32 %v8972_v7, %v3240_v55 }
 0x2a5   : > { %v3328_v3 = vmax.f32 %v3296_v2, 0.0  ;;  %v10632_v19 = vmul.f32 %v8972_v7, %v3241_v22  ;;  %v10634_v15 = vmul.f32 %v8972_v7, %v3242_v35  ;;  %v10636_v13 = vmul.f32 %v8972_v7, %v3243_v30  ;;  %v4034_v2 = vld [vmem:[#allocation8 + $0x160] sm:$0xff] }
 0x2a6   : > { %v10638_v47 = vmul.f32 %v8972_v7, %v3244_v54  ;;  %v10640_v14 = vmul.f32 %v8972_v7, %v3245_v33  ;;  %v10642_v9 = vmul.f32 %v8972_v7, %v3246_v42  ;;  %v10644_v0 = vmul.f32 %v8972_v7, %v3247_v31 }
 0x2a7   : > { %3360 = vst [vmem:[#allocation2 + $0x181] sm:$0xff] %v3328_v3  ;;  %v10646_v39 = vmul.f32 %v8972_v7, %v3248_v28  ;;  %v10648_v8 = vmul.f32 %v8972_v7, %v3249_v5  ;;  %v10650_v44 = vmul.f32 %v8972_v7, %v3250_v38  ;;  %v10652_v53 = vmul.f32 %v8972_v7, %v3251_v58 }
 0x2a8   : > { %v10654_v32 = vmul.f32 %v8972_v7, %v3252_v24  ;;  %v10656_v57 = vmul.f32 %v8972_v7, %v3253_v17  ;;  %v10658_v26 = vmul.f32 %v8972_v7, %v3254_v61  ;;  %v10660_v4 = vmul.f32 %v8972_v7, %v3255_v37 }
 0x2a9   : > { %v10662_v62 = vmul.f32 %v8972_v7, %v3256_v49  ;;  %v10664_v23 = vmul.f32 %v8972_v7, %v3257_v50  ;;  %v10666_v52 = vmul.f32 %v8972_v7, %v3258_v63  ;;  %v10668_v1 = vmul.f32 %v8972_v7, %v3259_v18  ;;  %v4036_v63 = vld [vmem:[#allocation8 + $0x170] sm:$0xff] }
 0x2aa   : > { %v10670_v54 = vmul.f32 %v8972_v7, %v3260_v20  ;;  %v10672_v33 = vmul.f32 %v8972_v7, %v3261_v29  ;;  %v10674_v46 = vmul.f32 %v8972_v7, %v3262_v56  ;;  %v10676_v42 = vmul.f32 %v8972_v7, %v3263_v21 }
 0x2ab   : > { %v10678_v31 = vmul.f32 %v8972_v7, %v3265_v36  ;;  %v3298_v28 = vmax.f32 %v10622_v11, 0.0  ;;  %v3299_v5 = vmax.f32 %v10624_v48, 0.0  ;;  %v10682_v38 = vmax.f32 %v3268_v10, 0.0 }
 0x2ac   : > { %v10684_v58 = vmax.f32 %v3269_v41, 0.0  ;;  %v3302_v24 = vmax.f32 %v10626_v51, 0.0  ;;  %v3303_v6 = vmax.f32 %v10628_v25, 0.0  ;;  %v3304_v17 = vmax.f32 %v10630_v34, 0.0  ;;  %v4029_v25 = vld [vmem:[#allocation8 + $0x138] sm:$0xff]  ;;  %v4342_v34 = vld [vmem:[#allocation8 + $0x1f0] sm:$0xff] }
 0x2ad   : > { %v3305_v61 = vmax.f32 %v10632_v19, 0.0  ;;  %v3306_v37 = vmax.f32 %v10634_v15, 0.0  ;;  %v3307_v49 = vmax.f32 %v10636_v13, 0.0  ;;  %v3308_v50 = vmax.f32 %v10638_v47, 0.0  ;;  %3330 = vst [vmem:[#allocation2 + $0x19] sm:$0xff] %v3298_v28  ;;  %3331 = vst [vmem:[#allocation2 + $0x21] sm:$0xff] %v3299_v5  ;;  %8212 = vmatprep.mubr.f32.mxu1 %v10682_v38 }
 0x2ae   : > { %3332 = vst [vmem:[#allocation2 + $0x31] sm:$0xff] %v10682_v38  ;;  %3364 = vst [vmem:[#allocation2 + $0x1] sm:$0xff] %v10682_v38  ;;  %v3309_v18 = vmax.f32 %v10640_v14, 0.0  ;;  %v3310_v20 = vmax.f32 %v10642_v9, 0.0  ;;  %v3311_v29 = vmax.f32 %v10644_v0, 0.0  ;;  %v3312_v56 = vmax.f32 %v10646_v39, 0.0  ;;  %8213 = vmatmul.mubr.f32.vlgmr.msra.gmra.mxu1 %v10684_v58 }
 0x2af   : > { %3333 = vst [vmem:[#allocation2 + $0x39] sm:$0xff] %v10684_v58  ;;  %3334 = vst [vmem:[#allocation2 + $0x49] sm:$0xff] %v3302_v24  ;;  %v3313_v21 = vmax.f32 %v10648_v8, 0.0  ;;  %v3314_v36 = vmax.f32 %v10650_v44, 0.0  ;;  %v3315_v40 = vmax.f32 %v10652_v53, 0.0  ;;  %v3316_v27 = vmax.f32 %v10654_v32, 0.0  ;;  %8215 = vmatprep.mubr.f32.mxu1 %v3298_v28  ;;  %8341 = vmatpush3.msra.mxu1 %v10238_v45 }
 0x2b0   : > { %3335 = vst [vmem:[#allocation2 + $0x51] sm:$0xff] %v3303_v6  ;;  %3336 = vst [vmem:[#allocation2 + $0x61] sm:$0xff] %v3304_v17  ;;  %v3317_v43 = vmax.f32 %v10656_v57, 0.0  ;;  %v3318_v60 = vmax.f32 %v10658_v26, 0.0  ;;  %v3319_v59 = vmax.f32 %v10660_v4, 0.0  ;;  %v3320_v7 = vmax.f32 %v10662_v62, 0.0  ;;  %8342 = vmatprep.subr.mxu1 %v4036_v63 }
 0x2b1   : > { %3365 = vst [vmem:[#allocation2 + $0x9] sm:$0xff] %v10684_v58  ;;  %3337 = vst [vmem:[#allocation2 + $0x69] sm:$0xff] %v3305_v61  ;;  %v3386_v45 = vld [vmem:[#allocation2 + $0x182] sm:$0x1]  ;;  %v3321_v55 = vmax.f32 %v10664_v23, 0.0  ;;  %v3322_v22 = vmax.f32 %v10666_v52, 0.0  ;;  %8343 = vmatpush3.msra.mxu1 %v4036_v63 }
 0x2b2   : > { %3338 = vst [vmem:[#allocation2 + $0x79] sm:$0xff] %v3306_v37  ;;  %3339 = vst [vmem:[#allocation2 + $0x81] sm:$0xff] %v3307_v49  ;;  %v3323_v35 = vmax.f32 %v10668_v1, 0.0  ;;  %v3324_v30 = vmax.f32 %v10670_v54, 0.0  ;;  %v3325_v11 = vmax.f32 %v10672_v33, 0.0  ;;  %v3326_v10 = vmax.f32 %v10674_v46, 0.0  ;;  %8216 = vmatmul.mubr.f32.gmra.mxu1 %v3299_v5  ;;  %8344 = vmatprep.subr.mxu1 %v4035_v16 }
 0x2b3   : > { %3340 = vst [vmem:[#allocation2 + $0x91] sm:$0xff] %v3308_v50  ;;  %3341 = vst [vmem:[#allocation2 + $0x99] sm:$0xff] %v3309_v18  ;;  %v3327_v41 = vmax.f32 %v10676_v42, 0.0  ;;  %v3329_v3 = vmax.f32 %v10678_v31, 0.0  ;;  %8218 = vmatprep.mubr.f32.mxu1 %v10682_v38  ;;  %8345 = vmatpush3.msra.mxu1 %v4035_v16  ;;  %v4033_v31 = vld [vmem:[#allocation8 + $0x158] sm:$0xff]  ;;  %v4032_v38 = vld [vmem:[#allocation8 + $0x150] sm:$0xff] }
 0x2b4   : > { %3342 = vst [vmem:[#allocation2 + $0xa9] sm:$0xff] %v3310_v20  ;;  %3343 = vst [vmem:[#allocation2 + $0xb1] sm:$0xff] %v3311_v29  ;;  %v3371_v28 = vld [vmem:[#allocation2 + $0x1a] sm:$0x1]  ;;  %8346 = vmatprep.subr.mxu1 %v4034_v2  ;;  %v4340_v47 = vld [vmem:[#allocation8 + $0x1e0] sm:$0xff] }
 0x2b5   : > { %3344 = vst [vmem:[#allocation2 + $0xc1] sm:$0xff] %v3312_v56  ;;  %3345 = vst [vmem:[#allocation2 + $0xc9] sm:$0xff] %v3313_v21  ;;  %v3370_v48 = vld [vmem:[#allocation2 + $0x2] sm:$0x1]  ;;  %v3372_v5 = vld [vmem:[#allocation2 + $0x32] sm:$0x1]  ;;  %8347 = vmatpush3.msra.mxu1 %v4034_v2 }
 0x2b6   : > { %3346 = vst [vmem:[#allocation2 + $0xd9] sm:$0xff] %v3314_v36  ;;  %3347 = vst [vmem:[#allocation2 + $0xe1] sm:$0xff] %v3315_v40  ;;  %8219 = vmatmul.mubr.f32.gmra.mxu1 %v10684_v58  ;;  %8348 = vmatprep.subr.mxu1 %v4033_v31  ;;  %v3373_v63 = vld [vmem:[#allocation2 + $0x4a] sm:$0x1]  ;;  %v4030_v2 = vld [vmem:[#allocation8 + $0x140] sm:$0xff] }
 0x2b7   : > { %3348 = vst [vmem:[#allocation2 + $0xf1] sm:$0xff] %v3316_v27  ;;  %3404 = vst [vmem:[#allocation2 + $0x180] sm:$0x1] %v3386_v45  ;;  %v3374_v16 = vld [vmem:[#allocation2 + $0x62] sm:$0x1]  ;;  %8221 = vmatprep.mubr.f32.mxu1 %v3302_v24  ;;  %8349 = vmatpush3.msra.mxu1 %v4033_v31  ;;  %v4031_v45 = vld [vmem:[#allocation8 + $0x148] sm:$0xff] }
 0x2b8   : > { %3349 = vst [vmem:[#allocation2 + $0xf9] sm:$0xff] %v3317_v43  ;;  %3350 = vst [vmem:[#allocation2 + $0x109] sm:$0xff] %v3318_v60  ;;  %8350 = vmatprep.subr.mxu1 %v4032_v38  ;;  %v4341_v15 = vld [vmem:[#allocation8 + $0x1e8] sm:$0xff]  ;;  %v3409_v13 = vld [vmem:[#allocation2 + $0x57] sm:$0x1] }
 0x2b9   : > { %3351 = vst [vmem:[#allocation2 + $0x111] sm:$0xff] %v3319_v59  ;;  %3352 = vst [vmem:[#allocation2 + $0x121] sm:$0xff] %v3320_v7  ;;  %8351 = vmatpush3.msra.mxu1 %v4032_v38  ;;  %v4026_v14 = vld [vmem:[#allocation8 + $0x120] sm:$0xff]  ;;  %v4338_v39 = vld [vmem:[#allocation8 + $0x1d0] sm:$0xff] }
 0x2ba   : > { %3353 = vst [vmem:[#allocation2 + $0x129] sm:$0xff] %v3321_v55  ;;  %3354 = vst [vmem:[#allocation2 + $0x139] sm:$0xff] %v3322_v22  ;;  %8222 = vmatmul.mubr.f32.gmra.mxu1 %v3303_v6  ;;  %8352 = vmatprep.subr.mxu1 %v4031_v45  ;;  %v4337_v44 = vld [vmem:[#allocation8 + $0x1c8] sm:$0xff]  ;;  %v4336_v53 = vld [vmem:[#allocation8 + $0x1c0] sm:$0xff] }
 0x2bb   : > { %3355 = vst [vmem:[#allocation2 + $0x141] sm:$0xff] %v3323_v35  ;;  %3356 = vst [vmem:[#allocation2 + $0x151] sm:$0xff] %v3324_v30  ;;  %8224 = vmatprep.mubr.f32.mxu1 %v3304_v17  ;;  %8353 = vmatpush3.msra.mxu1 %v4031_v45  ;;  %v4028_v45 = vld [vmem:[#allocation8 + $0x130] sm:$0xff]  ;;  %v10852_v32 = vld [vmem:[#allocation2 + $0xb0] sm:$0xff] }
 0x2bc   : > { %3357 = vst [vmem:[#allocation2 + $0x159] sm:$0xff] %v3325_v11  ;;  %3358 = vst [vmem:[#allocation2 + $0x169] sm:$0xff] %v3326_v10  ;;  %v3378_v58 = vld [vmem:[#allocation2 + $0xc2] sm:$0x1]  ;;  %8354 = vmatprep.subr.mxu1 %v4030_v2  ;;  %v3414_v9 = vld [vmem:[#allocation2 + $0xcf] sm:$0x1] }
 0x2bd   : > { %3359 = vst [vmem:[#allocation2 + $0x171] sm:$0xff] %v3327_v41  ;;  %3361 = vst [vmem:[#allocation2 + $0x189] sm:$0xff] %v3329_v3  ;;  %v3375_v3 = vld [vmem:[#allocation2 + $0x7a] sm:$0x1]  ;;  %8355 = vmatpush3.msra.mxu1 %v4030_v2  ;;  %v4335_v57 = vld [vmem:[#allocation8 + $0x1b8] sm:$0xff] }
 0x2be   : > { %3388 = vst [vmem:[#allocation2] sm:$0x1] %v3370_v48  ;;  %3389 = vst [vmem:[#allocation2 + $0x18] sm:$0x1] %v3371_v28  ;;  %v3376_v48 = vld [vmem:[#allocation2 + $0x92] sm:$0x1]  ;;  %8225 = vmatmul.mubr.f32.gmra.mxu1 %v3305_v61  ;;  %8356 = vmatprep.subr.mxu1 %v4029_v25 }
 0x2bf   : > { %3390 = vst [vmem:[#allocation2 + $0x30] sm:$0x1] %v3372_v5  ;;  %3391 = vst [vmem:[#allocation2 + $0x48] sm:$0x1] %v3373_v63  ;;  %v3377_v28 = vld [vmem:[#allocation2 + $0xaa] sm:$0x1]  ;;  %8227 = vmatprep.mubr.f32.mxu1 %v3306_v37  ;;  %8357 = vmatpush3.msra.mxu1 %v4029_v25 }
 0x2c0   : > { %3392 = vst [vmem:[#allocation2 + $0x60] sm:$0x1] %v3374_v16  ;;  %3393 = vst [vmem:[#allocation2 + $0x78] sm:$0x1] %v3375_v3  ;;  %v3379_v51 = vld [vmem:[#allocation2 + $0xda] sm:$0x1]  ;;  %8358 = vmatprep.subr.mxu1 %v4028_v45 }
 0x2c1   : > { %3394 = vst [vmem:[#allocation2 + $0x90] sm:$0x1] %v3376_v48  ;;  %3395 = vst [vmem:[#allocation2 + $0xa8] sm:$0x1] %v3377_v28  ;;  %v3380_v24 = vld [vmem:[#allocation2 + $0xf2] sm:$0x1]  ;;  %8359 = vmatpush3.msra.mxu1 %v4028_v45 }
 0x2c2   : > { %3396 = vst [vmem:[#allocation2 + $0xc0] sm:$0x1] %v3378_v58  ;;  %3397 = vst [vmem:[#allocation2 + $0xd8] sm:$0x1] %v3379_v51  ;;  %v3381_v31 = vld [vmem:[#allocation2 + $0x10a] sm:$0x1]  ;;  %8228 = vmatmul.mubr.f32.gmra.mxu1 %v3307_v49 }
 0x2c3   : > { %3398 = vst [vmem:[#allocation2 + $0xf0] sm:$0x1] %v3380_v24  ;;  %3399 = vst [vmem:[#allocation2 + $0x108] sm:$0x1] %v3381_v31  ;;  %v3382_v38 = vld [vmem:[#allocation2 + $0x122] sm:$0x1]  ;;  %8230 = vmatprep.mubr.f32.mxu1 %v3308_v50 }
 0x2c4   : > { %v3443_v63 = vld [vmem:[#allocation2 + $0x8] sm:$0xff]  ;;  %3400 = vst [vmem:[#allocation2 + $0x120] sm:$0x1] %v3382_v38  ;;  %v3383_v6 = vld [vmem:[#allocation2 + $0x13a] sm:$0x1]  ;;  %v10792_v3 = vld [vmem:[#allocation2 + $0x20] sm:$0xff] }
 0x2c5   : > { %v3442_v5 = vld [vmem:[#allocation2] sm:$0xff]  ;;  %v10784_v16 = vld [vmem:[#allocation2 + $0x18] sm:$0xff]  ;;  %3401 = vst [vmem:[#allocation2 + $0x138] sm:$0x1] %v3383_v6  ;;  %v3384_v17 = vld [vmem:[#allocation2 + $0x152] sm:$0x1] }
 0x2c6   : > { %8292 = vmatprep.mubr.f32.mxu0 %v3442_v5  ;;  %3402 = vst [vmem:[#allocation2 + $0x150] sm:$0x1] %v3384_v17  ;;  %v3406_v48 = vld [vmem:[#allocation2 + $0xf] sm:$0x1]  ;;  %v3385_v19 = vld [vmem:[#allocation2 + $0x16a] sm:$0x1]  ;;  %8231 = vmatmul.mubr.f32.gmra.mxu1 %v3309_v18 }
 0x2c7   : > { %8293 = vmatmul.mubr.f32.vlgmr.msra.gmra.mxu0 %v3443_v63  ;;  %v10795_v61 = vld [vmem:[#allocation2 + $0x30] sm:$0xff]  ;;  %3424 = vst [vmem:[#allocation2 + $0x11] sm:$0x1] %v3406_v48  ;;  %3403 = vst [vmem:[#allocation2 + $0x168] sm:$0x1] %v3385_v19  ;;  %v10802_v28 = vld [vmem:[#allocation2 + $0x38] sm:$0xff]  ;;  %8233 = vmatprep.mubr.f32.mxu1 %v3310_v20 }
 0x2c8   : > { %8295 = vmatprep.mubr.f32.mxu0 %v10784_v16  ;;  %8421 = vmatpush3.msra.mxu0 %v10445_v12  ;;  %v3407_v12 = vld [vmem:[#allocation2 + $0x27] sm:$0x1]  ;;  %v3408_v37 = vld [vmem:[#allocation2 + $0x3f] sm:$0x1]  ;;  %v10805_v49 = vld [vmem:[#allocation2 + $0x48] sm:$0xff] }
 0x2c9   : > { %8422 = vmatprep.subr.mxu0 %v4342_v34  ;;  %3425 = vst [vmem:[#allocation2 + $0x29] sm:$0x1] %v3407_v12  ;;  %v4027_v2 = vld [vmem:[#allocation8 + $0x128] sm:$0xff]  ;;  %3426 = vst [vmem:[#allocation2 + $0x41] sm:$0x1] %v3408_v37  ;;  %v10812_v31 = vld [vmem:[#allocation2 + $0x50] sm:$0xff] }
 0x2ca   : > { %8423 = vmatpush3.msra.mxu0 %v4342_v34  ;;  %3427 = vst [vmem:[#allocation2 + $0x59] sm:$0x1] %v3409_v13  ;;  %v3410_v50 = vld [vmem:[#allocation2 + $0x6f] sm:$0x1]  ;;  %v3411_v58 = vld [vmem:[#allocation2 + $0x87] sm:$0x1]  ;;  %8360 = vmatprep.subr.mxu1 %v4027_v2 }
 0x2cb   : > { %8296 = vmatmul.mubr.f32.gmra.mxu0 %v10792_v3  ;;  %8424 = vmatprep.subr.mxu0 %v4341_v15  ;;  %3428 = vst [vmem:[#allocation2 + $0x71] sm:$0x1] %v3410_v50  ;;  %3429 = vst [vmem:[#allocation2 + $0x89] sm:$0x1] %v3411_v58  ;;  %v3412_v51 = vld [vmem:[#allocation2 + $0x9f] sm:$0x1] }
 0x2cc   : > { %8298 = vmatprep.mubr.f32.mxu0 %v10795_v61  ;;  %8425 = vmatpush3.msra.mxu0 %v4341_v15  ;;  %v3413_v24 = vld [vmem:[#allocation2 + $0xb7] sm:$0x1]  ;;  %v4339_v18 = vld [vmem:[#allocation8 + $0x1d8] sm:$0xff]  ;;  %3430 = vst [vmem:[#allocation2 + $0xa1] sm:$0x1] %v3412_v51  ;;  %v10815_v5 = vld [vmem:[#allocation2 + $0x60] sm:$0xff] }
 0x2cd   : > { %8361 = vmatpush3.msra.mxu1 %v4027_v2  ;;  %8426 = vmatprep.subr.mxu0 %v4340_v47  ;;  %3431 = vst [vmem:[#allocation2 + $0xb9] sm:$0x1] %v3413_v24  ;;  %v3415_v20 = vld [vmem:[#allocation2 + $0xe7] sm:$0x1]  ;;  %3432 = vst [vmem:[#allocation2 + $0xd1] sm:$0x1] %v3414_v9 }
 0x2ce   : > { %8234 = vmatmul.mubr.f32.gmra.mxu1 %v3311_v29  ;;  %3433 = vst [vmem:[#allocation2 + $0xe9] sm:$0x1] %v3415_v20  ;;  %v3416_v38 = vld [vmem:[#allocation2 + $0xff] sm:$0x1]  ;;  %8362 = vmatprep.subr.mxu1 %v4026_v14  ;;  %v3417_v63 = vld [vmem:[#allocation2 + $0x117] sm:$0x1] }
 0x2cf   : > { %8299 = vmatmul.mubr.f32.gmra.mxu0 %v10802_v28  ;;  %8236 = vmatprep.mubr.f32.mxu1 %v3312_v56  ;;  %3434 = vst [vmem:[#allocation2 + $0x101] sm:$0x1] %v3416_v38  ;;  %v10822_v25 = vld [vmem:[#allocation2 + $0x68] sm:$0xff]  ;;  %3435 = vst [vmem:[#allocation2 + $0x119] sm:$0x1] %v3417_v63  ;;  %v10825_v29 = vld [vmem:[#allocation2 + $0x78] sm:$0xff] }
 0x2d0   : > { %8301 = vmatprep.mubr.f32.mxu0 %v10805_v49  ;;  %8427 = vmatpush3.msra.mxu0 %v4340_v47  ;;  %v4025_v6 = vld [vmem:[#allocation8 + $0x118] sm:$0xff]  ;;  %v3419_v56 = vld [vmem:[#allocation2 + $0x147] sm:$0x1]  ;;  %v3420_v34 = vld [vmem:[#allocation2 + $0x15f] sm:$0x1] }
 0x2d1   : > { %8363 = vmatpush3.msra.mxu1 %v4026_v14  ;;  %8428 = vmatprep.subr.mxu0 %v4339_v18  ;;  %v3418_v0 = vld [vmem:[#allocation2 + $0x12f] sm:$0x1]  ;;  %3437 = vst [vmem:[#allocation2 + $0x149] sm:$0x1] %v3419_v56  ;;  %3438 = vst [vmem:[#allocation2 + $0x161] sm:$0x1] %v3420_v34 }
 0x2d2   : > { %8237 = vmatmul.mubr.f32.gmra.mxu1 %v3313_v21  ;;  %3436 = vst [vmem:[#allocation2 + $0x131] sm:$0x1] %v3418_v0  ;;  %8364 = vmatprep.subr.mxu1 %v4025_v6  ;;  %v10832_v17 = vld [vmem:[#allocation2 + $0x80] sm:$0xff]  ;;  %v3421_v8 = vld [vmem:[#allocation2 + $0x177] sm:$0x1]  ;;  %v4023_v48 = vld [vmem:[#allocation8 + $0x108] sm:$0xff] }
 0x2d3   : > { %8302 = vmatmul.mubr.f32.gmra.mxu0 %v10812_v31  ;;  %8239 = vmatprep.mubr.f32.mxu1 %v3314_v36  ;;  %v4024_v45 = vld [vmem:[#allocation8 + $0x110] sm:$0xff]  ;;  %v10835_v21 = vld [vmem:[#allocation2 + $0x90] sm:$0xff]  ;;  %3439 = vst [vmem:[#allocation2 + $0x179] sm:$0x1] %v3421_v8  ;;  %v10842_v36 = vld [vmem:[#allocation2 + $0x98] sm:$0xff] }
 0x2d4   : > { %8304 = vmatprep.mubr.f32.mxu0 %v10815_v5  ;;  %8429 = vmatpush3.msra.mxu0 %v4339_v18  ;;  %v10845_v19 = vld [vmem:[#allocation2 + $0xa8] sm:$0xff]  ;;  %v4334_v4 = vld [vmem:[#allocation8 + $0x1b0] sm:$0xff]  ;;  %v4333_v23 = vld [vmem:[#allocation8 + $0x1a8] sm:$0xff] }
 0x2d5   : > { %8365 = vmatpush3.msra.mxu1 %v4025_v6  ;;  %8430 = vmatprep.subr.mxu0 %v4338_v39  ;;  %v10862_v26 = vld [vmem:[#allocation2 + $0xc8] sm:$0xff]  ;;  %v10872_v62 = vld [vmem:[#allocation2 + $0xe0] sm:$0xff]  ;;  %v10909_v12 = vld [vmem:[#allocation2 + $0x138] sm:$0xff] }
 0x2d6   : > { %8240 = vmatmul.mubr.f32.gmra.mxu1 %v3315_v40  ;;  %8431 = vmatpush3.msra.mxu0 %v4338_v39  ;;  %v4022_v40 = vld [vmem:[#allocation8 + $0x100] sm:$0xff]  ;;  %v10890_v1 = vld [vmem:[#allocation2 + $0x108] sm:$0xff]  ;;  %v4330_v15 = vld [vmem:[#allocation8 + $0x190] sm:$0xff] }
 0x2d7   : > { %8305 = vmatmul.mubr.f32.gmra.mxu0 %v10822_v25  ;;  %8242 = vmatprep.mubr.f32.mxu1 %v3316_v27  ;;  %v10855_v27 = vld [vmem:[#allocation2 + $0xc0] sm:$0xff]  ;;  %v10882_v52 = vld [vmem:[#allocation2 + $0x169] sm:$0xff]  ;;  %v4329_v13 = vld [vmem:[#allocation8 + $0x188] sm:$0xff] }
 0x2d8   : > { %8307 = vmatprep.mubr.f32.mxu0 %v10825_v29  ;;  %8366 = vmatprep.subr.mxu1 %v4024_v45  ;;  %3368 = vst [vmem:[#allocation2 + $0x199] sm:$0xff] %v10882_v52  ;;  %v3422_v54 = vld [vmem:[#allocation2 + $0x18f] sm:$0x1]  ;;  %v3989_v33 = vld [vmem:[#allocation2 + $0x2] sm:$0xff]  ;;  %v10911_v37 = vld [vmem:[#allocation2 + $0x1a] sm:$0xff] }
 0x2d9   : > { %8432 = vmatprep.subr.mxu0 %v4337_v44  ;;  %8367 = vmatpush3.msra.mxu1 %v4024_v45  ;;  %3440 = vst [vmem:[#allocation2 + $0x191] sm:$0x1] %v3422_v54  ;;  %v10906_v46 = vld [vmem:[#allocation2 + $0x128] sm:$0xff]  ;;  %v4648_v42 = vld [vmem:[#allocation8 + $0x270] sm:$0xff]  ;;  %v10920_v47 = vld [vmem:[#allocation2 + $0x150] sm:$0xff] }
 0x2da   : > { %8243 = vmatmul.mubr.f32.gmra.mxu1 %v3317_v43  ;;  %8433 = vmatpush3.msra.mxu0 %v4337_v44  ;;  %v4649_v43 = vld [vmem:[#allocation8 + $0x278] sm:$0xff]  ;;  %v10924_v50 = vld [vmem:[#allocation2 + $0x32] sm:$0xff]  ;;  %v10933_v9 = vld [vmem:[#allocation2 + $0x3a] sm:$0xff] }
 0x2db   : > { %8308 = vmatmul.mubr.f32.gmra.mxu0 %v10832_v17  ;;  %8245 = vmatprep.mubr.f32.mxu1 %v3318_v60  ;;  %v10865_v60 = vld [vmem:[#allocation2 + $0xd8] sm:$0xff]  ;;  %v10917_v2 = vld [vmem:[#allocation2 + $0x22] sm:$0xff]  ;;  %v4328_v58 = vld [vmem:[#allocation8 + $0x180] sm:$0xff] }
 0x2dc   : > { %8310 = vmatprep.mubr.f32.mxu0 %v10835_v21  ;;  %8368 = vmatprep.subr.mxu1 %v4023_v48  ;;  %v10927_v24 = vld [vmem:[#allocation2 + $0x158] sm:$0xff]  ;;  %v10930_v18 = vld [vmem:[#allocation2 + $0x168] sm:$0xff]  ;;  %v4646_v20 = vld [vmem:[#allocation8 + $0x260] sm:$0xff] }
 0x2dd   : > { %8434 = vmatprep.subr.mxu0 %v4336_v53  ;;  %8369 = vmatpush3.msra.mxu1 %v4023_v48  ;;  %v4647_v14 = vld [vmem:[#allocation8 + $0x268] sm:$0xff]  ;;  %v10936_v38 = vld [vmem:[#allocation2 + $0x4a] sm:$0xff]  ;;  %v4644_v39 = vld [vmem:[#allocation8 + $0x250] sm:$0xff] }
 0x2de   : > { %8246 = vmatmul.mubr.f32.gmra.mxu1 %v3319_v59  ;;  %8435 = vmatpush3.msra.mxu0 %v4336_v53  ;;  %v10875_v59 = vld [vmem:[#allocation2 + $0xf0] sm:$0xff]  ;;  %v4645_v6 = vld [vmem:[#allocation8 + $0x258] sm:$0xff]  ;;  %v4643_v34 = vld [vmem:[#allocation8 + $0x248] sm:$0xff] }
 0x2df   : > { %8311 = vmatmul.mubr.f32.gmra.mxu0 %v10842_v36  ;;  %8248 = vmatprep.mubr.f32.mxu1 %v3320_v7  ;;  %v10884_v7 = vld [vmem:[#allocation2 + $0xf8] sm:$0xff]  ;;  %v10938_v63 = vld [vmem:[#allocation2 + $0x170] sm:$0xff]  ;;  %v10946_v56 = vld [vmem:[#allocation2 + $0x62] sm:$0xff] }
 0x2e0   : > { %8313 = vmatprep.mubr.f32.mxu0 %v10845_v19  ;;  %8370 = vmatprep.subr.mxu1 %v4022_v40  ;;  %v3387_v51 = vld [vmem:[#allocation2 + $0x19a] sm:$0x1]  ;;  %v10943_v0 = vld [vmem:[#allocation2 + $0x52] sm:$0xff]  ;;  %v10951_v45 = vld [vmem:[#allocation2 + $0x6a] sm:$0xff] }
 0x2e1   : > { %8436 = vmatprep.subr.mxu0 %v4335_v57  ;;  %8371 = vmatpush3.msra.mxu1 %v4022_v40  ;;  %3405 = vst [vmem:[#allocation2 + $0x198] sm:$0x1] %v3387_v51  ;;  %v10954_v8 = vld [vmem:[#allocation2 + $0x7a] sm:$0xff]  ;;  %v4641_v44 = vld [vmem:[#allocation8 + $0x238] sm:$0xff]  ;;  %v10962_v53 = vld [vmem:[#allocation2 + $0x92] sm:$0xff] }
 0x2e2   : > { %8249 = vmatmul.mubr.f32.gmra.mxu1 %v3321_v55  ;;  %8437 = vmatpush3.msra.mxu0 %v4335_v57  ;;  %v10886_v55 = vld [vmem:[#allocation2 + $0x171] sm:$0xff]  ;;  %v4637_v54 = vld [vmem:[#allocation8 + $0x218] sm:$0xff]  ;;  %v4946_v51 = vld [vmem:[#allocation8 + $0x2b0] sm:$0xff] }
 0x2e3   : > { %8314 = vmatmul.mubr.f32.gmra.mxu0 %v10852_v32  ;;  %8251 = vmatprep.mubr.f32.mxu1 %v3322_v22  ;;  %v4332_v22 = vld [vmem:[#allocation8 + $0x1a0] sm:$0xff]  ;;  %3369 = vst [vmem:[#allocation2 + $0x1a1] sm:$0xff] %v10886_v55  ;;  %v4639_v40 = vld [vmem:[#allocation8 + $0x228] sm:$0xff] }
 0x2e4   : > { %8316 = vmatprep.mubr.f32.mxu0 %v10855_v27  ;;  %8500 = vmatprep.subr.mxu1 %v4649_v43  ;;  %v10970_v57 = vld [vmem:[#allocation2 + $0xaa] sm:$0xff] }
 0x2e5   : > { %8438 = vmatprep.subr.mxu0 %v4334_v4 }
 0x2e6   : > { %8252 = vmatmul.mubr.f32.gmra.mxu1 %v3323_v35  ;;  %8439 = vmatpush3.msra.mxu0 %v4334_v4  ;;  %v10898_v35 = vld [vmem:[#allocation2 + $0x110] sm:$0xff]  ;;  %v10978_v4 = vld [vmem:[#allocation2 + $0xc2] sm:$0xff] }
 0x2e7   : > { %8317 = vmatmul.mubr.f32.gmra.mxu0 %v10862_v26  ;;  %8254 = vmatprep.mubr.f32.mxu1 %v3324_v30  ;;  %v10901_v30 = vld [vmem:[#allocation2 + $0x120] sm:$0xff] }
 0x2e8   : > { %8319 = vmatprep.mubr.f32.mxu0 %v10865_v60  ;;  %8440 = vmatprep.subr.mxu0 %v4333_v23 }
 0x2e9   : > { %8441 = vmatpush3.msra.mxu0 %v4333_v23  ;;  %v4953_v23 = vld [vmem:[#allocation8 + $0x2e8] sm:$0xff] }
 0x2ea   : > { %8255 = vmatmul.mubr.f32.gmra.mxu1 %v3325_v11  ;;  %8442 = vmatprep.subr.mxu0 %v4332_v22  ;;  %v4331_v11 = vld [vmem:[#allocation8 + $0x198] sm:$0xff]  ;;  %v3423_v48 = vld [vmem:[#allocation2 + $0x1a7] sm:$0x1] }
 0x2eb   : > { %8320 = vmatmul.mubr.f32.gmra.mxu0 %v10872_v62  ;;  %8257 = vmatprep.mubr.f32.mxu1 %v3326_v10  ;;  %v3990_v10 = vld [vmem:[#allocation2 + $0xa] sm:$0xff]  ;;  %3441 = vst [vmem:[#allocation2 + $0x1a9] sm:$0x1] %v3423_v48 }
 0x2ec   : > { %8322 = vmatprep.mubr.f32.mxu0 %v10875_v59  ;;  %8443 = vmatpush3.msra.mxu0 %v4332_v22  ;;  %v10986_v22 = vld [vmem:[#allocation2 + $0xda] sm:$0xff]  ;;  %v11044_v48 = vld [vmem:[#allocation2 + $0x31] sm:$0xff] }
 0x2ed   : > { %8444 = vmatprep.subr.mxu0 %v4331_v11 }
 0x2ee   : > { %8258 = vmatmul.mubr.f32.gmra.mxu1 %v3327_v41  ;;  %8445 = vmatpush3.msra.mxu0 %v4331_v11  ;;  %v10915_v41 = vld [vmem:[#allocation2 + $0x140] sm:$0xff] }
 0x2ef   : > { %8323 = vmatmul.mubr.f32.gmra.mxu0 %v10884_v7  ;;  %8372 = vmatprep.mubr.f32.mxu1 %v3989_v33  ;;  %v10994_v33 = vld [vmem:[#allocation2 + $0xf2] sm:$0xff]  ;;  %v4950_v11 = vld [vmem:[#allocation8 + $0x2d0] sm:$0xff] }
 0x2f0   : > { %8325 = vmatprep.mubr.f32.mxu0 %v10890_v1  ;;  %8446 = vmatprep.subr.mxu0 %v4330_v15 }
 0x2f1   : > { %8447 = vmatpush3.msra.mxu0 %v4330_v15  ;;  %v4949_v15 = vld [vmem:[#allocation8 + $0x2c8] sm:$0xff] }
 0x2f2   : > { %8373 = vmatmul.mubr.f32.vlgmr.msra.gmra.mxu1 %v3990_v10  ;;  %8448 = vmatprep.subr.mxu0 %v4329_v13  ;;  %v11002_v10 = vld [vmem:[#allocation2 + $0x10a] sm:$0xff] }
 0x2f3   : > { %8326 = vmatmul.mubr.f32.gmra.mxu0 %v10898_v35  ;;  %8375 = vmatprep.mubr.f32.mxu1 %v10911_v37 }
 0x2f4   : > { %8328 = vmatprep.mubr.f32.mxu0 %v10901_v30  ;;  %8501 = vmatpush3.msra.mxu1 %v4649_v43  ;;  %v4954_v43 = vld [vmem:[#allocation8 + $0x2f0] sm:$0xff] }
 0x2f5   : > { %8502 = vmatprep.subr.mxu1 %v4648_v42  ;;  %8449 = vmatpush3.msra.mxu0 %v4329_v13  ;;  %v4635_v13 = vld [vmem:[#allocation8 + $0x208] sm:$0xff] }
 0x2f6   : > { %8376 = vmatmul.mubr.f32.gmra.mxu1 %v10917_v2  ;;  %8450 = vmatprep.subr.mxu0 %v4328_v58 }
 0x2f7   : > { %8329 = vmatmul.mubr.f32.gmra.mxu0 %v10906_v46  ;;  %8378 = vmatprep.mubr.f32.mxu1 %v10924_v50 }
 0x2f8   : > { %8331 = vmatprep.mubr.f32.mxu0 %v10909_v12  ;;  %8503 = vmatpush3.msra.mxu1 %v4648_v42  ;;  %v11010_v42 = vld [vmem:[#allocation2 + $0x122] sm:$0xff] }
 0x2f9   : > { %8451 = vmatpush3.msra.mxu0 %v4328_v58  ;;  %8504 = vmatprep.subr.mxu1 %v4647_v14  ;;  %v11018_v58 = vld [vmem:[#allocation2 + $0x13a] sm:$0xff] }
 0x2fa   : > { %8379 = vmatmul.mubr.f32.gmra.mxu1 %v10933_v9 }
 0x2fb   : > { %8332 = vmatmul.mubr.f32.gmra.mxu0 %v10915_v41  ;;  %8381 = vmatprep.mubr.f32.mxu1 %v10936_v38 }
 0x2fc   : > { %8334 = vmatprep.mubr.f32.mxu0 %v10920_v47  ;;  %8505 = vmatpush3.msra.mxu1 %v4647_v14  ;;  %v11026_v14 = vld [vmem:[#allocation2 + $0x152] sm:$0xff] }
 0x2fd   : > { %8506 = vmatprep.subr.mxu1 %v4646_v20 }
 0x2fe   : > { %8507 = vmatpush3.msra.mxu1 %v4646_v20  ;;  %v4945_v20 = vld [vmem:[#allocation8 + $0x2a8] sm:$0xff] }
 0x2ff   : > { %8335 = vmatmul.mubr.f32.gmra.mxu0 %v10927_v24  ;;  %8382 = vmatmul.mubr.f32.gmra.mxu1 %v10943_v0 }
 0x300   : > { %8337 = vmatprep.mubr.f32.mxu0 %v10930_v18  ;;  %8508 = vmatprep.subr.mxu1 %v4645_v6 }
 0x301   : > { %8384 = vmatprep.mubr.f32.mxu1 %v10946_v56  ;;  %8509 = vmatpush3.msra.mxu1 %v4645_v6  ;;  %v11034_v6 = vld [vmem:[#allocation2 + $0x16a] sm:$0xff] }
 0x302   : > { %8510 = vmatprep.subr.mxu1 %v4644_v39 }
 0x303   : > { %8338 = vmatmul.mubr.f32.gmra.mxu0 %v10938_v63  ;;  %8511 = vmatpush3.msra.mxu1 %v4644_v39  ;;  %v4943_v39 = vld [vmem:[#allocation8 + $0x298] sm:$0xff] }
 0x304   : > { %8452 = vmatprep.mubr.f32.mxu0 %v10784_v16  ;;  %v4642_v16 = vld [vmem:[#allocation8 + $0x240] sm:$0xff]  ;;  %8385 = vmatmul.mubr.f32.gmra.mxu1 %v10951_v45 }
 0x305   : > { %8512 = vmatprep.subr.mxu1 %v4643_v34  ;;  %8387 = vmatprep.mubr.f32.mxu1 %v10954_v8 }
 0x306   : > { %8513 = vmatpush3.msra.mxu1 %v4643_v34  ;;  %v4601_v34 = vld [vmem:[#allocation2 + $0x19] sm:$0xff] }
 0x307   : > { %8453 = vmatmul.mubr.f32.vlgmr.msra.gmra.mxu0 %v10792_v3  ;;  %8514 = vmatprep.subr.mxu1 %v4642_v16  ;;  %v10959_v3 = vld [vmem:[#allocation2 + $0x82] sm:$0xff] }
 0x308   : > { %8455 = vmatprep.mubr.f32.mxu0 %v10795_v61  ;;  %8515 = vmatpush3.msra.mxu1 %v4642_v16  ;;  %v4640_v61 = vld [vmem:[#allocation8 + $0x230] sm:$0xff] }
 0x309   : > { %8388 = vmatmul.mubr.f32.gmra.mxu1 %v10959_v3  ;;  %8516 = vmatprep.subr.mxu1 %v4641_v44  ;;  %v4942_v16 = vld [vmem:[#allocation8 + $0x290] sm:$0xff] }
 0x30a   : > { %8390 = vmatprep.mubr.f32.mxu1 %v10962_v53  ;;  %8517 = vmatpush3.msra.mxu1 %v4641_v44  ;;  %v4602_v44 = vld [vmem:[#allocation2 + $0x21] sm:$0xff] }
 0x30b   : > { %8456 = vmatmul.mubr.f32.gmra.mxu0 %v10802_v28  ;;  %8518 = vmatprep.subr.mxu1 %v4640_v61  ;;  %v4955_v28 = vld [vmem:[#allocation8 + $0x2f8] sm:$0xff] }
 0x30c   : > { %8458 = vmatprep.mubr.f32.mxu0 %v10805_v49  ;;  %v10967_v49 = vld [vmem:[#allocation2 + $0x9a] sm:$0xff]  ;;  %8519 = vmatpush3.msra.mxu1 %v4640_v61  ;;  %v4940_v61 = vld [vmem:[#allocation8 + $0x280] sm:$0xff] }
 0x30d   : > { %8391 = vmatmul.mubr.f32.gmra.mxu1 %v10967_v49  ;;  %8520 = vmatprep.subr.mxu1 %v4639_v40 }
 0x30e   : > { %8393 = vmatprep.mubr.f32.mxu1 %v10970_v57  ;;  %8580 = vmatprep.subr.mxu0 %v4955_v28 }
 0x30f   : > { %8459 = vmatmul.mubr.f32.gmra.mxu0 %v10812_v31  ;;  %8521 = vmatpush3.msra.mxu1 %v4639_v40  ;;  %v10975_v31 = vld [vmem:[#allocation2 + $0xb2] sm:$0xff]  ;;  %v11056_v40 = vld [vmem:[#allocation2 + $0x180] sm:$0xff] }
 0x310   : > { %8461 = vmatprep.mubr.f32.mxu0 %v10815_v5  ;;  %8581 = vmatpush3.msra.mxu0 %v4955_v28  ;;  %v4638_v5 = vld [vmem:[#allocation8 + $0x220] sm:$0xff]  ;;  %v11062_v28 = vld [vmem:[#allocation2 + $0x61] sm:$0xff] }
 0x311   : > { %8394 = vmatmul.mubr.f32.gmra.mxu1 %v10975_v31  ;;  %8582 = vmatprep.subr.mxu0 %v4954_v43 }
 0x312   : > { %8396 = vmatprep.mubr.f32.mxu1 %v10978_v4  ;;  %8583 = vmatpush3.msra.mxu0 %v4954_v43  ;;  %v5258_v43 = vld [vmem:[#allocation8 + $0x360] sm:$0xff] }
 0x313   : > { %8462 = vmatmul.mubr.f32.gmra.mxu0 %v10822_v25  ;;  %8522 = vmatprep.subr.mxu1 %v4638_v5  ;;  %v10983_v25 = vld [vmem:[#allocation2 + $0xca] sm:$0xff] }
 0x314   : > { %8464 = vmatprep.mubr.f32.mxu0 %v10825_v29  ;;  %8584 = vmatprep.subr.mxu0 %v4953_v23  ;;  %v4952_v29 = vld [vmem:[#allocation8 + $0x2e0] sm:$0xff] }
 0x315   : > { %8397 = vmatmul.mubr.f32.gmra.mxu1 %v10983_v25  ;;  %8585 = vmatpush3.msra.mxu0 %v4953_v23  ;;  %v11069_v23 = vld [vmem:[#allocation2 + $0x69] sm:$0xff] }
 0x316   : > { %8399 = vmatprep.mubr.f32.mxu1 %v10986_v22  ;;  %8523 = vmatpush3.msra.mxu1 %v4638_v5  ;;  %v11064_v5 = vld [vmem:[#allocation2 + $0x188] sm:$0xff] }
 0x317   : > { %8465 = vmatmul.mubr.f32.gmra.mxu0 %v10832_v17  ;;  %8586 = vmatprep.subr.mxu0 %v4952_v29  ;;  %v4951_v17 = vld [vmem:[#allocation8 + $0x2d8] sm:$0xff] }
 0x318   : > { %8467 = vmatprep.mubr.f32.mxu0 %v10835_v21  ;;  %v10991_v21 = vld [vmem:[#allocation2 + $0xe2] sm:$0xff]  ;;  %8587 = vmatpush3.msra.mxu0 %v4952_v29 }
 0x319   : > { %8400 = vmatmul.mubr.f32.gmra.mxu1 %v10991_v21  ;;  %8524 = vmatprep.subr.mxu1 %v4637_v54  ;;  %v5257_v29 = vld [vmem:[#allocation8 + $0x358] sm:$0xff] }
 0x31a   : > { %8402 = vmatprep.mubr.f32.mxu1 %v10994_v33  ;;  %8588 = vmatprep.subr.mxu0 %v4951_v17 }
 0x31b   : > { %8468 = vmatmul.mubr.f32.gmra.mxu0 %v10842_v36  ;;  %8525 = vmatpush3.msra.mxu1 %v4637_v54  ;;  %v10999_v36 = vld [vmem:[#allocation2 + $0xfa] sm:$0xff] }
 0x31c   : > { %8470 = vmatprep.mubr.f32.mxu0 %v10845_v19  ;;  %8589 = vmatpush3.msra.mxu0 %v4951_v17  ;;  %v4636_v19 = vld [vmem:[#allocation8 + $0x210] sm:$0xff] }
 0x31d   : > { %8403 = vmatmul.mubr.f32.gmra.mxu1 %v10999_v36  ;;  %8590 = vmatprep.subr.mxu0 %v4950_v11  ;;  %v11072_v54 = vld [vmem:[#allocation2 + $0x79] sm:$0xff] }
 0x31e   : > { %8405 = vmatprep.mubr.f32.mxu1 %v11002_v10  ;;  %8591 = vmatpush3.msra.mxu0 %v4950_v11  ;;  %v5256_v17 = vld [vmem:[#allocation8 + $0x350] sm:$0xff] }
 0x31f   : > { %8471 = vmatmul.mubr.f32.gmra.mxu0 %v10852_v32  ;;  %8526 = vmatprep.subr.mxu1 %v4636_v19  ;;  %v11007_v32 = vld [vmem:[#allocation2 + $0x112] sm:$0xff]  ;;  %v11077_v11 = vld [vmem:[#allocation2 + $0x81] sm:$0xff] }
 0x320   : > { %8473 = vmatprep.mubr.f32.mxu0 %v10855_v27  ;;  %8592 = vmatprep.subr.mxu0 %v4949_v15  ;;  %v4948_v27 = vld [vmem:[#allocation8 + $0x2c0] sm:$0xff] }
 0x321   : > { %8406 = vmatmul.mubr.f32.gmra.mxu1 %v11007_v32  ;;  %8593 = vmatpush3.msra.mxu0 %v4949_v15  ;;  %v5254_v15 = vld [vmem:[#allocation8 + $0x340] sm:$0xff] }
 0x322   : > { %8408 = vmatprep.mubr.f32.mxu1 %v11010_v42  ;;  %8527 = vmatpush3.msra.mxu1 %v4636_v19  ;;  %v11080_v19 = vld [vmem:[#allocation2 + $0x91] sm:$0xff] }
 0x323   : > { %8474 = vmatmul.mubr.f32.gmra.mxu0 %v10862_v26  ;;  %8594 = vmatprep.subr.mxu0 %v4948_v27  ;;  %v4947_v26 = vld [vmem:[#allocation8 + $0x2b8] sm:$0xff] }
 0x324   : > { %8476 = vmatprep.mubr.f32.mxu0 %v10865_v60  ;;  %v11015_v60 = vld [vmem:[#allocation2 + $0x12a] sm:$0xff]  ;;  %8595 = vmatpush3.msra.mxu0 %v4948_v27 }
 0x325   : > { %8409 = vmatmul.mubr.f32.gmra.mxu1 %v11015_v60  ;;  %8528 = vmatprep.subr.mxu1 %v4635_v13  ;;  %v11088_v27 = vld [vmem:[#allocation2 + $0xa9] sm:$0xff] }
 0x326   : > { %8411 = vmatprep.mubr.f32.mxu1 %v11018_v58  ;;  %8596 = vmatprep.subr.mxu0 %v4947_v26 }
 0x327   : > { %8477 = vmatmul.mubr.f32.gmra.mxu0 %v10872_v62  ;;  %8529 = vmatpush3.msra.mxu1 %v4635_v13  ;;  %v11023_v62 = vld [vmem:[#allocation2 + $0x142] sm:$0xff] }
 0x328   : > { %8479 = vmatprep.mubr.f32.mxu0 %v10875_v59  ;;  %8597 = vmatpush3.msra.mxu0 %v4947_v26  ;;  %v4634_v59 = vld [vmem:[#allocation8 + $0x200] sm:$0xff]  ;;  %v5252_v13 = vld [vmem:[#allocation8 + $0x330] sm:$0xff] }
 0x329   : > { %8412 = vmatmul.mubr.f32.gmra.mxu1 %v11023_v62  ;;  %8598 = vmatprep.subr.mxu0 %v4946_v51  ;;  %v11096_v26 = vld [vmem:[#allocation2 + $0xc1] sm:$0xff] }
 0x32a   : > { %8414 = vmatprep.mubr.f32.mxu1 %v11026_v14  ;;  %8599 = vmatpush3.msra.mxu0 %v4946_v51  ;;  %v5566_v51 = vld [vmem:[#allocation8 + $0x3f0] sm:$0xff] }
 0x32b   : > { %8480 = vmatmul.mubr.f32.gmra.mxu0 %v10884_v7  ;;  %8530 = vmatprep.subr.mxu1 %v4634_v59  ;;  %v11031_v7 = vld [vmem:[#allocation2 + $0x15a] sm:$0xff] }
 0x32c   : > { %8482 = vmatprep.mubr.f32.mxu0 %v10890_v1  ;;  %8600 = vmatprep.subr.mxu0 %v4945_v20  ;;  %v4944_v1 = vld [vmem:[#allocation8 + $0x2a0] sm:$0xff] }
 0x32d   : > { %8415 = vmatmul.mubr.f32.gmra.mxu1 %v11031_v7  ;;  %8601 = vmatpush3.msra.mxu0 %v4945_v20  ;;  %v5565_v20 = vld [vmem:[#allocation8 + $0x3e8] sm:$0xff] }
 0x32e   : > { %8417 = vmatprep.mubr.f32.mxu1 %v11034_v6  ;;  %8531 = vmatpush3.msra.mxu1 %v4634_v59  ;;  %v11104_v59 = vld [vmem:[#allocation2 + $0xd9] sm:$0xff] }
 0x32f   : > { %8483 = vmatmul.mubr.f32.gmra.mxu0 %v10898_v35  ;;  %8602 = vmatprep.subr.mxu0 %v4944_v1  ;;  %v5261_v35 = vld [vmem:[#allocation8 + $0x378] sm:$0xff] }
 0x330   : > { %8485 = vmatprep.mubr.f32.mxu0 %v10901_v30  ;;  %v11039_v30 = vld [vmem:[#allocation2 + $0x172] sm:$0xff]  ;;  %8603 = vmatpush3.msra.mxu0 %v4944_v1 }
 0x331   : > { %8418 = vmatmul.mubr.f32.gmra.mxu1 %v11039_v30  ;;  %8604 = vmatprep.subr.mxu0 %v4943_v39  ;;  %v11112_v1 = vld [vmem:[#allocation2 + $0xf1] sm:$0xff] }
 0x332   : > { %8532 = vmatprep.mubr.f32.mxu1 %v4601_v34  ;;  %8660 = vmatprep.subr.mxu1 %v5261_v35  ;;  %v5562_v34 = vld [vmem:[#allocation8 + $0x3d0] sm:$0xff] }
 0x333   : > { %8486 = vmatmul.mubr.f32.gmra.mxu0 %v10906_v46  ;;  %v5260_v46 = vld [vmem:[#allocation8 + $0x370] sm:$0xff] }
 0x334   : > { %8488 = vmatprep.mubr.f32.mxu0 %v10909_v12  ;;  %8605 = vmatpush3.msra.mxu0 %v4943_v39  ;;  %v4941_v12 = vld [vmem:[#allocation8 + $0x288] sm:$0xff]  ;;  %v5564_v39 = vld [vmem:[#allocation8 + $0x3e0] sm:$0xff] }
 0x335   : > { %8533 = vmatmul.mubr.f32.vlgmr.msra.gmra.mxu1 %v4602_v44  ;;  %8606 = vmatprep.subr.mxu0 %v4942_v16  ;;  %v5561_v44 = vld [vmem:[#allocation8 + $0x3c8] sm:$0xff] }
 0x336   : > { %8535 = vmatprep.mubr.f32.mxu1 %v11044_v48  ;;  %8661 = vmatpush3.msra.mxu1 %v5261_v35  ;;  %v11120_v35 = vld [vmem:[#allocation2 + $0x109] sm:$0xff] }
 0x337   : > { %8489 = vmatmul.mubr.f32.gmra.mxu0 %v10915_v41  ;;  %8662 = vmatprep.subr.mxu1 %v5260_v46  ;;  %v11049_v41 = vld [vmem:[#allocation2 + $0x39] sm:$0xff] }
 0x338   : > { %8491 = vmatprep.mubr.f32.mxu0 %v10920_v47  ;;  %8607 = vmatpush3.msra.mxu0 %v4942_v16  ;;  %v11052_v47 = vld [vmem:[#allocation2 + $0x49] sm:$0xff]  ;;  %v11128_v16 = vld [vmem:[#allocation2 + $0x121] sm:$0xff] }
 0x339   : > { %8536 = vmatmul.mubr.f32.gmra.mxu1 %v11049_v41  ;;  %8608 = vmatprep.subr.mxu0 %v4941_v12 }
 0x33a   : > { %8538 = vmatprep.mubr.f32.mxu1 %v11052_v47  ;;  %8609 = vmatpush3.msra.mxu0 %v4941_v12  ;;  %v5560_v12 = vld [vmem:[#allocation8 + $0x3c0] sm:$0xff] }
 0x33b   : > { %8492 = vmatmul.mubr.f32.gmra.mxu0 %v10927_v24  ;;  %8663 = vmatpush3.msra.mxu1 %v5260_v46  ;;  %v5259_v24 = vld [vmem:[#allocation8 + $0x368] sm:$0xff] }
 0x33c   : > { %8494 = vmatprep.mubr.f32.mxu0 %v10930_v18  ;;  %8610 = vmatprep.subr.mxu0 %v4940_v61  ;;  %v11059_v18 = vld [vmem:[#allocation2 + $0x51] sm:$0xff]  ;;  %v11136_v46 = vld [vmem:[#allocation2 + $0x139] sm:$0xff] }
 0x33d   : > { %8611 = vmatpush3.msra.mxu0 %v4940_v61  ;;  %8539 = vmatmul.mubr.f32.gmra.mxu1 %v11059_v18  ;;  %v11144_v61 = vld [vmem:[#allocation2 + $0x151] sm:$0xff] }
 0x33e   : > { %8664 = vmatprep.subr.mxu1 %v5259_v24  ;;  %8541 = vmatprep.mubr.f32.mxu1 %v11062_v28 }
 0x33f   : > { %8495 = vmatmul.mubr.f32.gmra.mxu0 %v10938_v63  ;;  %v5567_v63 = vld [vmem:[#allocation8 + $0x3f8] sm:$0xff]  ;;  %8665 = vmatpush3.msra.mxu1 %v5259_v24  ;;  %v5558_v24 = vld [vmem:[#allocation8 + $0x3b0] sm:$0xff] }
 0x340   : > { %8497 = vmatprep.mubr.f32.mxu0 %v11056_v40  ;;  %8666 = vmatprep.subr.mxu1 %v5258_v43 }
 0x341   : > { %8542 = vmatmul.mubr.f32.gmra.mxu1 %v11069_v23  ;;  %8740 = vmatprep.subr.mxu0 %v5567_v63 }
 0x342   : > { %8544 = vmatprep.mubr.f32.mxu1 %v11072_v54  ;;  %8667 = vmatpush3.msra.mxu1 %v5258_v43  ;;  %v5557_v43 = vld [vmem:[#allocation8 + $0x3a8] sm:$0xff] }
 0x343   : > { %8498 = vmatmul.mubr.f32.gmra.mxu0 %v11064_v5  ;;  %8668 = vmatprep.subr.mxu1 %v5257_v29 }
 0x344   : > { %8612 = vmatprep.mubr.f32.mxu0 %v10911_v37  ;;  %8669 = vmatpush3.msra.mxu1 %v5257_v29  ;;  %v5255_v37 = vld [vmem:[#allocation8 + $0x348] sm:$0xff] }
 0x345   : > { %8545 = vmatmul.mubr.f32.gmra.mxu1 %v11077_v11  ;;  %8670 = vmatprep.subr.mxu1 %v5256_v17 }
 0x346   : > { %8547 = vmatprep.mubr.f32.mxu1 %v11080_v19  ;;  %8671 = vmatpush3.msra.mxu1 %v5256_v17  ;;  %v5215_v17 = vld [vmem:[#allocation2 + $0x48] sm:$0xff] }
 0x347   : > { %8613 = vmatmul.mubr.f32.vlgmr.msra.gmra.mxu0 %v10917_v2  ;;  %8672 = vmatprep.subr.mxu1 %v5255_v37  ;;  %v11085_v2 = vld [vmem:[#allocation2 + $0x99] sm:$0xff] }
 0x348   : > { %8615 = vmatprep.mubr.f32.mxu0 %v10924_v50  ;;  %8673 = vmatpush3.msra.mxu1 %v5255_v37  ;;  %v5253_v50 = vld [vmem:[#allocation8 + $0x338] sm:$0xff] }
 0x349   : > { %8548 = vmatmul.mubr.f32.gmra.mxu1 %v11085_v2  ;;  %8674 = vmatprep.subr.mxu1 %v5254_v15 }
 0x34a   : > { %8550 = vmatprep.mubr.f32.mxu1 %v11088_v27  ;;  %8675 = vmatpush3.msra.mxu1 %v5254_v15  ;;  %v5553_v15 = vld [vmem:[#allocation8 + $0x388] sm:$0xff] }
 0x34b   : > { %8616 = vmatmul.mubr.f32.gmra.mxu0 %v10933_v9  ;;  %8676 = vmatprep.subr.mxu1 %v5253_v50  ;;  %v11093_v9 = vld [vmem:[#allocation2 + $0xb1] sm:$0xff] }
 0x34c   : > { %8618 = vmatprep.mubr.f32.mxu0 %v10936_v38  ;;  %8677 = vmatpush3.msra.mxu1 %v5253_v50  ;;  %v5251_v38 = vld [vmem:[#allocation8 + $0x328] sm:$0xff] }
 0x34d   : > { %8551 = vmatmul.mubr.f32.gmra.mxu1 %v11093_v9  ;;  %8678 = vmatprep.subr.mxu1 %v5252_v13 }
 0x34e   : > { %8553 = vmatprep.mubr.f32.mxu1 %v11096_v26  ;;  %8679 = vmatpush3.msra.mxu1 %v5252_v13 }
 0x34f   : > { %8619 = vmatmul.mubr.f32.gmra.mxu0 %v10943_v0  ;;  %8680 = vmatprep.subr.mxu1 %v5251_v38  ;;  %v11101_v0 = vld [vmem:[#allocation2 + $0xc9] sm:$0xff] }
 0x350   : > { %8621 = vmatprep.mubr.f32.mxu0 %v10946_v56  ;;  %8681 = vmatpush3.msra.mxu1 %v5251_v38  ;;  %v5250_v56 = vld [vmem:[#allocation8 + $0x320] sm:$0xff] }
 0x351   : > { %8554 = vmatmul.mubr.f32.gmra.mxu1 %v11101_v0  ;;  %8741 = vmatpush3.msra.mxu0 %v5567_v63  ;;  %v5556_v63 = vld [vmem:[#allocation8 + $0x3a0] sm:$0xff] }
 0x352   : > { %8556 = vmatprep.mubr.f32.mxu1 %v11104_v59  ;;  %8742 = vmatprep.subr.mxu0 %v5566_v51  ;;  %v5552_v38 = vld [vmem:[#allocation8 + $0x380] sm:$0xff] }
 0x353   : > { %8622 = vmatmul.mubr.f32.gmra.mxu0 %v10951_v45  ;;  %8682 = vmatprep.subr.mxu1 %v5250_v56  ;;  %v11109_v45 = vld [vmem:[#allocation2 + $0xe1] sm:$0xff] }
 0x354   : > { %8624 = vmatprep.mubr.f32.mxu0 %v10954_v8  ;;  %8743 = vmatpush3.msra.mxu0 %v5566_v51  ;;  %v5249_v8 = vld [vmem:[#allocation8 + $0x318] sm:$0xff] }
 0x355   : > { %8557 = vmatmul.mubr.f32.gmra.mxu1 %v11109_v45  ;;  %8744 = vmatprep.subr.mxu0 %v5565_v20  ;;  %v11173_v51 = vld [vmem:[#allocation2 + $0x182] sm:$0xff] }
 0x356   : > { %8559 = vmatprep.mubr.f32.mxu1 %v11112_v1  ;;  %8683 = vmatpush3.msra.mxu1 %v5250_v56  ;;  %v5871_v56 = vld [vmem:[#allocation8 + $0x468] sm:$0xff] }
 0x357   : > { %8625 = vmatmul.mubr.f32.gmra.mxu0 %v10959_v3  ;;  %8684 = vmatprep.subr.mxu1 %v5249_v8  ;;  %v11117_v3 = vld [vmem:[#allocation2 + $0xf9] sm:$0xff] }
 0x358   : > { %8627 = vmatprep.mubr.f32.mxu0 %v10962_v53  ;;  %8745 = vmatpush3.msra.mxu0 %v5565_v20  ;;  %v5563_v53 = vld [vmem:[#allocation8 + $0x3d8] sm:$0xff]  ;;  %v5219_v20 = vld [vmem:[#allocation2 + $0x78] sm:$0xff] }
 0x359   : > { %8560 = vmatmul.mubr.f32.gmra.mxu1 %v11117_v3  ;;  %8746 = vmatprep.subr.mxu0 %v5564_v39 }
 0x35a   : > { %8562 = vmatprep.mubr.f32.mxu1 %v11120_v35  ;;  %8747 = vmatpush3.msra.mxu0 %v5564_v39  ;;  %v5870_v39 = vld [vmem:[#allocation8 + $0x460] sm:$0xff] }
 0x35b   : > { %8628 = vmatmul.mubr.f32.gmra.mxu0 %v10967_v49  ;;  %8748 = vmatprep.subr.mxu0 %v5563_v53  ;;  %v11125_v49 = vld [vmem:[#allocation2 + $0x111] sm:$0xff] }
 0x35c   : > { %8630 = vmatprep.mubr.f32.mxu0 %v10970_v57  ;;  %8685 = vmatpush3.msra.mxu1 %v5249_v8  ;;  %v5248_v57 = vld [vmem:[#allocation8 + $0x310] sm:$0xff] }
 0x35d   : > { %8563 = vmatmul.mubr.f32.gmra.mxu1 %v11125_v49  ;;  %8749 = vmatpush3.msra.mxu0 %v5563_v53  ;;  %v11180_v53 = vld [vmem:[#allocation2 + $0x18a] sm:$0xff] }
 0x35e   : > { %8565 = vmatprep.mubr.f32.mxu1 %v11128_v16  ;;  %8750 = vmatprep.subr.mxu0 %v5562_v34 }
 0x35f   : > { %8631 = vmatmul.mubr.f32.gmra.mxu0 %v10975_v31  ;;  %8686 = vmatprep.subr.mxu1 %v5248_v57  ;;  %v11133_v31 = vld [vmem:[#allocation2 + $0x129] sm:$0xff] }
 0x360   : > { %8633 = vmatprep.mubr.f32.mxu0 %v10978_v4  ;;  %8751 = vmatpush3.msra.mxu0 %v5562_v34  ;;  %v5247_v4 = vld [vmem:[#allocation8 + $0x308] sm:$0xff]  ;;  %v5220_v34 = vld [vmem:[#allocation2 + $0x80] sm:$0xff] }
 0x361   : > { %8566 = vmatmul.mubr.f32.gmra.mxu1 %v11133_v31  ;;  %8752 = vmatprep.subr.mxu0 %v5561_v44 }
 0x362   : > { %8568 = vmatprep.mubr.f32.mxu1 %v11136_v46  ;;  %8687 = vmatpush3.msra.mxu1 %v5248_v57  ;;  %v5869_v57 = vld [vmem:[#allocation8 + $0x458] sm:$0xff] }
 0x363   : > { %8634 = vmatmul.mubr.f32.gmra.mxu0 %v10983_v25  ;;  %8688 = vmatprep.subr.mxu1 %v5247_v4  ;;  %v11141_v25 = vld [vmem:[#allocation2 + $0x141] sm:$0xff] }
 0x364   : > { %8636 = vmatprep.mubr.f32.mxu0 %v10986_v22  ;;  %8753 = vmatpush3.msra.mxu0 %v5561_v44  ;;  %v5559_v22 = vld [vmem:[#allocation8 + $0x3b8] sm:$0xff]  ;;  %v5221_v44 = vld [vmem:[#allocation2 + $0x90] sm:$0xff] }
 0x365   : > { %8569 = vmatmul.mubr.f32.gmra.mxu1 %v11141_v25  ;;  %8754 = vmatprep.subr.mxu0 %v5560_v12 }
 0x366   : > { %8571 = vmatprep.mubr.f32.mxu1 %v11144_v61  ;;  %8755 = vmatpush3.msra.mxu0 %v5560_v12  ;;  %v5868_v12 = vld [vmem:[#allocation8 + $0x450] sm:$0xff] }
 0x367   : > { %8637 = vmatmul.mubr.f32.gmra.mxu0 %v10991_v21  ;;  %8756 = vmatprep.subr.mxu0 %v5559_v22  ;;  %v11149_v21 = vld [vmem:[#allocation2 + $0x159] sm:$0xff] }
 0x368   : > { %8639 = vmatprep.mubr.f32.mxu0 %v10994_v33  ;;  %8689 = vmatpush3.msra.mxu1 %v5247_v4  ;;  %v5246_v33 = vld [vmem:[#allocation8 + $0x300] sm:$0xff] }
 0x369   : > { %8572 = vmatmul.mubr.f32.gmra.mxu1 %v11149_v21  ;;  %8757 = vmatpush3.msra.mxu0 %v5559_v22 }
 0x36a   : > { %8574 = vmatprep.mubr.f32.mxu1 %v10882_v52  ;;  %8758 = vmatprep.subr.mxu0 %v5558_v24  ;;  %v11161_v52 = vld [vmem:[#allocation2 + $0x189] sm:$0xff] }
 0x36b   : > { %8640 = vmatmul.mubr.f32.gmra.mxu0 %v10999_v36  ;;  %8690 = vmatprep.subr.mxu1 %v5246_v33  ;;  %v5873_v36 = vld [vmem:[#allocation8 + $0x478] sm:$0xff] }
 0x36c   : > { %8642 = vmatprep.mubr.f32.mxu0 %v11002_v10  ;;  %8759 = vmatpush3.msra.mxu0 %v5558_v24  ;;  %v11156_v10 = vld [vmem:[#allocation2 + $0x181] sm:$0xff] }
 0x36d   : > { %8575 = vmatmul.mubr.f32.gmra.mxu1 %v10886_v55  ;;  %8760 = vmatprep.subr.mxu0 %v5557_v43  ;;  %v5554_v55 = vld [vmem:[#allocation8 + $0x390] sm:$0xff] }
 0x36e   : > { %8577 = vmatprep.mubr.f32.mxu1 %v11156_v10  ;;  %8691 = vmatpush3.msra.mxu1 %v5246_v33  ;;  %v8214_v29 = vpop.f32.mrf.mxu1 }
 0x36f   : > { %8643 = vmatmul.mubr.f32.gmra.mxu0 %v11007_v32  ;;  %8820 = vmatprep.subr.mxu1 %v5873_v36  ;;  %v5555_v32 = vld [vmem:[#allocation8 + $0x398] sm:$0xff] }
 0x370   : > { %8645 = vmatprep.mubr.f32.mxu0 %v11010_v42  ;;  %8761 = vmatpush3.msra.mxu0 %v5557_v43  ;;  %v5213_v42 = vld [vmem:[#allocation2 + $0x30] sm:$0xff]  ;;  %v3605_v37 = vpop.f32.mrf.mxu1  ;;  %v5867_v43 = vld [vmem:[#allocation8 + $0x448] sm:$0xff] }
 0x371   : > { %8578 = vmatmul.mubr.f32.gmra.mxu1 %v11161_v52  ;;  %8762 = vmatprep.subr.mxu0 %v5556_v63 }
 0x372   : > { %8692 = vmatprep.mubr.f32.mxu1 %v5213_v42  ;;  %8763 = vmatpush3.msra.mxu0 %v5556_v63  ;;  %v11167_v50 = vpop.f32.mrf.mxu1  ;;  %v5223_v63 = vld [vmem:[#allocation2 + $0xa8] sm:$0xff] }
 0x373   : > { %8646 = vmatmul.mubr.f32.gmra.mxu0 %v11015_v60  ;;  %8764 = vmatprep.subr.mxu0 %v5555_v32  ;;  %v5214_v60 = vld [vmem:[#allocation2 + $0x38] sm:$0xff] }
 0x374   : > { %8648 = vmatprep.mubr.f32.mxu0 %v11018_v58  ;;  %8765 = vmatpush3.msra.mxu0 %v5555_v32  ;;  %v5872_v58 = vld [vmem:[#allocation8 + $0x470] sm:$0xff]  ;;  %v11170_v13 = vpop.f32.mrf.mxu1 }
 0x375   : > { %8693 = vmatmul.mubr.f32.vlgmr.msra.gmra.mxu1 %v5214_v60  ;;  %8766 = vmatprep.subr.mxu0 %v5554_v55  ;;  %v5224_v60 = vld [vmem:[#allocation2 + $0xb0] sm:$0xff] }
 0x376   : > { %8695 = vmatprep.mubr.f32.mxu1 %v5215_v17  ;;  %8821 = vmatpush3.msra.mxu1 %v5873_v36 }
 0x377   : > { %8649 = vmatmul.mubr.f32.gmra.mxu0 %v11023_v62  ;;  %8822 = vmatprep.subr.mxu1 %v5872_v58  ;;  %v5216_v62 = vld [vmem:[#allocation2 + $0x50] sm:$0xff] }
 0x378   : > { %8651 = vmatprep.mubr.f32.mxu0 %v11026_v14  ;;  %8767 = vmatpush3.msra.mxu0 %v5554_v55  ;;  %v5217_v14 = vld [vmem:[#allocation2 + $0x60] sm:$0xff] }
 0x379   : > { %8696 = vmatmul.mubr.f32.gmra.mxu1 %v5216_v62  ;;  %8768 = vmatprep.subr.mxu0 %v5553_v15 }
 0x37a   : > { %8698 = vmatprep.mubr.f32.mxu1 %v5217_v14  ;;  %8769 = vmatpush3.msra.mxu0 %v5553_v15 }
 0x37b   : > { %8652 = vmatmul.mubr.f32.gmra.mxu0 %v11031_v7  ;;  %8823 = vmatpush3.msra.mxu1 %v5872_v58  ;;  %v11175_v7 = vpop.f32.mrf.mxu1  ;;  %v5865_v58 = vld [vmem:[#allocation8 + $0x438] sm:$0xff] }
 0x37c   : > { %8654 = vmatprep.mubr.f32.mxu0 %v11034_v6  ;;  %8770 = vmatprep.subr.mxu0 %v5552_v38  ;;  %v5218_v6 = vld [vmem:[#allocation2 + $0x68] sm:$0xff] }
 0x37d   : > { %8771 = vmatpush3.msra.mxu0 %v5552_v38  ;;  %8699 = vmatmul.mubr.f32.gmra.mxu1 %v5218_v6  ;;  %v11178_v8 = vpop.f32.mrf.mxu1  ;;  %v5226_v38 = vld [vmem:[#allocation2 + $0xc8] sm:$0xff] }
 0x37e   : > { %8824 = vmatprep.subr.mxu1 %v5871_v56  ;;  %8701 = vmatprep.mubr.f32.mxu1 %v5219_v20 }
 0x37f   : > { %8655 = vmatmul.mubr.f32.gmra.mxu0 %v11039_v30  ;;  %8825 = vmatpush3.msra.mxu1 %v5871_v56  ;;  %v11183_v30 = vpop.f32.mrf.mxu1  ;;  %v5863_v56 = vld [vmem:[#allocation8 + $0x428] sm:$0xff] }
 0x380   : > { %8657 = vmatprep.mubr.f32.mxu0 %v11173_v51  ;;  %8826 = vmatprep.subr.mxu1 %v5870_v39 }
 0x381   : > { %8702 = vmatmul.mubr.f32.gmra.mxu1 %v5220_v34  ;;  %v11186_v4 = vpop.f32.mrf.mxu1 }
 0x382   : > { %8704 = vmatprep.mubr.f32.mxu1 %v5221_v44  ;;  %8827 = vmatpush3.msra.mxu1 %v5870_v39  ;;  %v5861_v44 = vld [vmem:[#allocation8 + $0x418] sm:$0xff] }
 0x383   : > { %8658 = vmatmul.mubr.f32.gmra.mxu0 %v11180_v53  ;;  %v11189_v24 = vpop.f32.mrf.mxu1  ;;  %8828 = vmatprep.subr.mxu1 %v5869_v57 }
 0x384   : > { %8772 = vmatprep.mubr.f32.mxu0 %v11044_v48  ;;  %v5222_v48 = vld [vmem:[#allocation2 + $0x98] sm:$0xff]  ;;  %8829 = vmatpush3.msra.mxu1 %v5869_v57  ;;  %v5228_v57 = vld [vmem:[#allocation2 + $0xe0] sm:$0xff] }
 0x385   : > { %8705 = vmatmul.mubr.f32.gmra.mxu1 %v5222_v48  ;;  %v11194_v32 = vpop.f32.mrf.mxu1  ;;  %8830 = vmatprep.subr.mxu1 %v5868_v12 }
 0x386   : > { %8707 = vmatprep.mubr.f32.mxu1 %v5223_v63  ;;  %8831 = vmatpush3.msra.mxu1 %v5868_v12  ;;  %v5859_v63 = vld [vmem:[#allocation8 + $0x408] sm:$0xff] }
 0x387   : > { %v8294_v22 = vpop.f32.mrf.mxu0  ;;  %8773 = vmatmul.mubr.f32.vlgmr.msra.gmra.mxu0 %v11049_v41  ;;  %v5866_v41 = vld [vmem:[#allocation8 + $0x440] sm:$0xff]  ;;  %8832 = vmatprep.subr.mxu1 %v5867_v43 }
 0x388   : > { %v11191_v33 = vadd.f32 %v8294_v22, %v8214_v29  ;;  %8775 = vmatprep.mubr.f32.mxu0 %v11052_v47  ;;  %v11199_v29 = vpop.f32.mrf.mxu1  ;;  %8833 = vmatpush3.msra.mxu1 %v5867_v43 }
 0x389   : > { %v3830_v36 = vpop.f32.mrf.mxu0  ;;  %8708 = vmatmul.mubr.f32.gmra.mxu1 %v5224_v60  ;;  %8834 = vmatprep.subr.mxu1 %v5866_v41 }
 0x38a   : > { %v11196_v42 = vadd.f32 %v3830_v36, %v3605_v37  ;;  %v5225_v37 = vld [vmem:[#allocation2 + $0xc0] sm:$0xff]  ;;  %v11205_v15 = vpop.f32.mrf.mxu1  ;;  %8835 = vmatpush3.msra.mxu1 %v5866_v41  ;;  %v5230_v36 = vld [vmem:[#allocation2 + $0xf8] sm:$0xff] }
 0x38b   : > { %v8297_v55 = vpop.f32.mrf.mxu0  ;;  %8776 = vmatmul.mubr.f32.gmra.mxu0 %v11059_v18  ;;  %8710 = vmatprep.mubr.f32.mxu1 %v5225_v37  ;;  %v5864_v18 = vld [vmem:[#allocation8 + $0x430] sm:$0xff] }
 0x38c   : > { %v11202_v47 = vadd.f32 %v8297_v55, %v11167_v50  ;;  %8778 = vmatprep.mubr.f32.mxu0 %v11062_v28  ;;  %v11211_v50 = vpop.f32.mrf.mxu1  ;;  %8836 = vmatprep.subr.mxu1 %v5865_v58 }
 0x38d   : > { %v3840_v17 = vpop.f32.mrf.mxu0  ;;  %8837 = vmatpush3.msra.mxu1 %v5865_v58 }
 0x38e   : > { %v11208_v62 = vadd.f32 %v3840_v17, %v11170_v13  ;;  %8711 = vmatmul.mubr.f32.gmra.mxu1 %v5226_v38  ;;  %v5227_v13 = vld [vmem:[#allocation2 + $0xd8] sm:$0xff]  ;;  %v11217_v20 = vpop.f32.mrf.mxu1  ;;  %8838 = vmatprep.subr.mxu1 %v5864_v18  ;;  %v5232_v17 = vld [vmem:[#allocation2 + $0x110] sm:$0xff] }
 0x38f   : > { %v8300_v14 = vpop.f32.mrf.mxu0  ;;  %8779 = vmatmul.mubr.f32.gmra.mxu0 %v11069_v23  ;;  %8713 = vmatprep.mubr.f32.mxu1 %v5227_v13  ;;  %v5862_v23 = vld [vmem:[#allocation8 + $0x420] sm:$0xff] }
 0x390   : > { %v11214_v28 = vadd.f32 %v8300_v14, %v11175_v7  ;;  %8781 = vmatprep.mubr.f32.mxu0 %v11072_v54  ;;  %8839 = vmatpush3.msra.mxu1 %v5864_v18  ;;  %v11223_v7 = vpop.f32.mrf.mxu1  ;;  %v5233_v18 = vld [vmem:[#allocation2 + $0x120] sm:$0xff] }
 0x391   : > { %v3850_v6 = vpop.f32.mrf.mxu0  ;;  %8840 = vmatprep.subr.mxu1 %v5863_v56 }
 0x392   : > { %v11220_v39 = vadd.f32 %v3850_v6, %v11178_v8  ;;  %8841 = vmatpush3.msra.mxu1 %v5863_v56  ;;  %v5229_v8 = vld [vmem:[#allocation2 + $0xf0] sm:$0xff]  ;;  %v3675_v22 = vpop.f32.mrf.mxu1  ;;  %v5235_v6 = vld [vmem:[#allocation2 + $0x138] sm:$0xff] }
 0x393   : > { %v8303_v34 = vpop.f32.mrf.mxu0  ;;  %8782 = vmatmul.mubr.f32.gmra.mxu0 %v11077_v11  ;;  %8714 = vmatmul.mubr.f32.gmra.mxu1 %v5228_v57  ;;  %v5860_v11 = vld [vmem:[#allocation8 + $0x410] sm:$0xff]  ;;  %v5237_v57 = vld [vmem:[#allocation2 + $0x150] sm:$0xff] }
 0x394   : > { %v11226_v54 = vadd.f32 %v8303_v34, %v11183_v30  ;;  %8784 = vmatprep.mubr.f32.mxu0 %v11080_v19  ;;  %8842 = vmatprep.subr.mxu1 %v5862_v23  ;;  %v8238_v30 = vpop.f32.mrf.mxu1 }
 0x395   : > { %v3860_v12 = vpop.f32.mrf.mxu0  ;;  %8716 = vmatprep.mubr.f32.mxu1 %v5229_v8  ;;  %8843 = vmatpush3.msra.mxu1 %v5862_v23 }
 0x396   : > { %v11230_v48 = vadd.f32 %v3860_v12, %v11186_v4  ;;  %8844 = vmatprep.subr.mxu1 %v5861_v44  ;;  %v5231_v4 = vld [vmem:[#allocation2 + $0x108] sm:$0xff]  ;;  %v3685_v55 = vpop.f32.mrf.mxu1 }
 0x397   : > { %v8306_v43 = vpop.f32.mrf.mxu0  ;;  %8785 = vmatmul.mubr.f32.gmra.mxu0 %v11085_v2  ;;  %8845 = vmatpush3.msra.mxu1 %v5861_v44  ;;  %v5858_v2 = vld [vmem:[#allocation8 + $0x400] sm:$0xff] }
 0x398   : > { %v11234_v19 = vadd.f32 %v8306_v43, %v11189_v24  ;;  %8787 = vmatprep.mubr.f32.mxu0 %v11088_v27  ;;  %8717 = vmatmul.mubr.f32.gmra.mxu1 %v5230_v36  ;;  %v8241_v24 = vpop.f32.mrf.mxu1 }
 0x399   : > { %v3870_v41 = vpop.f32.mrf.mxu0  ;;  %8846 = vmatprep.subr.mxu1 %v5860_v11  ;;  %8719 = vmatprep.mubr.f32.mxu1 %v5231_v4 }
 0x39a   : > { %v11238_v60 = vadd.f32 %v3870_v41, %v11194_v32  ;;  %8847 = vmatpush3.msra.mxu1 %v5860_v11  ;;  %v3695_v32 = vpop.f32.mrf.mxu1 }
 0x39b   : > { %v8309_v58 = vpop.f32.mrf.mxu0  ;;  %8788 = vmatmul.mubr.f32.gmra.mxu0 %v11093_v9  ;;  %8848 = vmatprep.subr.mxu1 %v5859_v63 }
 0x39c   : > { %v11242_v27 = vadd.f32 %v8309_v58, %v11199_v29  ;;  %8790 = vmatprep.mubr.f32.mxu0 %v11096_v26  ;;  %8849 = vmatpush3.msra.mxu1 %v5859_v63  ;;  %v8244_v38 = vpop.f32.mrf.mxu1  ;;  %v5234_v26 = vld [vmem:[#allocation2 + $0x128] sm:$0xff] }
 0x39d   : > { %v3880_v37 = vpop.f32.mrf.mxu0  ;;  %8720 = vmatmul.mubr.f32.gmra.mxu1 %v5232_v17  ;;  %8850 = vmatprep.subr.mxu1 %v5858_v2 }
 0x39e   : > { %v11246_v14 = vadd.f32 %v3880_v37, %v11205_v15  ;;  %8722 = vmatprep.mubr.f32.mxu1 %v5233_v18  ;;  %8851 = vmatpush3.msra.mxu1 %v5858_v2  ;;  %v3705_v13 = vpop.f32.mrf.mxu1 }
 0x39f   : > { %v8312_v9 = vpop.f32.mrf.mxu0  ;;  %8791 = vmatmul.mubr.f32.gmra.mxu0 %v11101_v0 }
 0x3a0   : > { %v11250_v29 = vadd.f32 %v8312_v9, %v11211_v50  ;;  %8793 = vmatprep.mubr.f32.mxu0 %v11104_v59  ;;  %v8247_v34 = vpop.f32.mrf.mxu1  ;;  %v5236_v50 = vld [vmem:[#allocation2 + $0x140] sm:$0xff] }
 0x3a1   : > { %v3890_v56 = vpop.f32.mrf.mxu0  ;;  %8723 = vmatmul.mubr.f32.gmra.mxu1 %v5234_v26 }
 0x3a2   : > { %v11254_v23 = vadd.f32 %v3890_v56, %v11217_v20  ;;  %8725 = vmatprep.mubr.f32.mxu1 %v5235_v6  ;;  %v3715_v44 = vpop.f32.mrf.mxu1 }
 0x3a3   : > { %v8315_v15 = vpop.f32.mrf.mxu0  ;;  %8794 = vmatmul.mubr.f32.gmra.mxu0 %v11109_v45  ;;  %v5238_v45 = vld [vmem:[#allocation2 + $0x158] sm:$0xff] }
 0x3a4   : > { %v11258_v0 = vadd.f32 %v8315_v15, %v11223_v7  ;;  %8796 = vmatprep.mubr.f32.mxu0 %v11112_v1  ;;  %v8250_v8 = vpop.f32.mrf.mxu1  ;;  %v5239_v1 = vld [vmem:[#allocation2 + $0x168] sm:$0xff] }
 0x3a5   : > { %v3900_v59 = vpop.f32.mrf.mxu0  ;;  %8726 = vmatmul.mubr.f32.gmra.mxu1 %v5236_v50  ;;  %v5827_v15 = vld [vmem:[#allocation2 + $0x4a] sm:$0xff] }
 0x3a6   : > { %v11261_v12 = vadd.f32 %v3900_v59, %v3675_v22  ;;  %8728 = vmatprep.mubr.f32.mxu1 %v5237_v57  ;;  %v3725_v43 = vpop.f32.mrf.mxu1 }
 0x3a7   : > { %v8318_v20 = vpop.f32.mrf.mxu0  ;;  %8797 = vmatmul.mubr.f32.gmra.mxu0 %v11117_v3  ;;  %v5240_v3 = vld [vmem:[#allocation2 + $0x170] sm:$0xff] }
 0x3a8   : > { %v11264_v11 = vadd.f32 %v8318_v20, %v8238_v30  ;;  %8799 = vmatprep.mubr.f32.mxu0 %v11120_v35  ;;  %v8253_v22 = vpop.f32.mrf.mxu1 }
 0x3a9   : > { %v3910_v7 = vpop.f32.mrf.mxu0  ;;  %8729 = vmatmul.mubr.f32.gmra.mxu1 %v5238_v45 }
 0x3aa   : > { %v11267_v36 = vadd.f32 %v3910_v7, %v3685_v55  ;;  %8731 = vmatprep.mubr.f32.mxu1 %v5239_v1  ;;  %v3735_v35 = vpop.f32.mrf.mxu1  ;;  %v5829_v7 = vld [vmem:[#allocation2 + $0x62] sm:$0xff] }
 0x3ab   : > { %v8321_v63 = vpop.f32.mrf.mxu0  ;;  %8800 = vmatmul.mubr.f32.gmra.mxu0 %v11125_v49 }
 0x3ac   : > { %v11270_v41 = vadd.f32 %v8321_v63, %v8241_v24  ;;  %8802 = vmatprep.mubr.f32.mxu0 %v11128_v16  ;;  %v8256_v55 = vpop.f32.mrf.mxu1  ;;  %v5243_v16 = vld [vmem:[#allocation2 + $0x198] sm:$0xff] }
 0x3ad   : > { %v3920_v30 = vpop.f32.mrf.mxu0  ;;  %8732 = vmatmul.mubr.f32.gmra.mxu1 %v5240_v3 }
 0x3ae   : > { %v11273_v4 = vadd.f32 %v3920_v30, %v3695_v32  ;;  %8734 = vmatprep.mubr.f32.mxu1 %v11056_v40  ;;  %v3745_v24 = vpop.f32.mrf.mxu1 }
 0x3af   : > { %v8324_v2 = vpop.f32.mrf.mxu0  ;;  %8803 = vmatmul.mubr.f32.gmra.mxu0 %v11133_v31  ;;  %v5244_v31 = vld [vmem:[#allocation2 + $0x1a0] sm:$0xff] }
 0x3b0   : > { %v11277_v58 = vadd.f32 %v8324_v2, %v8244_v38  ;;  %8805 = vmatprep.mubr.f32.mxu0 %v11136_v46  ;;  %v8259_v40 = vpop.f32.mrf.mxu1  ;;  %v5825_v46 = vld [vmem:[#allocation2 + $0x32] sm:$0xff] }
 0x3b1   : > { %v3930_v49 = vpop.f32.mrf.mxu0  ;;  %8735 = vmatmul.mubr.f32.gmra.mxu1 %v11064_v5 }
 0x3b2   : > { %v11281_v17 = vadd.f32 %v3930_v49, %v3705_v13  ;;  %8737 = vmatprep.mubr.f32.mxu1 %v5243_v16  ;;  %v3755_v9 = vpop.f32.mrf.mxu1  ;;  %v5826_v13 = vld [vmem:[#allocation2 + $0x3a] sm:$0xff] }
 0x3b3   : > { %v8327_v37 = vpop.f32.mrf.mxu0  ;;  %8806 = vmatmul.mubr.f32.gmra.mxu0 %v11141_v25  ;;  %v8990_v25 = vld [vmem:[#allocation2 + $0x199] sm:$0xff] }
 0x3b4   : > { %v11284_v18 = vadd.f32 %v8327_v37, %v8247_v34  ;;  %8808 = vmatprep.mubr.f32.mxu0 %v11144_v61  ;;  %v8374_v26 = vpop.f32.mrf.mxu1 }
 0x3b5   : > { %v3940_v32 = vpop.f32.mrf.mxu0  ;;  %8738 = vmatmul.mubr.f32.gmra.mxu1 %v5244_v31  ;;  %v4264_v6 = vadd.f32 %v8374_v26, %v11191_v33 }
 0x3b6   : > { %v11287_v38 = vadd.f32 %v3940_v32, %v3715_v44  ;;  %8852 = vmatprep.mubr.f32.mxu1 %v5825_v46  ;;  %v4104_v34 = vpop.f32.mrf.mxu1  ;;  %v8991_v44 = vld [vmem:[#allocation2 + $0x1a1] sm:$0xff]  ;;  %v5833_v32 = vld [vmem:[#allocation2 + $0x92] sm:$0xff] }
 0x3b7   : > { %v8330_v5 = vpop.f32.mrf.mxu0  ;;  %8809 = vmatmul.mubr.f32.gmra.mxu0 %v11149_v21  ;;  %v4263_v59 = vadd.f32 %v4104_v34, %v11196_v42 }
 0x3b8   : > { %v11290_v56 = vadd.f32 %v8330_v5, %v8250_v8  ;;  %8811 = vmatprep.mubr.f32.mxu0 %v8990_v25  ;;  %v8377_v21 = vpop.f32.mrf.mxu1  ;;  %v5828_v8 = vld [vmem:[#allocation2 + $0x52] sm:$0xff] }
 0x3b9   : > { %v3950_v61 = vpop.f32.mrf.mxu0  ;;  %8853 = vmatmul.mubr.f32.vlgmr.msra.gmra.mxu1 %v5826_v13  ;;  %v4266_v33 = vadd.f32 %v8377_v21, %v11202_v47  ;;  %v5831_v47 = vld [vmem:[#allocation2 + $0x7a] sm:$0xff] }
 0x3ba   : > { %v11293_v50 = vadd.f32 %v3950_v61, %v3725_v43  ;;  %8855 = vmatprep.mubr.f32.mxu1 %v5827_v15  ;;  %v4114_v1 = vpop.f32.mrf.mxu1 }
 0x3bb   : > { %v8333_v57 = vpop.f32.mrf.mxu0  ;;  %8812 = vmatmul.mubr.f32.gmra.mxu0 %v8991_v44  ;;  %v4265_v42 = vadd.f32 %v4114_v1, %v11208_v62 }
 0x3bc   : > { %v11296_v20 = vadd.f32 %v8333_v57, %v8253_v22  ;;  %8814 = vmatprep.mubr.f32.mxu0 %v11156_v10  ;;  %v5830_v22 = vld [vmem:[#allocation2 + $0x6a] sm:$0xff]  ;;  %v8380_v30 = vpop.f32.mrf.mxu1 }
 0x3bd   : > { %v3960_v45 = vpop.f32.mrf.mxu0  ;;  %8856 = vmatmul.mubr.f32.gmra.mxu1 %v5828_v8  ;;  %v4268_v49 = vadd.f32 %v8380_v30, %v11214_v28 }
 0x3be   : > { %v11300_v43 = vadd.f32 %v3960_v45, %v3735_v35  ;;  %8858 = vmatprep.mubr.f32.mxu1 %v5829_v7  ;;  %v4124_v16 = vpop.f32.mrf.mxu1 }
 0x3bf   : > { %v8336_v63 = vpop.f32.mrf.mxu0  ;;  %8815 = vmatmul.mubr.f32.gmra.mxu0 %v11161_v52  ;;  %v4267_v52 = vadd.f32 %v4124_v16, %v11220_v39  ;;  %v5835_v39 = vld [vmem:[#allocation2 + $0xaa] sm:$0xff] }
 0x3c0   : > { %v11304_v3 = vadd.f32 %v8336_v63, %v8256_v55  ;;  %8817 = vmatprep.mubr.f32.mxu0 %v8990_v25  ;;  %v5832_v55 = vld [vmem:[#allocation2 + $0x82] sm:$0xff]  ;;  %v8383_v31 = vpop.f32.mrf.mxu1 }
 0x3c1   : > { %v3970_v10 = vpop.f32.mrf.mxu0  ;;  %8859 = vmatmul.mubr.f32.gmra.mxu1 %v5830_v22 }
 0x3c2   : > { %v11306_v2 = vadd.f32 %v3970_v10, %v3745_v24  ;;  %8861 = vmatprep.mubr.f32.mxu1 %v5831_v47  ;;  %v4270_v24 = vadd.f32 %v8383_v31, %v11226_v54  ;;  %v4134_v28 = vpop.f32.mrf.mxu1 }
 0x3c3   : > { %v8339_v35 = vpop.f32.mrf.mxu0  ;;  %8818 = vmatmul.mubr.f32.gmra.mxu0 %v8991_v44  ;;  %v4269_v25 = vadd.f32 %v4134_v28, %v11230_v48  ;;  %v5837_v48 = vld [vmem:[#allocation2 + $0xc2] sm:$0xff] }
 0x3c4   : > { %v11309_v62 = vadd.f32 %v8339_v35, %v8259_v40  ;;  %v5834_v40 = vld [vmem:[#allocation2 + $0x9a] sm:$0xff]  ;;  %v8386_v61 = vpop.f32.mrf.mxu1 }
 0x3c5   : > { %v3980_v37 = vpop.f32.mrf.mxu0  ;;  %8862 = vmatmul.mubr.f32.gmra.mxu1 %v5832_v55  ;;  %v4272_v34 = vadd.f32 %v8386_v61, %v11234_v19 }
 0x3c6   : > { %v11312_v46 = vadd.f32 %v3980_v37, %v3755_v9  ;;  %8864 = vmatprep.mubr.f32.mxu1 %v5833_v32  ;;  %v4144_v57 = vpop.f32.mrf.mxu1 }
 0x3c7   : > { %v8454_v5 = vpop.f32.mrf.mxu0  ;;  %v4271_v44 = vadd.f32 %v4144_v57, %v11238_v60  ;;  %v5839_v60 = vld [vmem:[#allocation2 + $0xda] sm:$0xff] }
 0x3c8   : > { %v11315_v26 = vadd.f32 %v8454_v5, %v4264_v6  ;;  %v5836_v6 = vld [vmem:[#allocation2 + $0xb2] sm:$0xff] }
 0x3c9   : > { %v4410_v13 = vpop.f32.mrf.mxu0  ;;  %8865 = vmatmul.mubr.f32.gmra.mxu1 %v5834_v40  ;;  %v8389_v8 = vpop.f32.mrf.mxu1 }
 0x3ca   : > { %v11318_v15 = vadd.f32 %v4410_v13, %v4263_v59  ;;  %8867 = vmatprep.mubr.f32.mxu1 %v5835_v39  ;;  %v4274_v7 = vadd.f32 %v8389_v8, %v11242_v27 }
 0x3cb   : > { %v8457_v9 = vpop.f32.mrf.mxu0  ;;  %v4154_v1 = vpop.f32.mrf.mxu1 }
 0x3cc   : > { %v11321_v54 = vadd.f32 %v8457_v9, %v4266_v33  ;;  %v4273_v63 = vadd.f32 %v4154_v1, %v11246_v14  ;;  %v5838_v33 = vld [vmem:[#allocation2 + $0xca] sm:$0xff]  ;;  %v5841_v14 = vld [vmem:[#allocation2 + $0xf2] sm:$0xff] }
 0x3cd   : > { %v4420_v21 = vpop.f32.mrf.mxu0  ;;  %8868 = vmatmul.mubr.f32.gmra.mxu1 %v5836_v6  ;;  %v8392_v10 = vpop.f32.mrf.mxu1 }
 0x3ce   : > { %v11324_v45 = vadd.f32 %v4420_v21, %v4265_v42  ;;  %8870 = vmatprep.mubr.f32.mxu1 %v5837_v48  ;;  %v4276_v47 = vadd.f32 %v8392_v10, %v11250_v29 }
 0x3cf   : > { %v8460_v59 = vpop.f32.mrf.mxu0  ;;  %v4164_v35 = vpop.f32.mrf.mxu1 }
 0x3d0   : > { %v11327_v19 = vadd.f32 %v8460_v59, %v4268_v49  ;;  %v4275_v16 = vadd.f32 %v4164_v35, %v11254_v23  ;;  %v5840_v49 = vld [vmem:[#allocation2 + $0xe2] sm:$0xff]  ;;  %v5843_v23 = vld [vmem:[#allocation2 + $0x10a] sm:$0xff] }
 0x3d1   : > { %v4430_v22 = vpop.f32.mrf.mxu0  ;;  %8871 = vmatmul.mubr.f32.gmra.mxu1 %v5838_v33  ;;  %v8395_v37 = vpop.f32.mrf.mxu1 }
 0x3d2   : > { %v11330_v30 = vadd.f32 %v4430_v22, %v4267_v52  ;;  %8873 = vmatprep.mubr.f32.mxu1 %v5839_v60  ;;  %v4278_v32 = vadd.f32 %v8395_v37, %v11258_v0 }
 0x3d3   : > { %v8463_v42 = vpop.f32.mrf.mxu0  ;;  %v4174_v5 = vpop.f32.mrf.mxu1 }
 0x3d4   : > { %v11333_v27 = vadd.f32 %v8463_v42, %v4270_v24  ;;  %v4277_v28 = vadd.f32 %v4174_v5, %v11261_v12  ;;  %v5842_v24 = vld [vmem:[#allocation2 + $0xfa] sm:$0xff]  ;;  %v5845_v12 = vld [vmem:[#allocation2 + $0x122] sm:$0xff] }
 0x3d5   : > { %v4440_v55 = vpop.f32.mrf.mxu0  ;;  %8874 = vmatmul.mubr.f32.gmra.mxu1 %v5840_v49  ;;  %v8398_v13 = vpop.f32.mrf.mxu1 }
 0x3d6   : > { %v11336_v31 = vadd.f32 %v4440_v55, %v4269_v25  ;;  %8876 = vmatprep.mubr.f32.mxu1 %v5841_v14  ;;  %v4280_v39 = vadd.f32 %v8398_v13, %v11264_v11 }
 0x3d7   : > { %v8466_v52 = vpop.f32.mrf.mxu0  ;;  %v4184_v9 = vpop.f32.mrf.mxu1 }
 0x3d8   : > { %v11339_v29 = vadd.f32 %v8466_v52, %v4272_v34  ;;  %v4279_v57 = vadd.f32 %v4184_v9, %v11267_v36  ;;  %v5844_v34 = vld [vmem:[#allocation2 + $0x112] sm:$0xff]  ;;  %v5847_v36 = vld [vmem:[#allocation2 + $0x13a] sm:$0xff] }
 0x3d9   : > { %v4450_v40 = vpop.f32.mrf.mxu0  ;;  %8877 = vmatmul.mubr.f32.gmra.mxu1 %v5842_v24  ;;  %v8401_v21 = vpop.f32.mrf.mxu1 }
 0x3da   : > { %v11342_v61 = vadd.f32 %v4450_v40, %v4271_v44  ;;  %8879 = vmatprep.mubr.f32.mxu1 %v5843_v23  ;;  %v4282_v48 = vadd.f32 %v8401_v21, %v11270_v41 }
 0x3db   : > { %v8469_v25 = vpop.f32.mrf.mxu0  ;;  %v4194_v59 = vpop.f32.mrf.mxu1 }
 0x3dc   : > { %v11345_v0 = vadd.f32 %v8469_v25, %v4274_v7  ;;  %v4281_v1 = vadd.f32 %v4194_v59, %v11273_v4  ;;  %v5846_v7 = vld [vmem:[#allocation2 + $0x12a] sm:$0xff]  ;;  %v5849_v4 = vld [vmem:[#allocation2 + $0x152] sm:$0xff] }
 0x3dd   : > { %v4460_v6 = vpop.f32.mrf.mxu0  ;;  %8880 = vmatmul.mubr.f32.gmra.mxu1 %v5844_v34  ;;  %v8404_v22 = vpop.f32.mrf.mxu1 }
 0x3de   : > { %v11348_v8 = vadd.f32 %v4460_v6, %v4273_v63  ;;  %8882 = vmatprep.mubr.f32.mxu1 %v5845_v12  ;;  %v4284_v60 = vadd.f32 %v8404_v22, %v11277_v58 }
 0x3df   : > { %v8472_v44 = vpop.f32.mrf.mxu0  ;;  %v4204_v42 = vpop.f32.mrf.mxu1 }
 0x3e0   : > { %v11351_v11 = vadd.f32 %v8472_v44, %v4276_v47  ;;  %v4283_v35 = vadd.f32 %v4204_v42, %v11281_v17  ;;  %v5848_v47 = vld [vmem:[#allocation2 + $0x142] sm:$0xff]  ;;  %v5851_v17 = vld [vmem:[#allocation2 + $0x16a] sm:$0xff] }
 0x3e1   : > { %v4470_v33 = vpop.f32.mrf.mxu0  ;;  %8883 = vmatmul.mubr.f32.gmra.mxu1 %v5846_v7  ;;  %v8407_v55 = vpop.f32.mrf.mxu1 }
 0x3e2   : > { %v11354_v10 = vadd.f32 %v4470_v33, %v4275_v16  ;;  %8885 = vmatprep.mubr.f32.mxu1 %v5847_v36  ;;  %v4286_v14 = vadd.f32 %v8407_v55, %v11284_v18  ;;  %v5856_v36 = vld [vmem:[#allocation2 + $0x1a2] sm:$0xff] }
 0x3e3   : > { %v8475_v63 = vpop.f32.mrf.mxu0  ;;  %v4214_v52 = vpop.f32.mrf.mxu1 }
 0x3e4   : > { %v11357_v41 = vadd.f32 %v8475_v63, %v4278_v32  ;;  %v4285_v5 = vadd.f32 %v4214_v52, %v11287_v38  ;;  %v5850_v32 = vld [vmem:[#allocation2 + $0x15a] sm:$0xff] }
 0x3e5   : > { %v4480_v49 = vpop.f32.mrf.mxu0  ;;  %8886 = vmatmul.mubr.f32.gmra.mxu1 %v5848_v47  ;;  %v8410_v40 = vpop.f32.mrf.mxu1 }
 0x3e6   : > { %v11360_v37 = vadd.f32 %v4480_v49, %v4277_v28  ;;  %8888 = vmatprep.mubr.f32.mxu1 %v5849_v4  ;;  %v4288_v23 = vadd.f32 %v8410_v40, %v11290_v56 }
 0x3e7   : > { %v8478_v16 = vpop.f32.mrf.mxu0  ;;  %v4224_v25 = vpop.f32.mrf.mxu1 }
 0x3e8   : > { %v11363_v58 = vadd.f32 %v8478_v16, %v4280_v39  ;;  %v4287_v9 = vadd.f32 %v4224_v25, %v11293_v50  ;;  %v5852_v39 = vld [vmem:[#allocation2 + $0x172] sm:$0xff]  ;;  %v5855_v50 = vld [vmem:[#allocation2 + $0x19a] sm:$0xff] }
 0x3e9   : > { %v4490_v24 = vpop.f32.mrf.mxu0  ;;  %8889 = vmatmul.mubr.f32.gmra.mxu1 %v5850_v32  ;;  %v8413_v6 = vpop.f32.mrf.mxu1 }
 0x3ea   : > { %v11366_v13 = vadd.f32 %v4490_v24, %v4279_v57  ;;  %8891 = vmatprep.mubr.f32.mxu1 %v5851_v17  ;;  %v4290_v21 = vadd.f32 %v8413_v6, %v11296_v20 }
 0x3eb   : > { %v8481_v28 = vpop.f32.mrf.mxu0  ;;  %v4234_v12 = vpop.f32.mrf.mxu1 }
 0x3ec   : > { %v11369_v18 = vadd.f32 %v8481_v28, %v4282_v48  ;;  %v4289_v44 = vadd.f32 %v4234_v12, %v11300_v43 }
 0x3ed   : > { %v4500_v34 = vpop.f32.mrf.mxu0  ;;  %8892 = vmatmul.mubr.f32.gmra.mxu1 %v5852_v39  ;;  %v8416_v59 = vpop.f32.mrf.mxu1 }
 0x3ee   : > { %v11372_v38 = vadd.f32 %v4500_v34, %v4281_v1  ;;  %8894 = vmatprep.mubr.f32.mxu1 %v11173_v51  ;;  %v4292_v1 = vadd.f32 %v8416_v59, %v11304_v3 }
 0x3ef   : > { %v8484_v57 = vpop.f32.mrf.mxu0  ;;  %v4244_v20 = vpop.f32.mrf.mxu1 }
 0x3f0   : > { %v11376_v56 = vadd.f32 %v8484_v57, %v4284_v60  ;;  %v4291_v51 = vadd.f32 %v4244_v20, %v11306_v2 }
 0x3f1   : > { %v4510_v48 = vpop.f32.mrf.mxu0  ;;  %8895 = vmatmul.mubr.f32.gmra.mxu1 %v11180_v53  ;;  %v8419_v63 = vpop.f32.mrf.mxu1 }
 0x3f2   : > { %v11380_v7 = vadd.f32 %v4510_v48, %v4283_v35  ;;  %8897 = vmatprep.mubr.f32.mxu1 %v5855_v50  ;;  %v4294_v53 = vadd.f32 %v8419_v63, %v11309_v62 }
 0x3f3   : > { %v8487_v33 = vpop.f32.mrf.mxu0  ;;  %v4254_v35 = vpop.f32.mrf.mxu1 }
 0x3f4   : > { %v11383_v22 = vadd.f32 %v8487_v33, %v4286_v14  ;;  %v4293_v3 = vadd.f32 %v4254_v35, %v11312_v46 }
 0x3f5   : > { %v4520_v60 = vpop.f32.mrf.mxu0  ;;  %8898 = vmatmul.mubr.f32.gmra.mxu1 %v5856_v36  ;;  %v8534_v55 = vpop.f32.mrf.mxu1 }
 0x3f6   : > { %v11386_v43 = vadd.f32 %v4520_v60, %v4285_v5  ;;  %v4876_v2 = vadd.f32 %v8534_v55, %v11315_v26 }
 0x3f7   : > { %v8490_v42 = vpop.f32.mrf.mxu0  ;;  %v4716_v16 = vpop.f32.mrf.mxu1 }
 0x3f8   : > { %v11389_v47 = vadd.f32 %v8490_v42, %v4288_v23  ;;  %v11398_v5 = vadd.f32 %v4716_v16, %v11318_v15 }
 0x3f9   : > { %v4530_v49 = vpop.f32.mrf.mxu0  ;;  %v8537_v32 = vpop.f32.mrf.mxu1 }
 0x3fa   : > { %v11392_v4 = vadd.f32 %v4530_v49, %v4287_v9  ;;  %v4878_v40 = vadd.f32 %v8537_v32, %v11321_v54 }
 0x3fb   : > { %v8493_v14 = vpop.f32.mrf.mxu0  ;;  %v4726_v17 = vpop.f32.mrf.mxu1 }
 0x3fc   : > { %v11395_v52 = vadd.f32 %v8493_v14, %v4290_v21  ;;  %v11406_v28 = vadd.f32 %v4726_v17, %v11324_v45 }
 0x3fd   : > { %v4540_v62 = vpop.f32.mrf.mxu0  ;;  %v8540_v25 = vpop.f32.mrf.mxu1 }
 0x3fe   : > { %v11400_v24 = vadd.f32 %v4540_v62, %v4289_v44  ;;  %v4880_v15 = vadd.f32 %v8540_v25, %v11327_v19 }
 0x3ff   : > { %v8496_v46 = vpop.f32.mrf.mxu0  ;;  %v4736_v34 = vpop.f32.mrf.mxu1 }
 0x400   : > { %v11403_v23 = vadd.f32 %v8496_v46, %v4292_v1  ;;  %v11414_v21 = vadd.f32 %v4736_v34, %v11330_v30 }
 0x401   : > { %v4550_v26 = vpop.f32.mrf.mxu0  ;;  %v8543_v57 = vpop.f32.mrf.mxu1 }
 0x402   : > { %v11408_v9 = vadd.f32 %v4550_v26, %v4291_v51  ;;  %v4882_v45 = vadd.f32 %v8543_v57, %v11333_v27 }
 0x403   : > { %v8499_v39 = vpop.f32.mrf.mxu0  ;;  %v4746_v48 = vpop.f32.mrf.mxu1 }
 0x404   : > { %v11411_v6 = vadd.f32 %v8499_v39, %v4294_v53  ;;  %v11422_v50 = vadd.f32 %v4746_v48, %v11336_v31 }
 0x405   : > { %v4560_v54 = vpop.f32.mrf.mxu0  ;;  %v8546_v1 = vpop.f32.mrf.mxu1 }
 0x406   : > { %v11416_v12 = vadd.f32 %v4560_v54, %v4293_v3  ;;  %v4884_v33 = vadd.f32 %v8546_v1, %v11339_v29 }
 0x407   : > { %v8614_v44 = vpop.f32.mrf.mxu0  ;;  %v4756_v20 = vpop.f32.mrf.mxu1 }
 0x408   : > { %v11419_v59 = vadd.f32 %v8614_v44, %v4876_v2  ;;  %v11430_v36 = vadd.f32 %v4756_v20, %v11342_v61 }
 0x409   : > { %v11424_v19 = vpop.f32.mrf.mxu0  ;;  %v8549_v60 = vpop.f32.mrf.mxu1 }
 0x40a   : > { %v4886_v63 = vadd.f32 %v8549_v60, %v11345_v0 }
 0x40b   : > { %v8617_v30 = vpop.f32.mrf.mxu0  ;;  %v4766_v31 = vpop.f32.mrf.mxu1 }
 0x40c   : > { %v11427_v51 = vadd.f32 %v8617_v30, %v4878_v40  ;;  %v11438_v35 = vadd.f32 %v4766_v31, %v11348_v8 }
 0x40d   : > { %v11432_v27 = vpop.f32.mrf.mxu0  ;;  %v8552_v3 = vpop.f32.mrf.mxu1 }
 0x40e   : > { %v4888_v49 = vadd.f32 %v8552_v3, %v11351_v11 }
 0x40f   : > { %v8620_v53 = vpop.f32.mrf.mxu0  ;;  %v4776_v61 = vpop.f32.mrf.mxu1 }
 0x410   : > { %v11435_v42 = vadd.f32 %v8620_v53, %v4880_v15  ;;  %v11446_v14 = vadd.f32 %v4776_v61, %v11354_v10 }
 0x411   : > { %v11440_v29 = vpop.f32.mrf.mxu0  ;;  %v8555_v16 = vpop.f32.mrf.mxu1 }
 0x412   : > { %v4890_v62 = vadd.f32 %v8555_v16, %v11357_v41 }
 0x413   : > { %v8623_v55 = vpop.f32.mrf.mxu0  ;;  %v4786_v8 = vpop.f32.mrf.mxu1 }
 0x414   : > { %v11443_v2 = vadd.f32 %v8623_v55, %v4882_v45  ;;  %v11454_v46 = vadd.f32 %v4786_v8, %v11360_v37 }
 0x415   : > { %v11448_v0 = vpop.f32.mrf.mxu0  ;;  %v8558_v17 = vpop.f32.mrf.mxu1 }
 0x416   : > { %v4892_v26 = vadd.f32 %v8558_v17, %v11363_v58 }
 0x417   : > { %v8626_v32 = vpop.f32.mrf.mxu0  ;;  %v4796_v10 = vpop.f32.mrf.mxu1 }
 0x418   : > { %v11451_v40 = vadd.f32 %v8626_v32, %v4884_v33  ;;  %v11462_v39 = vadd.f32 %v4796_v10, %v11366_v13 }
 0x419   : > { %v11456_v11 = vpop.f32.mrf.mxu0  ;;  %v8561_v34 = vpop.f32.mrf.mxu1 }
 0x41a   : > { %v4894_v54 = vadd.f32 %v8561_v34, %v11369_v18 }
 0x41b   : > { %v8629_v25 = vpop.f32.mrf.mxu0  ;;  %v4806_v37 = vpop.f32.mrf.mxu1 }
 0x41c   : > { %v11459_v15 = vadd.f32 %v8629_v25, %v4886_v63  ;;  %v11470_v44 = vadd.f32 %v4806_v37, %v11372_v38 }
 0x41d   : > { %v11464_v41 = vpop.f32.mrf.mxu0  ;;  %v8564_v48 = vpop.f32.mrf.mxu1 }
 0x41e   : > { %12296 = vst [vmem:[#allocation45_spill] sm:$0xff] %v11470_v44  ;;  %v4896_v1 = vadd.f32 %v8564_v48, %v11376_v56 }
 0x41f   : > { %v8632_v57 = vpop.f32.mrf.mxu0  ;;  %v4816_v13 = vpop.f32.mrf.mxu1 }
 0x420   : > { %v11467_v45 = vadd.f32 %v8632_v57, %v4888_v49  ;;  %v11478_v20 = vadd.f32 %v4816_v13, %v11380_v7 }
 0x421   : > { %v11472_v58 = vpop.f32.mrf.mxu0  ;;  %v8567_v60 = vpop.f32.mrf.mxu1 }
 0x422   : > { %12297 = vst [vmem:[#allocation46_spill] sm:$0xff] %v11478_v20  ;;  %v4898_v63 = vadd.f32 %v8567_v60, %v11383_v22 }
 0x423   : > { %v8635_v33 = vpop.f32.mrf.mxu0  ;;  %v4826_v38 = vpop.f32.mrf.mxu1 }
 0x424   : > { %v11475_v30 = vadd.f32 %v8635_v33, %v4890_v62  ;;  %v11486_v3 = vadd.f32 %v4826_v38, %v11386_v43 }
 0x425   : > { %v11480_v18 = vpop.f32.mrf.mxu0  ;;  %v8570_v49 = vpop.f32.mrf.mxu1 }
 0x426   : > { %12298 = vst [vmem:[#allocation27_spill] sm:$0xff] %v11486_v3  ;;  %v4900_v55 = vadd.f32 %v8570_v49, %v11389_v47 }
 0x427   : > { %v8638_v53 = vpop.f32.mrf.mxu0  ;;  %v4836_v7 = vpop.f32.mrf.mxu1 }
 0x428   : > { %v11483_v31 = vadd.f32 %v8638_v53, %v4892_v26  ;;  %v11494_v62 = vadd.f32 %v4836_v7, %v11392_v4 }
 0x429   : > { %v11488_v56 = vpop.f32.mrf.mxu0  ;;  %v8573_v32 = vpop.f32.mrf.mxu1 }
 0x42a   : > { %12299 = vst [vmem:[#allocation28_spill] sm:$0xff] %v11494_v62  ;;  %v4902_v8 = vadd.f32 %v8573_v32, %v11395_v52 }
 0x42b   : > { %v8641_v61 = vpop.f32.mrf.mxu0  ;;  %v4846_v43 = vpop.f32.mrf.mxu1 }
 0x42c   : > { %v11491_v16 = vadd.f32 %v8641_v61, %v4894_v54  ;;  %v11502_v25 = vadd.f32 %v4846_v43, %v11400_v24 }
 0x42d   : > { %v11496_v22 = vpop.f32.mrf.mxu0  ;;  %v8576_v10 = vpop.f32.mrf.mxu1 }
 0x42e   : > { %12300 = vst [vmem:[#allocation29_spill] sm:$0xff] %v11496_v22  ;;  %12301 = vst [vmem:[#allocation66_spill] sm:$0xff] %v11502_v25  ;;  %v4904_v34 = vadd.f32 %v8576_v10, %v11403_v23 }
 0x42f   : > { %v8644_v17 = vpop.f32.mrf.mxu0  ;;  %v4856_v4 = vpop.f32.mrf.mxu1 }
 0x430   : > { %v11499_v26 = vadd.f32 %v8644_v17, %v4896_v1  ;;  %v11510_v37 = vadd.f32 %v4856_v4, %v11408_v9 }
 0x431   : > { %v11504_v47 = vpop.f32.mrf.mxu0  ;;  %v8579_v48 = vpop.f32.mrf.mxu1 }
 0x432   : > { %12302 = vst [vmem:[#allocation68_spill] sm:$0xff] %v11504_v47  ;;  %12303 = vst [vmem:[#allocation13_spill] sm:$0xff] %v11510_v37  ;;  %v4906_v1 = vadd.f32 %v8579_v48, %v11411_v6 }
 0x433   : > { %v8647_v54 = vpop.f32.mrf.mxu0  ;;  %v4866_v24 = vpop.f32.mrf.mxu1 }
 0x434   : > { %v11507_v57 = vadd.f32 %v8647_v54, %v4898_v63  ;;  %v11516_v60 = vadd.f32 %v4866_v24, %v11416_v12 }
 0x435   : > { %v11512_v52 = vpop.f32.mrf.mxu0  ;;  %v8694_v23 = vpop.f32.mrf.mxu1 }
 0x436   : > { %12304 = vst [vmem:[#allocation14_spill] sm:$0xff] %v11512_v52  ;;  %12305 = vst [vmem:[#allocation47_spill] sm:$0xff] %v11516_v60  ;;  %v11521_v63 = vadd.f32 %v8694_v23, %v11419_v59 }
 0x437   : > { %v8650_v33 = vpop.f32.mrf.mxu0  ;;  %v11523_v9 = vpop.f32.mrf.mxu1 }
 0x438   : > { %v5206_v13 = vadd.f32 %v8650_v33, %v4900_v55 }
 0x439   : > { %v11518_v53 = vpop.f32.mrf.mxu0  ;;  %v8697_v7 = vpop.f32.mrf.mxu1 }
 0x43a   : > { %12306 = vst [vmem:[#allocation48_spill] sm:$0xff] %v11518_v53  ;;  %v11528_v6 = vadd.f32 %v8697_v7, %v11427_v51 }
 0x43b   : > { %v8653_v38 = vpop.f32.mrf.mxu0  ;;  %v11530_v32 = vpop.f32.mrf.mxu1 }
 0x43c   : > { %v5208_v49 = vadd.f32 %v8653_v38, %v4902_v8 }
 0x43d   : > { %v11525_v61 = vpop.f32.mrf.mxu0  ;;  %v8700_v43 = vpop.f32.mrf.mxu1 }
 0x43e   : > { %12307 = vst [vmem:[#allocation30_spill] sm:$0xff] %v11525_v61  ;;  %v11535_v59 = vadd.f32 %v8700_v43, %v11435_v42 }
 0x43f   : > { %v8656_v55 = vpop.f32.mrf.mxu0  ;;  %v11537_v54 = vpop.f32.mrf.mxu1 }
 0x440   : > { %v5210_v12 = vadd.f32 %v8656_v55, %v4904_v34 }
 0x441   : > { %v11532_v17 = vpop.f32.mrf.mxu0  ;;  %v8703_v48 = vpop.f32.mrf.mxu1 }
 0x442   : > { %12308 = vst [vmem:[#allocation31_spill] sm:$0xff] %v11532_v17  ;;  %v11542_v51 = vadd.f32 %v8703_v48, %v11443_v2 }
 0x443   : > { %v8659_v10 = vpop.f32.mrf.mxu0  ;;  %v11544_v24 = vpop.f32.mrf.mxu1 }
 0x444   : > { %v5212_v8 = vadd.f32 %v8659_v10, %v4906_v1 }
 0x445   : > { %v11539_v4 = vpop.f32.mrf.mxu0  ;;  %v8706_v23 = vpop.f32.mrf.mxu1 }
 0x446   : > { %12309 = vst [vmem:[#allocation67_spill] sm:$0xff] %v11539_v4  ;;  %v11547_v38 = vadd.f32 %v8706_v23, %v11451_v40 }
 0x447   : > { %v8774_v33 = vpop.f32.mrf.mxu0  ;;  %v11549_v7 = vpop.f32.mrf.mxu1 }
 0x449   : > { %v5634_v34 = vpop.f32.mrf.mxu0  ;;  %v8709_v43 = vpop.f32.mrf.mxu1 }
 0x44a   : > { %v11552_v1 = vadd.f32 %v8709_v43, %v11459_v15 }
 0x44b   : > { %v8777_v42 = vpop.f32.mrf.mxu0  ;;  %v11556_v2 = vpop.f32.mrf.mxu1 }
 0x44d   : > { %v5644_v55 = vpop.f32.mrf.mxu0 }
 0x44e   : > { %v8712_v4 = vpop.f32.mrf.mxu1 }
 0x44f   : > { %v11554_v10 = vpop.f32.mrf.mxu0  ;;  %v11561_v60 = vadd.f32 %v8712_v4, %v11467_v45 }
 0x450   : > { %v11565_v23 = vpop.f32.mrf.mxu1 }
 0x451   : > { %v11558_v48 = vpop.f32.mrf.mxu0 }
 0x453   : > { %v11563_v40 = vpop.f32.mrf.mxu0  ;;  %v8715_v37 = vpop.f32.mrf.mxu1 }
 0x454   : > { %v11570_v15 = vadd.f32 %v8715_v37, %v11475_v30 }
 0x455   : > { %v11567_v17 = vpop.f32.mrf.mxu0  ;;  %v11574_v61 = vpop.f32.mrf.mxu1 }
 0x457   : > { %v11572_v43 = vpop.f32.mrf.mxu0 }
 0x458   : > { %v8718_v25 = vpop.f32.mrf.mxu1 }
 0x459   : > { %v11577_v53 = vadd.f32 %v8718_v25, %v11483_v31  ;;  %v11579_v45 = vpop.f32.mrf.mxu0 }
 0x45a   : > { %v11581_v4 = vpop.f32.mrf.mxu1 }
 0x45b   : > { %12310 = vst [vmem:[#allocation70_spill] sm:$0xff] %v11577_v53  ;;  %v11586_v3 = vpop.f32.mrf.mxu0 }
 0x45d   : > { %v8721_v62 = vpop.f32.mrf.mxu1  ;;  %v11593_v20 = vpop.f32.mrf.mxu0 }
 0x45e   : > { %v11584_v52 = vadd.f32 %v8721_v62, %v11491_v16 }
 0x45f   : > { %v11588_v30 = vpop.f32.mrf.mxu1  ;;  %v11600_v22 = vpop.f32.mrf.mxu0 }
 0x460   : > { %12311 = vst [vmem:[#allocation15_spill] sm:$0xff] %v11584_v52  ;;  %12312 = vst [vmem:[#allocation16_spill] sm:$0xff] %v11588_v30 }
 0x461   : > { %v8724_v37 = vpop.f32.mrf.mxu1  ;;  %v11606_v30 = vpop.f32.mrf.mxu0 }
 0x462   : > { %v11591_v47 = vadd.f32 %v8724_v37, %v11499_v26 }
 0x463   : > { %v11595_v31 = vpop.f32.mrf.mxu1 }
 0x464   : > { %12313 = vst [vmem:[#allocation49_spill] sm:$0xff] %v11591_v47  ;;  %12314 = vst [vmem:[#allocation50_spill] sm:$0xff] %v11595_v31  ;;  %v11612_v47 = vpop.f32.mrf.mxu0 }
 0x465   : > { %v8727_v25 = vpop.f32.mrf.mxu1 }
 0x466   : > { %v11598_v53 = vadd.f32 %v8727_v25, %v11507_v57 }
 0x467   : > { %v11602_v16 = vpop.f32.mrf.mxu1 }
 0x468   : > { %12315 = vst [vmem:[#allocation32_spill] sm:$0xff] %v11598_v53  ;;  %12316 = vst [vmem:[#allocation33_spill] sm:$0xff] %v11602_v16  ;;  %v11618_v53 = vpop.f32.mrf.mxu0 }
 0x469   : > { %v8730_v62 = vpop.f32.mrf.mxu1 }
 0x46a   : > { %v11604_v52 = vadd.f32 %v8730_v62, %v5206_v13  ;;  %v5181_v62 = vadd.f32 %v11424_v19, %v11398_v5 }
 0x46b   : > { %v11608_v44 = vpop.f32.mrf.mxu1 }
 0x46c   : > { %12317 = vst [vmem:[#allocation69_spill] sm:$0xff] %v11604_v52  ;;  %12318 = vst [vmem:[#allocation72_spill] sm:$0xff] %v11608_v44  ;;  %v11626_v44 = vpop.f32.mrf.mxu0 }
 0x46d   : > { %v8733_v26 = vpop.f32.mrf.mxu1 }
 0x46e   : > { %v11610_v37 = vadd.f32 %v8733_v26, %v5208_v49  ;;  %v5487_v26 = vadd.f32 %v11523_v9, %v5181_v62  ;;  %v5796_v62 = vadd.f32 %v8777_v42, %v11528_v6  ;;  %v5798_v6 = vadd.f32 %v11554_v10, %v11535_v59 }
 0x46f   : > { %v11614_v31 = vpop.f32.mrf.mxu1  ;;  %v5189_v10 = vadd.f32 %v11456_v11, %v11430_v36 }
 0x470   : > { %12319 = vst [vmem:[#allocation17_spill] sm:$0xff] %v11610_v37  ;;  %12320 = vst [vmem:[#allocation18_spill] sm:$0xff] %v11614_v31 }
 0x471   : > { %v8736_v57 = vpop.f32.mrf.mxu1 }
 0x472   : > { %v11616_v25 = vadd.f32 %v8736_v57, %v5210_v12  ;;  %v5183_v12 = vadd.f32 %v11432_v27, %v11406_v28  ;;  %v5794_v57 = vadd.f32 %v8774_v33, %v11521_v63 }
 0x473   : > { %v11620_v16 = vpop.f32.mrf.mxu1 }
 0x474   : > { %12321 = vst [vmem:[#allocation51_spill] sm:$0xff] %v11616_v25  ;;  %12322 = vst [vmem:[#allocation52_spill] sm:$0xff] %v11620_v16  ;;  %v5793_v25 = vadd.f32 %v5634_v34, %v5487_v26  ;;  %v11634_v16 = vpop.f32.mrf.mxu0  ;;  %v5489_v5 = vadd.f32 %v11530_v32, %v5183_v12 }
 0x475   : > { %v8739_v13 = vpop.f32.mrf.mxu1 }
 0x476   : > { %v11624_v52 = vadd.f32 %v8739_v13, %v5212_v8  ;;  %v5185_v13 = vadd.f32 %v11440_v29, %v11414_v21  ;;  %v11647_v63 = vpop.f32.mrf.mxu0  ;;  %v5187_v29 = vadd.f32 %v11448_v0, %v11422_v50 }
 0x477   : > { %v11628_v49 = vpop.f32.mrf.mxu1 }
 0x478   : > { %12323 = vst [vmem:[#allocation34_spill] sm:$0xff] %v11624_v52  ;;  %v5795_v52 = vadd.f32 %v5644_v55, %v5489_v5  ;;  %v5491_v27 = vadd.f32 %v11537_v54, %v5185_v13  ;;  %v5493_v26 = vadd.f32 %v11544_v24, %v5187_v29  ;;  %v11666_v12 = vpop.f32.mrf.mxu0  ;;  %v5800_v24 = vadd.f32 %v11563_v40, %v11542_v51 }
 0x479   : > { %v8854_v37 = vpop.f32.mrf.mxu1 }
 0x47a   : > { %v11637_v19 = vadd.f32 %v8854_v37, %v5794_v57  ;;  %v5797_v42 = vadd.f32 %v11558_v48, %v5491_v27  ;;  %v5799_v13 = vadd.f32 %v11567_v17, %v5493_v26  ;;  %v11683_v27 = vpop.f32.mrf.mxu0  ;;  %v5191_v17 = vadd.f32 %v11464_v41, %v11438_v35 }
 0x47b   : > { %v5940_v31 = vpop.f32.mrf.mxu1 }
 0x47c   : > { %v11639_v8 = vadd.f32 %v5940_v31, %v5793_v25  ;;  %v6202_v32 = vmul.f32 %v11637_v19, %v11637_v19 }
 0x47d   : > { %v8857_v9 = vpop.f32.mrf.mxu1 }
 0x47e   : > { %v6201_v28 = vmul.f32 %v11639_v8, %v11639_v8  ;;  %v6163_v34 = vadd.f32 %v11637_v19, %v11639_v8  ;;  %v11653_v31 = vadd.f32 %v8857_v9, %v5796_v62 }
 0x47f   : > { %v5950_v33 = vpop.f32.mrf.mxu1 }
 0x480   : > { %v11655_v21 = vadd.f32 %v5950_v33, %v5795_v52  ;;  %v6233_v55 = vadd.f32 %v6202_v32, %v6201_v28  ;;  %v6204_v50 = vmul.f32 %v11653_v31, %v11653_v31  ;;  %v5495_v28 = vadd.f32 %v11549_v7, %v5189_v10 }
 0x481   : > { %v8860_v54 = vpop.f32.mrf.mxu1  ;;  %v5802_v7 = vadd.f32 %v11572_v43, %v11547_v38  ;;  %v5193_v43 = vadd.f32 %v11472_v58, %v11446_v14 }
 0x482   : > { %v6164_v37 = vadd.f32 %v6163_v34, %v11655_v21  ;;  %v6203_v25 = vmul.f32 %v11655_v21, %v11655_v21  ;;  %v11670_v57 = vadd.f32 %v8860_v54, %v5798_v6  ;;  %v5801_v6 = vadd.f32 %v11579_v45, %v5495_v28 }
 0x483   : > { %v5960_v52 = vpop.f32.mrf.mxu1 }
 0x484   : > { %v6234_v0 = vadd.f32 %v6233_v55, %v6203_v25  ;;  %v11672_v59 = vadd.f32 %v5960_v52, %v5797_v42  ;;  %v6165_v48 = vadd.f32 %v6164_v37, %v11653_v31  ;;  %v6206_v36 = vmul.f32 %v11670_v57, %v11670_v57  ;;  %v11701_v37 = vpop.f32.mrf.mxu0 }
 0x485   : > { %v8863_v5 = vpop.f32.mrf.mxu1  ;;  %v5497_v55 = vadd.f32 %v11556_v2, %v5191_v17  ;;  %v5804_v2 = vadd.f32 %v11586_v3, %v11552_v1 }
 0x486   : > { %v6205_v9 = vmul.f32 %v11672_v59, %v11672_v59  ;;  %v6235_v62 = vadd.f32 %v6234_v0, %v6204_v50  ;;  %v6166_v33 = vadd.f32 %v6165_v48, %v11672_v59  ;;  %v11688_v34 = vadd.f32 %v8863_v5, %v5800_v24  ;;  %v11719_v24 = vpop.f32.mrf.mxu0 }
 0x487   : > { %v5970_v32 = vpop.f32.mrf.mxu1  ;;  %v5803_v0 = vadd.f32 %v11593_v20, %v5497_v55  ;;  %v5499_v5 = vadd.f32 %v11565_v23, %v5193_v43  ;;  %v5195_v20 = vadd.f32 %v11480_v18, %v11454_v46  ;;  %v5806_v23 = vadd.f32 %v11600_v22, %v11561_v60 }
 0x488   : > { %v6236_v11 = vadd.f32 %v6235_v62, %v6205_v9  ;;  %v11690_v51 = vadd.f32 %v5970_v32, %v5799_v13  ;;  %v6167_v40 = vadd.f32 %v6166_v33, %v11670_v57  ;;  %v6208_v35 = vmul.f32 %v11688_v34, %v11688_v34  ;;  %v11737_v17 = vpop.f32.mrf.mxu0 }
 0x489   : > { %v8866_v29 = vpop.f32.mrf.mxu1  ;;  %v5805_v33 = vadd.f32 %v11606_v30, %v5499_v5  ;;  %v5197_v60 = vadd.f32 %v11488_v56, %v11462_v39 }
 0x48a   : > { %v6207_v54 = vmul.f32 %v11690_v51, %v11690_v51  ;;  %v6237_v42 = vadd.f32 %v6236_v11, %v6206_v36  ;;  %v6168_v25 = vadd.f32 %v6167_v40, %v11690_v51  ;;  %v11706_v52 = vadd.f32 %v8866_v29, %v5802_v7 }
 0x48b   : > { %v5980_v26 = vpop.f32.mrf.mxu1  ;;  %v5501_v11 = vadd.f32 %v11574_v61, %v5195_v20  ;;  %v5808_v61 = vadd.f32 %v11612_v47, %v11570_v15  ;;  %v12325_v15 = vld [vmem:[#allocation29_spill] sm:$0xff] }
 0x48c   : > { %v6238_v41 = vadd.f32 %v6237_v42, %v6207_v54  ;;  %v11708_v38 = vadd.f32 %v5980_v26, %v5801_v6  ;;  %v6169_v45 = vadd.f32 %v6168_v25, %v11688_v34  ;;  %v6210_v14 = vmul.f32 %v11706_v52, %v11706_v52  ;;  %v11755_v26 = vpop.f32.mrf.mxu0 }
 0x48d   : > { %v8869_v50 = vpop.f32.mrf.mxu1  ;;  %v5807_v54 = vadd.f32 %v11618_v53, %v5501_v11  ;;  %v5503_v25 = vadd.f32 %v11581_v4, %v5197_v60  ;;  %v12324_v53 = vld [vmem:[#allocation45_spill] sm:$0xff]  ;;  %v12326_v4 = vld [vmem:[#allocation70_spill] sm:$0xff] }
 0x48e   : > { %v6209_v10 = vmul.f32 %v11708_v38, %v11708_v38  ;;  %v6239_v48 = vadd.f32 %v6238_v41, %v6208_v35  ;;  %v6170_v13 = vadd.f32 %v6169_v45, %v11708_v38  ;;  %v11724_v62 = vadd.f32 %v8869_v50, %v5804_v2 }
 0x48f   : > { %v5990_v9 = vpop.f32.mrf.mxu1  ;;  %v5199_v45 = vadd.f32 %v12325_v15, %v12324_v53  ;;  %v12334_v15 = vld [vmem:[#allocation49_spill] sm:$0xff] }
 0x490   : > { %v6240_v58 = vadd.f32 %v6239_v48, %v6209_v10  ;;  %v11726_v3 = vadd.f32 %v5990_v9, %v5803_v0  ;;  %v6171_v1 = vadd.f32 %v6170_v13, %v11706_v52  ;;  %v6212_v46 = vmul.f32 %v11724_v62, %v11724_v62  ;;  %v12327_v13 = vld [vmem:[#allocation16_spill] sm:$0xff] }
 0x491   : > { %v8872_v28 = vpop.f32.mrf.mxu1  ;;  %v5810_v0 = vadd.f32 %v11626_v44, %v12326_v4  ;;  %v5809_v10 = vadd.f32 %v11634_v16, %v5503_v25  ;;  %v5505_v9 = vadd.f32 %v12327_v13, %v5199_v45  ;;  %v12328_v44 = vld [vmem:[#allocation46_spill] sm:$0xff]  ;;  %v12329_v16 = vld [vmem:[#allocation68_spill] sm:$0xff]  ;;  %v5814_v45 = vadd.f32 %v11683_v27, %v12334_v15 }
 0x492   : > { %v6211_v32 = vmul.f32 %v11726_v3, %v11726_v3  ;;  %v6241_v36 = vadd.f32 %v6240_v58, %v6210_v14  ;;  %v6172_v40 = vadd.f32 %v6171_v1, %v11726_v3  ;;  %v11742_v7 = vadd.f32 %v8872_v28, %v5806_v23  ;;  %v5754_v14 = vpop.f32.mrf.mxu0  ;;  %v12336_v27 = vld [vmem:[#allocation28_spill] sm:$0xff] }
 0x493   : > { %v6000_v29 = vpop.f32.mrf.mxu1 }
 0x494   : > { %v6242_v18 = vadd.f32 %v6241_v36, %v6211_v32  ;;  %v11744_v22 = vadd.f32 %v6000_v29, %v5805_v33  ;;  %v6173_v30 = vadd.f32 %v6172_v40, %v11724_v62  ;;  %v6214_v39 = vmul.f32 %v11742_v7, %v11742_v7  ;;  %v12330_v40 = vld [vmem:[#allocation15_spill] sm:$0xff] }
 0x495   : > { %v8875_v6 = vpop.f32.mrf.mxu1  ;;  %v5201_v32 = vadd.f32 %v12329_v16, %v12328_v44  ;;  %v5812_v29 = vadd.f32 %v11647_v63, %v12330_v40  ;;  %v12332_v63 = vld [vmem:[#allocation27_spill] sm:$0xff] }
 0x496   : > { %v6213_v42 = vmul.f32 %v11744_v22, %v11744_v22  ;;  %v6243_v55 = vadd.f32 %v6242_v18, %v6212_v46  ;;  %v6174_v35 = vadd.f32 %v6173_v30, %v11744_v22  ;;  %v11760_v43 = vadd.f32 %v8875_v6, %v5808_v61  ;;  %v12331_v30 = vld [vmem:[#allocation50_spill] sm:$0xff]  ;;  %v8813_v61 = vpop.f32.mrf.mxu0 }
 0x497   : > { %v6010_v41 = vpop.f32.mrf.mxu1  ;;  %v5811_v46 = vadd.f32 %v11666_v12, %v5505_v9  ;;  %v5507_v6 = vadd.f32 %v12331_v30, %v5201_v32  ;;  %v12333_v12 = vld [vmem:[#allocation14_spill] sm:$0xff]  ;;  %v12338_v32 = vld [vmem:[#allocation32_spill] sm:$0xff] }
 0x498   : > { %v6244_v56 = vadd.f32 %v6243_v55, %v6213_v42  ;;  %v11762_v47 = vadd.f32 %v6010_v41, %v5807_v54  ;;  %v6175_v50 = vadd.f32 %v6174_v35, %v11742_v7  ;;  %v6216_v1 = vmul.f32 %v11760_v43, %v11760_v43 }
 0x499   : > { %v8878_v2 = vpop.f32.mrf.mxu1 }
 0x49a   : > { %v6215_v48 = vmul.f32 %v11762_v47, %v11762_v47  ;;  %v6245_v5 = vadd.f32 %v6244_v56, %v6214_v39  ;;  %v6176_v58 = vadd.f32 %v6175_v50, %v11762_v47  ;;  %v11776_v23 = vadd.f32 %v8878_v2, %v5810_v0  ;;  %v12335_v0 = vld [vmem:[#allocation33_spill] sm:$0xff] }
 0x49b   : > { %v6020_v20 = vpop.f32.mrf.mxu1  ;;  %v5203_v39 = vadd.f32 %v12333_v12, %v12332_v63  ;;  %v5813_v50 = vadd.f32 %v11701_v37, %v5507_v6  ;;  %v12337_v37 = vld [vmem:[#allocation48_spill] sm:$0xff] }
 0x49c   : > { %v6246_v28 = vadd.f32 %v6245_v5, %v6215_v48  ;;  %v11778_v33 = vadd.f32 %v6020_v20, %v5809_v10  ;;  %v6177_v36 = vadd.f32 %v6176_v58, %v11760_v43  ;;  %v6218_v55 = vmul.f32 %v11776_v23, %v11776_v23  ;;  %v5764_v48 = vpop.f32.mrf.mxu0 }
 0x49d   : > { %v8881_v11 = vpop.f32.mrf.mxu1  ;;  %v5509_v10 = vadd.f32 %v12335_v0, %v5203_v39 }
 0x49e   : > { %v6217_v18 = vmul.f32 %v11778_v33, %v11778_v33  ;;  %v6247_v60 = vadd.f32 %v6246_v28, %v6216_v1  ;;  %v6178_v54 = vadd.f32 %v6177_v36, %v11778_v33  ;;  %v11792_v35 = vadd.f32 %v8881_v11, %v5812_v29 }
 0x49f   : > { %v6030_v42 = vpop.f32.mrf.mxu1  ;;  %v5205_v28 = vadd.f32 %v12337_v37, %v12336_v27  ;;  %v5816_v36 = vadd.f32 %v11719_v24, %v12338_v32  ;;  %v5815_v11 = vadd.f32 %v11737_v17, %v5509_v10  ;;  %v12340_v24 = vld [vmem:[#allocation66_spill] sm:$0xff] }
 0x4a0   : > { %v6248_v25 = vadd.f32 %v6247_v60, %v6217_v18  ;;  %v11794_v41 = vadd.f32 %v6030_v42, %v5811_v46  ;;  %v6179_v56 = vadd.f32 %v6178_v54, %v11776_v23  ;;  %v6220_v9 = vmul.f32 %v11792_v35, %v11792_v35  ;;  %v12339_v46 = vld [vmem:[#allocation72_spill] sm:$0xff]  ;;  %v8816_v60 = vpop.f32.mrf.mxu0  ;;  %v12341_v17 = vld [vmem:[#allocation30_spill] sm:$0xff] }
 0x4a1   : > { %v8884_v53 = vpop.f32.mrf.mxu1  ;;  %v5511_v18 = vadd.f32 %v12339_v46, %v5205_v28  ;;  %v5207_v63 = vadd.f32 %v12341_v17, %v12340_v24 }
 0x4a2   : > { %v6219_v2 = vmul.f32 %v11794_v41, %v11794_v41  ;;  %v6249_v4 = vadd.f32 %v6248_v25, %v6218_v55  ;;  %v6180_v5 = vadd.f32 %v6179_v56, %v11794_v41  ;;  %v11808_v20 = vadd.f32 %v8884_v53, %v5814_v45  ;;  %v12342_v56 = vld [vmem:[#allocation69_spill] sm:$0xff]  ;;  %v5774_v0 = vpop.f32.mrf.mxu0 }
 0x4a3   : > { %v6040_v13 = vpop.f32.mrf.mxu1  ;;  %v5818_v53 = vadd.f32 %v11755_v26, %v12342_v56  ;;  %v5817_v15 = vadd.f32 %v5754_v14, %v5511_v18  ;;  %v12344_v26 = vld [vmem:[#allocation13_spill] sm:$0xff]  ;;  %v12345_v14 = vld [vmem:[#allocation31_spill] sm:$0xff] }
 0x4a4   : > { %v6250_v58 = vadd.f32 %v6249_v4, %v6219_v2  ;;  %v11810_v1 = vadd.f32 %v6040_v13, %v5813_v50  ;;  %v6181_v44 = vadd.f32 %v6180_v5, %v11792_v35  ;;  %v6222_v54 = vmul.f32 %v11808_v20, %v11808_v20  ;;  %v12343_v2 = vld [vmem:[#allocation18_spill] sm:$0xff]  ;;  %v8819_v18 = vpop.f32.mrf.mxu0  ;;  %v12350_v56 = vld [vmem:[#allocation51_spill] sm:$0xff] }
 0x4a5   : > { %v8887_v16 = vpop.f32.mrf.mxu1  ;;  %v5513_v4 = vadd.f32 %v12343_v2, %v5207_v63  ;;  %v5209_v37 = vadd.f32 %v12345_v14, %v12344_v26 }
 0x4a6   : > { %v6221_v40 = vmul.f32 %v11810_v1, %v11810_v1  ;;  %v6251_v29 = vadd.f32 %v6250_v58, %v6220_v9  ;;  %v6182_v30 = vadd.f32 %v6181_v44, %v11810_v1  ;;  %v11824_v55 = vadd.f32 %v8887_v16, %v5816_v36  ;;  %v12346_v16 = vld [vmem:[#allocation17_spill] sm:$0xff] }
 0x4a7   : > { %v6050_v6 = vpop.f32.mrf.mxu1  ;;  %v5820_v32 = vadd.f32 %v8813_v61, %v12346_v16  ;;  %v5819_v36 = vadd.f32 %v5764_v48, %v5513_v4  ;;  %v12348_v61 = vld [vmem:[#allocation47_spill] sm:$0xff]  ;;  %v5784_v4 = vpop.f32.mrf.mxu0 }
 0x4a8   : > { %v6252_v42 = vadd.f32 %v6251_v29, %v6221_v40  ;;  %v11826_v25 = vadd.f32 %v6050_v6, %v5815_v11  ;;  %v6183_v12 = vadd.f32 %v6182_v30, %v11808_v20  ;;  %v6224_v13 = vmul.f32 %v11824_v55, %v11824_v55  ;;  %v12347_v29 = vld [vmem:[#allocation52_spill] sm:$0xff]  ;;  %v12349_v48 = vld [vmem:[#allocation67_spill] sm:$0xff] }
 0x4a9   : > { %v8890_v39 = vpop.f32.mrf.mxu1  ;;  %v5515_v46 = vadd.f32 %v12347_v29, %v5209_v37  ;;  %v5211_v63 = vadd.f32 %v12349_v48, %v12348_v61  ;;  %v12351_v37 = vld [vmem:[#allocation34_spill] sm:$0xff] }
 0x4aa   : > { %v6223_v45 = vmul.f32 %v11826_v25, %v11826_v25  ;;  %v6253_v50 = vadd.f32 %v6252_v42, %v6222_v54  ;;  %v6184_v10 = vadd.f32 %v6183_v12, %v11826_v25  ;;  %v11839_v58 = vadd.f32 %v8890_v39, %v5818_v53 }
 0x4ab   : > { %v6060_v5 = vpop.f32.mrf.mxu1  ;;  %v5822_v53 = vadd.f32 %v8816_v60, %v12350_v56  ;;  %v5517_v2 = vadd.f32 %v11628_v49, %v5211_v63 }
 0x4ac   : > { %v6254_v9 = vadd.f32 %v6253_v50, %v6223_v45  ;;  %v11841_v27 = vadd.f32 %v6060_v5, %v5817_v15  ;;  %v6185_v28 = vadd.f32 %v6184_v10, %v11824_v55  ;;  %v6226_v54 = vmul.f32 %v11839_v58, %v11839_v58 }
 0x4ad   : > { %v8893_v44 = vpop.f32.mrf.mxu1  ;;  %v5821_v15 = vadd.f32 %v5774_v0, %v5515_v46 }
 0x4ae   : > { %v6225_v11 = vmul.f32 %v11841_v27, %v11841_v27  ;;  %v6255_v40 = vadd.f32 %v6254_v9, %v6224_v13  ;;  %v6186_v30 = vadd.f32 %v6185_v28, %v11841_v27  ;;  %v11853_v24 = vadd.f32 %v8893_v44, %v5820_v32 }
 0x4af   : > { %v6070_v6 = vpop.f32.mrf.mxu1  ;;  %v5824_v28 = vadd.f32 %v8819_v18, %v12351_v37  ;;  %v5823_v44 = vadd.f32 %v5784_v4, %v5517_v2 }
 0x4b0   : > { %v6256_v42 = vadd.f32 %v6255_v40, %v6225_v11  ;;  %v11855_v17 = vadd.f32 %v6070_v6, %v5819_v36  ;;  %v6187_v12 = vadd.f32 %v6186_v30, %v11839_v58  ;;  %v6228_v13 = vmul.f32 %v11853_v24, %v11853_v24 }
 0x4b1   : > { %v8896_v39 = vpop.f32.mrf.mxu1 }
 0x4b2   : > { %v6227_v45 = vmul.f32 %v11855_v17, %v11855_v17  ;;  %v6257_v50 = vadd.f32 %v6256_v42, %v6226_v54  ;;  %v6188_v10 = vadd.f32 %v6187_v12, %v11855_v17  ;;  %v11867_v26 = vadd.f32 %v8896_v39, %v5822_v53 }
 0x4b3   : > { %v6080_v5 = vpop.f32.mrf.mxu1 }
 0x4b4   : > { %v6258_v9 = vadd.f32 %v6257_v50, %v6227_v45  ;;  %v11869_v14 = vadd.f32 %v6080_v5, %v5821_v15  ;;  %v6189_v60 = vadd.f32 %v6188_v10, %v11853_v24  ;;  %v6230_v11 = vmul.f32 %v11867_v26, %v11867_v26 }
 0x4b5   : > { %v8899_v0 = vpop.f32.mrf.mxu1 }
 0x4b6   : > { %v6229_v49 = vmul.f32 %v11869_v14, %v11869_v14  ;;  %v6259_v16 = vadd.f32 %v6258_v9, %v6228_v13  ;;  %v6190_v32 = vadd.f32 %v6189_v60, %v11869_v14  ;;  %v11878_v29 = vadd.f32 %v8899_v0, %v5824_v28 }
 0x4b7   : > { %v6090_v36 = vpop.f32.mrf.mxu1 }
 0x4b8   : > { %v6260_v40 = vadd.f32 %v6259_v16, %v6229_v49  ;;  %v11880_v46 = vadd.f32 %v6090_v36, %v5823_v44  ;;  %v6191_v30 = vadd.f32 %v6190_v32, %v11867_v26  ;;  %v6232_v42 = vmul.f32 %v11878_v29, %v11878_v29 }
 0x4ba   : > { %v6231_v18 = vmul.f32 %v11880_v46, %v11880_v46  ;;  %v6261_v6 = vadd.f32 %v6260_v40, %v6230_v11  ;;  %v6192_v54 = vadd.f32 %v6191_v30, %v11880_v46 }
 0x4bc   : > { %v6262_v61 = vadd.f32 %v6261_v6, %v6231_v18  ;;  %v6193_v48 = vadd.f32 %v6192_v54, %v11878_v29 }
 0x4be   : > { %v6263_v63 = vadd.f32 %v6262_v61, %v6232_v42  ;;  %v6194_v12 = vrot.slane %v6193_v48, 4 }
 0x4c0   : > { %v6264_v39 = vrot.slane %v6263_v63, 4  ;;  %v6195_v56 = vadd.f32 %v6194_v12, %v6193_v48  ;;  %v6404_v48 = vld [vmem:[%s9312_s30 + $0xf0] sm:$0xff] }
 0x4c2   : > { %v6265_v53 = vadd.f32 %v6264_v39, %v6263_v63  ;;  %v6196_v15 = vrot.slane %v6195_v56, 2 }
 0x4c4   : > { %v6266_v45 = vrot.slane %v6265_v53, 2  ;;  %v6197_v50 = vadd.f32 %v6196_v15, %v6195_v56 }
 0x4c6   : > { %v6267_v2 = vadd.f32 %v6266_v45, %v6265_v53  ;;  %v6198_v4 = vrot.slane %v6197_v50, 1 }
 0x4c8   : > { %v6268_v10 = vrot.slane %v6267_v2, 1  ;;  %v6199_v5 = vadd.f32 %v6198_v4, %v6197_v50  ;;  %v6375_v50 = vld [vmem:[%s9312_s30 + $0x8] sm:$0xff] }
 0x4ca   : > { %v6269_v13 = vadd.f32 %v6268_v10, %v6267_v2  ;;  %v11889_v9 = vmul.f32 0.00390625, %v6199_v5 }
 0x4cc   : > { %v6272_v60 = vmul.f32 0.00390625, %v6269_v13  ;;  %v6273_v0 = vmul.f32 %v11889_v9, %v11889_v9  ;;  %v6340_v37 = vsub.f32 %v11880_v46, %v11889_v9  ;;  %v6320_v44 = vsub.f32 %v11726_v3, %v11889_v9  ;;  %v6377_v13 = vld [vmem:[%s9312_s30 + $0x18] sm:$0xff] }
 0x4cd   : > { %v6321_v49 = vsub.f32 %v11724_v62, %v11889_v9  ;;  %v6322_v16 = vsub.f32 %v11744_v22, %v11889_v9  ;;  %v6323_v36 = vsub.f32 %v11742_v7, %v11889_v9  ;;  %v6324_v11 = vsub.f32 %v11762_v47, %v11889_v9 }
 0x4ce   : > { %v6274_v28 = vsub.f32 %v6272_v60, %v6273_v0  ;;  %v6325_v40 = vsub.f32 %v11760_v43, %v11889_v9  ;;  %v6326_v46 = vsub.f32 %v11778_v33, %v11889_v9  ;;  %v6327_v3 = vsub.f32 %v11776_v23, %v11889_v9  ;;  %v6376_v60 = vld [vmem:[%s9312_s30 + $0x10] sm:$0xff]  ;;  %v6379_v0 = vld [vmem:[%s9312_s30 + $0x28] sm:$0xff] }
 0x4cf   : > { %v6328_v62 = vsub.f32 %v11794_v41, %v11889_v9  ;;  %v6329_v22 = vsub.f32 %v11792_v35, %v11889_v9  ;;  %v6330_v7 = vsub.f32 %v11810_v1, %v11889_v9  ;;  %v6331_v47 = vsub.f32 %v11808_v20, %v11889_v9 }
 0x4d0   : > { %v6275_v32 = vmax.f32 %v6274_v28, 0.0  ;;  %v6332_v43 = vsub.f32 %v11826_v25, %v11889_v9  ;;  %v6333_v33 = vsub.f32 %v11824_v55, %v11889_v9  ;;  %v6334_v23 = vsub.f32 %v11841_v27, %v11889_v9 }
 0x4d1   : > { %v6335_v35 = vsub.f32 %v11839_v58, %v11889_v9  ;;  %v6336_v41 = vsub.f32 %v11855_v17, %v11889_v9  ;;  %v6337_v20 = vsub.f32 %v11853_v24, %v11889_v9  ;;  %v6338_v1 = vsub.f32 %v11869_v14, %v11889_v9  ;;  %v6391_v17 = vld [vmem:[%s9312_s30 + $0x88] sm:$0xff] }
 0x4d2   : > { %v6276_v30 = vadd.f32 1e-05, %v6275_v32  ;;  %v6339_v55 = vsub.f32 %v11867_v26, %v11889_v9  ;;  %v6341_v25 = vsub.f32 %v11878_v29, %v11889_v9  ;;  %v6310_v27 = vsub.f32 %v11639_v8, %v11889_v9  ;;  %v6395_v26 = vld [vmem:[%s9312_s30 + $0xa8] sm:$0xff]  ;;  %v6396_v29 = vld [vmem:[%s9312_s30 + $0xb0] sm:$0xff] }
 0x4d3   : > { %v6311_v58 = vsub.f32 %v11637_v19, %v11889_v9  ;;  %v6312_v18 = vsub.f32 %v11655_v21, %v11889_v9  ;;  %v6313_v6 = vsub.f32 %v11653_v31, %v11889_v9  ;;  %v6314_v54 = vsub.f32 %v11672_v59, %v11889_v9 }
 0x4d4   : > { %8973 = vrsqrt.f32 %v6276_v30  ;;  %v6315_v42 = vsub.f32 %v11670_v57, %v11889_v9  ;;  %v6316_v8 = vsub.f32 %v11690_v51, %v11889_v9  ;;  %v6317_v19 = vsub.f32 %v11688_v34, %v11889_v9  ;;  %v6383_v30 = vld [vmem:[%s9312_s30 + $0x48] sm:$0xff] }
 0x4d5   : > { %v6318_v21 = vsub.f32 %v11708_v38, %v11889_v9  ;;  %v6319_v31 = vsub.f32 %v11706_v52, %v11889_v9  ;;  %v6374_v52 = vld [vmem:[%s9312_s30] sm:$0xff]  ;;  %v6399_v9 = vld [vmem:[%s9312_s30 + $0xc8] sm:$0xff] }
 0x4e1   : > { %v8974_v61 = vpop.eup %8973 }
 0x4e2   : > { %v6372_v59 = vmul.f32 %v8974_v61, %v6340_v37  ;;  %v6342_v63 = vmul.f32 %v8974_v61, %v6310_v27  ;;  %v6343_v12 = vmul.f32 %v8974_v61, %v6311_v58  ;;  %v6344_v57 = vmul.f32 %v8974_v61, %v6312_v18  ;;  %v6378_v37 = vld [vmem:[%s9312_s30 + $0x20] sm:$0xff] }
 0x4e3   : > { %v6345_v39 = vmul.f32 %v8974_v61, %v6313_v6  ;;  %v6346_v51 = vmul.f32 %v8974_v61, %v6314_v54  ;;  %v6347_v56 = vmul.f32 %v8974_v61, %v6315_v42  ;;  %v6348_v34 = vmul.f32 %v8974_v61, %v6316_v8  ;;  %v6382_v27 = vld [vmem:[%s9312_s30 + $0x40] sm:$0xff] }
 0x4e4   : > { %v6436_v53 = vadd.f32 %v6404_v48, %v6372_v59  ;;  %v6349_v15 = vmul.f32 %v8974_v61, %v6317_v19  ;;  %v6350_v45 = vmul.f32 %v8974_v61, %v6318_v21  ;;  %v6351_v38 = vmul.f32 %v8974_v61, %v6319_v31  ;;  %v6392_v19 = vld [vmem:[%s9312_s30 + $0x90] sm:$0xff] }
 0x4e5   : > { %v6352_v2 = vmul.f32 %v8974_v61, %v6320_v44  ;;  %v6353_v4 = vmul.f32 %v8974_v61, %v6321_v49  ;;  %v6354_v10 = vmul.f32 %v8974_v61, %v6322_v16  ;;  %v6355_v5 = vmul.f32 %v8974_v61, %v6323_v36  ;;  %v6381_v16 = vld [vmem:[%s9312_s30 + $0x38] sm:$0xff]  ;;  %v6380_v36 = vld [vmem:[%s9312_s30 + $0x30] sm:$0xff] }
 0x4e6   : > { %6468 = vst [vmem:[%s11966_s18 + $0xf0] sm:$0xff] %v6436_v53  ;;  %v6356_v28 = vmul.f32 %v8974_v61, %v6324_v11  ;;  %v11969_v32 = vmul.f32 %v8974_v61, %v6325_v40  ;;  %v11971_v44 = vmul.f32 %v8974_v61, %v6326_v46  ;;  %v11973_v49 = vmul.f32 %v8974_v61, %v6327_v3  ;;  %v6385_v40 = vld [vmem:[%s9312_s30 + $0x58] sm:$0xff]  ;;  %v6384_v46 = vld [vmem:[%s9312_s30 + $0x50] sm:$0xff]  ;;  %v6387_v3 = vld [vmem:[%s9312_s30 + $0x68] sm:$0xff] }
 0x4e7   : > { %v6360_v58 = vmul.f32 %v8974_v61, %v6328_v62  ;;  %v11979_v18 = vmul.f32 %v8974_v61, %v6329_v22  ;;  %v11981_v6 = vmul.f32 %v8974_v61, %v6330_v7  ;;  %v11983_v11 = vmul.f32 %v8974_v61, %v6331_v47  ;;  %v6386_v62 = vld [vmem:[%s9312_s30 + $0x60] sm:$0xff]  ;;  %v6389_v22 = vld [vmem:[%s9312_s30 + $0x78] sm:$0xff]  ;;  %v6388_v7 = vld [vmem:[%s9312_s30 + $0x70] sm:$0xff] }
 0x4e8   : > { %v6364_v54 = vmul.f32 %v8974_v61, %v6332_v43  ;;  %v11988_v42 = vmul.f32 %v8974_v61, %v6333_v33  ;;  %v11990_v48 = vmul.f32 %v8974_v61, %v6334_v23  ;;  %v11992_v8 = vmul.f32 %v8974_v61, %v6335_v35  ;;  %v6390_v35 = vld [vmem:[%s9312_s30 + $0x80] sm:$0xff] }
 0x4e9   : > { %v12000_v47 = vmul.f32 %v8974_v61, %v6336_v41  ;;  %v12005_v43 = vmul.f32 %v8974_v61, %v6337_v20  ;;  %v12010_v33 = vmul.f32 %v8974_v61, %v6338_v1  ;;  %v12015_v23 = vmul.f32 %v8974_v61, %v6339_v55  ;;  %v6393_v41 = vld [vmem:[%s9312_s30 + $0x98] sm:$0xff]  ;;  %v6394_v55 = vld [vmem:[%s9312_s30 + $0xa0] sm:$0xff] }
 0x4ea   : > { %v12023_v24 = vmul.f32 %v8974_v61, %v6341_v25  ;;  %v6406_v20 = vadd.f32 %v6374_v52, %v6342_v63  ;;  %v6407_v14 = vadd.f32 %v6375_v50, %v6343_v12  ;;  %v6408_v1 = vadd.f32 %v6376_v60, %v6344_v57  ;;  %v6398_v57 = vld [vmem:[%s9312_s30 + $0xc0] sm:$0xff]  ;;  %v6405_v52 = vld [vmem:[%s9312_s30 + $0xf8] sm:$0xff] }
 0x4eb   : > { %12352 = vst [vmem:[#allocation35_spill] sm:$0xff] %v12015_v23  ;;  %v6409_v21 = vadd.f32 %v6377_v13, %v6345_v39  ;;  %v6410_v31 = vadd.f32 %v6378_v37, %v6346_v51  ;;  %v6411_v59 = vadd.f32 %v6379_v0, %v6347_v56  ;;  %v6412_v53 = vadd.f32 %v6380_v36, %v6348_v34  ;;  %v6397_v23 = vld [vmem:[%s9312_s30 + $0xb8] sm:$0xff]  ;;  %v6400_v51 = vld [vmem:[%s9312_s30 + $0xd0] sm:$0xff]  ;;  %v6402_v50 = vld [vmem:[%s9312_s30 + $0xe0] sm:$0xff] }
 0x4ec   : > { %v6413_v25 = vadd.f32 %v6381_v16, %v6349_v15  ;;  %v6414_v61 = vadd.f32 %v6382_v27, %v6350_v45  ;;  %v6415_v63 = vadd.f32 %v6383_v30, %v6351_v38  ;;  %v6416_v12 = vadd.f32 %v6384_v46, %v6352_v2  ;;  %6438 = vst [vmem:[%s11966_s18] sm:$0xff] %v6406_v20  ;;  %v6401_v39 = vld [vmem:[%s9312_s30 + $0xd8] sm:$0xff]  ;;  %v6403_v38 = vld [vmem:[%s9312_s30 + $0xe8] sm:$0xff] }
 0x4ed   : > { %6439 = vst [vmem:[%s11966_s18 + $0x8] sm:$0xff] %v6407_v14  ;;  %6440 = vst [vmem:[%s11966_s18 + $0x10] sm:$0xff] %v6408_v1  ;;  %v6417_v56 = vadd.f32 %v6385_v40, %v6353_v4  ;;  %v6418_v34 = vadd.f32 %v6386_v62, %v6354_v10  ;;  %v6419_v15 = vadd.f32 %v6387_v3, %v6355_v5 }
 0x4ee   : > { %v6420_v45 = vadd.f32 %v6388_v7, %v6356_v28  ;;  %6441 = vst [vmem:[%s11966_s18 + $0x18] sm:$0xff] %v6409_v21  ;;  %6442 = vst [vmem:[%s11966_s18 + $0x20] sm:$0xff] %v6410_v31  ;;  %v6421_v2 = vadd.f32 %v6389_v22, %v11969_v32  ;;  %v6422_v4 = vadd.f32 %v6390_v35, %v11971_v44 }
 0x4ef   : > { %6443 = vst [vmem:[%s11966_s18 + $0x28] sm:$0xff] %v6411_v59  ;;  %6444 = vst [vmem:[%s11966_s18 + $0x30] sm:$0xff] %v6412_v53  ;;  %v6423_v10 = vadd.f32 %v6391_v17, %v11973_v49  ;;  %v6424_v5 = vadd.f32 %v6392_v19, %v6360_v58  ;;  %v6425_v13 = vadd.f32 %v6393_v41, %v11979_v18 }
 0x4f0   : > { %6445 = vst [vmem:[%s11966_s18 + $0x38] sm:$0xff] %v6413_v25  ;;  %6446 = vst [vmem:[%s11966_s18 + $0x40] sm:$0xff] %v6414_v61  ;;  %v6426_v60 = vadd.f32 %v6394_v55, %v11981_v6  ;;  %v6427_v0 = vadd.f32 %v6395_v26, %v11983_v11  ;;  %v6428_v37 = vadd.f32 %v6396_v29, %v6364_v54 }
 0x4f1   : > { %6447 = vst [vmem:[%s11966_s18 + $0x48] sm:$0xff] %v6415_v63  ;;  %6448 = vst [vmem:[%s11966_s18 + $0x50] sm:$0xff] %v6416_v12  ;;  %v6429_v28 = vadd.f32 %v6397_v23, %v11988_v42  ;;  %v6430_v32 = vadd.f32 %v6398_v57, %v11990_v48  ;;  %v6431_v44 = vadd.f32 %v6399_v9, %v11992_v8 }
 0x4f2   : > { %6449 = vst [vmem:[%s11966_s18 + $0x58] sm:$0xff] %v6417_v56  ;;  %6450 = vst [vmem:[%s11966_s18 + $0x60] sm:$0xff] %v6418_v34  ;;  %v6432_v49 = vadd.f32 %v6400_v51, %v12000_v47  ;;  %v6433_v16 = vadd.f32 %v6401_v39, %v12005_v43  ;;  %v6434_v36 = vadd.f32 %v6402_v50, %v12010_v33  ;;  %v12353_v30 = vld [vmem:[#allocation35_spill] sm:$0xff] }
 0x4f3   : > { %6451 = vst [vmem:[%s11966_s18 + $0x68] sm:$0xff] %v6419_v15  ;;  %6452 = vst [vmem:[%s11966_s18 + $0x70] sm:$0xff] %v6420_v45  ;;  %v6435_v27 = vadd.f32 %v6403_v38, %v12353_v30  ;;  %v6437_v58 = vadd.f32 %v6405_v52, %v12023_v24 }
 0x4f4   : > { %6453 = vst [vmem:[%s11966_s18 + $0x78] sm:$0xff] %v6421_v2  ;;  %6454 = vst [vmem:[%s11966_s18 + $0x80] sm:$0xff] %v6422_v4 }
 0x4f5   : > { %6455 = vst [vmem:[%s11966_s18 + $0x88] sm:$0xff] %v6423_v10  ;;  %6456 = vst [vmem:[%s11966_s18 + $0x90] sm:$0xff] %v6424_v5 }
 0x4f6   : > { %6457 = vst [vmem:[%s11966_s18 + $0x98] sm:$0xff] %v6425_v13  ;;  %6458 = vst [vmem:[%s11966_s18 + $0xa0] sm:$0xff] %v6426_v60 }
 0x4f7   : > { %6459 = vst [vmem:[%s11966_s18 + $0xa8] sm:$0xff] %v6427_v0  ;;  %6460 = vst [vmem:[%s11966_s18 + $0xb0] sm:$0xff] %v6428_v37 }
 0x4f8   : > { %6461 = vst [vmem:[%s11966_s18 + $0xb8] sm:$0xff] %v6429_v28  ;;  %6462 = vst [vmem:[%s11966_s18 + $0xc0] sm:$0xff] %v6430_v32 }
 0x4f9   : > { %6463 = vst [vmem:[%s11966_s18 + $0xc8] sm:$0xff] %v6431_v44  ;;  %6464 = vst [vmem:[%s11966_s18 + $0xd0] sm:$0xff] %v6432_v49 }
 0x4fa   : > { %6465 = vst [vmem:[%s11966_s18 + $0xd8] sm:$0xff] %v6433_v16  ;;  %6466 = vst [vmem:[%s11966_s18 + $0xe0] sm:$0xff] %v6434_v36 }
 0x4fb   : > { %6467 = vst [vmem:[%s11966_s18 + $0xe8] sm:$0xff] %v6435_v27  ;;  %6469 = vst [vmem:[%s11966_s18 + $0xf8] sm:$0xff] %v6437_v58 }
 0x4fc   : > { %9085 = shalt.err (!%p9082_p3)
}
 0x4fd   : > { %s9086_s17 = scalar_lea.hbm %s12073_s29, 4096  ;;  %s9090_s26 = scalar_lea.hbm %s12139_s3, 8192 }
 0x4fe   : > { %p9087_p11 = scmp.ne.s32.totalorder %s12073_s29, %s9086_s17  ;;  %p9091_p4 = scmp.lt.s32.totalorder %s12073_s29, %s12139_s3 }
 0x4ff   : > { %p9092_p6 = scmp.lt.s32.totalorder %s9090_s26, %s9086_s17 }
 0x500   : > { %p9088_p9 = pnand %p9087_p11, %p12354_p2 }
 0x501   : > { %p9093_p8 = por %p9092_p6, %p9091_p4 }
 0x502   : > { %p9089_p1 = pneg %p9088_p9 }
 0x504   : > { %p9094_p5 = pnand %p9093_p8, %p9089_p1 }
 0x506   : > { %9097 = shalt.err (!%p9094_p5)
}
 0x507   : > { %s9148_s30 = smov 128   ;;  %s9149_s18 = smov 8  }
 0x508   : > { %8910 = dma.vmem_to_hbm [thread:$0]  (%p12354_p2), %s12077_s27, 4096, %s12073_s29, %s6471_s16, %s9148_s30, %s9148_s30, %s9149_s18  }
 0x509 PF: > { %s6499_s20 = sand.u32 1, %s9128_s12   ;;  %p12355_p7 = scmp.ne.s32.totalorder %s12145_s19, 0 }
 0x50a   : > { %p12356_p12 = scmp.ge.s32.totalorder %s9140_s15, 2  ;;  %s6500_s28 = scalar_lea.sflag [#allocation5], %s6499_s20 }
 0x50c   : > { %p8924_p13 = pnand %p12356_p12, %p12355_p7 }
 0x50e   : > { %p8925_p0 = pneg %p8924_p13 }
 0x510   : > { %9123 = dma.done.wait (%p8925_p0), %s6500_s28, 4096  }
 0x511   : > { %9125 = vsyncadd (%p8925_p0), %s6500_s28, 4294963200  ;;  %p17_p10 = scmp.ge.s32.totalorder %s9248_s7, 4   ;;  %s12357_s12 = smov %s9132_s13 }
 0x512   : > { %s12358_s13 = smov %s9136_s14  ;;  %s12359_s14 = smov %s9264_s11 }
 0x513   : > { %s12360_s15 = smov %s9248_s7  ;;  %19 = sbr.rel (!%p17_p10) target bundleno = 6 (0x6), region = 105 }
 0x518   :  { %6505 = vsyncpa [#allocation4], 1 }
 0x519   :  { %6507 = vsyncpa [#allocation4 + $0x1], 1 }
 0x51a   :  { %6508 = vsyncpa [#allocation7], 1 }
 0x51b   :  { %6509 = vsyncpa [#allocation5], 1 }
 0x51c   :  { %6511 = vsyncpa [#allocation5 + $0x1], 1 }

</bundles_post_ra>
